<compile_context>
chip_gen: v7x
topology: tpu7x:2x2x1
jax: 0.10.0
libtpu: 0.0.40
codegen_flags: <defaults>
</compile_context>

<pallas_src>
import functools

import jax
import jax.numpy as jnp
from jax.experimental import pallas as pl
from jax.experimental.pallas import tpu as pltpu

N_CH = 2           # n
NF = 64            # nf
LRELU_SLOPE = 0.2
BN_EPS = 0.8       # nn.BatchNorm2d(out_feat, 0.8) -> eps = 0.8 (training-mode stats)
VMEM_LIMIT = 32 * 1024 * 1024   # conservative: fits v5e/v6e/v7x scoped VMEM


def _round_up(x, m):
    return (x + m - 1) // m * m


# ----------------------------- Pallas kernels -----------------------------

def _gemm_bias_kernel(a_ref, w_ref, b_ref, y_ref, sum_ref, sq_ref, acc_ref,
                      *, m_true, tm, apply_lrelu):
    """acc += a @ w over the K grid axis; epilogue adds bias, optional
    LeakyReLU, and emits per-M-tile channel sum / sum-of-squares (BN stats)."""
    # NOTE: program_id/num_programs are read at the TOP of the body only (never
    # inside a pl.when closure) so the primitive is resolved against the grid
    # environment both on hardware and in interpret mode.
    i = pl.program_id(0)
    k = pl.program_id(1)
    nk = pl.num_programs(1)
    row_base = i * tm

    @pl.when(k == 0)
    def _():
        acc_ref[...] = jnp.zeros_like(acc_ref)

    acc_ref[...] += jnp.dot(a_ref[...], w_ref[...],
                            preferred_element_type=jnp.float32)

    @pl.when(k == nk - 1)
    def _():
        y = acc_ref[...] + b_ref[...]
        if apply_lrelu:
            y = jnp.where(y > 0, y, LRELU_SLOPE * y)
        y_ref[...] = y
        # BatchNorm statistics for this M tile (mask padded rows past true M).
        row = jax.lax.broadcasted_iota(jnp.int32, (tm, 1), 0) + row_base
        ym = jnp.where(row < m_true, y, 0.0)
        s = jnp.sum(ym, axis=0, keepdims=True)
        ss = jnp.sum(ym * ym, axis=0, keepdims=True)
        sel = jax.lax.broadcasted_iota(jnp.int32, sum_ref.shape, 0) == 0
        sum_ref[...] = jnp.where(sel, s, 0.0)
        sq_ref[...] = jnp.where(sel, ss, 0.0)


def pallas_gemm_bias(a, w, b, *, apply_lrelu=False):
    """a: (M, K), w: (K, Cout), b: (Cout,) ->
       (y (M, Cout) f32, channel_sum (Cout,), channel_sumsq (Cout,))."""
    M, K = a.shape
    Cout = w.shape[1]

    Cp = max(128, _round_up(Cout, 128))        # lane-dense output columns
    TK = K if K <= 2048 else 1024              # K tiling with accumulator
    Kp = _round_up(K, TK)
    if M >= 512:
        TM, Mp = 512, _round_up(M, 512)
    else:
        TM = _round_up(M, 8)
        Mp = TM
    nm, nk = Mp // TM, Kp // TK

    a_p = jnp.pad(a.astype(jnp.bfloat16), ((0, Mp - M), (0, Kp - K)))
    w_p = jnp.pad(w.astype(jnp.bfloat16), ((0, Kp - K), (0, Cp - Cout)))
    b_p = jnp.pad(b.astype(jnp.float32), (0, Cp - Cout)).reshape(1, Cp)

    kernel = functools.partial(_gemm_bias_kernel, m_true=M, tm=TM,
                               apply_lrelu=apply_lrelu)
    y, s, ss = pl.pallas_call(
        kernel,
        out_shape=(jax.ShapeDtypeStruct((Mp, Cp), jnp.float32),
                   jax.ShapeDtypeStruct((8 * nm, Cp), jnp.float32),
                   jax.ShapeDtypeStruct((8 * nm, Cp), jnp.float32)),
        grid=(nm, nk),
        in_specs=[pl.BlockSpec((TM, TK), lambda i, k: (i, k)),
                  pl.BlockSpec((TK, Cp), lambda i, k: (k, 0)),
                  pl.BlockSpec((1, Cp), lambda i, k: (0, 0))],
        out_specs=(pl.BlockSpec((TM, Cp), lambda i, k: (i, 0)),
                   pl.BlockSpec((8, Cp), lambda i, k: (i, 0)),
                   pl.BlockSpec((8, Cp), lambda i, k: (i, 0))),
        scratch_shapes=[pltpu.VMEM((TM, Cp), jnp.float32)],
        compiler_params=pltpu.CompilerParams(
            dimension_semantics=("parallel", "arbitrary"),
            vmem_limit_bytes=VMEM_LIMIT),
    )(a_p, w_p, b_p)

    ch_sum = jnp.sum(s, axis=0)[:Cout]
    ch_sq = jnp.sum(ss, axis=0)[:Cout]
    return y[:M, :Cout], ch_sum, ch_sq


def _affine_lrelu_kernel(y_ref, s_ref, t_ref, o_ref):
    z = y_ref[...] * s_ref[...] + t_ref[...]
    o_ref[...] = jnp.where(z > 0, z, LRELU_SLOPE * z)


def pallas_affine_lrelu(y, scale, shift):
    """y: (M, C) f32 slab; per-channel affine (BatchNorm) then LeakyReLU(0.2).
    Thin-channel slabs are lane-folded so stores stay 128-lane dense."""
    M, C = y.shape
    fold = 1
    if C < 128 and 128 % C == 0 and M % (128 // C) == 0:
        fold = 128 // C
    rows, Cf = M // fold, C * fold
    yv = y.reshape(rows, Cf)
    sv = jnp.tile(scale.astype(jnp.float32), fold).reshape(1, Cf)
    tv = jnp.tile(shift.astype(jnp.float32), fold).reshape(1, Cf)

    if rows >= 512:
        TM, rp = 512, _round_up(rows, 512)
    else:
        TM = _round_up(rows, 8)
        rp = TM
    yv = jnp.pad(yv, ((0, rp - rows), (0, 0)))

    out = pl.pallas_call(
        _affine_lrelu_kernel,
        out_shape=jax.ShapeDtypeStruct((rp, Cf), jnp.float32),
        grid=(rp // TM,),
        in_specs=[pl.BlockSpec((TM, Cf), lambda i: (i, 0)),
                  pl.BlockSpec((1, Cf), lambda i: (0, 0)),
                  pl.BlockSpec((1, Cf), lambda i: (0, 0))],
        out_specs=pl.BlockSpec((TM, Cf), lambda i: (i, 0)),
        compiler_params=pltpu.CompilerParams(
            dimension_semantics=("parallel",),
            vmem_limit_bytes=VMEM_LIMIT),
    )(yv, sv, tv)
    return out[:rows].reshape(M, C)


# ------------------------------- glue (JAX) -------------------------------

def _im2col_nhwc(x, kh, kw, stride, pad):
    """x NHWC -> (N*Ho*Wo, kh*kw*C) patches; K index = (i*kw + j)*C + c."""
    N, H, W, C = x.shape
    sh, sw = stride
    (pt, pb), (pw0, pw1) = pad
    xp = jnp.pad(x, ((0, 0), (pt, pb), (pw0, pw1), (0, 0)))
    Ho = (H + pt + pb - kh) // sh + 1
    Wo = (W + pw0 + pw1 - kw) // sw + 1
    cols = []
    for i in range(kh):
        for j in range(kw):
            cols.append(xp[:, i:i + sh * Ho:sh, j:j + sw * Wo:sw, :])
    patches = jnp.concatenate(cols, axis=-1).reshape(N * Ho * Wo, kh * kw * C)
    return patches, N, Ho, Wo


def conv2d_nhwc(x, w, b, stride, pad, *, apply_lrelu=False):
    """x NHWC, w (Cout, Cin, kh, kw) [PyTorch Conv2d layout], b (Cout,)."""
    Cout, Cin, kh, kw = w.shape
    # TODO(synk): implicit-GEMM (shifted-window reduction grid) to avoid the
    # kh*kw HBM read inflation of materialized im2col patches.
    patches, N, Ho, Wo = _im2col_nhwc(x, kh, kw, stride, pad)
    wm = w.transpose(2, 3, 1, 0).reshape(kh * kw * Cin, Cout)
    y, s, ss = pallas_gemm_bias(patches, wm, b, apply_lrelu=apply_lrelu)
    return y, s, ss, (N, Ho, Wo, Cout)


def bn_affine_from_stats(ch_sum, ch_sq, count, gamma, beta):
    mean = ch_sum / count
    var = jnp.maximum(ch_sq / count - mean * mean, 0.0)   # biased var (train mode)
    scale = gamma * jax.lax.rsqrt(var + BN_EPS)
    shift = beta - mean * scale
    return scale, shift


def conv_t_41(x, w_t, b):
    """ConvTranspose2d(kernel=(4,1), stride=(4,1)): each input row maps to 4
    output rows -> single GEMM + row interleave (no zero-dilation)."""
    N, H, W, Cin = x.shape
    Cout = w_t.shape[1]
    wm = w_t[:, :, :, 0].transpose(0, 2, 1).reshape(Cin, 4 * Cout)  # [ci, i*Cout+co]
    bb = jnp.tile(b, 4)
    y, _, _ = pallas_gemm_bias(x.reshape(N * H * W, Cin), wm, bb)
    y = y.reshape(N, H, W, 4, Cout).transpose(0, 1, 3, 2, 4)
    return y.reshape(N, 4 * H, W, Cout)


def encoder_block(x, p):
    y, s, ss, (N, Ho, Wo, C) = conv2d_nhwc(
        x, p["w"], p["b"], (2, 2), ((1, 1), (1, 1)))
    scale, shift = bn_affine_from_stats(s, ss, float(N * Ho * Wo),
                                        p["gamma"], p["beta"])
    y = pallas_affine_lrelu(y, scale, shift)
    return y.reshape(N, Ho, Wo, C)


def decoder_block(x, p):
    """ConvTranspose2d(k=4, s=2, p=1) + BN + LeakyReLU via sub-pixel
    decomposition: each output parity (a, c) is a 2x2 stride-1 conv
    (output[2u+a, 2v+c] uses input rows u-1+a..u+a with kernel taps
    (3,1) for parity 0 and (2,0) for parity 1)."""
    w_t, b = p["w"], p["b"]                 # (Cin, Cout, 4, 4) PyTorch layout
    Cout = w_t.shape[1]
    N, H, W, _ = x.shape
    subs = []
    tot_s = tot_ss = 0.0
    for a in (0, 1):
        rsel = slice(3, None, -2) if a == 0 else slice(2, None, -2)   # taps (3,1)/(2,0)
        row_subs = []
        for c in (0, 1):
            csel = slice(3, None, -2) if c == 0 else slice(2, None, -2)
            w_sub = w_t[:, :, rsel, csel]                   # (Cin, Cout, 2, 2)
            w_conv = jnp.transpose(w_sub, (1, 0, 2, 3))     # Conv2d layout
            pad = ((1 - a, a), (1 - c, c))
            y, s, ss, _ = conv2d_nhwc(x, w_conv, b, (1, 1), pad)
            tot_s = tot_s + s
            tot_ss = tot_ss + ss
            row_subs.append(y.reshape(N, H, W, Cout))
        subs.append(row_subs)
    inner0 = jnp.stack(subs[0], axis=3)                     # (N, H, W, 2, C)
    inner1 = jnp.stack(subs[1], axis=3)
    yfull = jnp.stack([inner0, inner1], axis=2)             # (N, H, 2, W, 2, C)
    yfull = yfull.reshape(N, 2 * H, 2 * W, Cout)
    scale, shift = bn_affine_from_stats(tot_s, tot_ss, float(N * 4 * H * W),
                                        p["gamma"], p["beta"])
    y = pallas_affine_lrelu(yfull.reshape(-1, Cout), scale, shift)
    return y.reshape(N, 2 * H, 2 * W, Cout)


def generator_forward(x_nchw, P):
    x = jnp.transpose(x_nchw, (0, 2, 3, 1))                   # NHWC internally
    x_1 = conv_t_41(x, P["convT_w"], P["convT_b"])            # (N, 4H, W, 2)
    y, _, _, (N, Ho, Wo, C) = conv2d_nhwc(                    # Conv1 + fused LReLU
        x_1, P["conv1_w"], P["conv1_b"], (1, 1), ((1, 1), (1, 1)), apply_lrelu=True)
    x_3 = y.reshape(N, Ho, Wo, C)                             # (N, 4H, W, 2)

    x1 = encoder_block(x_3, P["enc1"])                        # (N, 2H, W/2, 64)
    x2 = encoder_block(x1, P["enc2"])                         # (N, H, W/4, 128)
    x3 = encoder_block(x2, P["enc3"])                         # (N, H/2, W/8, 256)

    y1 = decoder_block(x3, P["dec1"])                         # (N, H, W/4, 128)
    y2 = decoder_block(jnp.concatenate([y1, x2], axis=-1), P["dec2"])
    y3 = decoder_block(jnp.concatenate([y2, x1], axis=-1), P["dec3"])
    y4 = decoder_block(jnp.concatenate([y3, x_3], axis=-1), P["dec4"])

    y, _, _, (N, Ho, Wo, C) = conv2d_nhwc(                    # last conv, no act.
        y4, P["last_w"], P["last_b"], (2, 2), ((1, 1), (1, 1)))
    out = y.reshape(N, Ho, Wo, C)
    return jnp.transpose(out, (0, 3, 1, 2))                   # back to NCHW


# ----------------------------- parameter init -----------------------------

def init_params(key):
    keys = list(jax.random.split(key, 64))
    it = iter(keys)

    def rnd(shape, scale=0.05):
        return scale * jax.random.normal(next(it), shape, jnp.float32)

    def enc(cin, cout):
        return {"w": rnd((cout, cin, 4, 4)), "b": rnd((cout,)),
                "gamma": jnp.ones((cout,), jnp.float32) + rnd((cout,)),
                "beta": rnd((cout,))}

    def dec(cin, cout):
        return {"w": rnd((cin, cout, 4, 4)), "b": rnd((cout,)),
                "gamma": jnp.ones((cout,), jnp.float32) + rnd((cout,)),
                "beta": rnd((cout,))}

    P = {
        "convT_w": rnd((N_CH, N_CH, 4, 1)), "convT_b": rnd((N_CH,)),
        "conv1_w": rnd((N_CH, N_CH, 3, 3)), "conv1_b": rnd((N_CH,)),
        "enc1": enc(N_CH, NF),
        "enc2": enc(NF, NF * 2),
        "enc3": enc(NF * 2, NF * 4),
        "dec1": dec(NF * 4, NF * 2),
        "dec2": dec(NF * 4, NF * 2),
        "dec3": dec(NF * 3, NF),
        "dec4": dec(NF + N_CH, N_CH),
        "last_w": rnd((N_CH, N_CH, 4, 4)), "last_b": rnd((N_CH,)),
    }
    return P


# ---------------------------------- main ----------------------------------

if __name__ == "__main__":
    key = jax.random.PRNGKey(0)
    pkey, xkey = jax.random.split(key)
    params = init_params(pkey)

    # Small input consistent with the module: NCHW, 2 channels.
    x = jax.random.normal(xkey, (2, 2, 4, 16), jnp.float32)

    fwd = jax.jit(generator_forward)
    out = fwd(x, params)
    out = jax.block_until_ready(out)

    # ConvT (4H) -> U-Net encoders/decoders -> last conv stride 2 => (2, 2, 16, 16)
    assert out.shape == (2, 2, 16, 16), out.shape
    assert out.dtype == jnp.float32
    assert bool(jnp.all(jnp.isfinite(out)))
    print("KERNEL_OK")
</pallas_src>

<mosaic_0001>
module attributes {stable_mosaic.version = 11 : i64} {
  func.func @_gemm_bias_kernel(%arg0: i32, %arg1: i32, %arg2: memref<128x2xbf16, #tpu.memory_space<vmem>>, %arg3: memref<2x128xbf16, #tpu.memory_space<vmem>>, %arg4: memref<1x128xf32, #tpu.memory_space<vmem>>, %arg5: memref<128x128xf32, #tpu.memory_space<vmem>>, %arg6: memref<8x128xf32, #tpu.memory_space<vmem>>, %arg7: memref<8x128xf32, #tpu.memory_space<vmem>>, %arg8: memref<128x128xf32, #tpu.memory_space<vmem>>) attributes {dimension_semantics = [#tpu.dimension_semantics<parallel>, #tpu.dimension_semantics<arbitrary>], iteration_bounds = array<i64: 1, 1>, scalar_prefetch = 0 : i64, scratch_operands = 1 : i64, tpu.core_type = #tpu.core_type<tc>, window_params = [{transform_indices = @transform_0, window_bounds = array<i64: 128, 2>}, {transform_indices = @transform_1, window_bounds = array<i64: 2, 128>}, {pipeline_mode = #tpu.pipeline_mode<synchronous>, transform_indices = @transform_2, window_bounds = array<i64: 1, 128>}, {transform_indices = @transform_3, window_bounds = array<i64: 128, 128>}, {transform_indices = @transform_4, window_bounds = array<i64: 8, 128>}, {transform_indices = @transform_5, window_bounds = array<i64: 8, 128>}]} {
    %c128_i32 = arith.constant 128 : i32
    %0 = arith.muli %arg0, %c128_i32 : i32
    %c0_i32 = arith.constant 0 : i32
    %1 = arith.cmpi eq, %arg1, %c0_i32 : i32
    %2 = arith.extui %1 : i1 to i32
    %c0_i32_0 = arith.constant 0 : i32
    %3 = arith.cmpi ne, %2, %c0_i32_0 : i32
    scf.if %3 {
      %cst_10 = arith.constant 0.000000e+00 : f32
      %13 = vector.broadcast %cst_10 : f32 to vector<128x128xf32>
      %c0_11 = arith.constant 0 : index
      %c0_12 = arith.constant 0 : index
      %14 = vector.load %arg8[%c0_11, %c0_12] : memref<128x128xf32, #tpu.memory_space<vmem>>, vector<128x128xf32>
      tpu.vector_store %arg8[%c0_11, %c0_12], %13 {strides = array<i32>} : memref<128x128xf32, #tpu.memory_space<vmem>>, vector<128x128xf32>,
    } else {
    }
    %c0 = arith.constant 0 : index
    %c0_1 = arith.constant 0 : index
    %4 = vector.load %arg8[%c0, %c0_1] : memref<128x128xf32, #tpu.memory_space<vmem>>, vector<128x128xf32>
    %c0_2 = arith.constant 0 : index
    %c0_3 = arith.constant 0 : index
    %5 = vector.load %arg2[%c0_2, %c0_3] : memref<128x2xbf16, #tpu.memory_space<vmem>>, vector<128x2xbf16>
    %c0_4 = arith.constant 0 : index
    %c0_5 = arith.constant 0 : index
    %6 = vector.load %arg3[%c0_4, %c0_5] : memref<2x128xbf16, #tpu.memory_space<vmem>>, vector<2x128xbf16>
    %cst = arith.constant dense<0.000000e+00> : vector<128x128xf32>
    %7 = tpu.matmul %5, %6, %cst {dimension_numbers = #tpu.dot_dimension_numbers<[1], [0], [0], [1], [0, 0, 1, 1], [], []>} : vector<128x2xbf16>, vector<2x128xbf16>, vector<128x128xf32> -> vector<128x128xf32>
    %8 = arith.addf %4, %7 : vector<128x128xf32>
    %c0_6 = arith.constant 0 : index
    %c0_7 = arith.constant 0 : index
    %9 = vector.load %arg8[%c0_6, %c0_7] : memref<128x128xf32, #tpu.memory_space<vmem>>, vector<128x128xf32>
    tpu.vector_store %arg8[%c0_6, %c0_7], %8 {strides = array<i32>} : memref<128x128xf32, #tpu.memory_space<vmem>>, vector<128x128xf32>,
    %c0_i32_8 = arith.constant 0 : i32
    %10 = arith.cmpi eq, %arg1, %c0_i32_8 : i32
    %11 = arith.extui %10 : i1 to i32
    %c0_i32_9 = arith.constant 0 : i32
    %12 = arith.cmpi ne, %11, %c0_i32_9 : i32
    scf.if %12 {
      %c0_10 = arith.constant 0 : index
      %c0_11 = arith.constant 0 : index
      %13 = vector.load %arg8[%c0_10, %c0_11] : memref<128x128xf32, #tpu.memory_space<vmem>>, vector<128x128xf32>
      %c0_12 = arith.constant 0 : index
      %c0_13 = arith.constant 0 : index
      %14 = vector.load %arg4[%c0_12, %c0_13] : memref<1x128xf32, #tpu.memory_space<vmem>>, vector<1x128xf32>
      %15 = vector.broadcast %14 : vector<1x128xf32> to vector<128x128xf32>
      %16 = arith.addf %13, %15 : vector<128x128xf32>
      %c0_14 = arith.constant 0 : index
      %c0_15 = arith.constant 0 : index
      %17 = vector.load %arg5[%c0_14, %c0_15] : memref<128x128xf32, #tpu.memory_space<vmem>>, vector<128x128xf32>
      tpu.vector_store %arg5[%c0_14, %c0_15], %16 {strides = array<i32>} : memref<128x128xf32, #tpu.memory_space<vmem>>, vector<128x128xf32>,
      %18 = tpu.iota {dimensions = array<i32: 0>} : vector<128x1xi32>
      %19 = vector.broadcast %0 : i32 to vector<128x1xi32>
      %20 = arith.addi %18, %19 : vector<128x1xi32>
      %c128_i32_16 = arith.constant 128 : i32
      %21 = vector.broadcast %c128_i32_16 : i32 to vector<128x1xi32>
      %22 = arith.cmpi slt, %20, %21 : vector<128x1xi32>
      %cst_17 = arith.constant 0.000000e+00 : f32
      %23 = vector.shape_cast %22 : vector<128x1xi1> to vector<128x1xi1>
      %24 = vector.broadcast %23 : vector<128x1xi1> to vector<128x128xi1>
      %25 = vector.broadcast %cst_17 : f32 to vector<128x128xf32>
      %26 = arith.select %24, %16, %25 : vector<128x128xi1>, vector<128x128xf32>
      %cst_18 = arith.constant dense<0.000000e+00> : vector<128xf32>
      %27 = vector.multi_reduction <add>, %26, %cst_18 [0] : vector<128x128xf32> to vector<128xf32>
      %28 = vector.shape_cast %27 : vector<128xf32> to vector<1x128xf32>
      %29 = arith.mulf %26, %26 : vector<128x128xf32>
      %cst_19 = arith.constant dense<0.000000e+00> : vector<128xf32>
      %30 = vector.multi_reduction <add>, %29, %cst_19 [0] : vector<128x128xf32> to vector<128xf32>
      %31 = vector.shape_cast %30 : vector<128xf32> to vector<1x128xf32>
      %32 = tpu.iota {dimensions = array<i32: 0>} : vector<8x128xi32>
      %c0_i32_20 = arith.constant 0 : i32
      %33 = vector.broadcast %c0_i32_20 : i32 to vector<8x128xi32>
      %34 = arith.cmpi eq, %32, %33 : vector<8x128xi32>
      %cst_21 = arith.constant 0.000000e+00 : f32
      %35 = vector.shape_cast %28 : vector<1x128xf32> to vector<1x128xf32>
      %36 = vector.broadcast %35 : vector<1x128xf32> to vector<8x128xf32>
      %37 = vector.broadcast %cst_21 : f32 to vector<8x128xf32>
      %38 = arith.select %34, %36, %37 : vector<8x128xi1>, vector<8x128xf32>
      %c0_22 = arith.constant 0 : index
      %c0_23 = arith.constant 0 : index
      %39 = vector.load %arg6[%c0_22, %c0_23] : memref<8x128xf32, #tpu.memory_space<vmem>>, vector<8x128xf32>
      tpu.vector_store %arg6[%c0_22, %c0_23], %38 {strides = array<i32>} : memref<8x128xf32, #tpu.memory_space<vmem>>, vector<8x128xf32>,
      %cst_24 = arith.constant 0.000000e+00 : f32
      %40 = vector.shape_cast %31 : vector<1x128xf32> to vector<1x128xf32>
      %41 = vector.broadcast %40 : vector<1x128xf32> to vector<8x128xf32>
      %42 = vector.broadcast %cst_24 : f32 to vector<8x128xf32>
      %43 = arith.select %34, %41, %42 : vector<8x128xi1>, vector<8x128xf32>
      %c0_25 = arith.constant 0 : index
      %c0_26 = arith.constant 0 : index
      %44 = vector.load %arg7[%c0_25, %c0_26] : memref<8x128xf32, #tpu.memory_space<vmem>>, vector<8x128xf32>
      tpu.vector_store %arg7[%c0_25, %c0_26], %43 {strides = array<i32>} : memref<8x128xf32, #tpu.memory_space<vmem>>, vector<8x128xf32>,
    } else {
    }
    return
  }
  func.func @transform_0(%arg0: i32, %arg1: i32) -> (i32, i32) {
    %c0_i32 = arith.constant 0 : i32
    return %arg0, %arg1 : i32, i32
  }
  func.func @transform_1(%arg0: i32, %arg1: i32) -> (i32, i32) {
    %c0_i32 = arith.constant 0 : i32
    %c0_i32_0 = arith.constant 0 : i32
    return %arg1, %c0_i32 : i32, i32
  }
  func.func @transform_2(%arg0: i32, %arg1: i32) -> (i32, i32) {
    %c0_i32 = arith.constant 0 : i32
    %c0_i32_0 = arith.constant 0 : i32
    %c0_i32_1 = arith.constant 0 : i32
    return %c0_i32, %c0_i32_0 : i32, i32
  }
  func.func @transform_3(%arg0: i32, %arg1: i32) -> (i32, i32) {
    %c0_i32 = arith.constant 0 : i32
    %c0_i32_0 = arith.constant 0 : i32
    return %arg0, %c0_i32 : i32, i32
  }
  func.func @transform_4(%arg0: i32, %arg1: i32) -> (i32, i32) {
    %c0_i32 = arith.constant 0 : i32
    %c0_i32_0 = arith.constant 0 : i32
    return %arg0, %c0_i32 : i32, i32
  }
  func.func @transform_5(%arg0: i32, %arg1: i32) -> (i32, i32) {
    %c0_i32 = arith.constant 0 : i32
    %c0_i32_0 = arith.constant 0 : i32
    return %arg0, %c0_i32 : i32, i32
  }
}

module attributes {stable_mosaic.version = 11 : i64} {
  func.func @_gemm_bias_kernel(%arg0: i32, %arg1: i32, %arg2: memref<512x18xbf16, #tpu.memory_space<vmem>>, %arg3: memref<18x128xbf16, #tpu.memory_space<vmem>>, %arg4: memref<1x128xf32, #tpu.memory_space<vmem>>, %arg5: memref<512x128xf32, #tpu.memory_space<vmem>>, %arg6: memref<8x128xf32, #tpu.memory_space<vmem>>, %arg7: memref<8x128xf32, #tpu.memory_space<vmem>>, %arg8: memref<512x128xf32, #tpu.memory_space<vmem>>) attributes {dimension_semantics = [#tpu.dimension_semantics<parallel>, #tpu.dimension_semantics<arbitrary>], iteration_bounds = array<i64: 1, 1>, scalar_prefetch = 0 : i64, scratch_operands = 1 : i64, tpu.core_type = #tpu.core_type<tc>, window_params = [{transform_indices = @transform_0, window_bounds = array<i64: 512, 18>}, {transform_indices = @transform_1, window_bounds = array<i64: 18, 128>}, {pipeline_mode = #tpu.pipeline_mode<synchronous>, transform_indices = @transform_2, window_bounds = array<i64: 1, 128>}, {transform_indices = @transform_3, window_bounds = array<i64: 512, 128>}, {transform_indices = @transform_4, window_bounds = array<i64: 8, 128>}, {transform_indices = @transform_5, window_bounds = array<i64: 8, 128>}]} {
    %c512_i32 = arith.constant 512 : i32
    %0 = arith.muli %arg0, %c512_i32 : i32
    %c0_i32 = arith.constant 0 : i32
    %1 = arith.cmpi eq, %arg1, %c0_i32 : i32
    %2 = arith.extui %1 : i1 to i32
    %c0_i32_0 = arith.constant 0 : i32
    %3 = arith.cmpi ne, %2, %c0_i32_0 : i32
    scf.if %3 {
      %cst_10 = arith.constant 0.000000e+00 : f32
      %13 = vector.broadcast %cst_10 : f32 to vector<512x128xf32>
      %c0_11 = arith.constant 0 : index
      %c0_12 = arith.constant 0 : index
      %14 = vector.load %arg8[%c0_11, %c0_12] : memref<512x128xf32, #tpu.memory_space<vmem>>, vector<512x128xf32>
      tpu.vector_store %arg8[%c0_11, %c0_12], %13 {strides = array<i32>} : memref<512x128xf32, #tpu.memory_space<vmem>>, vector<512x128xf32>,
    } else {
    }
    %c0 = arith.constant 0 : index
    %c0_1 = arith.constant 0 : index
    %4 = vector.load %arg8[%c0, %c0_1] : memref<512x128xf32, #tpu.memory_space<vmem>>, vector<512x128xf32>
    %c0_2 = arith.constant 0 : index
    %c0_3 = arith.constant 0 : index
    %5 = vector.load %arg2[%c0_2, %c0_3] : memref<512x18xbf16, #tpu.memory_space<vmem>>, vector<512x18xbf16>
    %c0_4 = arith.constant 0 : index
    %c0_5 = arith.constant 0 : index
    %6 = vector.load %arg3[%c0_4, %c0_5] : memref<18x128xbf16, #tpu.memory_space<vmem>>, vector<18x128xbf16>
    %cst = arith.constant dense<0.000000e+00> : vector<512x128xf32>
    %7 = tpu.matmul %5, %6, %cst {dimension_numbers = #tpu.dot_dimension_numbers<[1], [0], [0], [1], [0, 0, 1, 1], [], []>} : vector<512x18xbf16>, vector<18x128xbf16>, vector<512x128xf32> -> vector<512x128xf32>
    %8 = arith.addf %4, %7 : vector<512x128xf32>
    %c0_6 = arith.constant 0 : index
    %c0_7 = arith.constant 0 : index
    %9 = vector.load %arg8[%c0_6, %c0_7] : memref<512x128xf32, #tpu.memory_space<vmem>>, vector<512x128xf32>
    tpu.vector_store %arg8[%c0_6, %c0_7], %8 {strides = array<i32>} : memref<512x128xf32, #tpu.memory_space<vmem>>, vector<512x128xf32>,
    %c0_i32_8 = arith.constant 0 : i32
    %10 = arith.cmpi eq, %arg1, %c0_i32_8 : i32
    %11 = arith.extui %10 : i1 to i32
    %c0_i32_9 = arith.constant 0 : i32
    %12 = arith.cmpi ne, %11, %c0_i32_9 : i32
    scf.if %12 {
      %c0_10 = arith.constant 0 : index
      %c0_11 = arith.constant 0 : index
      %13 = vector.load %arg8[%c0_10, %c0_11] : memref<512x128xf32, #tpu.memory_space<vmem>>, vector<512x128xf32>
      %c0_12 = arith.constant 0 : index
      %c0_13 = arith.constant 0 : index
      %14 = vector.load %arg4[%c0_12, %c0_13] : memref<1x128xf32, #tpu.memory_space<vmem>>, vector<1x128xf32>
      %15 = vector.broadcast %14 : vector<1x128xf32> to vector<512x128xf32>
      %16 = arith.addf %13, %15 : vector<512x128xf32>
      %cst_14 = arith.constant 0.000000e+00 : f32
      %17 = vector.broadcast %cst_14 : f32 to vector<512x128xf32>
      %18 = arith.cmpf ogt, %16, %17 : vector<512x128xf32>
      %cst_15 = arith.constant 2.000000e-01 : f32
      %19 = vector.broadcast %cst_15 : f32 to vector<512x128xf32>
      %20 = arith.mulf %19, %16 : vector<512x128xf32>
      %21 = arith.select %18, %16, %20 : vector<512x128xi1>, vector<512x128xf32>
      %c0_16 = arith.constant 0 : index
      %c0_17 = arith.constant 0 : index
      %22 = vector.load %arg5[%c0_16, %c0_17] : memref<512x128xf32, #tpu.memory_space<vmem>>, vector<512x128xf32>
      tpu.vector_store %arg5[%c0_16, %c0_17], %21 {strides = array<i32>} : memref<512x128xf32, #tpu.memory_space<vmem>>, vector<512x128xf32>,
      %23 = tpu.iota {dimensions = array<i32: 0>} : vector<512x1xi32>
      %24 = vector.broadcast %0 : i32 to vector<512x1xi32>
      %25 = arith.addi %23, %24 : vector<512x1xi32>
      %c512_i32_18 = arith.constant 512 : i32
      %26 = vector.broadcast %c512_i32_18 : i32 to vector<512x1xi32>
      %27 = arith.cmpi slt, %25, %26 : vector<512x1xi32>
      %cst_19 = arith.constant 0.000000e+00 : f32
      %28 = vector.shape_cast %27 : vector<512x1xi1> to vector<512x1xi1>
      %29 = vector.broadcast %28 : vector<512x1xi1> to vector<512x128xi1>
      %30 = vector.broadcast %cst_19 : f32 to vector<512x128xf32>
      %31 = arith.select %29, %21, %30 : vector<512x128xi1>, vector<512x128xf32>
      %cst_20 = arith.constant dense<0.000000e+00> : vector<128xf32>
      %32 = vector.multi_reduction <add>, %31, %cst_20 [0] : vector<512x128xf32> to vector<128xf32>
      %33 = vector.shape_cast %32 : vector<128xf32> to vector<1x128xf32>
      %34 = arith.mulf %31, %31 : vector<512x128xf32>
      %cst_21 = arith.constant dense<0.000000e+00> : vector<128xf32>
      %35 = vector.multi_reduction <add>, %34, %cst_21 [0] : vector<512x128xf32> to vector<128xf32>
      %36 = vector.shape_cast %35 : vector<128xf32> to vector<1x128xf32>
      %37 = tpu.iota {dimensions = array<i32: 0>} : vector<8x128xi32>
      %c0_i32_22 = arith.constant 0 : i32
      %38 = vector.broadcast %c0_i32_22 : i32 to vector<8x128xi32>
      %39 = arith.cmpi eq, %37, %38 : vector<8x128xi32>
      %cst_23 = arith.constant 0.000000e+00 : f32
      %40 = vector.shape_cast %33 : vector<1x128xf32> to vector<1x128xf32>
      %41 = vector.broadcast %40 : vector<1x128xf32> to vector<8x128xf32>
      %42 = vector.broadcast %cst_23 : f32 to vector<8x128xf32>
      %43 = arith.select %39, %41, %42 : vector<8x128xi1>, vector<8x128xf32>
      %c0_24 = arith.constant 0 : index
      %c0_25 = arith.constant 0 : index
      %44 = vector.load %arg6[%c0_24, %c0_25] : memref<8x128xf32, #tpu.memory_space<vmem>>, vector<8x128xf32>
      tpu.vector_store %arg6[%c0_24, %c0_25], %43 {strides = array<i32>} : memref<8x128xf32, #tpu.memory_space<vmem>>, vector<8x128xf32>,
      %cst_26 = arith.constant 0.000000e+00 : f32
      %45 = vector.shape_cast %36 : vector<1x128xf32> to vector<1x128xf32>
      %46 = vector.broadcast %45 : vector<1x128xf32> to vector<8x128xf32>
      %47 = vector.broadcast %cst_26 : f32 to vector<8x128xf32>
      %48 = arith.select %39, %46, %47 : vector<8x128xi1>, vector<8x128xf32>
      %c0_27 = arith.constant 0 : index
      %c0_28 = arith.constant 0 : index
      %49 = vector.load %arg7[%c0_27, %c0_28] : memref<8x128xf32, #tpu.memory_space<vmem>>, vector<8x128xf32>
      tpu.vector_store %arg7[%c0_27, %c0_28], %48 {strides = array<i32>} : memref<8x128xf32, #tpu.memory_space<vmem>>, vector<8x128xf32>,
    } else {
    }
    return
  }
  func.func @transform_0(%arg0: i32, %arg1: i32) -> (i32, i32) {
    %c0_i32 = arith.constant 0 : i32
    return %arg0, %arg1 : i32, i32
  }
  func.func @transform_1(%arg0: i32, %arg1: i32) -> (i32, i32) {
    %c0_i32 = arith.constant 0 : i32
    %c0_i32_0 = arith.constant 0 : i32
    return %arg1, %c0_i32 : i32, i32
  }
  func.func @transform_2(%arg0: i32, %arg1: i32) -> (i32, i32) {
    %c0_i32 = arith.constant 0 : i32
    %c0_i32_0 = arith.constant 0 : i32
    %c0_i32_1 = arith.constant 0 : i32
    return %c0_i32, %c0_i32_0 : i32, i32
  }
  func.func @transform_3(%arg0: i32, %arg1: i32) -> (i32, i32) {
    %c0_i32 = arith.constant 0 : i32
    %c0_i32_0 = arith.constant 0 : i32
    return %arg0, %c0_i32 : i32, i32
  }
  func.func @transform_4(%arg0: i32, %arg1: i32) -> (i32, i32) {
    %c0_i32 = arith.constant 0 : i32
    %c0_i32_0 = arith.constant 0 : i32
    return %arg0, %c0_i32 : i32, i32
  }
  func.func @transform_5(%arg0: i32, %arg1: i32) -> (i32, i32) {
    %c0_i32 = arith.constant 0 : i32
    %c0_i32_0 = arith.constant 0 : i32
    return %arg0, %c0_i32 : i32, i32
  }
}

module attributes {stable_mosaic.version = 11 : i64} {
  func.func @_gemm_bias_kernel(%arg0: i32, %arg1: i32, %arg2: memref<128x32xbf16, #tpu.memory_space<vmem>>, %arg3: memref<32x128xbf16, #tpu.memory_space<vmem>>, %arg4: memref<1x128xf32, #tpu.memory_space<vmem>>, %arg5: memref<128x128xf32, #tpu.memory_space<vmem>>, %arg6: memref<8x128xf32, #tpu.memory_space<vmem>>, %arg7: memref<8x128xf32, #tpu.memory_space<vmem>>, %arg8: memref<128x128xf32, #tpu.memory_space<vmem>>) attributes {dimension_semantics = [#tpu.dimension_semantics<parallel>, #tpu.dimension_semantics<arbitrary>], iteration_bounds = array<i64: 1, 1>, scalar_prefetch = 0 : i64, scratch_operands = 1 : i64, tpu.core_type = #tpu.core_type<tc>, window_params = [{transform_indices = @transform_0, window_bounds = array<i64: 128, 32>}, {transform_indices = @transform_1, window_bounds = array<i64: 32, 128>}, {pipeline_mode = #tpu.pipeline_mode<synchronous>, transform_indices = @transform_2, window_bounds = array<i64: 1, 128>}, {transform_indices = @transform_3, window_bounds = array<i64: 128, 128>}, {transform_indices = @transform_4, window_bounds = array<i64: 8, 128>}, {transform_indices = @transform_5, window_bounds = array<i64: 8, 128>}]} {
    %c128_i32 = arith.constant 128 : i32
    %0 = arith.muli %arg0, %c128_i32 : i32
    %c0_i32 = arith.constant 0 : i32
    %1 = arith.cmpi eq, %arg1, %c0_i32 : i32
    %2 = arith.extui %1 : i1 to i32
    %c0_i32_0 = arith.constant 0 : i32
    %3 = arith.cmpi ne, %2, %c0_i32_0 : i32
    scf.if %3 {
      %cst_10 = arith.constant 0.000000e+00 : f32
      %13 = vector.broadcast %cst_10 : f32 to vector<128x128xf32>
      %c0_11 = arith.constant 0 : index
      %c0_12 = arith.constant 0 : index
      %14 = vector.load %arg8[%c0_11, %c0_12] : memref<128x128xf32, #tpu.memory_space<vmem>>, vector<128x128xf32>
      tpu.vector_store %arg8[%c0_11, %c0_12], %13 {strides = array<i32>} : memref<128x128xf32, #tpu.memory_space<vmem>>, vector<128x128xf32>,
    } else {
    }
    %c0 = arith.constant 0 : index
    %c0_1 = arith.constant 0 : index
    %4 = vector.load %arg8[%c0, %c0_1] : memref<128x128xf32, #tpu.memory_space<vmem>>, vector<128x128xf32>
    %c0_2 = arith.constant 0 : index
    %c0_3 = arith.constant 0 : index
    %5 = vector.load %arg2[%c0_2, %c0_3] : memref<128x32xbf16, #tpu.memory_space<vmem>>, vector<128x32xbf16>
    %c0_4 = arith.constant 0 : index
    %c0_5 = arith.constant 0 : index
    %6 = vector.load %arg3[%c0_4, %c0_5] : memref<32x128xbf16, #tpu.memory_space<vmem>>, vector<32x128xbf16>
    %cst = arith.constant dense<0.000000e+00> : vector<128x128xf32>
    %7 = tpu.matmul %5, %6, %cst {dimension_numbers = #tpu.dot_dimension_numbers<[1], [0], [0], [1], [0, 0, 1, 1], [], []>} : vector<128x32xbf16>, vector<32x128xbf16>, vector<128x128xf32> -> vector<128x128xf32>
    %8 = arith.addf %4, %7 : vector<128x128xf32>
    %c0_6 = arith.constant 0 : index
    %c0_7 = arith.constant 0 : index
    %9 = vector.load %arg8[%c0_6, %c0_7] : memref<128x128xf32, #tpu.memory_space<vmem>>, vector<128x128xf32>
    tpu.vector_store %arg8[%c0_6, %c0_7], %8 {strides = array<i32>} : memref<128x128xf32, #tpu.memory_space<vmem>>, vector<128x128xf32>,
    %c0_i32_8 = arith.constant 0 : i32
    %10 = arith.cmpi eq, %arg1, %c0_i32_8 : i32
    %11 = arith.extui %10 : i1 to i32
    %c0_i32_9 = arith.constant 0 : i32
    %12 = arith.cmpi ne, %11, %c0_i32_9 : i32
    scf.if %12 {
      %c0_10 = arith.constant 0 : index
      %c0_11 = arith.constant 0 : index
      %13 = vector.load %arg8[%c0_10, %c0_11] : memref<128x128xf32, #tpu.memory_space<vmem>>, vector<128x128xf32>
      %c0_12 = arith.constant 0 : index
      %c0_13 = arith.constant 0 : index
      %14 = vector.load %arg4[%c0_12, %c0_13] : memref<1x128xf32, #tpu.memory_space<vmem>>, vector<1x128xf32>
      %15 = vector.broadcast %14 : vector<1x128xf32> to vector<128x128xf32>
      %16 = arith.addf %13, %15 : vector<128x128xf32>
      %c0_14 = arith.constant 0 : index
      %c0_15 = arith.constant 0 : index
      %17 = vector.load %arg5[%c0_14, %c0_15] : memref<128x128xf32, #tpu.memory_space<vmem>>, vector<128x128xf32>
      tpu.vector_store %arg5[%c0_14, %c0_15], %16 {strides = array<i32>} : memref<128x128xf32, #tpu.memory_space<vmem>>, vector<128x128xf32>,
      %18 = tpu.iota {dimensions = array<i32: 0>} : vector<128x1xi32>
      %19 = vector.broadcast %0 : i32 to vector<128x1xi32>
      %20 = arith.addi %18, %19 : vector<128x1xi32>
      %c128_i32_16 = arith.constant 128 : i32
      %21 = vector.broadcast %c128_i32_16 : i32 to vector<128x1xi32>
      %22 = arith.cmpi slt, %20, %21 : vector<128x1xi32>
      %cst_17 = arith.constant 0.000000e+00 : f32
      %23 = vector.shape_cast %22 : vector<128x1xi1> to vector<128x1xi1>
      %24 = vector.broadcast %23 : vector<128x1xi1> to vector<128x128xi1>
      %25 = vector.broadcast %cst_17 : f32 to vector<128x128xf32>
      %26 = arith.select %24, %16, %25 : vector<128x128xi1>, vector<128x128xf32>
      %cst_18 = arith.constant dense<0.000000e+00> : vector<128xf32>
      %27 = vector.multi_reduction <add>, %26, %cst_18 [0] : vector<128x128xf32> to vector<128xf32>
      %28 = vector.shape_cast %27 : vector<128xf32> to vector<1x128xf32>
      %29 = arith.mulf %26, %26 : vector<128x128xf32>
      %cst_19 = arith.constant dense<0.000000e+00> : vector<128xf32>
      %30 = vector.multi_reduction <add>, %29, %cst_19 [0] : vector<128x128xf32> to vector<128xf32>
      %31 = vector.shape_cast %30 : vector<128xf32> to vector<1x128xf32>
      %32 = tpu.iota {dimensions = array<i32: 0>} : vector<8x128xi32>
      %c0_i32_20 = arith.constant 0 : i32
      %33 = vector.broadcast %c0_i32_20 : i32 to vector<8x128xi32>
      %34 = arith.cmpi eq, %32, %33 : vector<8x128xi32>
      %cst_21 = arith.constant 0.000000e+00 : f32
      %35 = vector.shape_cast %28 : vector<1x128xf32> to vector<1x128xf32>
      %36 = vector.broadcast %35 : vector<1x128xf32> to vector<8x128xf32>
      %37 = vector.broadcast %cst_21 : f32 to vector<8x128xf32>
      %38 = arith.select %34, %36, %37 : vector<8x128xi1>, vector<8x128xf32>
      %c0_22 = arith.constant 0 : index
      %c0_23 = arith.constant 0 : index
      %39 = vector.load %arg6[%c0_22, %c0_23] : memref<8x128xf32, #tpu.memory_space<vmem>>, vector<8x128xf32>
      tpu.vector_store %arg6[%c0_22, %c0_23], %38 {strides = array<i32>} : memref<8x128xf32, #tpu.memory_space<vmem>>, vector<8x128xf32>,
      %cst_24 = arith.constant 0.000000e+00 : f32
      %40 = vector.shape_cast %31 : vector<1x128xf32> to vector<1x128xf32>
      %41 = vector.broadcast %40 : vector<1x128xf32> to vector<8x128xf32>
      %42 = vector.broadcast %cst_24 : f32 to vector<8x128xf32>
      %43 = arith.select %34, %41, %42 : vector<8x128xi1>, vector<8x128xf32>
      %c0_25 = arith.constant 0 : index
      %c0_26 = arith.constant 0 : index
      %44 = vector.load %arg7[%c0_25, %c0_26] : memref<8x128xf32, #tpu.memory_space<vmem>>, vector<8x128xf32>
      tpu.vector_store %arg7[%c0_25, %c0_26], %43 {strides = array<i32>} : memref<8x128xf32, #tpu.memory_space<vmem>>, vector<8x128xf32>,
    } else {
    }
    return
  }
  func.func @transform_0(%arg0: i32, %arg1: i32) -> (i32, i32) {
    %c0_i32 = arith.constant 0 : i32
    return %arg0, %arg1 : i32, i32
  }
  func.func @transform_1(%arg0: i32, %arg1: i32) -> (i32, i32) {
    %c0_i32 = arith.constant 0 : i32
    %c0_i32_0 = arith.constant 0 : i32
    return %arg1, %c0_i32 : i32, i32
  }
  func.func @transform_2(%arg0: i32, %arg1: i32) -> (i32, i32) {
    %c0_i32 = arith.constant 0 : i32
    %c0_i32_0 = arith.constant 0 : i32
    %c0_i32_1 = arith.constant 0 : i32
    return %c0_i32, %c0_i32_0 : i32, i32
  }
  func.func @transform_3(%arg0: i32, %arg1: i32) -> (i32, i32) {
    %c0_i32 = arith.constant 0 : i32
    %c0_i32_0 = arith.constant 0 : i32
    return %arg0, %c0_i32 : i32, i32
  }
  func.func @transform_4(%arg0: i32, %arg1: i32) -> (i32, i32) {
    %c0_i32 = arith.constant 0 : i32
    %c0_i32_0 = arith.constant 0 : i32
    return %arg0, %c0_i32 : i32, i32
  }
  func.func @transform_5(%arg0: i32, %arg1: i32) -> (i32, i32) {
    %c0_i32 = arith.constant 0 : i32
    %c0_i32_0 = arith.constant 0 : i32
    return %arg0, %c0_i32 : i32, i32
  }
}

module attributes {stable_mosaic.version = 11 : i64} {
  func.func @_affine_lrelu_kernel(%arg0: i32, %arg1: memref<64x128xf32, #tpu.memory_space<vmem>>, %arg2: memref<1x128xf32, #tpu.memory_space<vmem>>, %arg3: memref<1x128xf32, #tpu.memory_space<vmem>>, %arg4: memref<64x128xf32, #tpu.memory_space<vmem>>) attributes {dimension_semantics = [#tpu.dimension_semantics<parallel>], iteration_bounds = array<i64: 1>, scalar_prefetch = 0 : i64, scratch_operands = 0 : i64, tpu.core_type = #tpu.core_type<tc>, window_params = [{transform_indices = @transform_0, window_bounds = array<i64: 64, 128>}, {pipeline_mode = #tpu.pipeline_mode<synchronous>, transform_indices = @transform_1, window_bounds = array<i64: 1, 128>}, {pipeline_mode = #tpu.pipeline_mode<synchronous>, transform_indices = @transform_2, window_bounds = array<i64: 1, 128>}, {transform_indices = @transform_3, window_bounds = array<i64: 64, 128>}]} {
    %c0 = arith.constant 0 : index
    %c0_0 = arith.constant 0 : index
    %0 = vector.load %arg1[%c0, %c0_0] : memref<64x128xf32, #tpu.memory_space<vmem>>, vector<64x128xf32>
    %c0_1 = arith.constant 0 : index
    %c0_2 = arith.constant 0 : index
    %1 = vector.load %arg2[%c0_1, %c0_2] : memref<1x128xf32, #tpu.memory_space<vmem>>, vector<1x128xf32>
    %2 = vector.broadcast %1 : vector<1x128xf32> to vector<64x128xf32>
    %3 = arith.mulf %0, %2 : vector<64x128xf32>
    %c0_3 = arith.constant 0 : index
    %c0_4 = arith.constant 0 : index
    %4 = vector.load %arg3[%c0_3, %c0_4] : memref<1x128xf32, #tpu.memory_space<vmem>>, vector<1x128xf32>
    %5 = vector.broadcast %4 : vector<1x128xf32> to vector<64x128xf32>
    %6 = arith.addf %3, %5 : vector<64x128xf32>
    %cst = arith.constant 0.000000e+00 : f32
    %7 = vector.broadcast %cst : f32 to vector<64x128xf32>
    %8 = arith.cmpf ogt, %6, %7 : vector<64x128xf32>
    %cst_5 = arith.constant 2.000000e-01 : f32
    %9 = vector.broadcast %cst_5 : f32 to vector<64x128xf32>
    %10 = arith.mulf %9, %6 : vector<64x128xf32>
    %11 = arith.select %8, %6, %10 : vector<64x128xi1>, vector<64x128xf32>
    %c0_6 = arith.constant 0 : index
    %c0_7 = arith.constant 0 : index
    %12 = vector.load %arg4[%c0_6, %c0_7] : memref<64x128xf32, #tpu.memory_space<vmem>>, vector<64x128xf32>
    tpu.vector_store %arg4[%c0_6, %c0_7], %11 {strides = array<i32>} : memref<64x128xf32, #tpu.memory_space<vmem>>, vector<64x128xf32>,
    return
  }
  func.func @transform_0(%arg0: i32) -> (i32, i32) {
    %c0_i32 = arith.constant 0 : i32
    %c0_i32_0 = arith.constant 0 : i32
    return %arg0, %c0_i32 : i32, i32
  }
  func.func @transform_1(%arg0: i32) -> (i32, i32) {
    %c0_i32 = arith.constant 0 : i32
    %c0_i32_0 = arith.constant 0 : i32
    %c0_i32_1 = arith.constant 0 : i32
    return %c0_i32, %c0_i32_0 : i32, i32
  }
  func.func @transform_2(%arg0: i32) -> (i32, i32) {
    %c0_i32 = arith.constant 0 : i32
    %c0_i32_0 = arith.constant 0 : i32
    %c0_i32_1 = arith.constant 0 : i32
    return %c0_i32, %c0_i32_0 : i32, i32
  }
  func.func @transform_3(%arg0: i32) -> (i32, i32) {
    %c0_i32 = arith.constant 0 : i32
    %c0_i32_0 = arith.constant 0 : i32
    return %arg0, %c0_i32 : i32, i32
  }
}

module attributes {stable_mosaic.version = 11 : i64} {
  func.func @_gemm_bias_kernel(%arg0: i32, %arg1: i32, %arg2: memref<32x1024xbf16, #tpu.memory_space<vmem>>, %arg3: memref<1024x128xbf16, #tpu.memory_space<vmem>>, %arg4: memref<1x128xf32, #tpu.memory_space<vmem>>, %arg5: memref<32x128xf32, #tpu.memory_space<vmem>>, %arg6: memref<8x128xf32, #tpu.memory_space<vmem>>, %arg7: memref<8x128xf32, #tpu.memory_space<vmem>>, %arg8: memref<32x128xf32, #tpu.memory_space<vmem>>) attributes {dimension_semantics = [#tpu.dimension_semantics<parallel>, #tpu.dimension_semantics<arbitrary>], iteration_bounds = array<i64: 1, 1>, scalar_prefetch = 0 : i64, scratch_operands = 1 : i64, tpu.core_type = #tpu.core_type<tc>, window_params = [{transform_indices = @transform_0, window_bounds = array<i64: 32, 1024>}, {transform_indices = @transform_1, window_bounds = array<i64: 1024, 128>}, {pipeline_mode = #tpu.pipeline_mode<synchronous>, transform_indices = @transform_2, window_bounds = array<i64: 1, 128>}, {transform_indices = @transform_3, window_bounds = array<i64: 32, 128>}, {transform_indices = @transform_4, window_bounds = array<i64: 8, 128>}, {transform_indices = @transform_5, window_bounds = array<i64: 8, 128>}]} {
    %c32_i32 = arith.constant 32 : i32
    %0 = arith.muli %arg0, %c32_i32 : i32
    %c0_i32 = arith.constant 0 : i32
    %1 = arith.cmpi eq, %arg1, %c0_i32 : i32
    %2 = arith.extui %1 : i1 to i32
    %c0_i32_0 = arith.constant 0 : i32
    %3 = arith.cmpi ne, %2, %c0_i32_0 : i32
    scf.if %3 {
      %cst_10 = arith.constant 0.000000e+00 : f32
      %13 = vector.broadcast %cst_10 : f32 to vector<32x128xf32>
      %c0_11 = arith.constant 0 : index
      %c0_12 = arith.constant 0 : index
      %14 = vector.load %arg8[%c0_11, %c0_12] : memref<32x128xf32, #tpu.memory_space<vmem>>, vector<32x128xf32>
      tpu.vector_store %arg8[%c0_11, %c0_12], %13 {strides = array<i32>} : memref<32x128xf32, #tpu.memory_space<vmem>>, vector<32x128xf32>,
    } else {
    }
    %c0 = arith.constant 0 : index
    %c0_1 = arith.constant 0 : index
    %4 = vector.load %arg8[%c0, %c0_1] : memref<32x128xf32, #tpu.memory_space<vmem>>, vector<32x128xf32>
    %c0_2 = arith.constant 0 : index
    %c0_3 = arith.constant 0 : index
    %5 = vector.load %arg2[%c0_2, %c0_3] : memref<32x1024xbf16, #tpu.memory_space<vmem>>, vector<32x1024xbf16>
    %c0_4 = arith.constant 0 : index
    %c0_5 = arith.constant 0 : index
    %6 = vector.load %arg3[%c0_4, %c0_5] : memref<1024x128xbf16, #tpu.memory_space<vmem>>, vector<1024x128xbf16>
    %cst = arith.constant dense<0.000000e+00> : vector<32x128xf32>
    %7 = tpu.matmul %5, %6, %cst {dimension_numbers = #tpu.dot_dimension_numbers<[1], [0], [0], [1], [0, 0, 1, 1], [], []>} : vector<32x1024xbf16>, vector<1024x128xbf16>, vector<32x128xf32> -> vector<32x128xf32>
    %8 = arith.addf %4, %7 : vector<32x128xf32>
    %c0_6 = arith.constant 0 : index
    %c0_7 = arith.constant 0 : index
    %9 = vector.load %arg8[%c0_6, %c0_7] : memref<32x128xf32, #tpu.memory_space<vmem>>, vector<32x128xf32>
    tpu.vector_store %arg8[%c0_6, %c0_7], %8 {strides = array<i32>} : memref<32x128xf32, #tpu.memory_space<vmem>>, vector<32x128xf32>,
    %c0_i32_8 = arith.constant 0 : i32
    %10 = arith.cmpi eq, %arg1, %c0_i32_8 : i32
    %11 = arith.extui %10 : i1 to i32
    %c0_i32_9 = arith.constant 0 : i32
    %12 = arith.cmpi ne, %11, %c0_i32_9 : i32
    scf.if %12 {
      %c0_10 = arith.constant 0 : index
      %c0_11 = arith.constant 0 : index
      %13 = vector.load %arg8[%c0_10, %c0_11] : memref<32x128xf32, #tpu.memory_space<vmem>>, vector<32x128xf32>
      %c0_12 = arith.constant 0 : index
      %c0_13 = arith.constant 0 : index
      %14 = vector.load %arg4[%c0_12, %c0_13] : memref<1x128xf32, #tpu.memory_space<vmem>>, vector<1x128xf32>
      %15 = vector.broadcast %14 : vector<1x128xf32> to vector<32x128xf32>
      %16 = arith.addf %13, %15 : vector<32x128xf32>
      %c0_14 = arith.constant 0 : index
      %c0_15 = arith.constant 0 : index
      %17 = vector.load %arg5[%c0_14, %c0_15] : memref<32x128xf32, #tpu.memory_space<vmem>>, vector<32x128xf32>
      tpu.vector_store %arg5[%c0_14, %c0_15], %16 {strides = array<i32>} : memref<32x128xf32, #tpu.memory_space<vmem>>, vector<32x128xf32>,
      %18 = tpu.iota {dimensions = array<i32: 0>} : vector<32x1xi32>
      %19 = vector.broadcast %0 : i32 to vector<32x1xi32>
      %20 = arith.addi %18, %19 : vector<32x1xi32>
      %c32_i32_16 = arith.constant 32 : i32
      %21 = vector.broadcast %c32_i32_16 : i32 to vector<32x1xi32>
      %22 = arith.cmpi slt, %20, %21 : vector<32x1xi32>
      %cst_17 = arith.constant 0.000000e+00 : f32
      %23 = vector.shape_cast %22 : vector<32x1xi1> to vector<32x1xi1>
      %24 = vector.broadcast %23 : vector<32x1xi1> to vector<32x128xi1>
      %25 = vector.broadcast %cst_17 : f32 to vector<32x128xf32>
      %26 = arith.select %24, %16, %25 : vector<32x128xi1>, vector<32x128xf32>
      %cst_18 = arith.constant dense<0.000000e+00> : vector<128xf32>
      %27 = vector.multi_reduction <add>, %26, %cst_18 [0] : vector<32x128xf32> to vector<128xf32>
      %28 = vector.shape_cast %27 : vector<128xf32> to vector<1x128xf32>
      %29 = arith.mulf %26, %26 : vector<32x128xf32>
      %cst_19 = arith.constant dense<0.000000e+00> : vector<128xf32>
      %30 = vector.multi_reduction <add>, %29, %cst_19 [0] : vector<32x128xf32> to vector<128xf32>
      %31 = vector.shape_cast %30 : vector<128xf32> to vector<1x128xf32>
      %32 = tpu.iota {dimensions = array<i32: 0>} : vector<8x128xi32>
      %c0_i32_20 = arith.constant 0 : i32
      %33 = vector.broadcast %c0_i32_20 : i32 to vector<8x128xi32>
      %34 = arith.cmpi eq, %32, %33 : vector<8x128xi32>
      %cst_21 = arith.constant 0.000000e+00 : f32
      %35 = vector.shape_cast %28 : vector<1x128xf32> to vector<1x128xf32>
      %36 = vector.broadcast %35 : vector<1x128xf32> to vector<8x128xf32>
      %37 = vector.broadcast %cst_21 : f32 to vector<8x128xf32>
      %38 = arith.select %34, %36, %37 : vector<8x128xi1>, vector<8x128xf32>
      %c0_22 = arith.constant 0 : index
      %c0_23 = arith.constant 0 : index
      %39 = vector.load %arg6[%c0_22, %c0_23] : memref<8x128xf32, #tpu.memory_space<vmem>>, vector<8x128xf32>
      tpu.vector_store %arg6[%c0_22, %c0_23], %38 {strides = array<i32>} : memref<8x128xf32, #tpu.memory_space<vmem>>, vector<8x128xf32>,
      %cst_24 = arith.constant 0.000000e+00 : f32
      %40 = vector.shape_cast %31 : vector<1x128xf32> to vector<1x128xf32>
      %41 = vector.broadcast %40 : vector<1x128xf32> to vector<8x128xf32>
      %42 = vector.broadcast %cst_24 : f32 to vector<8x128xf32>
      %43 = arith.select %34, %41, %42 : vector<8x128xi1>, vector<8x128xf32>
      %c0_25 = arith.constant 0 : index
      %c0_26 = arith.constant 0 : index
      %44 = vector.load %arg7[%c0_25, %c0_26] : memref<8x128xf32, #tpu.memory_space<vmem>>, vector<8x128xf32>
      tpu.vector_store %arg7[%c0_25, %c0_26], %43 {strides = array<i32>} : memref<8x128xf32, #tpu.memory_space<vmem>>, vector<8x128xf32>,
    } else {
    }
    return
  }
  func.func @transform_0(%arg0: i32, %arg1: i32) -> (i32, i32) {
    %c0_i32 = arith.constant 0 : i32
    return %arg0, %arg1 : i32, i32
  }
  func.func @transform_1(%arg0: i32, %arg1: i32) -> (i32, i32) {
    %c0_i32 = arith.constant 0 : i32
    %c0_i32_0 = arith.constant 0 : i32
    return %arg1, %c0_i32 : i32, i32
  }
  func.func @transform_2(%arg0: i32, %arg1: i32) -> (i32, i32) {
    %c0_i32 = arith.constant 0 : i32
    %c0_i32_0 = arith.constant 0 : i32
    %c0_i32_1 = arith.constant 0 : i32
    return %c0_i32, %c0_i32_0 : i32, i32
  }
  func.func @transform_3(%arg0: i32, %arg1: i32) -> (i32, i32) {
    %c0_i32 = arith.constant 0 : i32
    %c0_i32_0 = arith.constant 0 : i32
    return %arg0, %c0_i32 : i32, i32
  }
  func.func @transform_4(%arg0: i32, %arg1: i32) -> (i32, i32) {
    %c0_i32 = arith.constant 0 : i32
    %c0_i32_0 = arith.constant 0 : i32
    return %arg0, %c0_i32 : i32, i32
  }
  func.func @transform_5(%arg0: i32, %arg1: i32) -> (i32, i32) {
    %c0_i32 = arith.constant 0 : i32
    %c0_i32_0 = arith.constant 0 : i32
    return %arg0, %c0_i32 : i32, i32
  }
}

module attributes {stable_mosaic.version = 11 : i64} {
  func.func @_affine_lrelu_kernel(%arg0: i32, %arg1: memref<32x128xf32, #tpu.memory_space<vmem>>, %arg2: memref<1x128xf32, #tpu.memory_space<vmem>>, %arg3: memref<1x128xf32, #tpu.memory_space<vmem>>, %arg4: memref<32x128xf32, #tpu.memory_space<vmem>>) attributes {dimension_semantics = [#tpu.dimension_semantics<parallel>], iteration_bounds = array<i64: 1>, scalar_prefetch = 0 : i64, scratch_operands = 0 : i64, tpu.core_type = #tpu.core_type<tc>, window_params = [{transform_indices = @transform_0, window_bounds = array<i64: 32, 128>}, {pipeline_mode = #tpu.pipeline_mode<synchronous>, transform_indices = @transform_1, window_bounds = array<i64: 1, 128>}, {pipeline_mode = #tpu.pipeline_mode<synchronous>, transform_indices = @transform_2, window_bounds = array<i64: 1, 128>}, {transform_indices = @transform_3, window_bounds = array<i64: 32, 128>}]} {
    %c0 = arith.constant 0 : index
    %c0_0 = arith.constant 0 : index
    %0 = vector.load %arg1[%c0, %c0_0] : memref<32x128xf32, #tpu.memory_space<vmem>>, vector<32x128xf32>
    %c0_1 = arith.constant 0 : index
    %c0_2 = arith.constant 0 : index
    %1 = vector.load %arg2[%c0_1, %c0_2] : memref<1x128xf32, #tpu.memory_space<vmem>>, vector<1x128xf32>
    %2 = vector.broadcast %1 : vector<1x128xf32> to vector<32x128xf32>
    %3 = arith.mulf %0, %2 : vector<32x128xf32>
    %c0_3 = arith.constant 0 : index
    %c0_4 = arith.constant 0 : index
    %4 = vector.load %arg3[%c0_3, %c0_4] : memref<1x128xf32, #tpu.memory_space<vmem>>, vector<1x128xf32>
    %5 = vector.broadcast %4 : vector<1x128xf32> to vector<32x128xf32>
    %6 = arith.addf %3, %5 : vector<32x128xf32>
    %cst = arith.constant 0.000000e+00 : f32
    %7 = vector.broadcast %cst : f32 to vector<32x128xf32>
    %8 = arith.cmpf ogt, %6, %7 : vector<32x128xf32>
    %cst_5 = arith.constant 2.000000e-01 : f32
    %9 = vector.broadcast %cst_5 : f32 to vector<32x128xf32>
    %10 = arith.mulf %9, %6 : vector<32x128xf32>
    %11 = arith.select %8, %6, %10 : vector<32x128xi1>, vector<32x128xf32>
    %c0_6 = arith.constant 0 : index
    %c0_7 = arith.constant 0 : index
    %12 = vector.load %arg4[%c0_6, %c0_7] : memref<32x128xf32, #tpu.memory_space<vmem>>, vector<32x128xf32>
    tpu.vector_store %arg4[%c0_6, %c0_7], %11 {strides = array<i32>} : memref<32x128xf32, #tpu.memory_space<vmem>>, vector<32x128xf32>,
    return
  }
  func.func @transform_0(%arg0: i32) -> (i32, i32) {
    %c0_i32 = arith.constant 0 : i32
    %c0_i32_0 = arith.constant 0 : i32
    return %arg0, %c0_i32 : i32, i32
  }
  func.func @transform_1(%arg0: i32) -> (i32, i32) {
    %c0_i32 = arith.constant 0 : i32
    %c0_i32_0 = arith.constant 0 : i32
    %c0_i32_1 = arith.constant 0 : i32
    return %c0_i32, %c0_i32_0 : i32, i32
  }
  func.func @transform_2(%arg0: i32) -> (i32, i32) {
    %c0_i32 = arith.constant 0 : i32
    %c0_i32_0 = arith.constant 0 : i32
    %c0_i32_1 = arith.constant 0 : i32
    return %c0_i32, %c0_i32_0 : i32, i32
  }
  func.func @transform_3(%arg0: i32) -> (i32, i32) {
    %c0_i32 = arith.constant 0 : i32
    %c0_i32_0 = arith.constant 0 : i32
    return %arg0, %c0_i32 : i32, i32
  }
}

module attributes {stable_mosaic.version = 11 : i64} {
  func.func @_gemm_bias_kernel(%arg0: i32, %arg1: i32, %arg2: memref<8x2048xbf16, #tpu.memory_space<vmem>>, %arg3: memref<2048x256xbf16, #tpu.memory_space<vmem>>, %arg4: memref<1x256xf32, #tpu.memory_space<vmem>>, %arg5: memref<8x256xf32, #tpu.memory_space<vmem>>, %arg6: memref<8x256xf32, #tpu.memory_space<vmem>>, %arg7: memref<8x256xf32, #tpu.memory_space<vmem>>, %arg8: memref<8x256xf32, #tpu.memory_space<vmem>>) attributes {dimension_semantics = [#tpu.dimension_semantics<parallel>, #tpu.dimension_semantics<arbitrary>], iteration_bounds = array<i64: 1, 1>, scalar_prefetch = 0 : i64, scratch_operands = 1 : i64, tpu.core_type = #tpu.core_type<tc>, window_params = [{transform_indices = @transform_0, window_bounds = array<i64: 8, 2048>}, {transform_indices = @transform_1, window_bounds = array<i64: 2048, 256>}, {pipeline_mode = #tpu.pipeline_mode<synchronous>, transform_indices = @transform_2, window_bounds = array<i64: 1, 256>}, {transform_indices = @transform_3, window_bounds = array<i64: 8, 256>}, {transform_indices = @transform_4, window_bounds = array<i64: 8, 256>}, {transform_indices = @transform_5, window_bounds = array<i64: 8, 256>}]} {
    %c8_i32 = arith.constant 8 : i32
    %0 = arith.muli %arg0, %c8_i32 : i32
    %c0_i32 = arith.constant 0 : i32
    %1 = arith.cmpi eq, %arg1, %c0_i32 : i32
    %2 = arith.extui %1 : i1 to i32
    %c0_i32_0 = arith.constant 0 : i32
    %3 = arith.cmpi ne, %2, %c0_i32_0 : i32
    scf.if %3 {
      %cst_10 = arith.constant 0.000000e+00 : f32
      %13 = vector.broadcast %cst_10 : f32 to vector<8x256xf32>
      %c0_11 = arith.constant 0 : index
      %c0_12 = arith.constant 0 : index
      %14 = vector.load %arg8[%c0_11, %c0_12] : memref<8x256xf32, #tpu.memory_space<vmem>>, vector<8x256xf32>
      tpu.vector_store %arg8[%c0_11, %c0_12], %13 {strides = array<i32>} : memref<8x256xf32, #tpu.memory_space<vmem>>, vector<8x256xf32>,
    } else {
    }
    %c0 = arith.constant 0 : index
    %c0_1 = arith.constant 0 : index
    %4 = vector.load %arg8[%c0, %c0_1] : memref<8x256xf32, #tpu.memory_space<vmem>>, vector<8x256xf32>
    %c0_2 = arith.constant 0 : index
    %c0_3 = arith.constant 0 : index
    %5 = vector.load %arg2[%c0_2, %c0_3] : memref<8x2048xbf16, #tpu.memory_space<vmem>>, vector<8x2048xbf16>
    %c0_4 = arith.constant 0 : index
    %c0_5 = arith.constant 0 : index
    %6 = vector.load %arg3[%c0_4, %c0_5] : memref<2048x256xbf16, #tpu.memory_space<vmem>>, vector<2048x256xbf16>
    %cst = arith.constant dense<0.000000e+00> : vector<8x256xf32>
    %7 = tpu.matmul %5, %6, %cst {dimension_numbers = #tpu.dot_dimension_numbers<[1], [0], [0], [1], [0, 0, 1, 1], [], []>} : vector<8x2048xbf16>, vector<2048x256xbf16>, vector<8x256xf32> -> vector<8x256xf32>
    %8 = arith.addf %4, %7 : vector<8x256xf32>
    %c0_6 = arith.constant 0 : index
    %c0_7 = arith.constant 0 : index
    %9 = vector.load %arg8[%c0_6, %c0_7] : memref<8x256xf32, #tpu.memory_space<vmem>>, vector<8x256xf32>
    tpu.vector_store %arg8[%c0_6, %c0_7], %8 {strides = array<i32>} : memref<8x256xf32, #tpu.memory_space<vmem>>, vector<8x256xf32>,
    %c0_i32_8 = arith.constant 0 : i32
    %10 = arith.cmpi eq, %arg1, %c0_i32_8 : i32
    %11 = arith.extui %10 : i1 to i32
    %c0_i32_9 = arith.constant 0 : i32
    %12 = arith.cmpi ne, %11, %c0_i32_9 : i32
    scf.if %12 {
      %c0_10 = arith.constant 0 : index
      %c0_11 = arith.constant 0 : index
      %13 = vector.load %arg8[%c0_10, %c0_11] : memref<8x256xf32, #tpu.memory_space<vmem>>, vector<8x256xf32>
      %c0_12 = arith.constant 0 : index
      %c0_13 = arith.constant 0 : index
      %14 = vector.load %arg4[%c0_12, %c0_13] : memref<1x256xf32, #tpu.memory_space<vmem>>, vector<1x256xf32>
      %15 = vector.broadcast %14 : vector<1x256xf32> to vector<8x256xf32>
      %16 = arith.addf %13, %15 : vector<8x256xf32>
      %c0_14 = arith.constant 0 : index
      %c0_15 = arith.constant 0 : index
      %17 = vector.load %arg5[%c0_14, %c0_15] : memref<8x256xf32, #tpu.memory_space<vmem>>, vector<8x256xf32>
      tpu.vector_store %arg5[%c0_14, %c0_15], %16 {strides = array<i32>} : memref<8x256xf32, #tpu.memory_space<vmem>>, vector<8x256xf32>,
      %18 = tpu.iota {dimensions = array<i32: 0>} : vector<8x1xi32>
      %19 = vector.broadcast %0 : i32 to vector<8x1xi32>
      %20 = arith.addi %18, %19 : vector<8x1xi32>
      %c8_i32_16 = arith.constant 8 : i32
      %21 = vector.broadcast %c8_i32_16 : i32 to vector<8x1xi32>
      %22 = arith.cmpi slt, %20, %21 : vector<8x1xi32>
      %cst_17 = arith.constant 0.000000e+00 : f32
      %23 = vector.shape_cast %22 : vector<8x1xi1> to vector<8x1xi1>
      %24 = vector.broadcast %23 : vector<8x1xi1> to vector<8x256xi1>
      %25 = vector.broadcast %cst_17 : f32 to vector<8x256xf32>
      %26 = arith.select %24, %16, %25 : vector<8x256xi1>, vector<8x256xf32>
      %cst_18 = arith.constant dense<0.000000e+00> : vector<256xf32>
      %27 = vector.multi_reduction <add>, %26, %cst_18 [0] : vector<8x256xf32> to vector<256xf32>
      %28 = vector.shape_cast %27 : vector<256xf32> to vector<1x256xf32>
      %29 = arith.mulf %26, %26 : vector<8x256xf32>
      %cst_19 = arith.constant dense<0.000000e+00> : vector<256xf32>
      %30 = vector.multi_reduction <add>, %29, %cst_19 [0] : vector<8x256xf32> to vector<256xf32>
      %31 = vector.shape_cast %30 : vector<256xf32> to vector<1x256xf32>
      %32 = tpu.iota {dimensions = array<i32: 0>} : vector<8x256xi32>
      %c0_i32_20 = arith.constant 0 : i32
      %33 = vector.broadcast %c0_i32_20 : i32 to vector<8x256xi32>
      %34 = arith.cmpi eq, %32, %33 : vector<8x256xi32>
      %cst_21 = arith.constant 0.000000e+00 : f32
      %35 = vector.shape_cast %28 : vector<1x256xf32> to vector<1x256xf32>
      %36 = vector.broadcast %35 : vector<1x256xf32> to vector<8x256xf32>
      %37 = vector.broadcast %cst_21 : f32 to vector<8x256xf32>
      %38 = arith.select %34, %36, %37 : vector<8x256xi1>, vector<8x256xf32>
      %c0_22 = arith.constant 0 : index
      %c0_23 = arith.constant 0 : index
      %39 = vector.load %arg6[%c0_22, %c0_23] : memref<8x256xf32, #tpu.memory_space<vmem>>, vector<8x256xf32>
      tpu.vector_store %arg6[%c0_22, %c0_23], %38 {strides = array<i32>} : memref<8x256xf32, #tpu.memory_space<vmem>>, vector<8x256xf32>,
      %cst_24 = arith.constant 0.000000e+00 : f32
      %40 = vector.shape_cast %31 : vector<1x256xf32> to vector<1x256xf32>
      %41 = vector.broadcast %40 : vector<1x256xf32> to vector<8x256xf32>
      %42 = vector.broadcast %cst_24 : f32 to vector<8x256xf32>
      %43 = arith.select %34, %41, %42 : vector<8x256xi1>, vector<8x256xf32>
      %c0_25 = arith.constant 0 : index
      %c0_26 = arith.constant 0 : index
      %44 = vector.load %arg7[%c0_25, %c0_26] : memref<8x256xf32, #tpu.memory_space<vmem>>, vector<8x256xf32>
      tpu.vector_store %arg7[%c0_25, %c0_26], %43 {strides = array<i32>} : memref<8x256xf32, #tpu.memory_space<vmem>>, vector<8x256xf32>,
    } else {
    }
    return
  }
  func.func @transform_0(%arg0: i32, %arg1: i32) -> (i32, i32) {
    %c0_i32 = arith.constant 0 : i32
    return %arg0, %arg1 : i32, i32
  }
  func.func @transform_1(%arg0: i32, %arg1: i32) -> (i32, i32) {
    %c0_i32 = arith.constant 0 : i32
    %c0_i32_0 = arith.constant 0 : i32
    return %arg1, %c0_i32 : i32, i32
  }
  func.func @transform_2(%arg0: i32, %arg1: i32) -> (i32, i32) {
    %c0_i32 = arith.constant 0 : i32
    %c0_i32_0 = arith.constant 0 : i32
    %c0_i32_1 = arith.constant 0 : i32
    return %c0_i32, %c0_i32_0 : i32, i32
  }
  func.func @transform_3(%arg0: i32, %arg1: i32) -> (i32, i32) {
    %c0_i32 = arith.constant 0 : i32
    %c0_i32_0 = arith.constant 0 : i32
    return %arg0, %c0_i32 : i32, i32
  }
  func.func @transform_4(%arg0: i32, %arg1: i32) -> (i32, i32) {
    %c0_i32 = arith.constant 0 : i32
    %c0_i32_0 = arith.constant 0 : i32
    return %arg0, %c0_i32 : i32, i32
  }
  func.func @transform_5(%arg0: i32, %arg1: i32) -> (i32, i32) {
    %c0_i32 = arith.constant 0 : i32
    %c0_i32_0 = arith.constant 0 : i32
    return %arg0, %c0_i32 : i32, i32
  }
}

module attributes {stable_mosaic.version = 11 : i64} {
  func.func @_affine_lrelu_kernel(%arg0: i32, %arg1: memref<8x256xf32, #tpu.memory_space<vmem>>, %arg2: memref<1x256xf32, #tpu.memory_space<vmem>>, %arg3: memref<1x256xf32, #tpu.memory_space<vmem>>, %arg4: memref<8x256xf32, #tpu.memory_space<vmem>>) attributes {dimension_semantics = [#tpu.dimension_semantics<parallel>], iteration_bounds = array<i64: 1>, scalar_prefetch = 0 : i64, scratch_operands = 0 : i64, tpu.core_type = #tpu.core_type<tc>, window_params = [{transform_indices = @transform_0, window_bounds = array<i64: 8, 256>}, {pipeline_mode = #tpu.pipeline_mode<synchronous>, transform_indices = @transform_1, window_bounds = array<i64: 1, 256>}, {pipeline_mode = #tpu.pipeline_mode<synchronous>, transform_indices = @transform_2, window_bounds = array<i64: 1, 256>}, {transform_indices = @transform_3, window_bounds = array<i64: 8, 256>}]} {
    %c0 = arith.constant 0 : index
    %c0_0 = arith.constant 0 : index
    %0 = vector.load %arg1[%c0, %c0_0] : memref<8x256xf32, #tpu.memory_space<vmem>>, vector<8x256xf32>
    %c0_1 = arith.constant 0 : index
    %c0_2 = arith.constant 0 : index
    %1 = vector.load %arg2[%c0_1, %c0_2] : memref<1x256xf32, #tpu.memory_space<vmem>>, vector<1x256xf32>
    %2 = vector.broadcast %1 : vector<1x256xf32> to vector<8x256xf32>
    %3 = arith.mulf %0, %2 : vector<8x256xf32>
    %c0_3 = arith.constant 0 : index
    %c0_4 = arith.constant 0 : index
    %4 = vector.load %arg3[%c0_3, %c0_4] : memref<1x256xf32, #tpu.memory_space<vmem>>, vector<1x256xf32>
    %5 = vector.broadcast %4 : vector<1x256xf32> to vector<8x256xf32>
    %6 = arith.addf %3, %5 : vector<8x256xf32>
    %cst = arith.constant 0.000000e+00 : f32
    %7 = vector.broadcast %cst : f32 to vector<8x256xf32>
    %8 = arith.cmpf ogt, %6, %7 : vector<8x256xf32>
    %cst_5 = arith.constant 2.000000e-01 : f32
    %9 = vector.broadcast %cst_5 : f32 to vector<8x256xf32>
    %10 = arith.mulf %9, %6 : vector<8x256xf32>
    %11 = arith.select %8, %6, %10 : vector<8x256xi1>, vector<8x256xf32>
    %c0_6 = arith.constant 0 : index
    %c0_7 = arith.constant 0 : index
    %12 = vector.load %arg4[%c0_6, %c0_7] : memref<8x256xf32, #tpu.memory_space<vmem>>, vector<8x256xf32>
    tpu.vector_store %arg4[%c0_6, %c0_7], %11 {strides = array<i32>} : memref<8x256xf32, #tpu.memory_space<vmem>>, vector<8x256xf32>,
    return
  }
  func.func @transform_0(%arg0: i32) -> (i32, i32) {
    %c0_i32 = arith.constant 0 : i32
    %c0_i32_0 = arith.constant 0 : i32
    return %arg0, %c0_i32 : i32, i32
  }
  func.func @transform_1(%arg0: i32) -> (i32, i32) {
    %c0_i32 = arith.constant 0 : i32
    %c0_i32_0 = arith.constant 0 : i32
    %c0_i32_1 = arith.constant 0 : i32
    return %c0_i32, %c0_i32_0 : i32, i32
  }
  func.func @transform_2(%arg0: i32) -> (i32, i32) {
    %c0_i32 = arith.constant 0 : i32
    %c0_i32_0 = arith.constant 0 : i32
    %c0_i32_1 = arith.constant 0 : i32
    return %c0_i32, %c0_i32_0 : i32, i32
  }
  func.func @transform_3(%arg0: i32) -> (i32, i32) {
    %c0_i32 = arith.constant 0 : i32
    %c0_i32_0 = arith.constant 0 : i32
    return %arg0, %c0_i32 : i32, i32
  }
}

module attributes {stable_mosaic.version = 11 : i64} {
  func.func @_gemm_bias_kernel(%arg0: i32, %arg1: i32, %arg2: memref<8x1024xbf16, #tpu.memory_space<vmem>>, %arg3: memref<1024x128xbf16, #tpu.memory_space<vmem>>, %arg4: memref<1x128xf32, #tpu.memory_space<vmem>>, %arg5: memref<8x128xf32, #tpu.memory_space<vmem>>, %arg6: memref<8x128xf32, #tpu.memory_space<vmem>>, %arg7: memref<8x128xf32, #tpu.memory_space<vmem>>, %arg8: memref<8x128xf32, #tpu.memory_space<vmem>>) attributes {dimension_semantics = [#tpu.dimension_semantics<parallel>, #tpu.dimension_semantics<arbitrary>], iteration_bounds = array<i64: 1, 1>, scalar_prefetch = 0 : i64, scratch_operands = 1 : i64, tpu.core_type = #tpu.core_type<tc>, window_params = [{transform_indices = @transform_0, window_bounds = array<i64: 8, 1024>}, {transform_indices = @transform_1, window_bounds = array<i64: 1024, 128>}, {pipeline_mode = #tpu.pipeline_mode<synchronous>, transform_indices = @transform_2, window_bounds = array<i64: 1, 128>}, {transform_indices = @transform_3, window_bounds = array<i64: 8, 128>}, {transform_indices = @transform_4, window_bounds = array<i64: 8, 128>}, {transform_indices = @transform_5, window_bounds = array<i64: 8, 128>}]} {
    %c8_i32 = arith.constant 8 : i32
    %0 = arith.muli %arg0, %c8_i32 : i32
    %c0_i32 = arith.constant 0 : i32
    %1 = arith.cmpi eq, %arg1, %c0_i32 : i32
    %2 = arith.extui %1 : i1 to i32
    %c0_i32_0 = arith.constant 0 : i32
    %3 = arith.cmpi ne, %2, %c0_i32_0 : i32
    scf.if %3 {
      %cst_10 = arith.constant 0.000000e+00 : f32
      %13 = vector.broadcast %cst_10 : f32 to vector<8x128xf32>
      %c0_11 = arith.constant 0 : index
      %c0_12 = arith.constant 0 : index
      %14 = vector.load %arg8[%c0_11, %c0_12] : memref<8x128xf32, #tpu.memory_space<vmem>>, vector<8x128xf32>
      tpu.vector_store %arg8[%c0_11, %c0_12], %13 {strides = array<i32>} : memref<8x128xf32, #tpu.memory_space<vmem>>, vector<8x128xf32>,
    } else {
    }
    %c0 = arith.constant 0 : index
    %c0_1 = arith.constant 0 : index
    %4 = vector.load %arg8[%c0, %c0_1] : memref<8x128xf32, #tpu.memory_space<vmem>>, vector<8x128xf32>
    %c0_2 = arith.constant 0 : index
    %c0_3 = arith.constant 0 : index
    %5 = vector.load %arg2[%c0_2, %c0_3] : memref<8x1024xbf16, #tpu.memory_space<vmem>>, vector<8x1024xbf16>
    %c0_4 = arith.constant 0 : index
    %c0_5 = arith.constant 0 : index
    %6 = vector.load %arg3[%c0_4, %c0_5] : memref<1024x128xbf16, #tpu.memory_space<vmem>>, vector<1024x128xbf16>
    %cst = arith.constant dense<0.000000e+00> : vector<8x128xf32>
    %7 = tpu.matmul %5, %6, %cst {dimension_numbers = #tpu.dot_dimension_numbers<[1], [0], [0], [1], [0, 0, 1, 1], [], []>} : vector<8x1024xbf16>, vector<1024x128xbf16>, vector<8x128xf32> -> vector<8x128xf32>
    %8 = arith.addf %4, %7 : vector<8x128xf32>
    %c0_6 = arith.constant 0 : index
    %c0_7 = arith.constant 0 : index
    %9 = vector.load %arg8[%c0_6, %c0_7] : memref<8x128xf32, #tpu.memory_space<vmem>>, vector<8x128xf32>
    tpu.vector_store %arg8[%c0_6, %c0_7], %8 {strides = array<i32>} : memref<8x128xf32, #tpu.memory_space<vmem>>, vector<8x128xf32>,
    %c0_i32_8 = arith.constant 0 : i32
    %10 = arith.cmpi eq, %arg1, %c0_i32_8 : i32
    %11 = arith.extui %10 : i1 to i32
    %c0_i32_9 = arith.constant 0 : i32
    %12 = arith.cmpi ne, %11, %c0_i32_9 : i32
    scf.if %12 {
      %c0_10 = arith.constant 0 : index
      %c0_11 = arith.constant 0 : index
      %13 = vector.load %arg8[%c0_10, %c0_11] : memref<8x128xf32, #tpu.memory_space<vmem>>, vector<8x128xf32>
      %c0_12 = arith.constant 0 : index
      %c0_13 = arith.constant 0 : index
      %14 = vector.load %arg4[%c0_12, %c0_13] : memref<1x128xf32, #tpu.memory_space<vmem>>, vector<1x128xf32>
      %15 = vector.broadcast %14 : vector<1x128xf32> to vector<8x128xf32>
      %16 = arith.addf %13, %15 : vector<8x128xf32>
      %c0_14 = arith.constant 0 : index
      %c0_15 = arith.constant 0 : index
      %17 = vector.load %arg5[%c0_14, %c0_15] : memref<8x128xf32, #tpu.memory_space<vmem>>, vector<8x128xf32>
      tpu.vector_store %arg5[%c0_14, %c0_15], %16 {strides = array<i32>} : memref<8x128xf32, #tpu.memory_space<vmem>>, vector<8x128xf32>,
      %18 = tpu.iota {dimensions = array<i32: 0>} : vector<8x1xi32>
      %19 = vector.broadcast %0 : i32 to vector<8x1xi32>
      %20 = arith.addi %18, %19 : vector<8x1xi32>
      %c8_i32_16 = arith.constant 8 : i32
      %21 = vector.broadcast %c8_i32_16 : i32 to vector<8x1xi32>
      %22 = arith.cmpi slt, %20, %21 : vector<8x1xi32>
      %cst_17 = arith.constant 0.000000e+00 : f32
      %23 = vector.shape_cast %22 : vector<8x1xi1> to vector<8x1xi1>
      %24 = vector.broadcast %23 : vector<8x1xi1> to vector<8x128xi1>
      %25 = vector.broadcast %cst_17 : f32 to vector<8x128xf32>
      %26 = arith.select %24, %16, %25 : vector<8x128xi1>, vector<8x128xf32>
      %cst_18 = arith.constant dense<0.000000e+00> : vector<128xf32>
      %27 = vector.multi_reduction <add>, %26, %cst_18 [0] : vector<8x128xf32> to vector<128xf32>
      %28 = vector.shape_cast %27 : vector<128xf32> to vector<1x128xf32>
      %29 = arith.mulf %26, %26 : vector<8x128xf32>
      %cst_19 = arith.constant dense<0.000000e+00> : vector<128xf32>
      %30 = vector.multi_reduction <add>, %29, %cst_19 [0] : vector<8x128xf32> to vector<128xf32>
      %31 = vector.shape_cast %30 : vector<128xf32> to vector<1x128xf32>
      %32 = tpu.iota {dimensions = array<i32: 0>} : vector<8x128xi32>
      %c0_i32_20 = arith.constant 0 : i32
      %33 = vector.broadcast %c0_i32_20 : i32 to vector<8x128xi32>
      %34 = arith.cmpi eq, %32, %33 : vector<8x128xi32>
      %cst_21 = arith.constant 0.000000e+00 : f32
      %35 = vector.shape_cast %28 : vector<1x128xf32> to vector<1x128xf32>
      %36 = vector.broadcast %35 : vector<1x128xf32> to vector<8x128xf32>
      %37 = vector.broadcast %cst_21 : f32 to vector<8x128xf32>
      %38 = arith.select %34, %36, %37 : vector<8x128xi1>, vector<8x128xf32>
      %c0_22 = arith.constant 0 : index
      %c0_23 = arith.constant 0 : index
      %39 = vector.load %arg6[%c0_22, %c0_23] : memref<8x128xf32, #tpu.memory_space<vmem>>, vector<8x128xf32>
      tpu.vector_store %arg6[%c0_22, %c0_23], %38 {strides = array<i32>} : memref<8x128xf32, #tpu.memory_space<vmem>>, vector<8x128xf32>,
      %cst_24 = arith.constant 0.000000e+00 : f32
      %40 = vector.shape_cast %31 : vector<1x128xf32> to vector<1x128xf32>
      %41 = vector.broadcast %40 : vector<1x128xf32> to vector<8x128xf32>
      %42 = vector.broadcast %cst_24 : f32 to vector<8x128xf32>
      %43 = arith.select %34, %41, %42 : vector<8x128xi1>, vector<8x128xf32>
      %c0_25 = arith.constant 0 : index
      %c0_26 = arith.constant 0 : index
      %44 = vector.load %arg7[%c0_25, %c0_26] : memref<8x128xf32, #tpu.memory_space<vmem>>, vector<8x128xf32>
      tpu.vector_store %arg7[%c0_25, %c0_26], %43 {strides = array<i32>} : memref<8x128xf32, #tpu.memory_space<vmem>>, vector<8x128xf32>,
    } else {
    }
    return
  }
  func.func @transform_0(%arg0: i32, %arg1: i32) -> (i32, i32) {
    %c0_i32 = arith.constant 0 : i32
    return %arg0, %arg1 : i32, i32
  }
  func.func @transform_1(%arg0: i32, %arg1: i32) -> (i32, i32) {
    %c0_i32 = arith.constant 0 : i32
    %c0_i32_0 = arith.constant 0 : i32
    return %arg1, %c0_i32 : i32, i32
  }
  func.func @transform_2(%arg0: i32, %arg1: i32) -> (i32, i32) {
    %c0_i32 = arith.constant 0 : i32
    %c0_i32_0 = arith.constant 0 : i32
    %c0_i32_1 = arith.constant 0 : i32
    return %c0_i32, %c0_i32_0 : i32, i32
  }
  func.func @transform_3(%arg0: i32, %arg1: i32) -> (i32, i32) {
    %c0_i32 = arith.constant 0 : i32
    %c0_i32_0 = arith.constant 0 : i32
    return %arg0, %c0_i32 : i32, i32
  }
  func.func @transform_4(%arg0: i32, %arg1: i32) -> (i32, i32) {
    %c0_i32 = arith.constant 0 : i32
    %c0_i32_0 = arith.constant 0 : i32
    return %arg0, %c0_i32 : i32, i32
  }
  func.func @transform_5(%arg0: i32, %arg1: i32) -> (i32, i32) {
    %c0_i32 = arith.constant 0 : i32
    %c0_i32_0 = arith.constant 0 : i32
    return %arg0, %c0_i32 : i32, i32
  }
}

module attributes {stable_mosaic.version = 11 : i64} {
  func.func @_affine_lrelu_kernel(%arg0: i32, %arg1: memref<128x128xf32, #tpu.memory_space<vmem>>, %arg2: memref<1x128xf32, #tpu.memory_space<vmem>>, %arg3: memref<1x128xf32, #tpu.memory_space<vmem>>, %arg4: memref<128x128xf32, #tpu.memory_space<vmem>>) attributes {dimension_semantics = [#tpu.dimension_semantics<parallel>], iteration_bounds = array<i64: 1>, scalar_prefetch = 0 : i64, scratch_operands = 0 : i64, tpu.core_type = #tpu.core_type<tc>, window_params = [{transform_indices = @transform_0, window_bounds = array<i64: 128, 128>}, {pipeline_mode = #tpu.pipeline_mode<synchronous>, transform_indices = @transform_1, window_bounds = array<i64: 1, 128>}, {pipeline_mode = #tpu.pipeline_mode<synchronous>, transform_indices = @transform_2, window_bounds = array<i64: 1, 128>}, {transform_indices = @transform_3, window_bounds = array<i64: 128, 128>}]} {
    %c0 = arith.constant 0 : index
    %c0_0 = arith.constant 0 : index
    %0 = vector.load %arg1[%c0, %c0_0] : memref<128x128xf32, #tpu.memory_space<vmem>>, vector<128x128xf32>
    %c0_1 = arith.constant 0 : index
    %c0_2 = arith.constant 0 : index
    %1 = vector.load %arg2[%c0_1, %c0_2] : memref<1x128xf32, #tpu.memory_space<vmem>>, vector<1x128xf32>
    %2 = vector.broadcast %1 : vector<1x128xf32> to vector<128x128xf32>
    %3 = arith.mulf %0, %2 : vector<128x128xf32>
    %c0_3 = arith.constant 0 : index
    %c0_4 = arith.constant 0 : index
    %4 = vector.load %arg3[%c0_3, %c0_4] : memref<1x128xf32, #tpu.memory_space<vmem>>, vector<1x128xf32>
    %5 = vector.broadcast %4 : vector<1x128xf32> to vector<128x128xf32>
    %6 = arith.addf %3, %5 : vector<128x128xf32>
    %cst = arith.constant 0.000000e+00 : f32
    %7 = vector.broadcast %cst : f32 to vector<128x128xf32>
    %8 = arith.cmpf ogt, %6, %7 : vector<128x128xf32>
    %cst_5 = arith.constant 2.000000e-01 : f32
    %9 = vector.broadcast %cst_5 : f32 to vector<128x128xf32>
    %10 = arith.mulf %9, %6 : vector<128x128xf32>
    %11 = arith.select %8, %6, %10 : vector<128x128xi1>, vector<128x128xf32>
    %c0_6 = arith.constant 0 : index
    %c0_7 = arith.constant 0 : index
    %12 = vector.load %arg4[%c0_6, %c0_7] : memref<128x128xf32, #tpu.memory_space<vmem>>, vector<128x128xf32>
    tpu.vector_store %arg4[%c0_6, %c0_7], %11 {strides = array<i32>} : memref<128x128xf32, #tpu.memory_space<vmem>>, vector<128x128xf32>,
    return
  }
  func.func @transform_0(%arg0: i32) -> (i32, i32) {
    %c0_i32 = arith.constant 0 : i32
    %c0_i32_0 = arith.constant 0 : i32
    return %arg0, %c0_i32 : i32, i32
  }
  func.func @transform_1(%arg0: i32) -> (i32, i32) {
    %c0_i32 = arith.constant 0 : i32
    %c0_i32_0 = arith.constant 0 : i32
    %c0_i32_1 = arith.constant 0 : i32
    return %c0_i32, %c0_i32_0 : i32, i32
  }
  func.func @transform_2(%arg0: i32) -> (i32, i32) {
    %c0_i32 = arith.constant 0 : i32
    %c0_i32_0 = arith.constant 0 : i32
    %c0_i32_1 = arith.constant 0 : i32
    return %c0_i32, %c0_i32_0 : i32, i32
  }
  func.func @transform_3(%arg0: i32) -> (i32, i32) {
    %c0_i32 = arith.constant 0 : i32
    %c0_i32_0 = arith.constant 0 : i32
    return %arg0, %c0_i32 : i32, i32
  }
}

module attributes {stable_mosaic.version = 11 : i64} {
  func.func @_gemm_bias_kernel(%arg0: i32, %arg1: i32, %arg2: memref<128x768xbf16, #tpu.memory_space<vmem>>, %arg3: memref<768x128xbf16, #tpu.memory_space<vmem>>, %arg4: memref<1x128xf32, #tpu.memory_space<vmem>>, %arg5: memref<128x128xf32, #tpu.memory_space<vmem>>, %arg6: memref<8x128xf32, #tpu.memory_space<vmem>>, %arg7: memref<8x128xf32, #tpu.memory_space<vmem>>, %arg8: memref<128x128xf32, #tpu.memory_space<vmem>>) attributes {dimension_semantics = [#tpu.dimension_semantics<parallel>, #tpu.dimension_semantics<arbitrary>], iteration_bounds = array<i64: 1, 1>, scalar_prefetch = 0 : i64, scratch_operands = 1 : i64, tpu.core_type = #tpu.core_type<tc>, window_params = [{transform_indices = @transform_0, window_bounds = array<i64: 128, 768>}, {transform_indices = @transform_1, window_bounds = array<i64: 768, 128>}, {pipeline_mode = #tpu.pipeline_mode<synchronous>, transform_indices = @transform_2, window_bounds = array<i64: 1, 128>}, {transform_indices = @transform_3, window_bounds = array<i64: 128, 128>}, {transform_indices = @transform_4, window_bounds = array<i64: 8, 128>}, {transform_indices = @transform_5, window_bounds = array<i64: 8, 128>}]} {
    %c128_i32 = arith.constant 128 : i32
    %0 = arith.muli %arg0, %c128_i32 : i32
    %c0_i32 = arith.constant 0 : i32
    %1 = arith.cmpi eq, %arg1, %c0_i32 : i32
    %2 = arith.extui %1 : i1 to i32
    %c0_i32_0 = arith.constant 0 : i32
    %3 = arith.cmpi ne, %2, %c0_i32_0 : i32
    scf.if %3 {
      %cst_10 = arith.constant 0.000000e+00 : f32
      %13 = vector.broadcast %cst_10 : f32 to vector<128x128xf32>
      %c0_11 = arith.constant 0 : index
      %c0_12 = arith.constant 0 : index
      %14 = vector.load %arg8[%c0_11, %c0_12] : memref<128x128xf32, #tpu.memory_space<vmem>>, vector<128x128xf32>
      tpu.vector_store %arg8[%c0_11, %c0_12], %13 {strides = array<i32>} : memref<128x128xf32, #tpu.memory_space<vmem>>, vector<128x128xf32>,
    } else {
    }
    %c0 = arith.constant 0 : index
    %c0_1 = arith.constant 0 : index
    %4 = vector.load %arg8[%c0, %c0_1] : memref<128x128xf32, #tpu.memory_space<vmem>>, vector<128x128xf32>
    %c0_2 = arith.constant 0 : index
    %c0_3 = arith.constant 0 : index
    %5 = vector.load %arg2[%c0_2, %c0_3] : memref<128x768xbf16, #tpu.memory_space<vmem>>, vector<128x768xbf16>
    %c0_4 = arith.constant 0 : index
    %c0_5 = arith.constant 0 : index
    %6 = vector.load %arg3[%c0_4, %c0_5] : memref<768x128xbf16, #tpu.memory_space<vmem>>, vector<768x128xbf16>
    %cst = arith.constant dense<0.000000e+00> : vector<128x128xf32>
    %7 = tpu.matmul %5, %6, %cst {dimension_numbers = #tpu.dot_dimension_numbers<[1], [0], [0], [1], [0, 0, 1, 1], [], []>} : vector<128x768xbf16>, vector<768x128xbf16>, vector<128x128xf32> -> vector<128x128xf32>
    %8 = arith.addf %4, %7 : vector<128x128xf32>
    %c0_6 = arith.constant 0 : index
    %c0_7 = arith.constant 0 : index
    %9 = vector.load %arg8[%c0_6, %c0_7] : memref<128x128xf32, #tpu.memory_space<vmem>>, vector<128x128xf32>
    tpu.vector_store %arg8[%c0_6, %c0_7], %8 {strides = array<i32>} : memref<128x128xf32, #tpu.memory_space<vmem>>, vector<128x128xf32>,
    %c0_i32_8 = arith.constant 0 : i32
    %10 = arith.cmpi eq, %arg1, %c0_i32_8 : i32
    %11 = arith.extui %10 : i1 to i32
    %c0_i32_9 = arith.constant 0 : i32
    %12 = arith.cmpi ne, %11, %c0_i32_9 : i32
    scf.if %12 {
      %c0_10 = arith.constant 0 : index
      %c0_11 = arith.constant 0 : index
      %13 = vector.load %arg8[%c0_10, %c0_11] : memref<128x128xf32, #tpu.memory_space<vmem>>, vector<128x128xf32>
      %c0_12 = arith.constant 0 : index
      %c0_13 = arith.constant 0 : index
      %14 = vector.load %arg4[%c0_12, %c0_13] : memref<1x128xf32, #tpu.memory_space<vmem>>, vector<1x128xf32>
      %15 = vector.broadcast %14 : vector<1x128xf32> to vector<128x128xf32>
      %16 = arith.addf %13, %15 : vector<128x128xf32>
      %c0_14 = arith.constant 0 : index
      %c0_15 = arith.constant 0 : index
      %17 = vector.load %arg5[%c0_14, %c0_15] : memref<128x128xf32, #tpu.memory_space<vmem>>, vector<128x128xf32>
      tpu.vector_store %arg5[%c0_14, %c0_15], %16 {strides = array<i32>} : memref<128x128xf32, #tpu.memory_space<vmem>>, vector<128x128xf32>,
      %18 = tpu.iota {dimensions = array<i32: 0>} : vector<128x1xi32>
      %19 = vector.broadcast %0 : i32 to vector<128x1xi32>
      %20 = arith.addi %18, %19 : vector<128x1xi32>
      %c128_i32_16 = arith.constant 128 : i32
      %21 = vector.broadcast %c128_i32_16 : i32 to vector<128x1xi32>
      %22 = arith.cmpi slt, %20, %21 : vector<128x1xi32>
      %cst_17 = arith.constant 0.000000e+00 : f32
      %23 = vector.shape_cast %22 : vector<128x1xi1> to vector<128x1xi1>
      %24 = vector.broadcast %23 : vector<128x1xi1> to vector<128x128xi1>
      %25 = vector.broadcast %cst_17 : f32 to vector<128x128xf32>
      %26 = arith.select %24, %16, %25 : vector<128x128xi1>, vector<128x128xf32>
      %cst_18 = arith.constant dense<0.000000e+00> : vector<128xf32>
      %27 = vector.multi_reduction <add>, %26, %cst_18 [0] : vector<128x128xf32> to vector<128xf32>
      %28 = vector.shape_cast %27 : vector<128xf32> to vector<1x128xf32>
      %29 = arith.mulf %26, %26 : vector<128x128xf32>
      %cst_19 = arith.constant dense<0.000000e+00> : vector<128xf32>
      %30 = vector.multi_reduction <add>, %29, %cst_19 [0] : vector<128x128xf32> to vector<128xf32>
      %31 = vector.shape_cast %30 : vector<128xf32> to vector<1x128xf32>
      %32 = tpu.iota {dimensions = array<i32: 0>} : vector<8x128xi32>
      %c0_i32_20 = arith.constant 0 : i32
      %33 = vector.broadcast %c0_i32_20 : i32 to vector<8x128xi32>
      %34 = arith.cmpi eq, %32, %33 : vector<8x128xi32>
      %cst_21 = arith.constant 0.000000e+00 : f32
      %35 = vector.shape_cast %28 : vector<1x128xf32> to vector<1x128xf32>
      %36 = vector.broadcast %35 : vector<1x128xf32> to vector<8x128xf32>
      %37 = vector.broadcast %cst_21 : f32 to vector<8x128xf32>
      %38 = arith.select %34, %36, %37 : vector<8x128xi1>, vector<8x128xf32>
      %c0_22 = arith.constant 0 : index
      %c0_23 = arith.constant 0 : index
      %39 = vector.load %arg6[%c0_22, %c0_23] : memref<8x128xf32, #tpu.memory_space<vmem>>, vector<8x128xf32>
      tpu.vector_store %arg6[%c0_22, %c0_23], %38 {strides = array<i32>} : memref<8x128xf32, #tpu.memory_space<vmem>>, vector<8x128xf32>,
      %cst_24 = arith.constant 0.000000e+00 : f32
      %40 = vector.shape_cast %31 : vector<1x128xf32> to vector<1x128xf32>
      %41 = vector.broadcast %40 : vector<1x128xf32> to vector<8x128xf32>
      %42 = vector.broadcast %cst_24 : f32 to vector<8x128xf32>
      %43 = arith.select %34, %41, %42 : vector<8x128xi1>, vector<8x128xf32>
      %c0_25 = arith.constant 0 : index
      %c0_26 = arith.constant 0 : index
      %44 = vector.load %arg7[%c0_25, %c0_26] : memref<8x128xf32, #tpu.memory_space<vmem>>, vector<8x128xf32>
      tpu.vector_store %arg7[%c0_25, %c0_26], %43 {strides = array<i32>} : memref<8x128xf32, #tpu.memory_space<vmem>>, vector<8x128xf32>,
    } else {
    }
    return
  }
  func.func @transform_0(%arg0: i32, %arg1: i32) -> (i32, i32) {
    %c0_i32 = arith.constant 0 : i32
    return %arg0, %arg1 : i32, i32
  }
  func.func @transform_1(%arg0: i32, %arg1: i32) -> (i32, i32) {
    %c0_i32 = arith.constant 0 : i32
    %c0_i32_0 = arith.constant 0 : i32
    return %arg1, %c0_i32 : i32, i32
  }
  func.func @transform_2(%arg0: i32, %arg1: i32) -> (i32, i32) {
    %c0_i32 = arith.constant 0 : i32
    %c0_i32_0 = arith.constant 0 : i32
    %c0_i32_1 = arith.constant 0 : i32
    return %c0_i32, %c0_i32_0 : i32, i32
  }
  func.func @transform_3(%arg0: i32, %arg1: i32) -> (i32, i32) {
    %c0_i32 = arith.constant 0 : i32
    %c0_i32_0 = arith.constant 0 : i32
    return %arg0, %c0_i32 : i32, i32
  }
  func.func @transform_4(%arg0: i32, %arg1: i32) -> (i32, i32) {
    %c0_i32 = arith.constant 0 : i32
    %c0_i32_0 = arith.constant 0 : i32
    return %arg0, %c0_i32 : i32, i32
  }
  func.func @transform_5(%arg0: i32, %arg1: i32) -> (i32, i32) {
    %c0_i32 = arith.constant 0 : i32
    %c0_i32_0 = arith.constant 0 : i32
    return %arg0, %c0_i32 : i32, i32
  }
}

module attributes {stable_mosaic.version = 11 : i64} {
  func.func @_affine_lrelu_kernel(%arg0: i32, %arg1: memref<256x128xf32, #tpu.memory_space<vmem>>, %arg2: memref<1x128xf32, #tpu.memory_space<vmem>>, %arg3: memref<1x128xf32, #tpu.memory_space<vmem>>, %arg4: memref<256x128xf32, #tpu.memory_space<vmem>>) attributes {dimension_semantics = [#tpu.dimension_semantics<parallel>], iteration_bounds = array<i64: 1>, scalar_prefetch = 0 : i64, scratch_operands = 0 : i64, tpu.core_type = #tpu.core_type<tc>, window_params = [{transform_indices = @transform_0, window_bounds = array<i64: 256, 128>}, {pipeline_mode = #tpu.pipeline_mode<synchronous>, transform_indices = @transform_1, window_bounds = array<i64: 1, 128>}, {pipeline_mode = #tpu.pipeline_mode<synchronous>, transform_indices = @transform_2, window_bounds = array<i64: 1, 128>}, {transform_indices = @transform_3, window_bounds = array<i64: 256, 128>}]} {
    %c0 = arith.constant 0 : index
    %c0_0 = arith.constant 0 : index
    %0 = vector.load %arg1[%c0, %c0_0] : memref<256x128xf32, #tpu.memory_space<vmem>>, vector<256x128xf32>
    %c0_1 = arith.constant 0 : index
    %c0_2 = arith.constant 0 : index
    %1 = vector.load %arg2[%c0_1, %c0_2] : memref<1x128xf32, #tpu.memory_space<vmem>>, vector<1x128xf32>
    %2 = vector.broadcast %1 : vector<1x128xf32> to vector<256x128xf32>
    %3 = arith.mulf %0, %2 : vector<256x128xf32>
    %c0_3 = arith.constant 0 : index
    %c0_4 = arith.constant 0 : index
    %4 = vector.load %arg3[%c0_3, %c0_4] : memref<1x128xf32, #tpu.memory_space<vmem>>, vector<1x128xf32>
    %5 = vector.broadcast %4 : vector<1x128xf32> to vector<256x128xf32>
    %6 = arith.addf %3, %5 : vector<256x128xf32>
    %cst = arith.constant 0.000000e+00 : f32
    %7 = vector.broadcast %cst : f32 to vector<256x128xf32>
    %8 = arith.cmpf ogt, %6, %7 : vector<256x128xf32>
    %cst_5 = arith.constant 2.000000e-01 : f32
    %9 = vector.broadcast %cst_5 : f32 to vector<256x128xf32>
    %10 = arith.mulf %9, %6 : vector<256x128xf32>
    %11 = arith.select %8, %6, %10 : vector<256x128xi1>, vector<256x128xf32>
    %c0_6 = arith.constant 0 : index
    %c0_7 = arith.constant 0 : index
    %12 = vector.load %arg4[%c0_6, %c0_7] : memref<256x128xf32, #tpu.memory_space<vmem>>, vector<256x128xf32>
    tpu.vector_store %arg4[%c0_6, %c0_7], %11 {strides = array<i32>} : memref<256x128xf32, #tpu.memory_space<vmem>>, vector<256x128xf32>,
    return
  }
  func.func @transform_0(%arg0: i32) -> (i32, i32) {
    %c0_i32 = arith.constant 0 : i32
    %c0_i32_0 = arith.constant 0 : i32
    return %arg0, %c0_i32 : i32, i32
  }
  func.func @transform_1(%arg0: i32) -> (i32, i32) {
    %c0_i32 = arith.constant 0 : i32
    %c0_i32_0 = arith.constant 0 : i32
    %c0_i32_1 = arith.constant 0 : i32
    return %c0_i32, %c0_i32_0 : i32, i32
  }
  func.func @transform_2(%arg0: i32) -> (i32, i32) {
    %c0_i32 = arith.constant 0 : i32
    %c0_i32_0 = arith.constant 0 : i32
    %c0_i32_1 = arith.constant 0 : i32
    return %c0_i32, %c0_i32_0 : i32, i32
  }
  func.func @transform_3(%arg0: i32) -> (i32, i32) {
    %c0_i32 = arith.constant 0 : i32
    %c0_i32_0 = arith.constant 0 : i32
    return %arg0, %c0_i32 : i32, i32
  }
}

module attributes {stable_mosaic.version = 11 : i64} {
  func.func @_gemm_bias_kernel(%arg0: i32, %arg1: i32, %arg2: memref<512x264xbf16, #tpu.memory_space<vmem>>, %arg3: memref<264x128xbf16, #tpu.memory_space<vmem>>, %arg4: memref<1x128xf32, #tpu.memory_space<vmem>>, %arg5: memref<512x128xf32, #tpu.memory_space<vmem>>, %arg6: memref<8x128xf32, #tpu.memory_space<vmem>>, %arg7: memref<8x128xf32, #tpu.memory_space<vmem>>, %arg8: memref<512x128xf32, #tpu.memory_space<vmem>>) attributes {dimension_semantics = [#tpu.dimension_semantics<parallel>, #tpu.dimension_semantics<arbitrary>], iteration_bounds = array<i64: 1, 1>, scalar_prefetch = 0 : i64, scratch_operands = 1 : i64, tpu.core_type = #tpu.core_type<tc>, window_params = [{transform_indices = @transform_0, window_bounds = array<i64: 512, 264>}, {transform_indices = @transform_1, window_bounds = array<i64: 264, 128>}, {pipeline_mode = #tpu.pipeline_mode<synchronous>, transform_indices = @transform_2, window_bounds = array<i64: 1, 128>}, {transform_indices = @transform_3, window_bounds = array<i64: 512, 128>}, {transform_indices = @transform_4, window_bounds = array<i64: 8, 128>}, {transform_indices = @transform_5, window_bounds = array<i64: 8, 128>}]} {
    %c512_i32 = arith.constant 512 : i32
    %0 = arith.muli %arg0, %c512_i32 : i32
    %c0_i32 = arith.constant 0 : i32
    %1 = arith.cmpi eq, %arg1, %c0_i32 : i32
    %2 = arith.extui %1 : i1 to i32
    %c0_i32_0 = arith.constant 0 : i32
    %3 = arith.cmpi ne, %2, %c0_i32_0 : i32
    scf.if %3 {
      %cst_10 = arith.constant 0.000000e+00 : f32
      %13 = vector.broadcast %cst_10 : f32 to vector<512x128xf32>
      %c0_11 = arith.constant 0 : index
      %c0_12 = arith.constant 0 : index
      %14 = vector.load %arg8[%c0_11, %c0_12] : memref<512x128xf32, #tpu.memory_space<vmem>>, vector<512x128xf32>
      tpu.vector_store %arg8[%c0_11, %c0_12], %13 {strides = array<i32>} : memref<512x128xf32, #tpu.memory_space<vmem>>, vector<512x128xf32>,
    } else {
    }
    %c0 = arith.constant 0 : index
    %c0_1 = arith.constant 0 : index
    %4 = vector.load %arg8[%c0, %c0_1] : memref<512x128xf32, #tpu.memory_space<vmem>>, vector<512x128xf32>
    %c0_2 = arith.constant 0 : index
    %c0_3 = arith.constant 0 : index
    %5 = vector.load %arg2[%c0_2, %c0_3] : memref<512x264xbf16, #tpu.memory_space<vmem>>, vector<512x264xbf16>
    %c0_4 = arith.constant 0 : index
    %c0_5 = arith.constant 0 : index
    %6 = vector.load %arg3[%c0_4, %c0_5] : memref<264x128xbf16, #tpu.memory_space<vmem>>, vector<264x128xbf16>
    %cst = arith.constant dense<0.000000e+00> : vector<512x128xf32>
    %7 = tpu.matmul %5, %6, %cst {dimension_numbers = #tpu.dot_dimension_numbers<[1], [0], [0], [1], [0, 0, 1, 1], [], []>} : vector<512x264xbf16>, vector<264x128xbf16>, vector<512x128xf32> -> vector<512x128xf32>
    %8 = arith.addf %4, %7 : vector<512x128xf32>
    %c0_6 = arith.constant 0 : index
    %c0_7 = arith.constant 0 : index
    %9 = vector.load %arg8[%c0_6, %c0_7] : memref<512x128xf32, #tpu.memory_space<vmem>>, vector<512x128xf32>
    tpu.vector_store %arg8[%c0_6, %c0_7], %8 {strides = array<i32>} : memref<512x128xf32, #tpu.memory_space<vmem>>, vector<512x128xf32>,
    %c0_i32_8 = arith.constant 0 : i32
    %10 = arith.cmpi eq, %arg1, %c0_i32_8 : i32
    %11 = arith.extui %10 : i1 to i32
    %c0_i32_9 = arith.constant 0 : i32
    %12 = arith.cmpi ne, %11, %c0_i32_9 : i32
    scf.if %12 {
      %c0_10 = arith.constant 0 : index
      %c0_11 = arith.constant 0 : index
      %13 = vector.load %arg8[%c0_10, %c0_11] : memref<512x128xf32, #tpu.memory_space<vmem>>, vector<512x128xf32>
      %c0_12 = arith.constant 0 : index
      %c0_13 = arith.constant 0 : index
      %14 = vector.load %arg4[%c0_12, %c0_13] : memref<1x128xf32, #tpu.memory_space<vmem>>, vector<1x128xf32>
      %15 = vector.broadcast %14 : vector<1x128xf32> to vector<512x128xf32>
      %16 = arith.addf %13, %15 : vector<512x128xf32>
      %c0_14 = arith.constant 0 : index
      %c0_15 = arith.constant 0 : index
      %17 = vector.load %arg5[%c0_14, %c0_15] : memref<512x128xf32, #tpu.memory_space<vmem>>, vector<512x128xf32>
      tpu.vector_store %arg5[%c0_14, %c0_15], %16 {strides = array<i32>} : memref<512x128xf32, #tpu.memory_space<vmem>>, vector<512x128xf32>,
      %18 = tpu.iota {dimensions = array<i32: 0>} : vector<512x1xi32>
      %19 = vector.broadcast %0 : i32 to vector<512x1xi32>
      %20 = arith.addi %18, %19 : vector<512x1xi32>
      %c512_i32_16 = arith.constant 512 : i32
      %21 = vector.broadcast %c512_i32_16 : i32 to vector<512x1xi32>
      %22 = arith.cmpi slt, %20, %21 : vector<512x1xi32>
      %cst_17 = arith.constant 0.000000e+00 : f32
      %23 = vector.shape_cast %22 : vector<512x1xi1> to vector<512x1xi1>
      %24 = vector.broadcast %23 : vector<512x1xi1> to vector<512x128xi1>
      %25 = vector.broadcast %cst_17 : f32 to vector<512x128xf32>
      %26 = arith.select %24, %16, %25 : vector<512x128xi1>, vector<512x128xf32>
      %cst_18 = arith.constant dense<0.000000e+00> : vector<128xf32>
      %27 = vector.multi_reduction <add>, %26, %cst_18 [0] : vector<512x128xf32> to vector<128xf32>
      %28 = vector.shape_cast %27 : vector<128xf32> to vector<1x128xf32>
      %29 = arith.mulf %26, %26 : vector<512x128xf32>
      %cst_19 = arith.constant dense<0.000000e+00> : vector<128xf32>
      %30 = vector.multi_reduction <add>, %29, %cst_19 [0] : vector<512x128xf32> to vector<128xf32>
      %31 = vector.shape_cast %30 : vector<128xf32> to vector<1x128xf32>
      %32 = tpu.iota {dimensions = array<i32: 0>} : vector<8x128xi32>
      %c0_i32_20 = arith.constant 0 : i32
      %33 = vector.broadcast %c0_i32_20 : i32 to vector<8x128xi32>
      %34 = arith.cmpi eq, %32, %33 : vector<8x128xi32>
      %cst_21 = arith.constant 0.000000e+00 : f32
      %35 = vector.shape_cast %28 : vector<1x128xf32> to vector<1x128xf32>
      %36 = vector.broadcast %35 : vector<1x128xf32> to vector<8x128xf32>
      %37 = vector.broadcast %cst_21 : f32 to vector<8x128xf32>
      %38 = arith.select %34, %36, %37 : vector<8x128xi1>, vector<8x128xf32>
      %c0_22 = arith.constant 0 : index
      %c0_23 = arith.constant 0 : index
      %39 = vector.load %arg6[%c0_22, %c0_23] : memref<8x128xf32, #tpu.memory_space<vmem>>, vector<8x128xf32>
      tpu.vector_store %arg6[%c0_22, %c0_23], %38 {strides = array<i32>} : memref<8x128xf32, #tpu.memory_space<vmem>>, vector<8x128xf32>,
      %cst_24 = arith.constant 0.000000e+00 : f32
      %40 = vector.shape_cast %31 : vector<1x128xf32> to vector<1x128xf32>
      %41 = vector.broadcast %40 : vector<1x128xf32> to vector<8x128xf32>
      %42 = vector.broadcast %cst_24 : f32 to vector<8x128xf32>
      %43 = arith.select %34, %41, %42 : vector<8x128xi1>, vector<8x128xf32>
      %c0_25 = arith.constant 0 : index
      %c0_26 = arith.constant 0 : index
      %44 = vector.load %arg7[%c0_25, %c0_26] : memref<8x128xf32, #tpu.memory_space<vmem>>, vector<8x128xf32>
      tpu.vector_store %arg7[%c0_25, %c0_26], %43 {strides = array<i32>} : memref<8x128xf32, #tpu.memory_space<vmem>>, vector<8x128xf32>,
    } else {
    }
    return
  }
  func.func @transform_0(%arg0: i32, %arg1: i32) -> (i32, i32) {
    %c0_i32 = arith.constant 0 : i32
    return %arg0, %arg1 : i32, i32
  }
  func.func @transform_1(%arg0: i32, %arg1: i32) -> (i32, i32) {
    %c0_i32 = arith.constant 0 : i32
    %c0_i32_0 = arith.constant 0 : i32
    return %arg1, %c0_i32 : i32, i32
  }
  func.func @transform_2(%arg0: i32, %arg1: i32) -> (i32, i32) {
    %c0_i32 = arith.constant 0 : i32
    %c0_i32_0 = arith.constant 0 : i32
    %c0_i32_1 = arith.constant 0 : i32
    return %c0_i32, %c0_i32_0 : i32, i32
  }
  func.func @transform_3(%arg0: i32, %arg1: i32) -> (i32, i32) {
    %c0_i32 = arith.constant 0 : i32
    %c0_i32_0 = arith.constant 0 : i32
    return %arg0, %c0_i32 : i32, i32
  }
  func.func @transform_4(%arg0: i32, %arg1: i32) -> (i32, i32) {
    %c0_i32 = arith.constant 0 : i32
    %c0_i32_0 = arith.constant 0 : i32
    return %arg0, %c0_i32 : i32, i32
  }
  func.func @transform_5(%arg0: i32, %arg1: i32) -> (i32, i32) {
    %c0_i32 = arith.constant 0 : i32
    %c0_i32_0 = arith.constant 0 : i32
    return %arg0, %c0_i32 : i32, i32
  }
}

module attributes {stable_mosaic.version = 11 : i64} {
  func.func @_gemm_bias_kernel(%arg0: i32, %arg1: i32, %arg2: memref<512x32xbf16, #tpu.memory_space<vmem>>, %arg3: memref<32x128xbf16, #tpu.memory_space<vmem>>, %arg4: memref<1x128xf32, #tpu.memory_space<vmem>>, %arg5: memref<512x128xf32, #tpu.memory_space<vmem>>, %arg6: memref<8x128xf32, #tpu.memory_space<vmem>>, %arg7: memref<8x128xf32, #tpu.memory_space<vmem>>, %arg8: memref<512x128xf32, #tpu.memory_space<vmem>>) attributes {dimension_semantics = [#tpu.dimension_semantics<parallel>, #tpu.dimension_semantics<arbitrary>], iteration_bounds = array<i64: 1, 1>, scalar_prefetch = 0 : i64, scratch_operands = 1 : i64, tpu.core_type = #tpu.core_type<tc>, window_params = [{transform_indices = @transform_0, window_bounds = array<i64: 512, 32>}, {transform_indices = @transform_1, window_bounds = array<i64: 32, 128>}, {pipeline_mode = #tpu.pipeline_mode<synchronous>, transform_indices = @transform_2, window_bounds = array<i64: 1, 128>}, {transform_indices = @transform_3, window_bounds = array<i64: 512, 128>}, {transform_indices = @transform_4, window_bounds = array<i64: 8, 128>}, {transform_indices = @transform_5, window_bounds = array<i64: 8, 128>}]} {
    %c512_i32 = arith.constant 512 : i32
    %0 = arith.muli %arg0, %c512_i32 : i32
    %c0_i32 = arith.constant 0 : i32
    %1 = arith.cmpi eq, %arg1, %c0_i32 : i32
    %2 = arith.extui %1 : i1 to i32
    %c0_i32_0 = arith.constant 0 : i32
    %3 = arith.cmpi ne, %2, %c0_i32_0 : i32
    scf.if %3 {
      %cst_10 = arith.constant 0.000000e+00 : f32
      %13 = vector.broadcast %cst_10 : f32 to vector<512x128xf32>
      %c0_11 = arith.constant 0 : index
      %c0_12 = arith.constant 0 : index
      %14 = vector.load %arg8[%c0_11, %c0_12] : memref<512x128xf32, #tpu.memory_space<vmem>>, vector<512x128xf32>
      tpu.vector_store %arg8[%c0_11, %c0_12], %13 {strides = array<i32>} : memref<512x128xf32, #tpu.memory_space<vmem>>, vector<512x128xf32>,
    } else {
    }
    %c0 = arith.constant 0 : index
    %c0_1 = arith.constant 0 : index
    %4 = vector.load %arg8[%c0, %c0_1] : memref<512x128xf32, #tpu.memory_space<vmem>>, vector<512x128xf32>
    %c0_2 = arith.constant 0 : index
    %c0_3 = arith.constant 0 : index
    %5 = vector.load %arg2[%c0_2, %c0_3] : memref<512x32xbf16, #tpu.memory_space<vmem>>, vector<512x32xbf16>
    %c0_4 = arith.constant 0 : index
    %c0_5 = arith.constant 0 : index
    %6 = vector.load %arg3[%c0_4, %c0_5] : memref<32x128xbf16, #tpu.memory_space<vmem>>, vector<32x128xbf16>
    %cst = arith.constant dense<0.000000e+00> : vector<512x128xf32>
    %7 = tpu.matmul %5, %6, %cst {dimension_numbers = #tpu.dot_dimension_numbers<[1], [0], [0], [1], [0, 0, 1, 1], [], []>} : vector<512x32xbf16>, vector<32x128xbf16>, vector<512x128xf32> -> vector<512x128xf32>
    %8 = arith.addf %4, %7 : vector<512x128xf32>
    %c0_6 = arith.constant 0 : index
    %c0_7 = arith.constant 0 : index
    %9 = vector.load %arg8[%c0_6, %c0_7] : memref<512x128xf32, #tpu.memory_space<vmem>>, vector<512x128xf32>
    tpu.vector_store %arg8[%c0_6, %c0_7], %8 {strides = array<i32>} : memref<512x128xf32, #tpu.memory_space<vmem>>, vector<512x128xf32>,
    %c0_i32_8 = arith.constant 0 : i32
    %10 = arith.cmpi eq, %arg1, %c0_i32_8 : i32
    %11 = arith.extui %10 : i1 to i32
    %c0_i32_9 = arith.constant 0 : i32
    %12 = arith.cmpi ne, %11, %c0_i32_9 : i32
    scf.if %12 {
      %c0_10 = arith.constant 0 : index
      %c0_11 = arith.constant 0 : index
      %13 = vector.load %arg8[%c0_10, %c0_11] : memref<512x128xf32, #tpu.memory_space<vmem>>, vector<512x128xf32>
      %c0_12 = arith.constant 0 : index
      %c0_13 = arith.constant 0 : index
      %14 = vector.load %arg4[%c0_12, %c0_13] : memref<1x128xf32, #tpu.memory_space<vmem>>, vector<1x128xf32>
      %15 = vector.broadcast %14 : vector<1x128xf32> to vector<512x128xf32>
      %16 = arith.addf %13, %15 : vector<512x128xf32>
      %c0_14 = arith.constant 0 : index
      %c0_15 = arith.constant 0 : index
      %17 = vector.load %arg5[%c0_14, %c0_15] : memref<512x128xf32, #tpu.memory_space<vmem>>, vector<512x128xf32>
      tpu.vector_store %arg5[%c0_14, %c0_15], %16 {strides = array<i32>} : memref<512x128xf32, #tpu.memory_space<vmem>>, vector<512x128xf32>,
      %18 = tpu.iota {dimensions = array<i32: 0>} : vector<512x1xi32>
      %19 = vector.broadcast %0 : i32 to vector<512x1xi32>
      %20 = arith.addi %18, %19 : vector<512x1xi32>
      %c512_i32_16 = arith.constant 512 : i32
      %21 = vector.broadcast %c512_i32_16 : i32 to vector<512x1xi32>
      %22 = arith.cmpi slt, %20, %21 : vector<512x1xi32>
      %cst_17 = arith.constant 0.000000e+00 : f32
      %23 = vector.shape_cast %22 : vector<512x1xi1> to vector<512x1xi1>
      %24 = vector.broadcast %23 : vector<512x1xi1> to vector<512x128xi1>
      %25 = vector.broadcast %cst_17 : f32 to vector<512x128xf32>
      %26 = arith.select %24, %16, %25 : vector<512x128xi1>, vector<512x128xf32>
      %cst_18 = arith.constant dense<0.000000e+00> : vector<128xf32>
      %27 = vector.multi_reduction <add>, %26, %cst_18 [0] : vector<512x128xf32> to vector<128xf32>
      %28 = vector.shape_cast %27 : vector<128xf32> to vector<1x128xf32>
      %29 = arith.mulf %26, %26 : vector<512x128xf32>
      %cst_19 = arith.constant dense<0.000000e+00> : vector<128xf32>
      %30 = vector.multi_reduction <add>, %29, %cst_19 [0] : vector<512x128xf32> to vector<128xf32>
      %31 = vector.shape_cast %30 : vector<128xf32> to vector<1x128xf32>
      %32 = tpu.iota {dimensions = array<i32: 0>} : vector<8x128xi32>
      %c0_i32_20 = arith.constant 0 : i32
      %33 = vector.broadcast %c0_i32_20 : i32 to vector<8x128xi32>
      %34 = arith.cmpi eq, %32, %33 : vector<8x128xi32>
      %cst_21 = arith.constant 0.000000e+00 : f32
      %35 = vector.shape_cast %28 : vector<1x128xf32> to vector<1x128xf32>
      %36 = vector.broadcast %35 : vector<1x128xf32> to vector<8x128xf32>
      %37 = vector.broadcast %cst_21 : f32 to vector<8x128xf32>
      %38 = arith.select %34, %36, %37 : vector<8x128xi1>, vector<8x128xf32>
      %c0_22 = arith.constant 0 : index
      %c0_23 = arith.constant 0 : index
      %39 = vector.load %arg6[%c0_22, %c0_23] : memref<8x128xf32, #tpu.memory_space<vmem>>, vector<8x128xf32>
      tpu.vector_store %arg6[%c0_22, %c0_23], %38 {strides = array<i32>} : memref<8x128xf32, #tpu.memory_space<vmem>>, vector<8x128xf32>,
      %cst_24 = arith.constant 0.000000e+00 : f32
      %40 = vector.shape_cast %31 : vector<1x128xf32> to vector<1x128xf32>
      %41 = vector.broadcast %40 : vector<1x128xf32> to vector<8x128xf32>
      %42 = vector.broadcast %cst_24 : f32 to vector<8x128xf32>
      %43 = arith.select %34, %41, %42 : vector<8x128xi1>, vector<8x128xf32>
      %c0_25 = arith.constant 0 : index
      %c0_26 = arith.constant 0 : index
      %44 = vector.load %arg7[%c0_25, %c0_26] : memref<8x128xf32, #tpu.memory_space<vmem>>, vector<8x128xf32>
      tpu.vector_store %arg7[%c0_25, %c0_26], %43 {strides = array<i32>} : memref<8x128xf32, #tpu.memory_space<vmem>>, vector<8x128xf32>,
    } else {
    }
    return
  }
  func.func @transform_0(%arg0: i32, %arg1: i32) -> (i32, i32) {
    %c0_i32 = arith.constant 0 : i32
    return %arg0, %arg1 : i32, i32
  }
  func.func @transform_1(%arg0: i32, %arg1: i32) -> (i32, i32) {
    %c0_i32 = arith.constant 0 : i32
    %c0_i32_0 = arith.constant 0 : i32
    return %arg1, %c0_i32 : i32, i32
  }
  func.func @transform_2(%arg0: i32, %arg1: i32) -> (i32, i32) {
    %c0_i32 = arith.constant 0 : i32
    %c0_i32_0 = arith.constant 0 : i32
    %c0_i32_1 = arith.constant 0 : i32
    return %c0_i32, %c0_i32_0 : i32, i32
  }
  func.func @transform_3(%arg0: i32, %arg1: i32) -> (i32, i32) {
    %c0_i32 = arith.constant 0 : i32
    %c0_i32_0 = arith.constant 0 : i32
    return %arg0, %c0_i32 : i32, i32
  }
  func.func @transform_4(%arg0: i32, %arg1: i32) -> (i32, i32) {
    %c0_i32 = arith.constant 0 : i32
    %c0_i32_0 = arith.constant 0 : i32
    return %arg0, %c0_i32 : i32, i32
  }
  func.func @transform_5(%arg0: i32, %arg1: i32) -> (i32, i32) {
    %c0_i32 = arith.constant 0 : i32
    %c0_i32_0 = arith.constant 0 : i32
    return %arg0, %c0_i32 : i32, i32
  }
}

</mosaic_0001>

<bundles_post_ra>
// kernel: tile.46
= control target key start
LH: loop header
LB: loop body
LE: loop exit
PB: predicated region body
PF: predicated region fallthrough
CT: control target
= control target key end

     0   :  { %2 = vsyncpa [#allocation1], 0  ;;  %s44_s6 = smov [#allocation0]   ;;  %s70_s0 = inlined_call_operand.hbm [shape: f32[2], index: 0, kind: input, shape index: {}]   ;;  %s71_s1 = inlined_call_operand.vmem [shape: f32[4,2], index: 1, kind: output, shape index: {}]  }
   0x1   :  { %s9_s7 = sshll.u32 %s44_s6, 4  ;;  %s20_s10 = scalar_lea.hbm %s70_s0, 16  ;;  %s10_s7 = int_to_ptr.vmem [resolvable:$true] %s9_s7 }
   0x2   :  { %p21_p0 = scmp.ne.s32.totalorder %s70_s0, %s20_s10  ;;  %p24_p1 = scmp.lt.u32.totalorder %s20_s10, %s70_s0 }
   0x4   :  { %p26_p2 = pnand %p24_p1, %p21_p0 }
   0x6   :  { %29 = shalt.err (!%p26_p2)
}
   0x7   :  { %s30_s15 = scalar_lea.vmem %s10_s7, 16  ;;  %s34_s16 = scalar_lea.vmem %s10_s7, 32 }
   0x8   :  { %p31_p3 = scmp.ne.s32.totalorder %s10_s7, %s30_s15  ;;  %p35_p4 = scmp.lt.s32.totalorder %s10_s7, %s10_s7 }
   0x9   :  { %p36_p5 = scmp.lt.s32.totalorder %s34_s16, %s30_s15 }
   0xb   :  { %p37_p6 = por %p36_p5, %p35_p4 }
   0xd   :  { %p38_p7 = pnand %p37_p6, %p31_p3 }
   0xf   :  { %41 = shalt.err (!%p38_p7)
}
  0x10   :  { %12 = dma.hbm_to_vmem [thread:$0]  %s70_s0, 16, %s10_s7, [#allocation1]  }
  0x11   :  { %42 = dma.done.wait [#allocation1], 16  }
  0x12   :  { %43 = vsyncadd [#allocation1], 4294967280  ;;  %v16_v0 = vld [vmem:[#allocation0] ss:$0 sm:$0xff] }
  0x13   :  { %17 = vst [vmem:[%s71_s1] sm:$0xf] %v16_v0 }
  0x14   :  { %18 = vsyncpa [#allocation1], 1 }

// kernel: tile.47
= control target key start
LH: loop header
LB: loop body
LE: loop exit
PB: predicated region body
PF: predicated region fallthrough
CT: control target
= control target key end

     0   :  { %vm7_vm0 = vcmask 15360   ;;  %s37_s8 = smov 2   ;;  %s38_s9 = smov 4   ;;  %vm13_vm1 = vcmask 64560   ;;  %vm19_vm2 = vcmask 48160   ;;  %vm25_vm3 = vcmask 31760   ;;  %s55_s0 = inlined_call_operand.vmem [shape: f32[4,2], index: 0, kind: input, shape index: {}]   ;;  %s56_s1 = inlined_call_operand.vmem [shape: f32[8], index: 1, kind: output, shape index: {}]  }
   0x1   :  { %v4_v0 = vld [vmem:[%s55_s0] sm:$0xf]  ;;  %s36_s0 = smov 6  }
   0x2   :  { %5 = vst [vmem:[#allocation1] sm:$0xf] %v4_v0 }
   0x9   :  { %v10_v1 = vld [vmem:[#allocation1 + $0x3] sm:$0x1]   ;;  %v22_v2 = vld [vmem:[#allocation1 + $0x1] sm:$0x1]   ;;  %v6_v3 = vld [vmem:[#allocation1] sm:$0x1]  }
   0xa   :  { %11 = vrot.lane.b32.xlu0 %v10_v1, %s36_s0  ;;  %23 = vrot.lane.b32.xlu1 %v22_v2, %s37_s8  ;;  %v16_v4 = vld [vmem:[#allocation1 + $0x2] sm:$0x1]   ;;  %8 = vst.msk [vmem:[#allocation0] sm:$0x1] %vm7_vm0, %v6_v3  }
   0xe   :  { %17 = vrot.lane.b32.xlu0 %v16_v4, %s38_s9 }
  0x7c   :  { %v12_v5 = vpop.permute.xlu0 %11   ;;  %v24_v6 = vpop.permute.xlu1 %23  }
  0x7d   :  { %14 = vst.msk [vmem:[#allocation0] sm:$0x1] %vm13_vm1, %v12_v5  }
  0x80   :  { %v18_v7 = vpop.permute.xlu0 %17  }
  0x81   :  { %20 = vst.msk [vmem:[#allocation0] sm:$0x1] %vm19_vm2, %v18_v7  }
  0x82   :  { %26 = vst.msk [vmem:[#allocation0] sm:$0x1] %vm25_vm3, %v24_v6  }
  0x89   :  { %v30_v8 = vld [vmem:[#allocation0] sm:$0x1] }
  0x8a   :  { %32 = vst [vmem:[%s56_s1] sm:$0x1] %v30_v8 }

// kernel: generator_forward.29
= control target key start
LH: loop header
LB: loop body
LE: loop exit
PB: predicated region body
PF: predicated region fallthrough
CT: control target
= control target key end

     0   :  { %11 = vsyncpa [#allocation4], 0  ;;  %vm139_vm0 = vcmask 1040384   ;;  %vm114_vm1 = vcmask 15360   ;;  %s779_s0 = inlined_call_operand.vmem [shape: bf16[128,2], index: 0, kind: input, shape index: {}]   ;;  %s780_s1 = inlined_call_operand.vmem [shape: bf16[2,128], index: 1, kind: input, shape index: {}]   ;;  %s781_s2 = inlined_call_operand.vmem [shape: f32[1,128], index: 2, kind: input, shape index: {}]   ;;  %s782_s3 = inlined_call_operand.vmem [shape: f32[128,128], index: 3, kind: output, shape index: {0}]   ;;  %s783_s4 = inlined_call_operand.hbm [shape: f32[8,128], index: 4, kind: output, shape index: {1}]   ;;  %s784_s5 = inlined_call_operand.hbm [shape: f32[8,128], index: 5, kind: output, shape index: {2}]  }
   0x1   :  { %v73_v0 = vld [vmem:[%s780_s1] sm:$0x1]  ;;  %v574_v3 = vld [vmem:[%s779_s0 + $0x8] sm:$0xff]   ;;  %v575_v4 = vld [vmem:[%s779_s0 + $0x10] sm:$0xff]  }
   0x2   :  { %v573_v1 = vld [vmem:[%s779_s0] sm:$0xff]   ;;  %569 = vmatprep.subr.msk.bf16.mxu0 %vm139_vm0, %v73_v0  ;;  %v141_v2 = vsel %vm139_vm0, %v73_v0, 0  ;;  %570 = vmatprep.subr.msk.bf16.mxu1 %vm139_vm0, %v73_v0  ;;  %v578_v6 = vld [vmem:[%s779_s0 + $0x28] sm:$0xff]   ;;  %v579_v7 = vld [vmem:[%s779_s0 + $0x30] sm:$0xff]  }
   0x3   :  { %550 = vmatpush3.bf16.msra.mxu0 %v141_v2  ;;  %551 = vmatprep.mubr.msk.bf16.mxu0 %vm114_vm1, %v573_v1  ;;  %v577_v5 = vld [vmem:[%s779_s0 + $0x20] sm:$0xff]  }
   0x4   :  { %568 = vmatpush3.bf16.msra.mxu1 %v141_v2  ;;  %559 = vmatprep.mubr.msk.bf16.mxu1 %vm114_vm1, %v577_v5 }
   0x6   :  { %552 = vmatmul.mubr.msk.bf16.vlgmr.msra.gmra.mrb[0].mxu0 %vm114_vm1, %v574_v3 }
   0x7   :  { %555 = vmatprep.mubr.msk.bf16.mxu0 %vm114_vm1, %v575_v4  ;;  %560 = vmatmul.mubr.msk.bf16.vlgmr.msra.gmra.mrb[0].mxu1 %vm114_vm1, %v578_v6 }
   0x8   :  { %12 = vsyncpa [#allocation6], 0  ;;  %v576_v8 = vld [vmem:[%s779_s0 + $0x18] sm:$0xff]   ;;  %563 = vmatprep.mubr.msk.bf16.mxu1 %vm114_vm1, %v579_v7  ;;  %v539_v10 = vld [vmem:[%s781_s2] ss:$0 sm:$0xff]  ;;  %s630_s15 = smov [#allocation5]  }
   0x9   :  { %v580_v9 = vld [vmem:[%s779_s0 + $0x38] sm:$0xff]   ;;  %s509_s16 = sshll.u32 %s630_s15, 4  ;;  %s510_s16 = int_to_ptr.vmem [resolvable:$true] %s509_s16 }
   0xe   :  { %556 = vmatmul.mubr.msk.bf16.gmra.mrb[4].mxu0 %vm114_vm1, %v576_v8 }
   0xf   :  { %564 = vmatmul.mubr.msk.bf16.gmra.mrb[4].mxu1 %vm114_vm1, %v580_v9 }
  0xd9   :  { %v553_v11 = vpop.f32.mrb[0].mxu0 }
  0xda   :  { %v300_v12 = vadd.f32 %v553_v11, %v539_v10  ;;  %v177_v13 = vpop.f32.mrb[1].mxu0  ;;  %v561_v18 = vpop.f32.mrb[0].mxu1 }
  0xdb   :  { %v298_v14 = vadd.f32 %v539_v10, %v177_v13  ;;  %v554_v15 = vpop.f32.mrb[2].mxu0  ;;  %v705_v20 = vadd.f32 %v561_v18, %v539_v10  ;;  %v209_v21 = vpop.f32.mrb[1].mxu1 }
  0xdc   :  { %316 = vst [vmem:[%s782_s3 + $0x10] sm:$0xff] %v300_v12  ;;  %v301_v16 = vadd.f32 %v554_v15, %v539_v10  ;;  %v180_v17 = vpop.f32.mrb[3].mxu0  ;;  %v306_v22 = vadd.f32 %v539_v10, %v209_v21  ;;  %v562_v23 = vpop.f32.mrb[2].mxu1  ;;  %v451_v30 = vmul.f32 %v300_v12, %v300_v12 }
  0xdd   :  { %314 = vst [vmem:[%s782_s3] sm:$0xff] %v298_v14  ;;  %v299_v19 = vadd.f32 %v539_v10, %v180_v17  ;;  %v449_v24 = vmul.f32 %v298_v14, %v298_v14  ;;  %324 = vst [vmem:[%s782_s3 + $0x50] sm:$0xff] %v705_v20  ;;  %v309_v27 = vadd.f32 %v562_v23, %v539_v10  ;;  %v212_v28 = vpop.f32.mrb[3].mxu1 }
  0xde   :  { %317 = vst [vmem:[%s782_s3 + $0x18] sm:$0xff] %v301_v16  ;;  %322 = vst [vmem:[%s782_s3 + $0x40] sm:$0xff] %v306_v22  ;;  %v307_v29 = vadd.f32 %v539_v10, %v212_v28  ;;  %v452_v36 = vmul.f32 %v301_v16, %v301_v16  ;;  %v457_v0 = vmul.f32 %v306_v22, %v306_v22  ;;  %v330_v28 = vlaneseq }
  0xdf   :  { %315 = vst [vmem:[%s782_s3 + $0x8] sm:$0xff] %v299_v19  ;;  %v428_v25 = vadd.f32 %v299_v19, %v298_v14  ;;  %v450_v26 = vmul.f32 %v299_v19, %v299_v19  ;;  %325 = vst [vmem:[%s782_s3 + $0x58] sm:$0xff] %v309_v27  ;;  %v459_v6 = vmul.f32 %v705_v20, %v705_v20 }
  0xe0   :  { %323 = vst [vmem:[%s782_s3 + $0x48] sm:$0xff] %v307_v29  ;;  %v458_v5 = vmul.f32 %v307_v29, %v307_v29  ;;  %v460_v9 = vmul.f32 %v309_v27, %v309_v27 }
  0xe1   :  { %v429_v31 = vadd.f32 %v428_v25, %v300_v12  ;;  %v465_v32 = vadd.f32 %v450_v26, %v449_v24  ;;  %v557_v33 = vpop.f32.mrb[4].mxu0 }
  0xe2   :  { %v304_v34 = vadd.f32 %v557_v33, %v539_v10  ;;  %v193_v35 = vpop.f32.mrb[5].mxu0  ;;  %v565_v43 = vpop.f32.mrb[4].mxu1 }
  0xe3   :  { %v466_v37 = vadd.f32 %v465_v32, %v451_v30  ;;  %v302_v38 = vadd.f32 %v539_v10, %v193_v35  ;;  %v430_v39 = vadd.f32 %v429_v31, %v301_v16  ;;  %v558_v40 = vpop.f32.mrb[6].mxu0  ;;  %v225_v48 = vpop.f32.mrb[5].mxu1  ;;  %v312_v49 = vadd.f32 %v565_v43, %v539_v10 }
  0xe4   :  { %320 = vst [vmem:[%s782_s3 + $0x30] sm:$0xff] %v304_v34  ;;  %v305_v41 = vadd.f32 %v558_v40, %v539_v10  ;;  %v196_v42 = vpop.f32.mrb[7].mxu0  ;;  %v310_v50 = vadd.f32 %v539_v10, %v225_v48  ;;  %v566_v51 = vpop.f32.mrb[6].mxu1  ;;  %v455_v58 = vmul.f32 %v304_v34, %v304_v34 }
  0xe5   :  { %318 = vst [vmem:[%s782_s3 + $0x20] sm:$0xff] %v302_v38  ;;  %v431_v44 = vadd.f32 %v430_v39, %v302_v38  ;;  %v453_v45 = vmul.f32 %v302_v38, %v302_v38  ;;  %v467_v46 = vadd.f32 %v466_v37, %v452_v36  ;;  %v303_v47 = vadd.f32 %v539_v10, %v196_v42  ;;  %v228_v56 = vpop.f32.mrb[7].mxu1 }
  0xe6   :  { %321 = vst [vmem:[%s782_s3 + $0x38] sm:$0xff] %v305_v41  ;;  %v313_v55 = vadd.f32 %v566_v51, %v539_v10  ;;  %328 = vst [vmem:[%s782_s3 + $0x70] sm:$0xff] %v312_v49  ;;  %v311_v57 = vadd.f32 %v539_v10, %v228_v56  ;;  %v456_v61 = vmul.f32 %v305_v41, %v305_v41 }
  0xe7   :  { %v468_v52 = vadd.f32 %v467_v46, %v453_v45  ;;  %319 = vst [vmem:[%s782_s3 + $0x28] sm:$0xff] %v303_v47  ;;  %v432_v53 = vadd.f32 %v431_v44, %v303_v47  ;;  %v454_v54 = vmul.f32 %v303_v47, %v303_v47  ;;  %326 = vst [vmem:[%s782_s3 + $0x60] sm:$0xff] %v310_v50 }
  0xe8   :  { %329 = vst [vmem:[%s782_s3 + $0x78] sm:$0xff] %v313_v55  ;;  %327 = vst [vmem:[%s782_s3 + $0x68] sm:$0xff] %v311_v57  ;;  %v461_v12 = vmul.f32 %v310_v50, %v310_v50  ;;  %v462_v17 = vmul.f32 %v311_v57, %v311_v57  ;;  %v463_v18 = vmul.f32 %v312_v49, %v312_v49  ;;  %s629_s3 = smov [#allocation3]  }
  0xe9   :  { %v433_v59 = vadd.f32 %v432_v53, %v304_v34  ;;  %v469_v60 = vadd.f32 %v468_v52, %v454_v54  ;;  %s499_s2 = sshll.u32 %s629_s3, 4  ;;  %s500_s2 = int_to_ptr.vmem [resolvable:$true] %s499_s2 }
  0xea   :  { %s581_s17 = scalar_lea.vmem %s500_s2, 128  ;;  %p586_p1 = scmp.lt.s32.totalorder %s500_s2, %s500_s2 }
  0xeb   :  { %v470_v62 = vadd.f32 %v469_v60, %v455_v58  ;;  %v434_v63 = vadd.f32 %v433_v59, %v305_v41  ;;  %p582_p0 = scmp.ne.s32.totalorder %s500_s2, %s581_s17  ;;  %p587_p2 = scmp.lt.s32.totalorder %s581_s17, %s581_s17 }
  0xed   :  { %v435_v1 = vadd.f32 %v434_v63, %v306_v22  ;;  %v471_v2 = vadd.f32 %v470_v62, %v456_v61  ;;  %v464_v22 = vmul.f32 %v313_v55, %v313_v55  ;;  %p588_p3 = por %p587_p2, %p586_p1 }
  0xef   :  { %v472_v3 = vadd.f32 %v471_v2, %v457_v0  ;;  %v436_v4 = vadd.f32 %v435_v1, %v307_v29  ;;  %p589_p4 = pnand %p588_p3, %p582_p0 }
  0xf1   :  { %v437_v7 = vadd.f32 %v436_v4, %v705_v20  ;;  %v473_v8 = vadd.f32 %v472_v3, %v458_v5 }
  0xf3   :  { %v474_v10 = vadd.f32 %v473_v8, %v459_v6  ;;  %v438_v11 = vadd.f32 %v437_v7, %v309_v27  ;;  %v331_v27 = vshrl.u32 %v330_v28, 7 }
  0xf5   :  { %v439_v13 = vadd.f32 %v438_v11, %v310_v50  ;;  %v475_v14 = vadd.f32 %v474_v10, %v460_v9  ;;  %vm486_vm2 = vcmp.eq.s32.totalorder %v331_v27, 0 }
  0xf7   :  { %v476_v15 = vadd.f32 %v475_v14, %v461_v12  ;;  %v440_v16 = vadd.f32 %v439_v13, %v311_v57 }
  0xf9   :  { %v441_v19 = vadd.f32 %v440_v16, %v312_v49  ;;  %v477_v21 = vadd.f32 %v476_v15, %v462_v17 }
  0xfb   :  { %v478_v23 = vadd.f32 %v477_v21, %v463_v18  ;;  %v442_v24 = vadd.f32 %v441_v19, %v313_v55 }
  0xfd   :  { %v443_v25 = vrot.slane %v442_v24, 4  ;;  %v479_v26 = vadd.f32 %v478_v23, %v464_v22 }
  0xff   :  { %v444_v20 = vadd.f32 %v443_v25, %v442_v24  ;;  %v480_v29 = vrot.slane %v479_v26, 4 }
 0x101   :  { %v445_v30 = vrot.slane %v444_v20, 2  ;;  %v481_v31 = vadd.f32 %v480_v29, %v479_v26 }
 0x103   :  { %v446_v32 = vadd.f32 %v445_v30, %v444_v20  ;;  %v482_v33 = vrot.slane %v481_v31, 2 }
 0x105   :  { %v447_v34 = vrot.slane %v446_v32, 1  ;;  %v483_v35 = vadd.f32 %v482_v33, %v481_v31 }
 0x107   :  { %v448_v36 = vadd.f32 %v447_v34, %v446_v32  ;;  %v484_v37 = vrot.slane %v483_v35, 1 }
 0x109   :  { %v487_v38 = vsel %vm486_vm2, %v448_v36, 0.0  ;;  %v485_v39 = vadd.f32 %v484_v37, %v483_v35 }
 0x10a   :  { %488 = vst [vmem:[#allocation3] sm:$0xff] %v487_v38 }
 0x10b   :  { %592 = shalt.err (!%p589_p4)
}
 0x10c   :  { %s593_s20 = scalar_lea.hbm %s783_s4, 128 }
 0x10d   :  { %p594_p5 = scmp.ne.s32.totalorder %s783_s4, %s593_s20  ;;  %p597_p6 = scmp.lt.u32.totalorder %s593_s20, %s783_s4 }
 0x10f   :  { %p599_p7 = pnand %p597_p6, %p594_p5 }
 0x111   :  { %602 = shalt.err (!%p599_p7)
}
 0x112   :  { %502 = dma.vmem_to_hbm [thread:$0]  %s500_s2, 128, %s783_s4, [#allocation4]   ;;  %v489_v40 = vsel %vm486_vm2, %v485_v39, 0.0 }
 0x113   :  { %490 = vst [vmem:[#allocation5] sm:$0xff] %v489_v40  ;;  %s603_s26 = scalar_lea.vmem %s510_s16, 128  ;;  %p608_p9 = scmp.lt.s32.totalorder %s510_s16, %s510_s16 }
 0x114   :  { %p604_p8 = scmp.ne.s32.totalorder %s510_s16, %s603_s26  ;;  %p609_p10 = scmp.lt.s32.totalorder %s603_s26, %s603_s26 }
 0x116   :  { %p610_p11 = por %p609_p10, %p608_p9 }
 0x118   :  { %p611_p12 = pnand %p610_p11, %p604_p8 }
 0x11a   :  { %614 = shalt.err (!%p611_p12)
}
 0x11b   :  { %s615_s29 = scalar_lea.hbm %s784_s5, 128 }
 0x11c   :  { %p616_p13 = scmp.ne.s32.totalorder %s784_s5, %s615_s29  ;;  %p619_p0 = scmp.lt.u32.totalorder %s615_s29, %s784_s5 }
 0x11e   :  { %p621_p1 = pnand %p619_p0, %p616_p13 }
 0x120   :  { %624 = shalt.err (!%p621_p1)
}
 0x121   :  { %512 = dma.vmem_to_hbm [thread:$0]  %s510_s16, 128, %s784_s5, [#allocation6]  }
 0x122   :  { %625 = dma.done.wait [#allocation4], 128  }
 0x123   :  { %626 = vsyncadd [#allocation4], 4294967168 }
 0x124   :  { %627 = dma.done.wait [#allocation6], 128  }
 0x125   :  { %628 = vsyncadd [#allocation6], 4294967168 }
 0x126   :  { %521 = vsyncpa [#allocation4], 1 }
 0x127   :  { %522 = vsyncpa [#allocation6], 1 }

// kernel: tile.51
= control target key start
LH: loop header
LB: loop body
LE: loop exit
PB: predicated region body
PF: predicated region fallthrough
CT: control target
= control target key end

     0   :  { %s22_s0 = inlined_call_operand.vmem [shape: f32[64], index: 0, kind: input, shape index: {}]   ;;  %s23_s1 = inlined_call_operand.vmem [shape: f32[2,64], index: 1, kind: output, shape index: {}]  }
   0x1   :  { %v4_v0 = vld [vmem:[%s22_s0] ss:$0 sm:$0xff] }
   0x2   :  { %5 = vst [vmem:[%s23_s1] sm:$0x3] %v4_v0 }

// kernel: tile.52
= control target key start
LH: loop header
LB: loop body
LE: loop exit
PB: predicated region body
PF: predicated region fallthrough
CT: control target
= control target key end

     0   :  { %vm7_vm0 = vcmask 523264   ;;  %vm13_vm1 = vcmask 1048064   ;;  %s39_s0 = inlined_call_operand.vmem [shape: f32[2,64], index: 0, kind: input, shape index: {}]   ;;  %s40_s1 = inlined_call_operand.vmem [shape: f32[1,128], index: 1, kind: output, shape index: {}]  }
   0x1   :  { %v4_v0 = vld [vmem:[%s39_s0] sm:$0x3]  ;;  %s22_s0 = smov 64  }
   0x2   :  { %5 = vst [vmem:[#allocation1] sm:$0x3] %v4_v0 }
   0x9   :  { %v10_v1 = vld [vmem:[#allocation1 + $0x1] sm:$0x1]   ;;  %v6_v2 = vld [vmem:[#allocation1] sm:$0x1]  }
   0xa   :  { %11 = vrot.lane.b32.xlu0 %v10_v1, %s22_s0  ;;  %8 = vst.msk [vmem:[#allocation0] sm:$0x1] %vm7_vm0, %v6_v2  }
  0x7c   :  { %v12_v3 = vpop.permute.xlu0 %11  }
  0x7d   :  { %14 = vst.msk [vmem:[#allocation0] sm:$0x1] %vm13_vm1, %v12_v3  }
  0x84   :  { %v18_v4 = vld [vmem:[#allocation0] sm:$0x1] }
  0x85   :  { %20 = vst [vmem:[%s40_s1] sm:$0x1] %v18_v4 }

// kernel: generator_forward.30
= control target key start
LH: loop header
LB: loop body
LE: loop exit
PB: predicated region body
PF: predicated region fallthrough
CT: control target
= control target key end

     0   :  { %11 = vsyncpa [#allocation4], 0  ;;  %vm486_vm0 = vcmask 1040384   ;;  %vm389_vm1 = vcmask 146432   ;;  %s2870_s0 = inlined_call_operand.vmem [shape: bf16[512,18], index: 0, kind: input, shape index: {}]   ;;  %s2871_s1 = inlined_call_operand.vmem [shape: bf16[18,128], index: 1, kind: input, shape index: {}]   ;;  %s2872_s2 = inlined_call_operand.vmem [shape: f32[1,128], index: 2, kind: input, shape index: {}]   ;;  %s2873_s3 = inlined_call_operand.vmem [shape: f32[512,128], index: 3, kind: output, shape index: {0}]   ;;  %s2874_s4 = inlined_call_operand.hbm [shape: f32[8,128], index: 4, kind: output, shape index: {1}]   ;;  %s2875_s5 = inlined_call_operand.hbm [shape: f32[8,128], index: 5, kind: output, shape index: {2}]  }
   0x1   :  { %v2103_v0 = vld [vmem:[%s2871_s1] sm:$0xff]   ;;  %v2104_v1 = vld [vmem:[%s2871_s1 + $0x8] ss:$0 sps:$4 sm:$0x11]   ;;  %v2107_v5 = vld [vmem:[%s2870_s0 + $0x10] sm:$0xff]  }
   0x2   :  { %v2105_v2 = vld [vmem:[%s2870_s0] sm:$0xff]   ;;  %2027 = vmatprep.subr.bf16.mxu0 %v2103_v0  ;;  %2095 = vmatprep.subr.bf16.mxu1 %v2103_v0  ;;  %v488_v3 = vsel %vm486_vm0, %v2104_v1, 0  ;;  %v2106_v4 = vld [vmem:[%s2870_s0 + $0x8] sm:$0xff]   ;;  %v2108_v6 = vld [vmem:[%s2870_s0 + $0x18] sm:$0xff]  }
   0x3   :  { %2028 = vmatpush3.bf16.msra.mxu0 %v2103_v0  ;;  %2031 = vmatprep.mubr.msk.bf16.mxu0 %vm389_vm1, %v2105_v2  ;;  %v2109_v7 = vld [vmem:[%s2870_s0 + $0x20] sm:$0xff]   ;;  %v2122_v9 = vld [vmem:[%s2870_s0 + $0x88] sm:$0xff]   ;;  %v2123_v10 = vld [vmem:[%s2870_s0 + $0x90] sm:$0xff]  }
   0x4   :  { %2099 = vmatprep.subr.msk.bf16.mxu0 %vm486_vm0, %v2104_v1  ;;  %2097 = vmatpush3.bf16.msra.mxu1 %v2103_v0  ;;  %v2121_v8 = vld [vmem:[%s2870_s0 + $0x80] sm:$0xff]   ;;  %v2110_v11 = vld [vmem:[%s2870_s0 + $0x28] sm:$0xff]   ;;  %v2111_v12 = vld [vmem:[%s2870_s0 + $0x30] sm:$0xff]  }
   0x5   :  { %2100 = vmatprep.subr.msk.bf16.mxu1 %vm486_vm0, %v2104_v1  ;;  %2063 = vmatprep.mubr.msk.bf16.mxu1 %vm389_vm1, %v2121_v8  ;;  %v2124_v13 = vld [vmem:[%s2870_s0 + $0x98] sm:$0xff]   ;;  %v2125_v14 = vld [vmem:[%s2870_s0 + $0xa0] sm:$0xff]   ;;  %v2126_v17 = vld [vmem:[%s2870_s0 + $0xa8] sm:$0xff]  }
   0x6   :  { %v2112_v15 = vld [vmem:[%s2870_s0 + $0x38] sm:$0xff]   ;;  %v2113_v16 = vld [vmem:[%s2870_s0 + $0x40] sm:$0xff]  }
   0x7   :  { %2030 = vmatpush3.bf16.msra.mxu0 %v488_v3 }
   0x8   :  { %2098 = vmatpush3.bf16.msra.mxu1 %v488_v3 }
   0xa   :  { %2032 = vmatmul.mubr.msk.bf16.vlgmr.msra.gmra.mrb[0].mxu0 %vm389_vm1, %v2106_v4 }
   0xb   :  { %2035 = vmatprep.mubr.msk.bf16.mxu0 %vm389_vm1, %v2107_v5  ;;  %2064 = vmatmul.mubr.msk.bf16.vlgmr.msra.gmra.mrb[0].mxu1 %vm389_vm1, %v2122_v9 }
   0xc   :  { %2067 = vmatprep.mubr.msk.bf16.mxu1 %vm389_vm1, %v2123_v10 }
  0x12   :  { %2036 = vmatmul.mubr.msk.bf16.gmra.mrb[4].mxu0 %vm389_vm1, %v2108_v6 }
  0x13   :  { %2039 = vmatprep.mubr.msk.bf16.mxu0 %vm389_vm1, %v2109_v7  ;;  %2068 = vmatmul.mubr.msk.bf16.gmra.mrb[4].mxu1 %vm389_vm1, %v2124_v13 }
  0x14   :  { %2071 = vmatprep.mubr.msk.bf16.mxu1 %vm389_vm1, %v2125_v14 }
  0x1a   :  { %2040 = vmatmul.mubr.msk.bf16.gmra.mrb[8].mxu0 %vm389_vm1, %v2110_v11 }
  0x1b   :  { %2043 = vmatprep.mubr.msk.bf16.mxu0 %vm389_vm1, %v2111_v12 }
  0x1c   :  { %12 = vsyncpa [#allocation6], 0  ;;  %v2127_v18 = vld [vmem:[%s2870_s0 + $0xb0] sm:$0xff]   ;;  %2072 = vmatmul.mubr.msk.bf16.gmra.mrb[8].mxu1 %vm389_vm1, %v2126_v17  ;;  %v2114_v19 = vld [vmem:[%s2870_s0 + $0x48] sm:$0xff]   ;;  %s2187_s30 = smov [#allocation5]  }
  0x1d   :  { %2075 = vmatprep.mubr.msk.bf16.mxu1 %vm389_vm1, %v2127_v18  ;;  %v2115_v20 = vld [vmem:[%s2870_s0 + $0x50] sm:$0xff]   ;;  %v2128_v21 = vld [vmem:[%s2870_s0 + $0xb8] sm:$0xff]   ;;  %v2129_v22 = vld [vmem:[%s2870_s0 + $0xc0] sm:$0xff]   ;;  %s1912_s6 = sshll.u32 %s2187_s30, 4  ;;  %s1913_s6 = int_to_ptr.vmem [resolvable:$true] %s1912_s6 }
  0x1e   :  { %v2116_v23 = vld [vmem:[%s2870_s0 + $0x58] sm:$0xff]   ;;  %v2117_v24 = vld [vmem:[%s2870_s0 + $0x60] sm:$0xff]   ;;  %v2130_v25 = vld [vmem:[%s2870_s0 + $0xc8] sm:$0xff]  }
  0x1f   :  { %v2131_v26 = vld [vmem:[%s2870_s0 + $0xd0] sm:$0xff]   ;;  %v2118_v27 = vld [vmem:[%s2870_s0 + $0x68] sm:$0xff]   ;;  %v2132_v29 = vld [vmem:[%s2870_s0 + $0xd8] sm:$0xff]  }
  0x20   :  { %v2119_v28 = vld [vmem:[%s2870_s0 + $0x70] sm:$0xff]   ;;  %v2133_v30 = vld [vmem:[%s2870_s0 + $0xe0] sm:$0xff]   ;;  %v2120_v31 = vld [vmem:[%s2870_s0 + $0x78] sm:$0xff]  }
  0x21   :  { %v2134_v32 = vld [vmem:[%s2870_s0 + $0xe8] sm:$0xff]   ;;  %v2135_v33 = vld [vmem:[%s2870_s0 + $0xf0] sm:$0xff]   ;;  %v2136_v34 = vld [vmem:[%s2870_s0 + $0xf8] sm:$0xff]  }
  0x22   :  { %2044 = vmatmul.mubr.msk.bf16.gmra.mrb[12].mxu0 %vm389_vm1, %v2112_v15  ;;  %v2355_v35 = vld [vmem:[%s2872_s2] ss:$0 sm:$0xff] }
  0x23   :  { %2047 = vmatprep.mubr.msk.bf16.mxu0 %vm389_vm1, %v2113_v16 }
  0x24   :  { %2076 = vmatmul.mubr.msk.bf16.gmra.mrb[12].mxu1 %vm389_vm1, %v2128_v21 }
  0x25   :  { %2079 = vmatprep.mubr.msk.bf16.mxu1 %vm389_vm1, %v2129_v22 }
  0x2a   :  { %2048 = vmatmul.mubr.msk.bf16.gmra.mrb[16].mxu0 %vm389_vm1, %v2114_v19 }
  0x2b   :  { %2051 = vmatprep.mubr.msk.bf16.mxu0 %vm389_vm1, %v2115_v20 }
  0x2c   :  { %2080 = vmatmul.mubr.msk.bf16.gmra.mrb[16].mxu1 %vm389_vm1, %v2130_v25 }
  0x2d   :  { %2083 = vmatprep.mubr.msk.bf16.mxu1 %vm389_vm1, %v2131_v26 }
  0x32   :  { %2052 = vmatmul.mubr.msk.bf16.gmra.mrb[20].mxu0 %vm389_vm1, %v2116_v23 }
  0x33   :  { %2055 = vmatprep.mubr.msk.bf16.mxu0 %vm389_vm1, %v2117_v24 }
  0x34   :  { %2084 = vmatmul.mubr.msk.bf16.gmra.mrb[20].mxu1 %vm389_vm1, %v2132_v29 }
  0x35   :  { %2087 = vmatprep.mubr.msk.bf16.mxu1 %vm389_vm1, %v2133_v30 }
  0x3a   :  { %2056 = vmatmul.mubr.msk.bf16.gmra.mrb[24].mxu0 %vm389_vm1, %v2118_v27 }
  0x3b   :  { %2059 = vmatprep.mubr.msk.bf16.mxu0 %vm389_vm1, %v2119_v28 }
  0x3c   :  { %2088 = vmatmul.mubr.msk.bf16.gmra.mrb[24].mxu1 %vm389_vm1, %v2134_v32 }
  0x3d   :  { %2091 = vmatprep.mubr.msk.bf16.mxu1 %vm389_vm1, %v2135_v33 }
  0x42   :  { %2060 = vmatmul.mubr.msk.bf16.gmra.mrb[28].mxu0 %vm389_vm1, %v2120_v31 }
  0x44   :  { %2092 = vmatmul.mubr.msk.bf16.gmra.mrb[28].mxu1 %vm389_vm1, %v2136_v34 }
  0xdd   :  { %v2033_v36 = vpop.f32.mrb[0].mxu0 }
  0xde   :  { %v983_v37 = vadd.f32 %v2033_v36, %v2355_v35  ;;  %v524_v38 = vpop.f32.mrb[1].mxu0  ;;  %v2065_v2 = vpop.f32.mrb[0].mxu1 }
  0xdf   :  { %v981_v39 = vadd.f32 %v2355_v35, %v524_v38  ;;  %v2034_v40 = vpop.f32.mrb[2].mxu0  ;;  %v652_v6 = vpop.f32.mrb[1].mxu1  ;;  %v1015_v10 = vadd.f32 %v2065_v2, %v2355_v35 }
  0xe0   :  { %vm1047_vm2 = vcmp.gt.f32.partialorder %v983_v37, 0.0  ;;  %v1111_v41 = vmul.f32 0.2, %v983_v37  ;;  %v984_v42 = vadd.f32 %v2034_v40, %v2355_v35  ;;  %v527_v43 = vpop.f32.mrb[3].mxu0  ;;  %v2378_v11 = vpop.f32.mrb[2].mxu1  ;;  %v1013_v29 = vadd.f32 %v2355_v35, %v652_v6 }
  0xe1   :  { %vm1045_vm3 = vcmp.gt.f32.partialorder %v981_v39, 0.0  ;;  %v1109_v44 = vmul.f32 0.2, %v981_v39  ;;  %v982_v45 = vadd.f32 %v2355_v35, %v527_v43  ;;  %v2383_v14 = vpop.f32.mrb[3].mxu1  ;;  %vm1079_vm10 = vcmp.gt.f32.partialorder %v1015_v10, 0.0 }
  0xe2   :  { %v1175_v46 = vsel %vm1047_vm2, %v983_v37, %v1111_v41  ;;  %vm1048_vm4 = vcmp.gt.f32.partialorder %v984_v42, 0.0  ;;  %v1112_v47 = vmul.f32 0.2, %v984_v42  ;;  %v1143_v21 = vmul.f32 0.2, %v1015_v10 }
  0xe3   :  { %1239 = vst [vmem:[%s2873_s3 + $0x10] sm:$0xff] %v1175_v46  ;;  %v1173_v48 = vsel %vm1045_vm3, %v981_v39, %v1109_v44  ;;  %vm1046_vm5 = vcmp.gt.f32.partialorder %v982_v45, 0.0  ;;  %v1110_v49 = vmul.f32 0.2, %v982_v45  ;;  %v1758_v58 = vmul.f32 %v1175_v46, %v1175_v46 }
  0xe4   :  { %1237 = vst [vmem:[%s2873_s3] sm:$0xff] %v1173_v48  ;;  %v1176_v50 = vsel %vm1048_vm4, %v984_v42, %v1112_v47  ;;  %v1756_v53 = vmul.f32 %v1173_v48, %v1173_v48  ;;  %v2393_v28 = vsel %vm1079_vm10, %v1015_v10, %v1143_v21  ;;  %vm1077_vm15 = vcmp.gt.f32.partialorder %v1013_v29, 0.0 }
  0xe5   :  { %1240 = vst [vmem:[%s2873_s3 + $0x18] sm:$0xff] %v1176_v50  ;;  %v1174_v51 = vsel %vm1046_vm5, %v982_v45, %v1110_v49  ;;  %v2037_v52 = vpop.f32.mrb[4].mxu0  ;;  %v1759_v59 = vmul.f32 %v1176_v50, %v1176_v50  ;;  %1271 = vst [vmem:[%s2873_s3 + $0x110] sm:$0xff] %v2393_v28 }
  0xe6   :  { %1238 = vst [vmem:[%s2873_s3 + $0x8] sm:$0xff] %v1174_v51  ;;  %v1687_v54 = vadd.f32 %v1174_v51, %v1173_v48  ;;  %v1757_v55 = vmul.f32 %v1174_v51, %v1174_v51  ;;  %v987_v56 = vadd.f32 %v2037_v52, %v2355_v35  ;;  %v540_v57 = vpop.f32.mrb[5].mxu0  ;;  %v2403_v34 = vpop.f32.mrb[4].mxu1 }
  0xe7   :  { %v985_v60 = vadd.f32 %v2355_v35, %v540_v57  ;;  %v2038_v61 = vpop.f32.mrb[6].mxu0  ;;  %v2407_v39 = vpop.f32.mrb[5].mxu1 }
  0xe8   :  { %v1688_v62 = vadd.f32 %v1687_v54, %v1175_v46  ;;  %v1820_v63 = vadd.f32 %v1757_v55, %v1756_v53  ;;  %vm1051_vm6 = vcmp.gt.f32.partialorder %v987_v56, 0.0  ;;  %v1115_v0 = vmul.f32 0.2, %v987_v56  ;;  %v543_v1 = vpop.f32.mrb[7].mxu0  ;;  %v2409_v44 = vpop.f32.mrb[6].mxu1 }
  0xe9   :  { %vm1049_vm7 = vcmp.gt.f32.partialorder %v985_v60, 0.0  ;;  %v1113_v3 = vmul.f32 0.2, %v985_v60  ;;  %v988_v4 = vadd.f32 %v2038_v61, %v2355_v35  ;;  %v986_v5 = vadd.f32 %v2355_v35, %v543_v1  ;;  %v2414_v48 = vpop.f32.mrb[7].mxu1 }
  0xea   :  { %v1821_v7 = vadd.f32 %v1820_v63, %v1758_v58  ;;  %v1179_v8 = vsel %vm1051_vm6, %v987_v56, %v1115_v0  ;;  %v1689_v9 = vadd.f32 %v1688_v62, %v1176_v50  ;;  %v1141_v55 = vmul.f32 0.2, %v1013_v29 }
  0xeb   :  { %1243 = vst [vmem:[%s2873_s3 + $0x30] sm:$0xff] %v1179_v8  ;;  %v1177_v12 = vsel %vm1049_vm7, %v985_v60, %v1113_v3  ;;  %vm1052_vm8 = vcmp.gt.f32.partialorder %v988_v4, 0.0  ;;  %v1116_v13 = vmul.f32 0.2, %v988_v4  ;;  %vm1050_vm9 = vcmp.gt.f32.partialorder %v986_v5, 0.0 }
  0xec   :  { %1241 = vst [vmem:[%s2873_s3 + $0x20] sm:$0xff] %v1177_v12  ;;  %v1690_v15 = vadd.f32 %v1689_v9, %v1177_v12  ;;  %v1760_v16 = vmul.f32 %v1177_v12, %v1177_v12  ;;  %v1822_v17 = vadd.f32 %v1821_v7, %v1759_v59  ;;  %v1114_v19 = vmul.f32 0.2, %v986_v5 }
  0xed   :  { %v1180_v18 = vsel %vm1052_vm8, %v988_v4, %v1116_v13  ;;  %v2041_v20 = vpop.f32.mrb[8].mxu0  ;;  %v1762_v40 = vmul.f32 %v1179_v8, %v1179_v8  ;;  %v1016_v60 = vadd.f32 %v2378_v11, %v2355_v35  ;;  %v2426_v1 = vsel %vm1077_vm15, %v1013_v29, %v1141_v55 }
  0xee   :  { %v1823_v22 = vadd.f32 %v1822_v17, %v1760_v16  ;;  %1244 = vst [vmem:[%s2873_s3 + $0x38] sm:$0xff] %v1180_v18  ;;  %v991_v23 = vadd.f32 %v2041_v20, %v2355_v35  ;;  %v556_v24 = vpop.f32.mrb[9].mxu0  ;;  %v1178_v25 = vsel %vm1050_vm9, %v986_v5, %v1114_v19  ;;  %v1763_v45 = vmul.f32 %v1180_v18, %v1180_v18 }
  0xef   :  { %v989_v26 = vadd.f32 %v2355_v35, %v556_v24  ;;  %v2042_v27 = vpop.f32.mrb[10].mxu0  ;;  %1242 = vst [vmem:[%s2873_s3 + $0x28] sm:$0xff] %v1178_v25  ;;  %v1691_v30 = vadd.f32 %v1690_v15, %v1178_v25  ;;  %v1761_v31 = vmul.f32 %v1178_v25, %v1178_v25  ;;  %1269 = vst [vmem:[%s2873_s3 + $0x100] sm:$0xff] %v2426_v1  ;;  %v2435_v6 = vpop.f32.mrb[8].mxu1  ;;  %vm1080_vm3 = vcmp.gt.f32.partialorder %v1016_v60, 0.0 }
  0xf0   :  { %vm1055_vm11 = vcmp.gt.f32.partialorder %v991_v23, 0.0  ;;  %v1119_v32 = vmul.f32 0.2, %v991_v23  ;;  %v559_v33 = vpop.f32.mrb[11].mxu0  ;;  %v992_v37 = vadd.f32 %v2042_v27, %v2355_v35  ;;  %v2438_v10 = vpop.f32.mrb[9].mxu1  ;;  %v1014_v55 = vadd.f32 %v2355_v35, %v2383_v14 }
  0xf1   :  { %vm1053_vm12 = vcmp.gt.f32.partialorder %v989_v26, 0.0  ;;  %v1117_v36 = vmul.f32 0.2, %v989_v26  ;;  %v990_v38 = vadd.f32 %v2355_v35, %v559_v33  ;;  %v1692_v41 = vadd.f32 %v1691_v30, %v1179_v8  ;;  %v2441_v16 = vpop.f32.mrb[10].mxu1 }
  0xf2   :  { %v1824_v42 = vadd.f32 %v1823_v22, %v1761_v31  ;;  %v1183_v43 = vsel %vm1055_vm11, %v991_v23, %v1119_v32  ;;  %vm1056_vm13 = vcmp.gt.f32.partialorder %v992_v37, 0.0  ;;  %v1120_v47 = vmul.f32 0.2, %v992_v37  ;;  %v2443_v20 = vpop.f32.mrb[11].mxu1 }
  0xf3   :  { %1247 = vst [vmem:[%s2873_s3 + $0x50] sm:$0xff] %v1183_v43  ;;  %v1181_v46 = vsel %vm1053_vm12, %v989_v26, %v1117_v36  ;;  %v1693_v50 = vadd.f32 %v1692_v41, %v1180_v18  ;;  %vm1054_vm14 = vcmp.gt.f32.partialorder %v990_v38, 0.0  ;;  %v1118_v53 = vmul.f32 0.2, %v990_v38 }
  0xf4   :  { %v1825_v49 = vadd.f32 %v1824_v42, %v1762_v40  ;;  %1245 = vst [vmem:[%s2873_s3 + $0x40] sm:$0xff] %v1181_v46  ;;  %v1764_v51 = vmul.f32 %v1181_v46, %v1181_v46  ;;  %v1184_v52 = vsel %vm1056_vm13, %v992_v37, %v1120_v47  ;;  %v1766_v61 = vmul.f32 %v1183_v43, %v1183_v43 }
  0xf5   :  { %v2045_v54 = vpop.f32.mrb[12].mxu0  ;;  %v1694_v56 = vadd.f32 %v1693_v50, %v1181_v46  ;;  %1248 = vst [vmem:[%s2873_s3 + $0x58] sm:$0xff] %v1184_v52  ;;  %v1182_v62 = vsel %vm1054_vm14, %v990_v38, %v1118_v53  ;;  %v1767_v11 = vmul.f32 %v1184_v52, %v1184_v52  ;;  %v1144_v27 = vmul.f32 0.2, %v1016_v60 }
  0xf6   :  { %v1826_v57 = vadd.f32 %v1825_v49, %v1763_v45  ;;  %v995_v58 = vadd.f32 %v2045_v54, %v2355_v35  ;;  %v572_v59 = vpop.f32.mrb[13].mxu0  ;;  %1246 = vst [vmem:[%s2873_s3 + $0x48] sm:$0xff] %v1182_v62  ;;  %v1765_v4 = vmul.f32 %v1182_v62, %v1182_v62  ;;  %vm1078_vm9 = vcmp.gt.f32.partialorder %v1014_v55, 0.0 }
  0xf7   :  { %v993_v63 = vadd.f32 %v2355_v35, %v572_v59  ;;  %v2046_v0 = vpop.f32.mrb[14].mxu0  ;;  %v1695_v3 = vadd.f32 %v1694_v56, %v1182_v62  ;;  %v2456_v40 = vsel %vm1080_vm3, %v1016_v60, %v1144_v27  ;;  %v2465_v46 = vpop.f32.mrb[12].mxu1 }
  0xf8   :  { %v1827_v2 = vadd.f32 %v1826_v57, %v1764_v51  ;;  %vm1059_vm0 = vcmp.gt.f32.partialorder %v995_v58, 0.0  ;;  %v575_v5 = vpop.f32.mrb[15].mxu0  ;;  %v1123_v7 = vmul.f32 0.2, %v995_v58  ;;  %v996_v9 = vadd.f32 %v2046_v0, %v2355_v35  ;;  %1272 = vst [vmem:[%s2873_s3 + $0x118] sm:$0xff] %v2456_v40  ;;  %v2468_v51 = vpop.f32.mrb[13].mxu1 }
  0xf9   :  { %vm1057_vm1 = vcmp.gt.f32.partialorder %v993_v63, 0.0  ;;  %v1121_v8 = vmul.f32 0.2, %v993_v63  ;;  %v1696_v12 = vadd.f32 %v1695_v3, %v1183_v43  ;;  %v994_v15 = vadd.f32 %v2355_v35, %v575_v5  ;;  %v2473_v56 = vpop.f32.mrb[14].mxu1 }
  0xfa   :  { %v1828_v13 = vadd.f32 %v1827_v2, %v1765_v4  ;;  %v1187_v17 = vsel %vm1059_vm0, %v995_v58, %v1123_v7  ;;  %vm1060_vm2 = vcmp.gt.f32.partialorder %v996_v9, 0.0  ;;  %v1124_v19 = vmul.f32 0.2, %v996_v9  ;;  %v2475_v60 = vpop.f32.mrb[15].mxu1 }
  0xfb   :  { %v1185_v18 = vsel %vm1057_vm1, %v993_v63, %v1121_v8  ;;  %1251 = vst [vmem:[%s2873_s3 + $0x70] sm:$0xff] %v1187_v17  ;;  %v1697_v22 = vadd.f32 %v1696_v12, %v1184_v52  ;;  %vm1058_vm4 = vcmp.gt.f32.partialorder %v994_v15, 0.0  ;;  %v1122_v25 = vmul.f32 0.2, %v994_v15 }
  0xfc   :  { %v1829_v21 = vadd.f32 %v1828_v13, %v1766_v61  ;;  %1249 = vst [vmem:[%s2873_s3 + $0x60] sm:$0xff] %v1185_v18  ;;  %v1768_v23 = vmul.f32 %v1185_v18, %v1185_v18  ;;  %v1188_v24 = vsel %vm1060_vm2, %v996_v9, %v1124_v19  ;;  %v1770_v33 = vmul.f32 %v1187_v17, %v1187_v17 }
  0xfd   :  { %v2049_v26 = vpop.f32.mrb[16].mxu0  ;;  %v1698_v29 = vadd.f32 %v1697_v22, %v1185_v18  ;;  %1252 = vst [vmem:[%s2873_s3 + $0x78] sm:$0xff] %v1188_v24  ;;  %v1186_v36 = vsel %vm1058_vm4, %v994_v15, %v1122_v25  ;;  %v1771_v61 = vmul.f32 %v1188_v24, %v1188_v24  ;;  %v1142_v15 = vmul.f32 0.2, %v1014_v55 }
  0xfe   :  { %v1830_v30 = vadd.f32 %v1829_v21, %v1767_v11  ;;  %v999_v31 = vadd.f32 %v2049_v26, %v2355_v35  ;;  %v588_v32 = vpop.f32.mrb[17].mxu0  ;;  %1250 = vst [vmem:[%s2873_s3 + $0x68] sm:$0xff] %v1186_v36  ;;  %v1769_v43 = vmul.f32 %v1186_v36, %v1186_v36 }
  0xff   :  { %v997_v37 = vadd.f32 %v2355_v35, %v588_v32  ;;  %v2050_v38 = vpop.f32.mrb[18].mxu0  ;;  %v1699_v42 = vadd.f32 %v1698_v29, %v1186_v36 }
 0x100   :  { %v1831_v41 = vadd.f32 %v1830_v30, %v1768_v23  ;;  %vm1063_vm5 = vcmp.gt.f32.partialorder %v999_v31, 0.0  ;;  %v591_v45 = vpop.f32.mrb[19].mxu0  ;;  %v1127_v47 = vmul.f32 0.2, %v999_v31  ;;  %v1000_v50 = vadd.f32 %v2050_v38, %v2355_v35  ;;  %v2493_v23 = vpop.f32.mrb[16].mxu1 }
 0x101   :  { %vm1061_vm6 = vcmp.gt.f32.partialorder %v997_v37, 0.0  ;;  %v1125_v49 = vmul.f32 0.2, %v997_v37  ;;  %v1700_v52 = vadd.f32 %v1699_v42, %v1187_v17  ;;  %v998_v54 = vadd.f32 %v2355_v35, %v591_v45  ;;  %v2496_v27 = vpop.f32.mrb[17].mxu1 }
 0x102   :  { %v1832_v53 = vadd.f32 %v1831_v41, %v1769_v43  ;;  %v1191_v57 = vsel %vm1063_vm5, %v999_v31, %v1127_v47  ;;  %vm1064_vm7 = vcmp.gt.f32.partialorder %v1000_v50, 0.0  ;;  %v1128_v59 = vmul.f32 0.2, %v1000_v50  ;;  %v2502_v32 = vpop.f32.mrb[18].mxu1 }
 0x103   :  { %v1189_v58 = vsel %vm1061_vm6, %v997_v37, %v1125_v49  ;;  %1255 = vst [vmem:[%s2873_s3 + $0x90] sm:$0xff] %v1191_v57  ;;  %v1701_v63 = vadd.f32 %v1700_v52, %v1188_v24  ;;  %v1774_v0 = vmul.f32 %v1191_v57, %v1191_v57  ;;  %vm1062_vm8 = vcmp.gt.f32.partialorder %v998_v54, 0.0  ;;  %v2508_v38 = vpop.f32.mrb[19].mxu1 }
 0x104   :  { %v1833_v62 = vadd.f32 %v1832_v53, %v1770_v33  ;;  %1253 = vst [vmem:[%s2873_s3 + $0x80] sm:$0xff] %v1189_v58  ;;  %v1772_v14 = vmul.f32 %v1189_v58, %v1189_v58  ;;  %v1192_v2 = vsel %vm1064_vm7, %v1000_v50, %v1128_v59  ;;  %v1126_v3 = vmul.f32 0.2, %v998_v54 }
 0x105   :  { %v2053_v4 = vpop.f32.mrb[20].mxu0  ;;  %v1702_v5 = vadd.f32 %v1701_v63, %v1189_v58  ;;  %1256 = vst [vmem:[%s2873_s3 + $0x98] sm:$0xff] %v1192_v2  ;;  %v1019_v17 = vadd.f32 %v2403_v34, %v2355_v35  ;;  %v2500_v31 = vsel %vm1078_vm9, %v1014_v55, %v1142_v15  ;;  %v1775_v41 = vmul.f32 %v1192_v2, %v1192_v2 }
 0x106   :  { %v1834_v7 = vadd.f32 %v1833_v62, %v1771_v61  ;;  %v1003_v8 = vadd.f32 %v2053_v4, %v2355_v35  ;;  %v604_v9 = vpop.f32.mrb[21].mxu0  ;;  %v1190_v11 = vsel %vm1062_vm8, %v998_v54, %v1126_v3  ;;  %1270 = vst [vmem:[%s2873_s3 + $0x108] sm:$0xff] %v2500_v31 }
 0x107   :  { %v1001_v12 = vadd.f32 %v2355_v35, %v604_v9  ;;  %v2054_v13 = vpop.f32.mrb[22].mxu0  ;;  %1254 = vst [vmem:[%s2873_s3 + $0x88] sm:$0xff] %v1190_v11  ;;  %v1703_v19 = vadd.f32 %v1702_v5, %v1190_v11  ;;  %v1773_v21 = vmul.f32 %v1190_v11, %v1190_v11  ;;  %vm1083_vm14 = vcmp.gt.f32.partialorder %v1019_v17, 0.0  ;;  %v2524_v3 = vpop.f32.mrb[20].mxu1 }
 0x108   :  { %v1835_v18 = vadd.f32 %v1834_v7, %v1772_v14  ;;  %vm1067_vm10 = vcmp.gt.f32.partialorder %v1003_v8, 0.0  ;;  %v607_v22 = vpop.f32.mrb[23].mxu0  ;;  %v1131_v24 = vmul.f32 0.2, %v1003_v8  ;;  %v1004_v26 = vadd.f32 %v2054_v13, %v2355_v35 }
 0x109   :  { %vm1065_vm11 = vcmp.gt.f32.partialorder %v1001_v12, 0.0  ;;  %v1129_v25 = vmul.f32 0.2, %v1001_v12  ;;  %v1704_v29 = vadd.f32 %v1703_v19, %v1191_v57  ;;  %v1002_v30 = vadd.f32 %v2355_v35, %v607_v22 }
 0x10a   :  { %v1836_v34 = vadd.f32 %v1835_v18, %v1773_v21  ;;  %v1195_v33 = vsel %vm1067_vm10, %v1003_v8, %v1131_v24  ;;  %vm1068_vm12 = vcmp.gt.f32.partialorder %v1004_v26, 0.0  ;;  %v1132_v37 = vmul.f32 0.2, %v1004_v26  ;;  %v2527_v8 = vpop.f32.mrb[21].mxu1 }
 0x10b   :  { %v1193_v36 = vsel %vm1065_vm11, %v1001_v12, %v1129_v25  ;;  %1259 = vst [vmem:[%s2873_s3 + $0xb0] sm:$0xff] %v1195_v33  ;;  %v1705_v43 = vadd.f32 %v1704_v29, %v1192_v2  ;;  %vm1066_vm13 = vcmp.gt.f32.partialorder %v1002_v30, 0.0  ;;  %v1130_v49 = vmul.f32 0.2, %v1002_v30  ;;  %v2533_v15 = vpop.f32.mrb[22].mxu1 }
 0x10c   :  { %v1837_v42 = vadd.f32 %v1836_v34, %v1774_v0  ;;  %1257 = vst [vmem:[%s2873_s3 + $0xa0] sm:$0xff] %v1193_v36  ;;  %v1776_v45 = vmul.f32 %v1193_v36, %v1193_v36  ;;  %v1196_v47 = vsel %vm1068_vm12, %v1004_v26, %v1132_v37  ;;  %v1778_v52 = vmul.f32 %v1195_v33, %v1195_v33  ;;  %v2539_v22 = vpop.f32.mrb[23].mxu1 }
 0x10d   :  { %v2057_v50 = vpop.f32.mrb[24].mxu0  ;;  %v1706_v53 = vadd.f32 %v1705_v43, %v1193_v36  ;;  %1260 = vst [vmem:[%s2873_s3 + $0xb8] sm:$0xff] %v1196_v47  ;;  %v1194_v58 = vsel %vm1066_vm13, %v1002_v30, %v1130_v49  ;;  %v1147_v62 = vmul.f32 0.2, %v1019_v17  ;;  %v1779_v24 = vmul.f32 %v1196_v47, %v1196_v47 }
 0x10e   :  { %v1838_v54 = vadd.f32 %v1837_v42, %v1775_v41  ;;  %v1007_v55 = vadd.f32 %v2057_v50, %v2355_v35  ;;  %v620_v57 = vpop.f32.mrb[25].mxu0  ;;  %1258 = vst [vmem:[%s2873_s3 + $0xa8] sm:$0xff] %v1194_v58  ;;  %v1777_v0 = vmul.f32 %v1194_v58, %v1194_v58  ;;  %v1017_v50 = vadd.f32 %v2355_v35, %v2407_v39 }
 0x10f   :  { %v1005_v59 = vadd.f32 %v2355_v35, %v620_v57  ;;  %v2058_v61 = vpop.f32.mrb[26].mxu0  ;;  %v1707_v14 = vadd.f32 %v1706_v53, %v1194_v58  ;;  %v2531_v13 = vsel %vm1083_vm14, %v1019_v17, %v1147_v62  ;;  %v2557_v57 = vpop.f32.mrb[24].mxu1 }
 0x110   :  { %v1839_v63 = vadd.f32 %v1838_v54, %v1776_v45  ;;  %vm1071_vm15 = vcmp.gt.f32.partialorder %v1007_v55, 0.0  ;;  %v623_v2 = vpop.f32.mrb[27].mxu0  ;;  %v1135_v4 = vmul.f32 0.2, %v1007_v55  ;;  %v1008_v7 = vadd.f32 %v2058_v61, %v2355_v35  ;;  %1275 = vst [vmem:[%s2873_s3 + $0x130] sm:$0xff] %v2531_v13  ;;  %v2560_v62 = vpop.f32.mrb[25].mxu1 }
 0x111   :  { %vm1069_vm0 = vcmp.gt.f32.partialorder %v1005_v59, 0.0  ;;  %v1133_v5 = vmul.f32 0.2, %v1005_v59  ;;  %v1708_v9 = vadd.f32 %v1707_v14, %v1195_v33  ;;  %v1006_v12 = vadd.f32 %v2355_v35, %v623_v2  ;;  %v2565_v2 = vpop.f32.mrb[26].mxu1 }
 0x112   :  { %v1840_v11 = vadd.f32 %v1839_v63, %v1777_v0  ;;  %v1199_v18 = vsel %vm1071_vm15, %v1007_v55, %v1135_v4  ;;  %vm1072_vm1 = vcmp.gt.f32.partialorder %v1008_v7, 0.0  ;;  %v1136_v21 = vmul.f32 0.2, %v1008_v7 }
 0x113   :  { %v1197_v19 = vsel %vm1069_vm0, %v1005_v59, %v1133_v5  ;;  %1263 = vst [vmem:[%s2873_s3 + $0xd0] sm:$0xff] %v1199_v18  ;;  %v1709_v17 = vadd.f32 %v1708_v9, %v1196_v47  ;;  %vm1070_vm2 = vcmp.gt.f32.partialorder %v1006_v12, 0.0  ;;  %v1134_v34 = vmul.f32 0.2, %v1006_v12  ;;  %v2567_v9 = vpop.f32.mrb[27].mxu1 }
 0x114   :  { %v1841_v25 = vadd.f32 %v1840_v11, %v1778_v52  ;;  %1261 = vst [vmem:[%s2873_s3 + $0xc0] sm:$0xff] %v1197_v19  ;;  %v1780_v26 = vmul.f32 %v1197_v19, %v1197_v19  ;;  %v1200_v29 = vsel %vm1072_vm1, %v1008_v7, %v1136_v21  ;;  %v1782_v33 = vmul.f32 %v1199_v18, %v1199_v18 }
 0x115   :  { %v2061_v30 = vpop.f32.mrb[28].mxu0  ;;  %v1710_v36 = vadd.f32 %v1709_v17, %v1197_v19  ;;  %1264 = vst [vmem:[%s2873_s3 + $0xd8] sm:$0xff] %v1200_v29  ;;  %v1783_v43 = vmul.f32 %v1200_v29, %v1200_v29  ;;  %v1198_v45 = vsel %vm1070_vm2, %v1006_v12, %v1134_v34  ;;  %v1020_v0 = vadd.f32 %v2409_v44, %v2355_v35 }
 0x116   :  { %v1842_v37 = vadd.f32 %v1841_v25, %v1779_v24  ;;  %v1011_v41 = vadd.f32 %v2061_v30, %v2355_v35  ;;  %v636_v42 = vpop.f32.mrb[29].mxu0  ;;  %1262 = vst [vmem:[%s2873_s3 + $0xc8] sm:$0xff] %v1198_v45  ;;  %v1781_v54 = vmul.f32 %v1198_v45, %v1198_v45  ;;  %vm1081_vm6 = vcmp.gt.f32.partialorder %v1017_v50, 0.0 }
 0x117   :  { %v1009_v49 = vadd.f32 %v2355_v35, %v636_v42  ;;  %v2062_v47 = vpop.f32.mrb[30].mxu0  ;;  %v1711_v53 = vadd.f32 %v1710_v36, %v1198_v45  ;;  %v1145_v21 = vmul.f32 0.2, %v1017_v50  ;;  %vm1084_vm8 = vcmp.gt.f32.partialorder %v1020_v0, 0.0 }
 0x118   :  { %v1843_v52 = vadd.f32 %v1842_v37, %v1780_v26  ;;  %vm1075_vm3 = vcmp.gt.f32.partialorder %v1011_v41, 0.0  ;;  %v639_v55 = vpop.f32.mrb[31].mxu0  ;;  %v1139_v58 = vmul.f32 0.2, %v1011_v41  ;;  %v1012_v61 = vadd.f32 %v2062_v47, %v2355_v35  ;;  %v2589_v37 = vpop.f32.mrb[28].mxu1 }
 0x119   :  { %vm1073_vm4 = vcmp.gt.f32.partialorder %v1009_v49, 0.0  ;;  %v1137_v59 = vmul.f32 0.2, %v1009_v49  ;;  %v1712_v63 = vadd.f32 %v1711_v53, %v1199_v18  ;;  %v1010_v14 = vadd.f32 %v2355_v35, %v639_v55 }
 0x11a   :  { %v1844_v39 = vadd.f32 %v1843_v52, %v1781_v54  ;;  %v1203_v4 = vsel %vm1075_vm3, %v1011_v41, %v1139_v58  ;;  %vm1076_vm5 = vcmp.gt.f32.partialorder %v1012_v61, 0.0  ;;  %v1140_v7 = vmul.f32 0.2, %v1012_v61 }
 0x11b   :  { %v1201_v5 = vsel %vm1073_vm4, %v1009_v49, %v1137_v59  ;;  %1267 = vst [vmem:[%s2873_s3 + $0xf0] sm:$0xff] %v1203_v4  ;;  %v1713_v12 = vadd.f32 %v1712_v63, %v1200_v29  ;;  %vm1074_vm7 = vcmp.gt.f32.partialorder %v1010_v14, 0.0  ;;  %v1138_v19 = vmul.f32 0.2, %v1010_v14 }
 0x11c   :  { %v1845_v11 = vadd.f32 %v1844_v39, %v1782_v33  ;;  %1265 = vst [vmem:[%s2873_s3 + $0xe0] sm:$0xff] %v1201_v5  ;;  %v1784_v18 = vmul.f32 %v1201_v5, %v1201_v5  ;;  %v1204_v44 = vsel %vm1076_vm5, %v1012_v61, %v1140_v7  ;;  %v2578_v26 = vsel %vm1081_vm6, %v1017_v50, %v1145_v21 }
 0x11d   :  { %v1714_v24 = vadd.f32 %v1713_v12, %v1201_v5  ;;  %1268 = vst [vmem:[%s2873_s3 + $0xf8] sm:$0xff] %v1204_v44  ;;  %v1202_v17 = vsel %vm1074_vm7, %v1010_v14, %v1138_v19  ;;  %v1148_v34 = vmul.f32 0.2, %v1020_v0  ;;  %v1018_v29 = vadd.f32 %v2355_v35, %v2414_v48  ;;  %1273 = vst [vmem:[%s2873_s3 + $0x120] sm:$0xff] %v2578_v26 }
 0x11e   :  { %v1846_v25 = vadd.f32 %v1845_v11, %v1783_v43  ;;  %1266 = vst [vmem:[%s2873_s3 + $0xe8] sm:$0xff] %v1202_v17  ;;  %v1785_v36 = vmul.f32 %v1202_v17, %v1202_v17  ;;  %v1023_v48 = vadd.f32 %v2435_v6, %v2355_v35  ;;  %v2595_v43 = vpop.f32.mrb[29].mxu1  ;;  %v1786_v45 = vmul.f32 %v1203_v4, %v1203_v4 }
 0x11f   :  { %v1715_v33 = vadd.f32 %v1714_v24, %v1202_v17  ;;  %v2591_v41 = vsel %vm1084_vm8, %v1020_v0, %v1148_v34  ;;  %vm1082_vm9 = vcmp.gt.f32.partialorder %v1018_v29, 0.0  ;;  %v1146_v42 = vmul.f32 0.2, %v1018_v29  ;;  %v2603_v52 = vpop.f32.mrb[30].mxu1 }
 0x120   :  { %v1847_v30 = vadd.f32 %v1846_v25, %v1784_v18  ;;  %1276 = vst [vmem:[%s2873_s3 + $0x138] sm:$0xff] %v2591_v41  ;;  %v1021_v50 = vadd.f32 %v2355_v35, %v2438_v10  ;;  %vm1087_vm10 = vcmp.gt.f32.partialorder %v1023_v48, 0.0  ;;  %v1151_v54 = vmul.f32 0.2, %v1023_v48  ;;  %v2607_v55 = vpop.f32.mrb[31].mxu1 }
 0x121   :  { %v1716_v49 = vadd.f32 %v1715_v33, %v1203_v4  ;;  %v1210_v53 = vsel %vm1082_vm9, %v1018_v29, %v1146_v42  ;;  %v1024_v6 = vadd.f32 %v2441_v16, %v2355_v35  ;;  %v1787_v58 = vmul.f32 %v1204_v44, %v1204_v44 }
 0x122   :  { %v1848_v47 = vadd.f32 %v1847_v30, %v1785_v36  ;;  %1274 = vst [vmem:[%s2873_s3 + $0x128] sm:$0xff] %v1210_v53  ;;  %vm1085_vm11 = vcmp.gt.f32.partialorder %v1021_v50, 0.0  ;;  %v2612_v63 = vsel %vm1087_vm10, %v1023_v48, %v1151_v54  ;;  %v1149_v10 = vmul.f32 0.2, %v1021_v50 }
 0x123   :  { %v1717_v61 = vadd.f32 %v1716_v49, %v1204_v44  ;;  %vm1088_vm12 = vcmp.gt.f32.partialorder %v1024_v6, 0.0  ;;  %v1152_v39 = vmul.f32 0.2, %v1024_v6  ;;  %v1788_v16 = vmul.f32 %v2426_v1, %v2426_v1  ;;  %1279 = vst [vmem:[%s2873_s3 + $0x150] sm:$0xff] %v2612_v63 }
 0x124   :  { %v1849_v59 = vadd.f32 %v1848_v47, %v1786_v45  ;;  %v1022_v4 = vadd.f32 %v2355_v35, %v2443_v20  ;;  %v2623_v5 = vsel %vm1085_vm11, %v1021_v50, %v1149_v10  ;;  %v1027_v11 = vadd.f32 %v2465_v46, %v2355_v35 }
 0x125   :  { %v1718_v14 = vadd.f32 %v1717_v61, %v2426_v1  ;;  %v2625_v7 = vsel %vm1088_vm12, %v1024_v6, %v1152_v39  ;;  %v1025_v12 = vadd.f32 %v2355_v35, %v2468_v51  ;;  %v1790_v1 = vmul.f32 %v2393_v28, %v2393_v28  ;;  %1277 = vst [vmem:[%s2873_s3 + $0x140] sm:$0xff] %v2623_v5 }
 0x126   :  { %v1850_v0 = vadd.f32 %v1849_v59, %v1787_v58  ;;  %v1789_v19 = vmul.f32 %v2500_v31, %v2500_v31  ;;  %1280 = vst [vmem:[%s2873_s3 + $0x158] sm:$0xff] %v2625_v7  ;;  %vm1086_vm13 = vcmp.gt.f32.partialorder %v1022_v4, 0.0  ;;  %v1150_v20 = vmul.f32 0.2, %v1022_v4 }
 0x127   :  { %v1719_v44 = vadd.f32 %v1718_v14, %v2500_v31  ;;  %vm1091_vm14 = vcmp.gt.f32.partialorder %v1027_v11, 0.0  ;;  %v1155_v46 = vmul.f32 0.2, %v1027_v11  ;;  %vm1089_vm15 = vcmp.gt.f32.partialorder %v1025_v12, 0.0 }
 0x128   :  { %v1851_v18 = vadd.f32 %v1850_v0, %v1788_v16  ;;  %v1153_v24 = vmul.f32 0.2, %v1025_v12  ;;  %v1214_v31 = vsel %vm1086_vm13, %v1022_v4, %v1150_v20  ;;  %v1028_v17 = vadd.f32 %v2473_v56, %v2355_v35 }
 0x129   :  { %v1720_v51 = vadd.f32 %v1719_v44, %v2393_v28  ;;  %v2645_v25 = vsel %vm1091_vm14, %v1027_v11, %v1155_v46  ;;  %v1026_v34 = vadd.f32 %v2355_v35, %v2475_v60  ;;  %v1791_v29 = vmul.f32 %v2456_v40, %v2456_v40  ;;  %1278 = vst [vmem:[%s2873_s3 + $0x148] sm:$0xff] %v1214_v31 }
 0x12a   :  { %v1852_v21 = vadd.f32 %v1851_v18, %v1789_v19  ;;  %1283 = vst [vmem:[%s2873_s3 + $0x170] sm:$0xff] %v2645_v25  ;;  %v2661_v28 = vsel %vm1089_vm15, %v1025_v12, %v1153_v24  ;;  %vm1092_vm0 = vcmp.gt.f32.partialorder %v1028_v17, 0.0  ;;  %v1156_v56 = vmul.f32 0.2, %v1028_v17 }
 0x12b   :  { %v1721_v33 = vadd.f32 %v1720_v51, %v2456_v40  ;;  %vm1090_vm1 = vcmp.gt.f32.partialorder %v1026_v34, 0.0  ;;  %v1792_v36 = vmul.f32 %v2578_v26, %v2578_v26  ;;  %1281 = vst [vmem:[%s2873_s3 + $0x160] sm:$0xff] %v2661_v28  ;;  %v1154_v42 = vmul.f32 0.2, %v1026_v34 }
 0x12c   :  { %v1853_v30 = vadd.f32 %v1852_v21, %v1790_v1  ;;  %v2670_v48 = vsel %vm1092_vm0, %v1028_v17, %v1156_v56  ;;  %v1031_v45 = vadd.f32 %v2493_v23, %v2355_v35  ;;  %v1029_v49 = vadd.f32 %v2355_v35, %v2496_v27 }
 0x12d   :  { %v1722_v60 = vadd.f32 %v1721_v33, %v2578_v26  ;;  %v1032_v47 = vadd.f32 %v2502_v32, %v2355_v35  ;;  %v1793_v54 = vmul.f32 %v1210_v53, %v1210_v53  ;;  %1284 = vst [vmem:[%s2873_s3 + $0x178] sm:$0xff] %v2670_v48  ;;  %v2682_v6 = vsel %vm1090_vm1, %v1026_v34, %v1154_v42 }
 0x12e   :  { %v1854_v40 = vadd.f32 %v1853_v30, %v1791_v29  ;;  %v1794_v58 = vmul.f32 %v2531_v13, %v2531_v13  ;;  %1282 = vst [vmem:[%s2873_s3 + $0x168] sm:$0xff] %v2682_v6  ;;  %vm1095_vm2 = vcmp.gt.f32.partialorder %v1031_v45, 0.0  ;;  %v1159_v23 = vmul.f32 0.2, %v1031_v45 }
 0x12f   :  { %v1723_v26 = vadd.f32 %v1722_v60, %v1210_v53  ;;  %vm1093_vm3 = vcmp.gt.f32.partialorder %v1029_v49, 0.0  ;;  %v1157_v53 = vmul.f32 0.2, %v1029_v49  ;;  %vm1096_vm4 = vcmp.gt.f32.partialorder %v1032_v47, 0.0 }
 0x130   :  { %v1855_v50 = vadd.f32 %v1854_v40, %v1792_v36  ;;  %v2691_v59 = vsel %vm1095_vm2, %v1031_v45, %v1159_v23  ;;  %v1160_v61 = vmul.f32 0.2, %v1032_v47  ;;  %v1030_v10 = vadd.f32 %v2355_v35, %v2508_v38 }
 0x131   :  { %v1724_v27 = vadd.f32 %v1723_v26, %v2531_v13  ;;  %v1035_v39 = vadd.f32 %v2524_v3, %v2355_v35  ;;  %v1795_v14 = vmul.f32 %v2591_v41, %v2591_v41  ;;  %1287 = vst [vmem:[%s2873_s3 + $0x190] sm:$0xff] %v2691_v59  ;;  %v2704_v13 = vsel %vm1093_vm3, %v1029_v49, %v1157_v53 }
 0x132   :  { %v1856_v32 = vadd.f32 %v1855_v50, %v1793_v54  ;;  %1285 = vst [vmem:[%s2873_s3 + $0x180] sm:$0xff] %v2704_v13  ;;  %v2710_v38 = vsel %vm1096_vm4, %v1032_v47, %v1160_v61  ;;  %vm1094_vm5 = vcmp.gt.f32.partialorder %v1030_v10, 0.0  ;;  %v1158_v3 = vmul.f32 0.2, %v1030_v10 }
 0x133   :  { %v1725_v0 = vadd.f32 %v1724_v27, %v2591_v41  ;;  %v1796_v41 = vmul.f32 %v2623_v5, %v2623_v5  ;;  %1288 = vst [vmem:[%s2873_s3 + $0x198] sm:$0xff] %v2710_v38  ;;  %vm1099_vm6 = vcmp.gt.f32.partialorder %v1035_v39, 0.0  ;;  %v1163_v1 = vmul.f32 0.2, %v1035_v39 }
 0x134   :  { %v1857_v16 = vadd.f32 %v1856_v32, %v1794_v58  ;;  %v2719_v12 = vsel %vm1094_vm5, %v1030_v10, %v1158_v3  ;;  %v1033_v18 = vadd.f32 %v2355_v35, %v2527_v8  ;;  %v1036_v44 = vadd.f32 %v2533_v15, %v2355_v35 }
 0x135   :  { %v1726_v4 = vadd.f32 %v1725_v0, %v2623_v5  ;;  %v1797_v46 = vmul.f32 %v1214_v31, %v1214_v31  ;;  %1286 = vst [vmem:[%s2873_s3 + $0x188] sm:$0xff] %v2719_v12  ;;  %v1034_v5 = vadd.f32 %v2355_v35, %v2539_v22  ;;  %v2731_v51 = vsel %vm1099_vm6, %v1035_v39, %v1163_v1  ;;  %v2137_v0 = vld [vmem:[%s2872_s2] ss:$0 sm:$0xff] }
 0x136   :  { %v1858_v11 = vadd.f32 %v1857_v16, %v1795_v14  ;;  %vm1097_vm7 = vcmp.gt.f32.partialorder %v1033_v18, 0.0  ;;  %v1161_v21 = vmul.f32 0.2, %v1033_v18  ;;  %vm1100_vm8 = vcmp.gt.f32.partialorder %v1036_v44, 0.0  ;;  %1291 = vst [vmem:[%s2873_s3 + $0x1b0] sm:$0xff] %v2731_v51 }
 0x137   :  { %v1727_v20 = vadd.f32 %v1726_v4, %v1214_v31  ;;  %v1798_v8 = vmul.f32 %v2612_v63, %v2612_v63  ;;  %v1164_v31 = vmul.f32 0.2, %v1036_v44  ;;  %vm1098_vm9 = vcmp.gt.f32.partialorder %v1034_v5, 0.0 }
 0x138   :  { %v1859_v19 = vadd.f32 %v1858_v11, %v1796_v41  ;;  %v2740_v17 = vsel %vm1097_vm7, %v1033_v18, %v1161_v21  ;;  %v1162_v22 = vmul.f32 0.2, %v1034_v5  ;;  %v1039_v34 = vadd.f32 %v2557_v57, %v2355_v35 }
 0x139   :  { %v1728_v15 = vadd.f32 %v1727_v20, %v2612_v63  ;;  %v1799_v29 = vmul.f32 %v2625_v7, %v2625_v7  ;;  %1289 = vst [vmem:[%s2873_s3 + $0x1a0] sm:$0xff] %v2740_v17  ;;  %v2751_v33 = vsel %vm1100_vm8, %v1036_v44, %v1164_v31  ;;  %v1802_v56 = vmul.f32 %v2645_v25, %v2645_v25 }
 0x13a   :  { %v1860_v24 = vadd.f32 %v1859_v19, %v1797_v46  ;;  %1292 = vst [vmem:[%s2873_s3 + $0x1b8] sm:$0xff] %v2751_v33  ;;  %v2759_v57 = vsel %vm1098_vm9, %v1034_v5, %v1162_v22  ;;  %vm1103_vm10 = vcmp.gt.f32.partialorder %v1039_v34, 0.0  ;;  %v1167_v60 = vmul.f32 0.2, %v1039_v34 }
 0x13b   :  { %v1729_v63 = vadd.f32 %v1728_v15, %v2625_v7  ;;  %v1800_v36 = vmul.f32 %v2661_v28, %v2661_v28  ;;  %1290 = vst [vmem:[%s2873_s3 + $0x1a8] sm:$0xff] %v2759_v57  ;;  %v1037_v42 = vadd.f32 %v2355_v35, %v2560_v62  ;;  %v1040_v49 = vadd.f32 %v2565_v2, %v2355_v35 }
 0x13c   :  { %v1861_v30 = vadd.f32 %v1860_v24, %v1798_v8  ;;  %v2770_v45 = vsel %vm1103_vm10, %v1039_v34, %v1167_v60  ;;  %v1038_v47 = vadd.f32 %v2355_v35, %v2567_v9  ;;  %v1801_v54 = vmul.f32 %v2682_v6, %v2682_v6 }
 0x13d   :  { %v1730_v7 = vadd.f32 %v1729_v63, %v2661_v28  ;;  %v1043_v28 = vadd.f32 %v2589_v37, %v2355_v35  ;;  %1295 = vst [vmem:[%s2873_s3 + $0x1d0] sm:$0xff] %v2770_v45  ;;  %vm1101_vm11 = vcmp.gt.f32.partialorder %v1037_v42, 0.0  ;;  %v1165_v62 = vmul.f32 0.2, %v1037_v42 }
 0x13e   :  { %v1862_v40 = vadd.f32 %v1861_v30, %v1799_v29  ;;  %vm1104_vm12 = vcmp.gt.f32.partialorder %v1040_v49, 0.0  ;;  %v1168_v2 = vmul.f32 0.2, %v1040_v49  ;;  %vm1102_vm13 = vcmp.gt.f32.partialorder %v1038_v47, 0.0 }
 0x13f   :  { %v1731_v26 = vadd.f32 %v1730_v7, %v2682_v6  ;;  %v1166_v37 = vmul.f32 0.2, %v1038_v47  ;;  %vm1107_vm14 = vcmp.gt.f32.partialorder %v1043_v28, 0.0  ;;  %v1229_v23 = vsel %vm1101_vm11, %v1037_v42, %v1165_v62 }
 0x140   :  { %v1863_v50 = vadd.f32 %v1862_v40, %v1800_v36  ;;  %v1232_v27 = vsel %vm1104_vm12, %v1040_v49, %v1168_v2  ;;  %v1171_v32 = vmul.f32 0.2, %v1043_v28  ;;  %v1041_v6 = vadd.f32 %v2355_v35, %v2595_v43  ;;  %1293 = vst [vmem:[%s2873_s3 + $0x1c0] sm:$0xff] %v1229_v23 }
 0x141   :  { %v1732_v9 = vadd.f32 %v1731_v26, %v2645_v25  ;;  %v1803_v53 = vmul.f32 %v2670_v48, %v2670_v48  ;;  %1296 = vst [vmem:[%s2873_s3 + $0x1d8] sm:$0xff] %v1232_v27  ;;  %v1230_v25 = vsel %vm1102_vm13, %v1038_v47, %v1166_v37  ;;  %v1804_v43 = vmul.f32 %v2704_v13, %v2704_v13 }
 0x142   :  { %v1864_v58 = vadd.f32 %v1863_v50, %v1801_v54  ;;  %v1235_v39 = vsel %vm1107_vm14, %v1043_v28, %v1171_v32  ;;  %vm1105_vm15 = vcmp.gt.f32.partialorder %v1041_v6, 0.0  ;;  %v1169_v14 = vmul.f32 0.2, %v1041_v6  ;;  %1294 = vst [vmem:[%s2873_s3 + $0x1c8] sm:$0xff] %v1230_v25 }
 0x143   :  { %v1733_v10 = vadd.f32 %v1732_v9, %v2670_v48  ;;  %1299 = vst [vmem:[%s2873_s3 + $0x1f0] sm:$0xff] %v1235_v39  ;;  %v1044_v3 = vadd.f32 %v2137_v0, %v2603_v52  ;;  %v1042_v4 = vadd.f32 %v2137_v0, %v2607_v55  ;;  %v1805_v11 = vmul.f32 %v2719_v12, %v2719_v12 }
 0x144   :  { %v1865_v61 = vadd.f32 %v1864_v58, %v1802_v56  ;;  %v1233_v48 = vsel %vm1105_vm15, %v1041_v6, %v1169_v14  ;;  %v1806_v44 = vmul.f32 %v2691_v59, %v2691_v59  ;;  %v1807_v46 = vmul.f32 %v2710_v38, %v2710_v38 }
 0x145   :  { %v1734_v35 = vadd.f32 %v1733_v10, %v2704_v13  ;;  %1297 = vst [vmem:[%s2873_s3 + $0x1e0] sm:$0xff] %v1233_v48  ;;  %vm1108_vm0 = vcmp.gt.f32.partialorder %v1044_v3, 0.0  ;;  %v1172_v1 = vmul.f32 0.2, %v1044_v3  ;;  %vm1106_vm1 = vcmp.gt.f32.partialorder %v1042_v4, 0.0 }
 0x146   :  { %v1866_v16 = vadd.f32 %v1865_v61, %v1803_v53  ;;  %v1170_v18 = vmul.f32 0.2, %v1042_v4  ;;  %v1810_v31 = vmul.f32 %v2731_v51, %v2731_v51  ;;  %v1811_v29 = vmul.f32 %v2751_v33, %v2751_v33 }
 0x147   :  { %v1735_v13 = vadd.f32 %v1734_v35, %v2719_v12  ;;  %v1236_v19 = vsel %vm1108_vm0, %v1044_v3, %v1172_v1  ;;  %v1812_v56 = vmul.f32 %v1229_v23, %v1229_v23  ;;  %v1813_v40 = vmul.f32 %v1230_v25, %v1230_v25 }
 0x148   :  { %v1867_v41 = vadd.f32 %v1866_v16, %v1804_v43  ;;  %v1234_v20 = vsel %vm1106_vm1, %v1042_v4, %v1170_v18  ;;  %1300 = vst [vmem:[%s2873_s3 + $0x1f8] sm:$0xff] %v1236_v19  ;;  %v1816_v26 = vmul.f32 %v1233_v48, %v1233_v48  ;;  %v1818_v9 = vmul.f32 %v1235_v39, %v1235_v39 }
 0x149   :  { %v1736_v52 = vadd.f32 %v1735_v13, %v2691_v59  ;;  %1298 = vst [vmem:[%s2873_s3 + $0x1e8] sm:$0xff] %v1234_v20  ;;  %v1808_v59 = vmul.f32 %v2740_v17, %v2740_v17  ;;  %v1817_v2 = vmul.f32 %v1234_v20, %v1234_v20  ;;  %v1301_v10 = vlaneseq  ;;  %s2186_s3 = smov [#allocation3]  }
 0x14a   :  { %v1868_v55 = vadd.f32 %v1867_v41, %v1805_v11  ;;  %s1902_s29 = sshll.u32 %s2186_s3, 4  ;;  %s1903_s29 = int_to_ptr.vmem [resolvable:$true] %s1902_s29 }
 0x14b   :  { %v1737_v5 = vadd.f32 %v1736_v52, %v2710_v38  ;;  %v1809_v38 = vmul.f32 %v2759_v57, %v2759_v57  ;;  %s2138_s7 = scalar_lea.vmem %s1903_s29, 128  ;;  %p2143_p1 = scmp.lt.s32.totalorder %s1903_s29, %s1903_s29 }
 0x14c   :  { %v1869_v12 = vadd.f32 %v1868_v55, %v1806_v44  ;;  %p2139_p0 = scmp.ne.s32.totalorder %s1903_s29, %s2138_s7  ;;  %p2144_p2 = scmp.lt.s32.totalorder %s2138_s7, %s2138_s7 }
 0x14d   :  { %v1738_v21 = vadd.f32 %v1737_v5, %v2740_v17 }
 0x14e   :  { %v1870_v8 = vadd.f32 %v1869_v12, %v1807_v46  ;;  %p2145_p3 = por %p2144_p2, %p2143_p1 }
 0x14f   :  { %v1739_v24 = vadd.f32 %v1738_v21, %v2759_v57  ;;  %v1814_v57 = vmul.f32 %v2770_v45, %v2770_v45 }
 0x150   :  { %v1871_v15 = vadd.f32 %v1870_v8, %v1808_v59  ;;  %p2146_p4 = pnand %p2145_p3, %p2139_p0 }
 0x151   :  { %v1740_v22 = vadd.f32 %v1739_v24, %v2731_v51  ;;  %v1815_v51 = vmul.f32 %v1232_v27, %v1232_v27 }
 0x152   :  { %v1872_v34 = vadd.f32 %v1871_v15, %v1809_v38 }
 0x153   :  { %v1741_v63 = vadd.f32 %v1740_v22, %v2751_v33 }
 0x154   :  { %v1873_v30 = vadd.f32 %v1872_v34, %v1810_v31 }
 0x155   :  { %v1742_v17 = vadd.f32 %v1741_v63, %v1229_v23  ;;  %v1819_v23 = vmul.f32 %v1236_v19, %v1236_v19 }
 0x156   :  { %v1874_v60 = vadd.f32 %v1873_v30, %v1811_v29 }
 0x157   :  { %v1743_v36 = vadd.f32 %v1742_v17, %v1230_v25 }
 0x158   :  { %v1875_v7 = vadd.f32 %v1874_v60, %v1812_v56 }
 0x159   :  { %v1744_v42 = vadd.f32 %v1743_v36, %v2770_v45 }
 0x15a   :  { %v1876_v49 = vadd.f32 %v1875_v7, %v1813_v40 }
 0x15b   :  { %v1745_v28 = vadd.f32 %v1744_v42, %v1232_v27  ;;  %v1302_v27 = vshrl.u32 %v1301_v10, 7 }
 0x15c   :  { %v1877_v47 = vadd.f32 %v1876_v49, %v1814_v57 }
 0x15d   :  { %v1746_v50 = vadd.f32 %v1745_v28, %v1233_v48  ;;  %vm1889_vm2 = vcmp.eq.s32.totalorder %v1302_v27, 0 }
 0x15e   :  { %v1878_v54 = vadd.f32 %v1877_v47, %v1815_v51 }
 0x15f   :  { %v1747_v33 = vadd.f32 %v1746_v50, %v1234_v20 }
 0x160   :  { %v1879_v62 = vadd.f32 %v1878_v54, %v1816_v26 }
 0x161   :  { %v1748_v58 = vadd.f32 %v1747_v33, %v1235_v39 }
 0x162   :  { %v1880_v37 = vadd.f32 %v1879_v62, %v1817_v2 }
 0x163   :  { %v1749_v6 = vadd.f32 %v1748_v58, %v1236_v19 }
 0x164   :  { %v1881_v32 = vadd.f32 %v1880_v37, %v1818_v9 }
 0x165   :  { %v1750_v53 = vrot.slane %v1749_v6, 4 }
 0x166   :  { %v1882_v61 = vadd.f32 %v1881_v32, %v1819_v23 }
 0x167   :  { %v1751_v45 = vadd.f32 %v1750_v53, %v1749_v6 }
 0x168   :  { %v1883_v25 = vrot.slane %v1882_v61, 4 }
 0x169   :  { %v1752_v14 = vrot.slane %v1751_v45, 2 }
 0x16a   :  { %v1884_v35 = vadd.f32 %v1883_v25, %v1882_v61 }
 0x16b   :  { %v1753_v43 = vadd.f32 %v1752_v14, %v1751_v45 }
 0x16c   :  { %v1885_v16 = vrot.slane %v1884_v35, 2 }
 0x16d   :  { %v1754_v48 = vrot.slane %v1753_v43, 1 }
 0x16e   :  { %v1886_v0 = vadd.f32 %v1885_v16, %v1884_v35 }
 0x16f   :  { %v1755_v39 = vadd.f32 %v1754_v48, %v1753_v43 }
 0x170   :  { %v1887_v3 = vrot.slane %v1886_v0, 1 }
 0x171   :  { %v1890_v4 = vsel %vm1889_vm2, %v1755_v39, 0.0 }
 0x172   :  { %v1888_v41 = vadd.f32 %v1887_v3, %v1886_v0  ;;  %1891 = vst [vmem:[#allocation3] sm:$0xff] %v1890_v4 }
 0x173   :  { %2149 = shalt.err (!%p2146_p4)
}
 0x174   :  { %s2150_s0 = scalar_lea.hbm %s2874_s4, 128 }
 0x175   :  { %p2151_p5 = scmp.ne.s32.totalorder %s2874_s4, %s2150_s0  ;;  %p2154_p6 = scmp.lt.u32.totalorder %s2150_s0, %s2874_s4 }
 0x177   :  { %p2156_p7 = pnand %p2154_p6, %p2151_p5 }
 0x179   :  { %2159 = shalt.err (!%p2156_p7)
}
 0x17a   :  { %1905 = dma.vmem_to_hbm [thread:$0]  %s1903_s29, 128, %s2874_s4, [#allocation4]   ;;  %v1892_v13 = vsel %vm1889_vm2, %v1888_v41, 0.0 }
 0x17b   :  { %1893 = vst [vmem:[#allocation5] sm:$0xff] %v1892_v13  ;;  %s2160_s16 = scalar_lea.vmem %s1913_s6, 128  ;;  %p2165_p9 = scmp.lt.s32.totalorder %s1913_s6, %s1913_s6 }
 0x17c   :  { %p2161_p8 = scmp.ne.s32.totalorder %s1913_s6, %s2160_s16  ;;  %p2166_p10 = scmp.lt.s32.totalorder %s2160_s16, %s2160_s16 }
 0x17e   :  { %p2167_p11 = por %p2166_p10, %p2165_p9 }
 0x180   :  { %p2168_p12 = pnand %p2167_p11, %p2161_p8 }
 0x182   :  { %2171 = shalt.err (!%p2168_p12)
}
 0x183   :  { %s2172_s19 = scalar_lea.hbm %s2875_s5, 128 }
 0x184   :  { %p2173_p13 = scmp.ne.s32.totalorder %s2875_s5, %s2172_s19  ;;  %p2176_p0 = scmp.lt.u32.totalorder %s2172_s19, %s2875_s5 }
 0x186   :  { %p2178_p1 = pnand %p2176_p0, %p2173_p13 }
 0x188   :  { %2181 = shalt.err (!%p2178_p1)
}
 0x189   :  { %1915 = dma.vmem_to_hbm [thread:$0]  %s1913_s6, 128, %s2875_s5, [#allocation6]  }
 0x18a   :  { %2182 = dma.done.wait [#allocation4], 128  }
 0x18b   :  { %2183 = vsyncadd [#allocation4], 4294967168 }
 0x18c   :  { %2184 = dma.done.wait [#allocation6], 128  }
 0x18d   :  { %2185 = vsyncadd [#allocation6], 4294967168 }
 0x18e   :  { %1924 = vsyncpa [#allocation4], 1 }
 0x18f   :  { %1925 = vsyncpa [#allocation6], 1 }

// kernel: generator_forward.32
= control target key start
LH: loop header
LB: loop body
LE: loop exit
PB: predicated region body
PF: predicated region fallthrough
CT: control target
= control target key end

     0   :  { %s164_s0 = inlined_call_operand.vmem [shape: f32[64,128], index: 0, kind: input, shape index: {}]   ;;  %s165_s1 = inlined_call_operand.vmem [shape: f32[1,128], index: 1, kind: input, shape index: {}]   ;;  %s166_s2 = inlined_call_operand.vmem [shape: f32[1,128], index: 2, kind: input, shape index: {}]   ;;  %s167_s3 = inlined_call_operand.vmem [shape: f32[64,128], index: 3, kind: output, shape index: {}]  }
   0x1   :  { %v14_v0 = vld [vmem:[%s164_s0] sm:$0xff]  ;;  %v15_v4 = vld [vmem:[%s164_s0 + $0x8] sm:$0xff]  ;;  %v16_v5 = vld [vmem:[%s164_s0 + $0x10] sm:$0xff] }
   0x2   :  { %v88_v1 = vld [vmem:[%s165_s1] ss:$0 sm:$0xff]  ;;  %v17_v6 = vld [vmem:[%s164_s0 + $0x18] sm:$0xff]  ;;  %v19_v11 = vld [vmem:[%s164_s0 + $0x28] sm:$0xff] }
   0x3   :  { %v89_v2 = vld [vmem:[%s166_s2] ss:$0 sm:$0xff]  ;;  %v29_v3 = vmul.f32 %v88_v1, %v14_v0  ;;  %v30_v7 = vmul.f32 %v88_v1, %v15_v4  ;;  %v31_v8 = vmul.f32 %v88_v1, %v16_v5  ;;  %v32_v9 = vmul.f32 %v88_v1, %v17_v6  ;;  %v20_v12 = vld [vmem:[%s164_s0 + $0x30] sm:$0xff]  ;;  %v21_v17 = vld [vmem:[%s164_s0 + $0x38] sm:$0xff] }
   0x4   :  { %v18_v10 = vld [vmem:[%s164_s0 + $0x20] sm:$0xff]  ;;  %v34_v15 = vmul.f32 %v88_v1, %v19_v11  ;;  %v35_v16 = vmul.f32 %v88_v1, %v20_v12  ;;  %v36_v21 = vmul.f32 %v88_v1, %v21_v17 }
   0x5   :  { %v44_v13 = vadd.f32 %v89_v2, %v29_v3  ;;  %v33_v14 = vmul.f32 %v88_v1, %v18_v10  ;;  %v45_v18 = vadd.f32 %v89_v2, %v30_v7  ;;  %v46_v19 = vadd.f32 %v89_v2, %v31_v8 }
   0x6   :  { %v47_v20 = vadd.f32 %v89_v2, %v32_v9  ;;  %v49_v24 = vadd.f32 %v89_v2, %v34_v15  ;;  %v50_v34 = vadd.f32 %v89_v2, %v35_v16  ;;  %v51_v35 = vadd.f32 %v89_v2, %v36_v21 }
   0x7   :  { %vm52_vm0 = vcmp.gt.f32.partialorder %v44_v13, 0.0  ;;  %v60_v22 = vmul.f32 0.2, %v44_v13  ;;  %v48_v23 = vadd.f32 %v89_v2, %v33_v14  ;;  %vm53_vm1 = vcmp.gt.f32.partialorder %v45_v18, 0.0 }
   0x8   :  { %v61_v25 = vmul.f32 0.2, %v45_v18  ;;  %vm54_vm2 = vcmp.gt.f32.partialorder %v46_v19, 0.0  ;;  %v62_v26 = vmul.f32 0.2, %v46_v19  ;;  %vm55_vm3 = vcmp.gt.f32.partialorder %v47_v20, 0.0 }
   0x9   :  { %v68_v27 = vsel %vm52_vm0, %v44_v13, %v60_v22  ;;  %v63_v28 = vmul.f32 0.2, %v47_v20  ;;  %vm56_vm4 = vcmp.gt.f32.partialorder %v48_v23, 0.0  ;;  %v64_v31 = vmul.f32 0.2, %v48_v23 }
   0xa   :  { %76 = vst [vmem:[%s167_s3] sm:$0xff] %v68_v27  ;;  %v69_v29 = vsel %vm53_vm1, %v45_v18, %v61_v25  ;;  %v70_v30 = vsel %vm54_vm2, %v46_v19, %v62_v26  ;;  %vm57_vm5 = vcmp.gt.f32.partialorder %v49_v24, 0.0  ;;  %v65_v33 = vmul.f32 0.2, %v49_v24 }
   0xb   :  { %77 = vst [vmem:[%s167_s3 + $0x8] sm:$0xff] %v69_v29  ;;  %78 = vst [vmem:[%s167_s3 + $0x10] sm:$0xff] %v70_v30  ;;  %v71_v32 = vsel %vm55_vm3, %v47_v20, %v63_v28  ;;  %v72_v36 = vsel %vm56_vm4, %v48_v23, %v64_v31  ;;  %vm58_vm6 = vcmp.gt.f32.partialorder %v50_v34, 0.0  ;;  %v66_v38 = vmul.f32 0.2, %v50_v34 }
   0xc   :  { %79 = vst [vmem:[%s167_s3 + $0x18] sm:$0xff] %v71_v32  ;;  %80 = vst [vmem:[%s167_s3 + $0x20] sm:$0xff] %v72_v36  ;;  %v73_v37 = vsel %vm57_vm5, %v49_v24, %v65_v33  ;;  %vm59_vm7 = vcmp.gt.f32.partialorder %v51_v35, 0.0  ;;  %v67_v39 = vmul.f32 0.2, %v51_v35 }
   0xd   :  { %81 = vst [vmem:[%s167_s3 + $0x28] sm:$0xff] %v73_v37  ;;  %v74_v40 = vsel %vm58_vm6, %v50_v34, %v66_v38 }
   0xe   :  { %82 = vst [vmem:[%s167_s3 + $0x30] sm:$0xff] %v74_v40  ;;  %v75_v41 = vsel %vm59_vm7, %v51_v35, %v67_v39 }
   0xf   :  { %83 = vst [vmem:[%s167_s3 + $0x38] sm:$0xff] %v75_v41 }

// kernel: generator_forward.31
= control target key start
LH: loop header
LB: loop body
LE: loop exit
PB: predicated region body
PF: predicated region fallthrough
CT: control target
= control target key end

     0   :  { %vm127_vm0 = vcmask 261120   ;;  %s712_s1 = inlined_call_operand.vmem [shape: bf16[32,128], index: 1, kind: input, shape index: {}]   ;;  %s713_s0 = inlined_call_operand.vmem [shape: bf16[128,32], index: 0, kind: input, shape index: {}]   ;;  %s714_s2 = inlined_call_operand.vmem [shape: f32[1,128], index: 2, kind: input, shape index: {}]   ;;  %s715_s3 = inlined_call_operand.vmem [shape: f32[128,128], index: 3, kind: output, shape index: {0}]   ;;  %s716_s4 = inlined_call_operand.vmem [shape: f32[8,128], index: 4, kind: output, shape index: {1}]   ;;  %s717_s5 = inlined_call_operand.vmem [shape: f32[8,128], index: 5, kind: output, shape index: {2}]  }
   0x1   :  { %v565_v0 = vld [vmem:[%s712_s1] sm:$0xff]   ;;  %v566_v1 = vld [vmem:[%s712_s1 + $0x8] sm:$0xff]   ;;  %v569_v4 = vld [vmem:[%s713_s0 + $0x10] sm:$0xff]  }
   0x2   :  { %541 = vmatprep.subr.bf16.mxu0 %v565_v0  ;;  %v567_v2 = vld [vmem:[%s713_s0] sm:$0xff]   ;;  %561 = vmatprep.subr.bf16.mxu1 %v565_v0  ;;  %v568_v3 = vld [vmem:[%s713_s0 + $0x8] sm:$0xff]   ;;  %v573_v7 = vld [vmem:[%s713_s0 + $0x30] sm:$0xff]  }
   0x3   :  { %542 = vmatpush3.bf16.msra.mxu0 %v565_v0  ;;  %563 = vmatpush3.bf16.msra.mxu1 %v565_v0  ;;  %v571_v5 = vld [vmem:[%s713_s0 + $0x20] sm:$0xff]   ;;  %v572_v6 = vld [vmem:[%s713_s0 + $0x28] sm:$0xff]   ;;  %v570_v8 = vld [vmem:[%s713_s0 + $0x18] sm:$0xff]  }
   0x4   :  { %543 = vmatprep.subr.bf16.mxu0 %v566_v1  ;;  %545 = vmatprep.mubr.msk.bf16.mxu0 %vm127_vm0, %v567_v2  ;;  %v574_v9 = vld [vmem:[%s713_s0 + $0x38] sm:$0xff]   ;;  %v530_v10 = vld [vmem:[%s714_s2] ss:$0 sm:$0xff] }
   0x5   :  { %562 = vmatprep.subr.bf16.mxu1 %v566_v1  ;;  %553 = vmatprep.mubr.msk.bf16.mxu1 %vm127_vm0, %v571_v5 }
   0x7   :  { %544 = vmatpush3.bf16.msra.mxu0 %v566_v1  ;;  %564 = vmatpush3.bf16.msra.mxu1 %v566_v1 }
   0xa   :  { %546 = vmatmul.mubr.msk.bf16.vlgmr.msra.gmra.mrb[0].mxu0 %vm127_vm0, %v568_v3  ;;  %554 = vmatmul.mubr.msk.bf16.vlgmr.msra.gmra.mrb[0].mxu1 %vm127_vm0, %v572_v6 }
   0xb   :  { %549 = vmatprep.mubr.msk.bf16.mxu0 %vm127_vm0, %v569_v4  ;;  %557 = vmatprep.mubr.msk.bf16.mxu1 %vm127_vm0, %v573_v7 }
  0x12   :  { %550 = vmatmul.mubr.msk.bf16.gmra.mrb[4].mxu0 %vm127_vm0, %v570_v8  ;;  %558 = vmatmul.mubr.msk.bf16.gmra.mrb[4].mxu1 %vm127_vm0, %v574_v9 }
  0xdd   :  { %v547_v11 = vpop.f32.mrb[0].mxu0  ;;  %v555_v12 = vpop.f32.mrb[0].mxu1 }
  0xde   :  { %v309_v13 = vadd.f32 %v547_v11, %v530_v10  ;;  %v186_v14 = vpop.f32.mrb[1].mxu0  ;;  %v646_v15 = vadd.f32 %v555_v12, %v530_v10  ;;  %v218_v16 = vpop.f32.mrb[1].mxu1 }
  0xdf   :  { %v307_v17 = vadd.f32 %v530_v10, %v186_v14  ;;  %v548_v18 = vpop.f32.mrb[2].mxu0  ;;  %v315_v19 = vadd.f32 %v530_v10, %v218_v16  ;;  %v556_v20 = vpop.f32.mrb[2].mxu1 }
  0xe0   :  { %325 = vst [vmem:[%s715_s3 + $0x10] sm:$0xff] %v309_v13  ;;  %v310_v21 = vadd.f32 %v548_v18, %v530_v10  ;;  %v189_v22 = vpop.f32.mrb[3].mxu0  ;;  %333 = vst [vmem:[%s715_s3 + $0x50] sm:$0xff] %v646_v15  ;;  %v655_v23 = vadd.f32 %v556_v20, %v530_v10  ;;  %v221_v24 = vpop.f32.mrb[3].mxu1  ;;  %v460_v30 = vmul.f32 %v309_v13, %v309_v13 }
  0xe1   :  { %323 = vst [vmem:[%s715_s3] sm:$0xff] %v307_v17  ;;  %v308_v25 = vadd.f32 %v530_v10, %v189_v22  ;;  %331 = vst [vmem:[%s715_s3 + $0x40] sm:$0xff] %v315_v19  ;;  %v316_v26 = vadd.f32 %v530_v10, %v221_v24  ;;  %v458_v27 = vmul.f32 %v307_v17, %v307_v17 }
  0xe2   :  { %326 = vst [vmem:[%s715_s3 + $0x18] sm:$0xff] %v310_v21  ;;  %334 = vst [vmem:[%s715_s3 + $0x58] sm:$0xff] %v655_v23  ;;  %v461_v35 = vmul.f32 %v310_v21, %v310_v21  ;;  %v466_v0 = vmul.f32 %v315_v19, %v315_v19  ;;  %v468_v6 = vmul.f32 %v646_v15, %v646_v15 }
  0xe3   :  { %324 = vst [vmem:[%s715_s3 + $0x8] sm:$0xff] %v308_v25  ;;  %v437_v28 = vadd.f32 %v308_v25, %v307_v17  ;;  %v459_v29 = vmul.f32 %v308_v25, %v308_v25  ;;  %332 = vst [vmem:[%s715_s3 + $0x48] sm:$0xff] %v316_v26  ;;  %v467_v5 = vmul.f32 %v316_v26, %v316_v26 }
  0xe4   :  { %v469_v9 = vmul.f32 %v655_v23, %v655_v23 }
  0xe5   :  { %v438_v31 = vadd.f32 %v437_v28, %v309_v13  ;;  %v474_v32 = vadd.f32 %v459_v29, %v458_v27  ;;  %v551_v33 = vpop.f32.mrb[4].mxu0  ;;  %v559_v34 = vpop.f32.mrb[4].mxu1  ;;  %v339_v27 = vlaneseq }
  0xe6   :  { %v313_v36 = vadd.f32 %v551_v33, %v530_v10  ;;  %v202_v37 = vpop.f32.mrb[5].mxu0  ;;  %v321_v38 = vadd.f32 %v559_v34, %v530_v10  ;;  %v234_v39 = vpop.f32.mrb[5].mxu1 }
  0xe7   :  { %v475_v40 = vadd.f32 %v474_v32, %v460_v30  ;;  %v311_v41 = vadd.f32 %v530_v10, %v202_v37  ;;  %v439_v42 = vadd.f32 %v438_v31, %v310_v21  ;;  %v552_v43 = vpop.f32.mrb[6].mxu0  ;;  %v319_v44 = vadd.f32 %v530_v10, %v234_v39  ;;  %v560_v45 = vpop.f32.mrb[6].mxu1 }
  0xe8   :  { %329 = vst [vmem:[%s715_s3 + $0x30] sm:$0xff] %v313_v36  ;;  %v314_v46 = vadd.f32 %v552_v43, %v530_v10  ;;  %v205_v47 = vpop.f32.mrb[7].mxu0  ;;  %337 = vst [vmem:[%s715_s3 + $0x70] sm:$0xff] %v321_v38  ;;  %v322_v48 = vadd.f32 %v560_v45, %v530_v10  ;;  %v237_v49 = vpop.f32.mrb[7].mxu1  ;;  %v464_v58 = vmul.f32 %v313_v36, %v313_v36 }
  0xe9   :  { %327 = vst [vmem:[%s715_s3 + $0x20] sm:$0xff] %v311_v41  ;;  %v440_v50 = vadd.f32 %v439_v42, %v311_v41  ;;  %v462_v51 = vmul.f32 %v311_v41, %v311_v41  ;;  %v476_v52 = vadd.f32 %v475_v40, %v461_v35  ;;  %v312_v53 = vadd.f32 %v530_v10, %v205_v47 }
  0xea   :  { %335 = vst [vmem:[%s715_s3 + $0x60] sm:$0xff] %v319_v44  ;;  %330 = vst [vmem:[%s715_s3 + $0x38] sm:$0xff] %v314_v46  ;;  %v320_v54 = vadd.f32 %v530_v10, %v237_v49  ;;  %v465_v61 = vmul.f32 %v314_v46, %v314_v46  ;;  %v470_v12 = vmul.f32 %v319_v44, %v319_v44 }
  0xeb   :  { %338 = vst [vmem:[%s715_s3 + $0x78] sm:$0xff] %v322_v48  ;;  %v477_v55 = vadd.f32 %v476_v52, %v462_v51  ;;  %328 = vst [vmem:[%s715_s3 + $0x28] sm:$0xff] %v312_v53  ;;  %v441_v56 = vadd.f32 %v440_v50, %v312_v53  ;;  %v463_v57 = vmul.f32 %v312_v53, %v312_v53 }
  0xec   :  { %336 = vst [vmem:[%s715_s3 + $0x68] sm:$0xff] %v320_v54  ;;  %v471_v18 = vmul.f32 %v320_v54, %v320_v54  ;;  %v473_v22 = vmul.f32 %v322_v48, %v322_v48 }
  0xed   :  { %v442_v59 = vadd.f32 %v441_v56, %v313_v36  ;;  %v478_v60 = vadd.f32 %v477_v55, %v463_v57 }
  0xef   :  { %v479_v62 = vadd.f32 %v478_v60, %v464_v58  ;;  %v443_v63 = vadd.f32 %v442_v59, %v314_v46 }
  0xf1   :  { %v444_v1 = vadd.f32 %v443_v63, %v315_v19  ;;  %v480_v2 = vadd.f32 %v479_v62, %v465_v61  ;;  %v472_v19 = vmul.f32 %v321_v38, %v321_v38 }
  0xf3   :  { %v481_v3 = vadd.f32 %v480_v2, %v466_v0  ;;  %v445_v4 = vadd.f32 %v444_v1, %v316_v26 }
  0xf5   :  { %v446_v7 = vadd.f32 %v445_v4, %v646_v15  ;;  %v482_v8 = vadd.f32 %v481_v3, %v467_v5 }
  0xf7   :  { %v483_v10 = vadd.f32 %v482_v8, %v468_v6  ;;  %v447_v11 = vadd.f32 %v446_v7, %v655_v23  ;;  %v340_v23 = vshrl.u32 %v339_v27, 7 }
  0xf9   :  { %v448_v13 = vadd.f32 %v447_v11, %v319_v44  ;;  %v484_v14 = vadd.f32 %v483_v10, %v469_v9  ;;  %vm495_vm1 = vcmp.eq.s32.totalorder %v340_v23, 0 }
  0xfb   :  { %v485_v16 = vadd.f32 %v484_v14, %v470_v12  ;;  %v449_v17 = vadd.f32 %v448_v13, %v320_v54 }
  0xfd   :  { %v450_v20 = vadd.f32 %v449_v17, %v321_v38  ;;  %v486_v21 = vadd.f32 %v485_v16, %v471_v18 }
  0xff   :  { %v451_v24 = vadd.f32 %v450_v20, %v322_v48  ;;  %v487_v25 = vadd.f32 %v486_v21, %v472_v19 }
 0x101   :  { %v452_v15 = vrot.slane %v451_v24, 4  ;;  %v488_v26 = vadd.f32 %v487_v25, %v473_v22 }
 0x103   :  { %v453_v28 = vadd.f32 %v452_v15, %v451_v24  ;;  %v489_v29 = vrot.slane %v488_v26, 4 }
 0x105   :  { %v454_v30 = vrot.slane %v453_v28, 2  ;;  %v490_v31 = vadd.f32 %v489_v29, %v488_v26 }
 0x107   :  { %v455_v32 = vadd.f32 %v454_v30, %v453_v28  ;;  %v491_v33 = vrot.slane %v490_v31, 2 }
 0x109   :  { %v456_v34 = vrot.slane %v455_v32, 1  ;;  %v492_v35 = vadd.f32 %v491_v33, %v490_v31 }
 0x10b   :  { %v457_v36 = vadd.f32 %v456_v34, %v455_v32  ;;  %v493_v37 = vrot.slane %v492_v35, 1 }
 0x10d   :  { %v494_v38 = vadd.f32 %v493_v37, %v492_v35  ;;  %v496_v39 = vsel %vm495_vm1, %v457_v36, 0.0 }
 0x10e   :  { %497 = vst [vmem:[%s716_s4] sm:$0xff] %v496_v39 }
 0x10f   :  { %v498_v40 = vsel %vm495_vm1, %v494_v38, 0.0 }
 0x110   :  { %499 = vst [vmem:[%s717_s5] sm:$0xff] %v498_v40 }

// kernel: generator_forward.34
= control target key start
LH: loop header
LB: loop body
LE: loop exit
PB: predicated region body
PF: predicated region fallthrough
CT: control target
= control target key end

     0   :  { %s112_s0 = inlined_call_operand.vmem [shape: f32[32,128], index: 0, kind: input, shape index: {}]   ;;  %s113_s1 = inlined_call_operand.vmem [shape: f32[1,128], index: 1, kind: input, shape index: {}]   ;;  %s114_s2 = inlined_call_operand.vmem [shape: f32[1,128], index: 2, kind: input, shape index: {}]   ;;  %s115_s3 = inlined_call_operand.vmem [shape: f32[32,128], index: 3, kind: output, shape index: {}]  }
   0x1   :  { %v14_v0 = vld [vmem:[%s112_s0] sm:$0xff]  ;;  %v15_v4 = vld [vmem:[%s112_s0 + $0x8] sm:$0xff]  ;;  %v16_v5 = vld [vmem:[%s112_s0 + $0x10] sm:$0xff] }
   0x2   :  { %v60_v1 = vld [vmem:[%s113_s1] ss:$0 sm:$0xff]  ;;  %v17_v6 = vld [vmem:[%s112_s0 + $0x18] sm:$0xff] }
   0x3   :  { %v61_v2 = vld [vmem:[%s114_s2] ss:$0 sm:$0xff]  ;;  %v25_v3 = vmul.f32 %v60_v1, %v14_v0  ;;  %v26_v7 = vmul.f32 %v60_v1, %v15_v4  ;;  %v27_v8 = vmul.f32 %v60_v1, %v16_v5  ;;  %v28_v9 = vmul.f32 %v60_v1, %v17_v6 }
   0x5   :  { %v36_v10 = vadd.f32 %v61_v2, %v25_v3  ;;  %v37_v11 = vadd.f32 %v61_v2, %v26_v7  ;;  %v38_v12 = vadd.f32 %v61_v2, %v27_v8  ;;  %v39_v13 = vadd.f32 %v61_v2, %v28_v9 }
   0x7   :  { %vm40_vm0 = vcmp.gt.f32.partialorder %v36_v10, 0.0  ;;  %v44_v14 = vmul.f32 0.2, %v36_v10  ;;  %vm41_vm1 = vcmp.gt.f32.partialorder %v37_v11, 0.0  ;;  %v45_v15 = vmul.f32 0.2, %v37_v11 }
   0x8   :  { %vm42_vm2 = vcmp.gt.f32.partialorder %v38_v12, 0.0  ;;  %v46_v16 = vmul.f32 0.2, %v38_v12  ;;  %vm43_vm3 = vcmp.gt.f32.partialorder %v39_v13, 0.0  ;;  %v47_v18 = vmul.f32 0.2, %v39_v13 }
   0x9   :  { %v48_v17 = vsel %vm40_vm0, %v36_v10, %v44_v14  ;;  %v49_v19 = vsel %vm41_vm1, %v37_v11, %v45_v15 }
   0xa   :  { %52 = vst [vmem:[%s115_s3] sm:$0xff] %v48_v17  ;;  %v50_v20 = vsel %vm42_vm2, %v38_v12, %v46_v16  ;;  %53 = vst [vmem:[%s115_s3 + $0x8] sm:$0xff] %v49_v19  ;;  %v51_v21 = vsel %vm43_vm3, %v39_v13, %v47_v18 }
   0xb   :  { %54 = vst [vmem:[%s115_s3 + $0x10] sm:$0xff] %v50_v20  ;;  %55 = vst [vmem:[%s115_s3 + $0x18] sm:$0xff] %v51_v21 }

// kernel: generator_forward.33
= control target key start
LH: loop header
LB: loop body
LE: loop exit
PB: predicated region body
PF: predicated region fallthrough
CT: control target
= control target key end

     0   :  { %s1478_s1 = inlined_call_operand.vmem [shape: bf16[1024,128], index: 1, kind: input, shape index: {}]   ;;  %s1479_s0 = inlined_call_operand.vmem [shape: bf16[32,1024], index: 0, kind: input, shape index: {}]   ;;  %s1480_s2 = inlined_call_operand.vmem [shape: f32[1,128], index: 2, kind: input, shape index: {}]   ;;  %s1481_s3 = inlined_call_operand.vmem [shape: f32[32,128], index: 3, kind: output, shape index: {0}]   ;;  %s1482_s4 = inlined_call_operand.vmem [shape: f32[8,128], index: 4, kind: output, shape index: {1}]   ;;  %s1483_s5 = inlined_call_operand.vmem [shape: f32[8,128], index: 5, kind: output, shape index: {2}]  }
   0x1   :  { %v1123_v0 = vld [vmem:[%s1478_s1 + $0x40] sm:$0xff]   ;;  %v1127_v4 = vld [vmem:[%s1478_s1 + $0x48] sm:$0xff]   ;;  %v1131_v8 = vld [vmem:[%s1478_s1 + $0x50] sm:$0xff]  }
   0x2   :  { %v1124_v1 = vld [vmem:[%s1478_s1 + $0xc0] sm:$0xff]   ;;  %1011 = vmatprep.subr.bf16.mxu0 %v1123_v0  ;;  %v1128_v5 = vld [vmem:[%s1478_s1 + $0xc8] sm:$0xff]   ;;  %v1132_v9 = vld [vmem:[%s1478_s1 + $0xd0] sm:$0xff]  }
   0x3   :  { %v1125_v2 = vld [vmem:[%s1478_s1] sm:$0xff]   ;;  %1039 = vmatprep.subr.bf16.mxu1 %v1124_v1  ;;  %v1129_v6 = vld [vmem:[%s1478_s1 + $0x8] sm:$0xff]   ;;  %v1133_v10 = vld [vmem:[%s1478_s1 + $0x10] sm:$0xff]  }
   0x4   :  { %v1126_v3 = vld [vmem:[%s1478_s1 + $0x80] sm:$0xff]   ;;  %1012 = vmatpush3.bf16.msra.mxu0 %v1125_v2  ;;  %v1130_v7 = vld [vmem:[%s1478_s1 + $0x88] sm:$0xff]   ;;  %v1134_v11 = vld [vmem:[%s1478_s1 + $0x90] sm:$0xff]  }
   0x5   :  { %1040 = vmatpush3.bf16.msra.mxu1 %v1126_v3  ;;  %1013 = vmatprep.subr.bf16.mxu0 %v1127_v4  ;;  %v1135_v12 = vld [vmem:[%s1478_s1 + $0x58] sm:$0xff]   ;;  %v1139_v16 = vld [vmem:[%s1478_s1 + $0x60] sm:$0xff]   ;;  %v1143_v20 = vld [vmem:[%s1478_s1 + $0x68] sm:$0xff]  }
   0x6   :  { %1041 = vmatprep.subr.bf16.mxu1 %v1128_v5  ;;  %v1136_v13 = vld [vmem:[%s1478_s1 + $0xd8] sm:$0xff]   ;;  %v1140_v17 = vld [vmem:[%s1478_s1 + $0xe0] sm:$0xff]   ;;  %v1144_v21 = vld [vmem:[%s1478_s1 + $0xe8] sm:$0xff]  }
   0x7   :  { %v1137_v14 = vld [vmem:[%s1478_s1 + $0x18] sm:$0xff]   ;;  %v1141_v18 = vld [vmem:[%s1478_s1 + $0x20] sm:$0xff]   ;;  %v1145_v22 = vld [vmem:[%s1478_s1 + $0x28] sm:$0xff]  }
   0x8   :  { %1014 = vmatpush3.bf16.msra.mxu0 %v1129_v6  ;;  %v1138_v15 = vld [vmem:[%s1478_s1 + $0x98] sm:$0xff]   ;;  %v1142_v19 = vld [vmem:[%s1478_s1 + $0xa0] sm:$0xff]   ;;  %v1146_v23 = vld [vmem:[%s1478_s1 + $0xa8] sm:$0xff]  }
   0x9   :  { %1042 = vmatpush3.bf16.msra.mxu1 %v1130_v7  ;;  %1015 = vmatprep.subr.bf16.mxu0 %v1131_v8  ;;  %v1147_v24 = vld [vmem:[%s1478_s1 + $0x70] sm:$0xff]   ;;  %v1151_v28 = vld [vmem:[%s1478_s1 + $0x78] sm:$0xff]   ;;  %v31_v32 = vld [vmem:[%s1479_s0] sm:$0xff] }
   0xa   :  { %1043 = vmatprep.subr.bf16.mxu1 %v1132_v9  ;;  %v1148_v25 = vld [vmem:[%s1478_s1 + $0xf0] sm:$0xff]   ;;  %v1152_v29 = vld [vmem:[%s1478_s1 + $0xf8] sm:$0xff]   ;;  %v35_v33 = vld [vmem:[%s1479_s0 + $0x20] sm:$0xff] }
   0xb   :  { %v1149_v26 = vld [vmem:[%s1478_s1 + $0x30] sm:$0xff]   ;;  %v1153_v30 = vld [vmem:[%s1478_s1 + $0x38] sm:$0xff]   ;;  %v32_v34 = vld [vmem:[%s1479_s0 + $0x8] sm:$0xff]  ;;  %v930_v35 = vcombine.low %v31_v32, %v35_v33  ;;  %v931_v36 = vcombine.high %v31_v32, %v35_v33 }
   0xc   :  { %1016 = vmatpush3.bf16.msra.mxu0 %v1133_v10  ;;  %v1150_v27 = vld [vmem:[%s1478_s1 + $0xb0] sm:$0xff]   ;;  %v1154_v31 = vld [vmem:[%s1478_s1 + $0xb8] sm:$0xff]   ;;  %v36_v37 = vld [vmem:[%s1479_s0 + $0x28] sm:$0xff] }
   0xd   :  { %1044 = vmatpush3.bf16.msra.mxu1 %v1134_v11  ;;  %1017 = vmatprep.subr.bf16.mxu0 %v1135_v12  ;;  %v932_v38 = vcombine.low %v32_v34, %v36_v37  ;;  %v933_v39 = vcombine.high %v32_v34, %v36_v37  ;;  %v1155_v40 = vld [vmem:[%s1478_s1 + $0x140] sm:$0xff]   ;;  %v1159_v44 = vld [vmem:[%s1478_s1 + $0x148] sm:$0xff]   ;;  %v1163_v48 = vld [vmem:[%s1478_s1 + $0x150] sm:$0xff]  }
   0xe   :  { %1045 = vmatprep.subr.bf16.mxu1 %v1136_v13  ;;  %671 = vmatprep.mubr.bf16.mxu0 %v931_v36  ;;  %v1156_v41 = vld [vmem:[%s1478_s1 + $0x1c0] sm:$0xff]   ;;  %v1160_v45 = vld [vmem:[%s1478_s1 + $0x1c8] sm:$0xff]   ;;  %v1164_v49 = vld [vmem:[%s1478_s1 + $0x1d0] sm:$0xff]  }
   0xf   :  { %720 = vmatprep.mubr.bf16.mxu1 %v933_v39  ;;  %v1157_v42 = vld [vmem:[%s1478_s1 + $0x100] sm:$0xff]   ;;  %v1161_v46 = vld [vmem:[%s1478_s1 + $0x108] sm:$0xff]   ;;  %v1165_v50 = vld [vmem:[%s1478_s1 + $0x110] sm:$0xff]  }
  0x10   :  { %1018 = vmatpush3.bf16.msra.mxu0 %v1137_v14  ;;  %v1158_v43 = vld [vmem:[%s1478_s1 + $0x180] sm:$0xff]   ;;  %v1162_v47 = vld [vmem:[%s1478_s1 + $0x188] sm:$0xff]   ;;  %v1166_v51 = vld [vmem:[%s1478_s1 + $0x190] sm:$0xff]  }
  0x11   :  { %1046 = vmatpush3.bf16.msra.mxu1 %v1138_v15  ;;  %1019 = vmatprep.subr.bf16.mxu0 %v1139_v16  ;;  %v1167_v52 = vld [vmem:[%s1478_s1 + $0x158] sm:$0xff]   ;;  %v1171_v56 = vld [vmem:[%s1478_s1 + $0x160] sm:$0xff]   ;;  %v40_v63 = vld [vmem:[%s1479_s0 + $0x48] sm:$0xff] }
  0x12   :  { %1047 = vmatprep.subr.bf16.mxu1 %v1140_v17  ;;  %v1168_v53 = vld [vmem:[%s1478_s1 + $0x1d8] sm:$0xff]   ;;  %v1172_v57 = vld [vmem:[%s1478_s1 + $0x1e0] sm:$0xff]   ;;  %v44_v0 = vld [vmem:[%s1479_s0 + $0x68] sm:$0xff] }
  0x13   :  { %v1169_v54 = vld [vmem:[%s1478_s1 + $0x118] sm:$0xff]   ;;  %v1173_v58 = vld [vmem:[%s1478_s1 + $0x120] sm:$0xff]   ;;  %v941_v2 = vcombine.high %v40_v63, %v44_v0  ;;  %v1175_v3 = vld [vmem:[%s1478_s1 + $0x168] sm:$0xff]   ;;  %v940_v4 = vcombine.low %v40_v63, %v44_v0 }
  0x14   :  { %1020 = vmatpush3.bf16.msra.mxu0 %v1141_v18  ;;  %v1170_v55 = vld [vmem:[%s1478_s1 + $0x198] sm:$0xff]   ;;  %v1174_v59 = vld [vmem:[%s1478_s1 + $0x1a0] sm:$0xff]   ;;  %v1176_v5 = vld [vmem:[%s1478_s1 + $0x1e8] sm:$0xff]  }
  0x15   :  { %1048 = vmatpush3.bf16.msra.mxu1 %v1142_v19  ;;  %1021 = vmatprep.subr.bf16.mxu0 %v1143_v20  ;;  %v39_v60 = vld [vmem:[%s1479_s0 + $0x40] sm:$0xff]  ;;  %v1177_v6 = vld [vmem:[%s1478_s1 + $0x128] sm:$0xff]   ;;  %v1179_v8 = vld [vmem:[%s1478_s1 + $0x170] sm:$0xff]  }
  0x16   :  { %1049 = vmatprep.subr.bf16.mxu1 %v1144_v21  ;;  %v43_v61 = vld [vmem:[%s1479_s0 + $0x60] sm:$0xff]  ;;  %v1178_v7 = vld [vmem:[%s1478_s1 + $0x1a8] sm:$0xff]   ;;  %v1180_v9 = vld [vmem:[%s1478_s1 + $0x1f0] sm:$0xff]  }
  0x17   :  { %v939_v62 = vcombine.high %v39_v60, %v43_v61  ;;  %v938_v1 = vcombine.low %v39_v60, %v43_v61  ;;  %v1181_v10 = vld [vmem:[%s1478_s1 + $0x130] sm:$0xff]   ;;  %v1183_v12 = vld [vmem:[%s1478_s1 + $0x178] sm:$0xff]  }
  0x18   :  { %1022 = vmatpush3.bf16.msra.mxu0 %v1145_v22  ;;  %v1182_v11 = vld [vmem:[%s1478_s1 + $0x1b0] sm:$0xff]   ;;  %v1184_v13 = vld [vmem:[%s1478_s1 + $0x1f8] sm:$0xff]  }
  0x19   :  { %1050 = vmatpush3.bf16.msra.mxu1 %v1146_v23  ;;  %1023 = vmatprep.subr.bf16.mxu0 %v1147_v24  ;;  %v1185_v14 = vld [vmem:[%s1478_s1 + $0x138] sm:$0xff]   ;;  %v33_v16 = vld [vmem:[%s1479_s0 + $0x10] sm:$0xff] }
  0x1a   :  { %1051 = vmatprep.subr.bf16.mxu1 %v1148_v25  ;;  %v1186_v15 = vld [vmem:[%s1478_s1 + $0x1b8] sm:$0xff]   ;;  %v37_v17 = vld [vmem:[%s1479_s0 + $0x30] sm:$0xff] }
  0x1b   :  { %v34_v18 = vld [vmem:[%s1479_s0 + $0x18] sm:$0xff]  ;;  %v934_v20 = vcombine.low %v33_v16, %v37_v17  ;;  %v935_v21 = vcombine.high %v33_v16, %v37_v17  ;;  %v41_v24 = vld [vmem:[%s1479_s0 + $0x50] sm:$0xff] }
  0x1c   :  { %1024 = vmatpush3.bf16.msra.mxu0 %v1149_v26  ;;  %v38_v19 = vld [vmem:[%s1479_s0 + $0x38] sm:$0xff]  ;;  %v45_v25 = vld [vmem:[%s1479_s0 + $0x70] sm:$0xff] }
  0x1d   :  { %1052 = vmatpush3.bf16.msra.mxu1 %v1150_v27  ;;  %1025 = vmatprep.subr.bf16.mxu0 %v1151_v28  ;;  %v936_v22 = vcombine.low %v34_v18, %v38_v19  ;;  %v937_v23 = vcombine.high %v34_v18, %v38_v19  ;;  %v42_v26 = vld [vmem:[%s1479_s0 + $0x58] sm:$0xff]  ;;  %v943_v27 = vcombine.high %v41_v24, %v45_v25 }
  0x1e   :  { %1053 = vmatprep.subr.bf16.mxu1 %v1152_v29  ;;  %v46_v28 = vld [vmem:[%s1479_s0 + $0x78] sm:$0xff] }
  0x1f   :  { %v945_v29 = vcombine.high %v42_v26, %v46_v28 }
  0x20   :  { %1026 = vmatpush3.bf16.msra.mxu0 %v1153_v30  ;;  %v942_v30 = vcombine.low %v41_v24, %v45_v25 }
  0x21   :  { %1054 = vmatpush3.bf16.msra.mxu1 %v1154_v31  ;;  %1067 = vmatprep.subr.bf16.mxu0 %v1155_v40  ;;  %v944_v31 = vcombine.low %v42_v26, %v46_v28 }
  0x22   :  { %1095 = vmatprep.subr.bf16.mxu1 %v1156_v41 }
  0x23   :  { %672 = vmatmul.mubr.bf16.vlgmr.msra.gmra.mrb[0].mxu0 %v930_v35 }
  0x24   :  { %721 = vmatmul.mubr.bf16.vlgmr.msra.gmra.mrb[0].mxu1 %v932_v38  ;;  %1068 = vmatpush3.bf16.msra.mxu0 %v1157_v42 }
  0x25   :  { %1096 = vmatpush3.bf16.msra.mxu1 %v1158_v43  ;;  %1069 = vmatprep.subr.bf16.mxu0 %v1159_v44 }
  0x26   :  { %1097 = vmatprep.subr.bf16.mxu1 %v1160_v45  ;;  %679 = vmatprep.mubr.bf16.mxu0 %v939_v62 }
  0x27   :  { %728 = vmatprep.mubr.bf16.mxu1 %v941_v2 }
  0x28   :  { %1070 = vmatpush3.bf16.msra.mxu0 %v1161_v46 }
  0x29   :  { %1098 = vmatpush3.bf16.msra.mxu1 %v1162_v47  ;;  %1071 = vmatprep.subr.bf16.mxu0 %v1163_v48 }
  0x2a   :  { %1099 = vmatprep.subr.bf16.mxu1 %v1164_v49 }
  0x2b   :  { %680 = vmatmul.mubr.bf16.gmra.mrb[4].mxu0 %v938_v1 }
  0x2c   :  { %1072 = vmatpush3.bf16.msra.mxu0 %v1165_v50  ;;  %729 = vmatmul.mubr.bf16.gmra.mrb[4].mxu1 %v940_v4 }
  0x2d   :  { %1100 = vmatpush3.bf16.msra.mxu1 %v1166_v51  ;;  %1073 = vmatprep.subr.bf16.mxu0 %v1167_v52 }
  0x2e   :  { %1101 = vmatprep.subr.bf16.mxu1 %v1168_v53  ;;  %769 = vmatprep.mubr.bf16.mxu0 %v935_v21 }
  0x2f   :  { %818 = vmatprep.mubr.bf16.mxu1 %v937_v23 }
  0x30   :  { %1074 = vmatpush3.bf16.msra.mxu0 %v1169_v54 }
  0x31   :  { %1102 = vmatpush3.bf16.msra.mxu1 %v1170_v55  ;;  %1075 = vmatprep.subr.bf16.mxu0 %v1171_v56 }
  0x32   :  { %1103 = vmatprep.subr.bf16.mxu1 %v1172_v57 }
  0x34   :  { %1076 = vmatpush3.bf16.msra.mxu0 %v1173_v58 }
  0x35   :  { %1104 = vmatpush3.bf16.msra.mxu1 %v1174_v59  ;;  %1077 = vmatprep.subr.bf16.mxu0 %v1175_v3 }
  0x36   :  { %1105 = vmatprep.subr.bf16.mxu1 %v1176_v5 }
  0x38   :  { %1078 = vmatpush3.bf16.msra.mxu0 %v1177_v6 }
  0x39   :  { %1106 = vmatpush3.bf16.msra.mxu1 %v1178_v7  ;;  %1079 = vmatprep.subr.bf16.mxu0 %v1179_v8 }
  0x3a   :  { %1107 = vmatprep.subr.bf16.mxu1 %v1180_v9  ;;  %v1010_v9 = vld [vmem:[%s1480_s2] ss:$0 sm:$0xff] }
  0x3c   :  { %1080 = vmatpush3.bf16.msra.mxu0 %v1181_v10 }
  0x3d   :  { %1108 = vmatpush3.bf16.msra.mxu1 %v1182_v11  ;;  %1081 = vmatprep.subr.bf16.mxu0 %v1183_v12 }
  0x3e   :  { %1109 = vmatprep.subr.bf16.mxu1 %v1184_v13 }
  0x40   :  { %1082 = vmatpush3.bf16.msra.mxu0 %v1185_v14 }
  0x41   :  { %1110 = vmatpush3.bf16.msra.mxu1 %v1186_v15 }
  0x43   :  { %770 = vmatmul.mubr.bf16.vlgmr.msra.gmra.mrb[8].mxu0 %v934_v20 }
  0x44   :  { %819 = vmatmul.mubr.bf16.vlgmr.msra.gmra.mrb[8].mxu1 %v936_v22  ;;  %777 = vmatprep.mubr.bf16.mxu0 %v943_v27 }
  0x45   :  { %826 = vmatprep.mubr.bf16.mxu1 %v945_v29 }
  0x4b   :  { %778 = vmatmul.mubr.bf16.gmra.mrb[12].mxu0 %v942_v30 }
  0x4c   :  { %827 = vmatmul.mubr.bf16.gmra.mrb[12].mxu1 %v944_v31 }
  0xf6   :  { %v1027_v32 = vpop.f32.mrb[0].mxu0 }
  0xf7   :  { %v1055_v33 = vpop.f32.mrb[0].mxu1  ;;  %v1028_v34 = vpop.f32.mrb[1].mxu0 }
  0xf8   :  { %v1029_v35 = vadd.f32 %v1028_v34, %v1027_v32  ;;  %v1056_v36 = vpop.f32.mrb[1].mxu1  ;;  %v1030_v37 = vpop.f32.mrb[2].mxu0 }
  0xf9   :  { %v1057_v38 = vadd.f32 %v1056_v36, %v1055_v33  ;;  %v1058_v39 = vpop.f32.mrb[2].mxu1  ;;  %v1031_v40 = vpop.f32.mrb[3].mxu0 }
  0xfa   :  { %v1032_v41 = vadd.f32 %v1031_v40, %v1030_v37  ;;  %v1059_v42 = vpop.f32.mrb[3].mxu1 }
  0xfb   :  { %v723_v43 = vadd.f32 %v1057_v38, %v1029_v35  ;;  %v1060_v44 = vadd.f32 %v1059_v42, %v1058_v39 }
  0xfd   :  { %v726_v45 = vadd.f32 %v1060_v44, %v1032_v41  ;;  %v865_v44 = vlaneseq }
  0xfe   :  { %v1033_v46 = vpop.f32.mrb[4].mxu0 }
  0xff   :  { %v1061_v47 = vpop.f32.mrb[4].mxu1  ;;  %v1034_v48 = vpop.f32.mrb[5].mxu0 }
 0x100   :  { %v1035_v49 = vadd.f32 %v1034_v48, %v1033_v46  ;;  %v1062_v50 = vpop.f32.mrb[5].mxu1  ;;  %v1036_v51 = vpop.f32.mrb[6].mxu0 }
 0x101   :  { %v1063_v52 = vadd.f32 %v1062_v50, %v1061_v47  ;;  %v1064_v53 = vpop.f32.mrb[6].mxu1  ;;  %v1037_v54 = vpop.f32.mrb[7].mxu0 }
 0x102   :  { %v1038_v55 = vadd.f32 %v1037_v54, %v1036_v51  ;;  %v1065_v56 = vpop.f32.mrb[7].mxu1 }
 0x103   :  { %v731_v57 = vadd.f32 %v1063_v52, %v1035_v49  ;;  %v1066_v58 = vadd.f32 %v1065_v56, %v1064_v53  ;;  %v866_v49 = vshrl.u32 %v865_v44, 7 }
 0x105   :  { %v734_v59 = vadd.f32 %v1066_v58, %v1038_v55  ;;  %vm913_vm0 = vcmp.eq.s32.totalorder %v866_v49, 0 }
 0x116   :  { %v1083_v60 = vpop.f32.mrb[8].mxu0 }
 0x117   :  { %v1111_v61 = vpop.f32.mrb[8].mxu1  ;;  %v1084_v62 = vpop.f32.mrb[9].mxu0 }
 0x118   :  { %v1112_v63 = vpop.f32.mrb[9].mxu1  ;;  %v1085_v0 = vadd.f32 %v1084_v62, %v1083_v60  ;;  %v1086_v2 = vpop.f32.mrb[10].mxu0 }
 0x119   :  { %v1113_v1 = vadd.f32 %v1112_v63, %v1111_v61  ;;  %v1114_v3 = vpop.f32.mrb[10].mxu1  ;;  %v1087_v4 = vpop.f32.mrb[11].mxu0 }
 0x11a   :  { %v1115_v5 = vpop.f32.mrb[11].mxu1  ;;  %v772_v6 = vadd.f32 %v1085_v0, %v723_v43  ;;  %v1088_v7 = vadd.f32 %v1087_v4, %v1086_v2 }
 0x11b   :  { %v1116_v8 = vadd.f32 %v1115_v5, %v1114_v3 }
 0x11c   :  { %v821_v10 = vadd.f32 %v1113_v1, %v772_v6  ;;  %v775_v11 = vadd.f32 %v1088_v7, %v726_v45 }
 0x11e   :  { %v857_v12 = vadd.f32 %v1010_v9, %v821_v10  ;;  %v824_v13 = vadd.f32 %v1116_v8, %v775_v11  ;;  %v1089_v14 = vpop.f32.mrb[12].mxu0 }
 0x11f   :  { %v1117_v15 = vpop.f32.mrb[12].mxu1  ;;  %v1090_v16 = vpop.f32.mrb[13].mxu0 }
 0x120   :  { %v1118_v17 = vpop.f32.mrb[13].mxu1  ;;  %861 = vst [vmem:[%s1481_s3] sm:$0xff] %v857_v12  ;;  %v858_v18 = vadd.f32 %v1010_v9, %v824_v13  ;;  %v1091_v19 = vadd.f32 %v1090_v16, %v1089_v14  ;;  %v1092_v21 = vpop.f32.mrb[14].mxu0  ;;  %v900_v23 = vmul.f32 %v857_v12, %v857_v12 }
 0x121   :  { %v1119_v20 = vadd.f32 %v1118_v17, %v1117_v15  ;;  %v1120_v22 = vpop.f32.mrb[14].mxu1  ;;  %v1093_v24 = vpop.f32.mrb[15].mxu0 }
 0x122   :  { %v1121_v25 = vpop.f32.mrb[15].mxu1  ;;  %862 = vst [vmem:[%s1481_s3 + $0x8] sm:$0xff] %v858_v18  ;;  %v891_v26 = vadd.f32 %v858_v18, %v857_v12  ;;  %v901_v27 = vmul.f32 %v858_v18, %v858_v18  ;;  %v780_v28 = vadd.f32 %v1091_v19, %v731_v57  ;;  %v1094_v29 = vadd.f32 %v1093_v24, %v1092_v21 }
 0x123   :  { %v1122_v30 = vadd.f32 %v1121_v25, %v1120_v22 }
 0x124   :  { %v904_v31 = vadd.f32 %v901_v27, %v900_v23  ;;  %v829_v32 = vadd.f32 %v1119_v20, %v780_v28  ;;  %v783_v33 = vadd.f32 %v1094_v29, %v734_v59 }
 0x126   :  { %v859_v34 = vadd.f32 %v1010_v9, %v829_v32  ;;  %v832_v35 = vadd.f32 %v1122_v30, %v783_v33 }
 0x128   :  { %863 = vst [vmem:[%s1481_s3 + $0x10] sm:$0xff] %v859_v34  ;;  %v892_v36 = vadd.f32 %v891_v26, %v859_v34  ;;  %v902_v37 = vmul.f32 %v859_v34, %v859_v34  ;;  %v860_v38 = vadd.f32 %v1010_v9, %v832_v35 }
 0x12a   :  { %v905_v39 = vadd.f32 %v904_v31, %v902_v37  ;;  %864 = vst [vmem:[%s1481_s3 + $0x18] sm:$0xff] %v860_v38  ;;  %v893_v40 = vadd.f32 %v892_v36, %v860_v38  ;;  %v903_v41 = vmul.f32 %v860_v38, %v860_v38 }
 0x12c   :  { %v894_v42 = vrot.slane %v893_v40, 4  ;;  %v906_v43 = vadd.f32 %v905_v39, %v903_v41 }
 0x12e   :  { %v895_v45 = vadd.f32 %v894_v42, %v893_v40  ;;  %v907_v46 = vrot.slane %v906_v43, 4 }
 0x130   :  { %v896_v47 = vrot.slane %v895_v45, 2  ;;  %v908_v48 = vadd.f32 %v907_v46, %v906_v43 }
 0x132   :  { %v897_v50 = vadd.f32 %v896_v47, %v895_v45  ;;  %v909_v51 = vrot.slane %v908_v48, 2 }
 0x134   :  { %v898_v52 = vrot.slane %v897_v50, 1  ;;  %v910_v53 = vadd.f32 %v909_v51, %v908_v48 }
 0x136   :  { %v899_v54 = vadd.f32 %v898_v52, %v897_v50  ;;  %v911_v55 = vrot.slane %v910_v53, 1 }
 0x138   :  { %v912_v56 = vadd.f32 %v911_v55, %v910_v53  ;;  %v914_v57 = vsel %vm913_vm0, %v899_v54, 0.0 }
 0x139   :  { %915 = vst [vmem:[%s1482_s4] sm:$0xff] %v914_v57 }
 0x13a   :  { %v916_v58 = vsel %vm913_vm0, %v912_v56, 0.0 }
 0x13b   :  { %917 = vst [vmem:[%s1483_s5] sm:$0xff] %v916_v58 }

// kernel: generator_forward.36
= control target key start
LH: loop header
LB: loop body
LE: loop exit
PB: predicated region body
PF: predicated region fallthrough
CT: control target
= control target key end

     0   :  { %v18_v0 = vlaneseq  ;;  %s94_s1 = inlined_call_operand.vmem [shape: f32[1,256], index: 1, kind: input, shape index: {}]   ;;  %s95_s2 = inlined_call_operand.vmem [shape: f32[1,256], index: 2, kind: input, shape index: {}]   ;;  %s96_s0 = inlined_call_operand.vmem [shape: f32[8,256], index: 0, kind: input, shape index: {}]   ;;  %s97_s3 = inlined_call_operand.vmem [shape: f32[8,256], index: 3, kind: output, shape index: {}]  }
   0x1   :  { %v16_v2 = vld [vmem:[%s94_s1] sm:$0x3]  ;;  %v15_v7 = vld [vmem:[%s96_s0 + $0x8] sm:$0xff] }
   0x2   :  { %v19_v1 = vshrl.u32 %v18_v0, 7  ;;  %v30_v3 = vld [vmem:[%s95_s2] sm:$0x3] }
   0x3   :  { %v14_v6 = vld [vmem:[%s96_s0] sm:$0xff] }
   0x4   :  { %v20_v4 = vsub.s32 0, %v19_v1  ;;  %v24_v5 = vsub.s32 1, %v19_v1 }
   0x6   :  { %v21_v8 = vrot.slane %v16_v2, %v20_v4  ;;  %v35_v9 = vrot.slane %v30_v3, %v20_v4  ;;  %v25_v10 = vrot.slane %v16_v2, %v24_v5  ;;  %v39_v11 = vrot.slane %v30_v3, %v24_v5 }
   0x8   :  { %v28_v12 = vmul.f32 %v21_v8, %v14_v6  ;;  %v29_v13 = vmul.f32 %v25_v10, %v15_v7 }
   0xa   :  { %v42_v14 = vadd.f32 %v35_v9, %v28_v12  ;;  %v43_v15 = vadd.f32 %v39_v11, %v29_v13 }
   0xc   :  { %vm44_vm0 = vcmp.gt.f32.partialorder %v42_v14, 0.0  ;;  %v46_v16 = vmul.f32 0.2, %v42_v14  ;;  %vm45_vm1 = vcmp.gt.f32.partialorder %v43_v15, 0.0  ;;  %v47_v17 = vmul.f32 0.2, %v43_v15 }
   0xe   :  { %v48_v18 = vsel %vm44_vm0, %v42_v14, %v46_v16  ;;  %v49_v19 = vsel %vm45_vm1, %v43_v15, %v47_v17 }
   0xf   :  { %50 = vst [vmem:[%s97_s3] sm:$0xff] %v48_v18  ;;  %51 = vst [vmem:[%s97_s3 + $0x8] sm:$0xff] %v49_v19 }

// kernel: generator_forward.35
= control target key start
LH: loop header
LB: loop body
LE: loop exit
PB: predicated region body
PF: predicated region fallthrough
CT: control target
= control target key end

     0   :  { %s3590_s1 = inlined_call_operand.vmem [shape: bf16[2048,256], index: 1, kind: input, shape index: {}]   ;;  %s3591_s0 = inlined_call_operand.vmem [shape: bf16[8,2048], index: 0, kind: input, shape index: {}]   ;;  %s3592_s2 = inlined_call_operand.vmem [shape: f32[1,256], index: 2, kind: input, shape index: {}]   ;;  %s3593_s3 = inlined_call_operand.vmem [shape: f32[8,256], index: 3, kind: output, shape index: {0}]   ;;  %s3594_s4 = inlined_call_operand.vmem [shape: f32[8,256], index: 4, kind: output, shape index: {1}]   ;;  %s3595_s5 = inlined_call_operand.vmem [shape: f32[8,256], index: 5, kind: output, shape index: {2}]  }
   0x1   :  { %v2307_v0 = vld [vmem:[%s3590_s1 + $0x4] ss:$8 sps:$4 sm:$0xff]   ;;  %v2311_v2 = vld [vmem:[%s3590_s1] ss:$8 sps:$4 sm:$0xff]   ;;  %v2313_v4 = vld [vmem:[%s3590_s1 + $0x14] ss:$8 sps:$4 sm:$0xff]  }
   0x2   :  { %v2309_v1 = vld [vmem:[%s3590_s1 + $0x104] ss:$8 sps:$4 sm:$0xff]   ;;  %1626 = vmatprep.subr.bf16.mxu0 %v2307_v0  ;;  %v2312_v3 = vld [vmem:[%s3590_s1 + $0x100] ss:$8 sps:$4 sm:$0xff]   ;;  %v2315_v5 = vld [vmem:[%s3590_s1 + $0x114] ss:$8 sps:$4 sm:$0xff]  }
   0x3   :  { %1667 = vmatprep.subr.bf16.mxu1 %v2309_v1  ;;  %1627 = vmatpush1.bf16.msra.mxu0 %v2311_v2  ;;  %v2317_v6 = vld [vmem:[%s3590_s1 + $0x10] ss:$8 sps:$4 sm:$0xff]   ;;  %v2319_v8 = vld [vmem:[%s3590_s1 + $0x24] ss:$8 sps:$4 sm:$0xff]   ;;  %v2323_v10 = vld [vmem:[%s3590_s1 + $0x20] ss:$8 sps:$4 sm:$0xff]  }
   0x4   :  { %1668 = vmatpush1.bf16.msra.mxu1 %v2312_v3  ;;  %1628 = vmatprep.subr.bf16.mxu0 %v2313_v4  ;;  %v2318_v7 = vld [vmem:[%s3590_s1 + $0x110] ss:$8 sps:$4 sm:$0xff]   ;;  %v2321_v9 = vld [vmem:[%s3590_s1 + $0x124] ss:$8 sps:$4 sm:$0xff]   ;;  %v2324_v11 = vld [vmem:[%s3590_s1 + $0x120] ss:$8 sps:$4 sm:$0xff]  }
   0x5   :  { %1669 = vmatprep.subr.bf16.mxu1 %v2315_v5  ;;  %v2325_v12 = vld [vmem:[%s3590_s1 + $0x34] ss:$8 sps:$4 sm:$0xff]   ;;  %v2329_v14 = vld [vmem:[%s3590_s1 + $0x30] ss:$8 sps:$4 sm:$0xff]   ;;  %v2331_v16 = vld [vmem:[%s3590_s1 + $0x44] ss:$8 sps:$4 sm:$0xff]  }
   0x6   :  { %v2327_v13 = vld [vmem:[%s3590_s1 + $0x134] ss:$8 sps:$4 sm:$0xff]   ;;  %v2330_v15 = vld [vmem:[%s3590_s1 + $0x130] ss:$8 sps:$4 sm:$0xff]   ;;  %v2333_v17 = vld [vmem:[%s3590_s1 + $0x144] ss:$8 sps:$4 sm:$0xff]  }
   0x7   :  { %1629 = vmatpush1.bf16.msra.mxu0 %v2317_v6  ;;  %v2335_v18 = vld [vmem:[%s3590_s1 + $0x40] ss:$8 sps:$4 sm:$0xff]   ;;  %v2337_v20 = vld [vmem:[%s3590_s1 + $0x54] ss:$8 sps:$4 sm:$0xff]   ;;  %v2341_v22 = vld [vmem:[%s3590_s1 + $0x50] ss:$8 sps:$4 sm:$0xff]  }
   0x8   :  { %1670 = vmatpush1.bf16.msra.mxu1 %v2318_v7  ;;  %1630 = vmatprep.subr.bf16.mxu0 %v2319_v8  ;;  %v2336_v19 = vld [vmem:[%s3590_s1 + $0x140] ss:$8 sps:$4 sm:$0xff]   ;;  %v2339_v21 = vld [vmem:[%s3590_s1 + $0x154] ss:$8 sps:$4 sm:$0xff]   ;;  %v2342_v23 = vld [vmem:[%s3590_s1 + $0x150] ss:$8 sps:$4 sm:$0xff]  }
   0x9   :  { %1671 = vmatprep.subr.bf16.mxu1 %v2321_v9  ;;  %v2343_v24 = vld [vmem:[%s3590_s1 + $0x64] ss:$8 sps:$4 sm:$0xff]   ;;  %v2347_v26 = vld [vmem:[%s3590_s1 + $0x60] ss:$8 sps:$4 sm:$0xff]   ;;  %v2349_v28 = vld [vmem:[%s3590_s1 + $0x74] ss:$8 sps:$4 sm:$0xff]  }
   0xa   :  { %v2345_v25 = vld [vmem:[%s3590_s1 + $0x164] ss:$8 sps:$4 sm:$0xff]   ;;  %v2348_v27 = vld [vmem:[%s3590_s1 + $0x160] ss:$8 sps:$4 sm:$0xff]   ;;  %v2351_v29 = vld [vmem:[%s3590_s1 + $0x174] ss:$8 sps:$4 sm:$0xff]  }
   0xb   :  { %1631 = vmatpush1.bf16.msra.mxu0 %v2323_v10  ;;  %v2353_v30 = vld [vmem:[%s3590_s1 + $0x70] ss:$8 sps:$4 sm:$0xff]   ;;  %v2355_v32 = vld [vmem:[%s3590_s1 + $0x84] ss:$8 sps:$4 sm:$0xff]   ;;  %v2359_v34 = vld [vmem:[%s3590_s1 + $0x80] ss:$8 sps:$4 sm:$0xff]  }
   0xc   :  { %1672 = vmatpush1.bf16.msra.mxu1 %v2324_v11  ;;  %1632 = vmatprep.subr.bf16.mxu0 %v2325_v12  ;;  %v2354_v31 = vld [vmem:[%s3590_s1 + $0x170] ss:$8 sps:$4 sm:$0xff]   ;;  %v2357_v33 = vld [vmem:[%s3590_s1 + $0x184] ss:$8 sps:$4 sm:$0xff]   ;;  %v2360_v35 = vld [vmem:[%s3590_s1 + $0x180] ss:$8 sps:$4 sm:$0xff]  }
   0xd   :  { %1673 = vmatprep.subr.bf16.mxu1 %v2327_v13  ;;  %v2361_v36 = vld [vmem:[%s3590_s1 + $0x94] ss:$8 sps:$4 sm:$0xff]   ;;  %v2365_v38 = vld [vmem:[%s3590_s1 + $0x90] ss:$8 sps:$4 sm:$0xff]   ;;  %v2367_v40 = vld [vmem:[%s3590_s1 + $0xa4] ss:$8 sps:$4 sm:$0xff]  }
   0xe   :  { %v2363_v37 = vld [vmem:[%s3590_s1 + $0x194] ss:$8 sps:$4 sm:$0xff]   ;;  %v2366_v39 = vld [vmem:[%s3590_s1 + $0x190] ss:$8 sps:$4 sm:$0xff]   ;;  %v2369_v41 = vld [vmem:[%s3590_s1 + $0x1a4] ss:$8 sps:$4 sm:$0xff]  }
   0xf   :  { %1633 = vmatpush1.bf16.msra.mxu0 %v2329_v14  ;;  %v2371_v42 = vld [vmem:[%s3590_s1 + $0xa0] ss:$8 sps:$4 sm:$0xff]   ;;  %v2373_v44 = vld [vmem:[%s3590_s1 + $0xb4] ss:$8 sps:$4 sm:$0xff]   ;;  %v2377_v49 = vld [vmem:[%s3590_s1 + $0xb0] ss:$8 sps:$4 sm:$0xff]  }
  0x10   :  { %1674 = vmatpush1.bf16.msra.mxu1 %v2330_v15  ;;  %1634 = vmatprep.subr.bf16.mxu0 %v2331_v16  ;;  %v2372_v43 = vld [vmem:[%s3590_s1 + $0x1a0] ss:$8 sps:$4 sm:$0xff]   ;;  %v2375_v45 = vld [vmem:[%s3590_s1 + $0x1b4] ss:$8 sps:$4 sm:$0xff]   ;;  %v2378_v50 = vld [vmem:[%s3590_s1 + $0x1b0] ss:$8 sps:$4 sm:$0xff]  }
  0x11   :  { %1675 = vmatprep.subr.bf16.mxu1 %v2333_v17  ;;  %v26_v46 = vld [vmem:[%s3591_s0] sm:$0xff]  ;;  %v27_v48 = vld [vmem:[%s3591_s0 + $0x8] sm:$0xff]  ;;  %v2385_v56 = vld [vmem:[%s3590_s1 + $0xd4] ss:$8 sps:$4 sm:$0xff]  }
  0x12   :  { %v2036_v47 = vcombine.high %v26_v46, %v26_v46  ;;  %v2038_v51 = vcombine.high %v27_v48, %v27_v48  ;;  %v2379_v52 = vld [vmem:[%s3590_s1 + $0xc4] ss:$8 sps:$4 sm:$0xff]   ;;  %v2383_v54 = vld [vmem:[%s3590_s1 + $0xc0] ss:$8 sps:$4 sm:$0xff]   ;;  %v2387_v57 = vld [vmem:[%s3590_s1 + $0x1d4] ss:$8 sps:$4 sm:$0xff]   ;;  %v2035_v6 = vcombine.low %v26_v46, %v26_v46  ;;  %v2037_v7 = vcombine.low %v27_v48, %v27_v48 }
  0x13   :  { %1635 = vmatpush1.bf16.msra.mxu0 %v2335_v18  ;;  %v2381_v53 = vld [vmem:[%s3590_s1 + $0x1c4] ss:$8 sps:$4 sm:$0xff]   ;;  %v2384_v55 = vld [vmem:[%s3590_s1 + $0x1c0] ss:$8 sps:$4 sm:$0xff]   ;;  %v2389_v58 = vld [vmem:[%s3590_s1 + $0xd0] ss:$8 sps:$4 sm:$0xff]  }
  0x14   :  { %1676 = vmatpush1.bf16.msra.mxu1 %v2336_v19  ;;  %1636 = vmatprep.subr.bf16.mxu0 %v2337_v20  ;;  %v2390_v59 = vld [vmem:[%s3590_s1 + $0x1d0] ss:$8 sps:$4 sm:$0xff]   ;;  %v2391_v60 = vld [vmem:[%s3590_s1 + $0xe4] ss:$8 sps:$4 sm:$0xff]   ;;  %v2395_v62 = vld [vmem:[%s3590_s1 + $0xe0] ss:$8 sps:$4 sm:$0xff]  }
  0x15   :  { %1677 = vmatprep.subr.bf16.mxu1 %v2339_v21  ;;  %1658 = vmatprep.mubr.bf16.mxu0 %v2036_v47  ;;  %v2393_v61 = vld [vmem:[%s3590_s1 + $0x1e4] ss:$8 sps:$4 sm:$0xff]   ;;  %v2396_v63 = vld [vmem:[%s3590_s1 + $0x1e0] ss:$8 sps:$4 sm:$0xff]   ;;  %v2397_v0 = vld [vmem:[%s3590_s1 + $0xf4] ss:$8 sps:$4 sm:$0xff]  }
  0x16   :  { %1699 = vmatprep.mubr.bf16.mxu1 %v2038_v51  ;;  %v2399_v1 = vld [vmem:[%s3590_s1 + $0x1f4] ss:$8 sps:$4 sm:$0xff]   ;;  %v2401_v2 = vld [vmem:[%s3590_s1 + $0xf0] ss:$8 sps:$4 sm:$0xff]   ;;  %v2409_v4 = vld [vmem:[%s3590_s1 + $0x204] ss:$8 sps:$4 sm:$0xff]  }
  0x17   :  { %1637 = vmatpush1.bf16.msra.mxu0 %v2341_v22  ;;  %v2402_v3 = vld [vmem:[%s3590_s1 + $0x1f0] ss:$8 sps:$4 sm:$0xff]   ;;  %v2412_v5 = vld [vmem:[%s3590_s1 + $0x304] ss:$8 sps:$4 sm:$0xff]   ;;  %v2407_v8 = vld [vmem:[%s3590_s1 + $0x200] ss:$8 sps:$4 sm:$0xff]  }
  0x18   :  { %1678 = vmatpush1.bf16.msra.mxu1 %v2342_v23  ;;  %1638 = vmatprep.subr.bf16.mxu0 %v2343_v24  ;;  %v2410_v9 = vld [vmem:[%s3590_s1 + $0x300] ss:$8 sps:$4 sm:$0xff]   ;;  %v2415_v10 = vld [vmem:[%s3590_s1 + $0x214] ss:$8 sps:$4 sm:$0xff]   ;;  %v2413_v12 = vld [vmem:[%s3590_s1 + $0x210] ss:$8 sps:$4 sm:$0xff]  }
  0x19   :  { %1679 = vmatprep.subr.bf16.mxu1 %v2345_v25  ;;  %v2418_v11 = vld [vmem:[%s3590_s1 + $0x314] ss:$8 sps:$4 sm:$0xff]   ;;  %v2416_v13 = vld [vmem:[%s3590_s1 + $0x310] ss:$8 sps:$4 sm:$0xff]   ;;  %v2421_v14 = vld [vmem:[%s3590_s1 + $0x224] ss:$8 sps:$4 sm:$0xff]  }
  0x1a   :  { %v2424_v15 = vld [vmem:[%s3590_s1 + $0x324] ss:$8 sps:$4 sm:$0xff]   ;;  %v2419_v16 = vld [vmem:[%s3590_s1 + $0x220] ss:$8 sps:$4 sm:$0xff]   ;;  %v2427_v18 = vld [vmem:[%s3590_s1 + $0x234] ss:$8 sps:$4 sm:$0xff]  }
  0x1b   :  { %1639 = vmatpush1.bf16.msra.mxu0 %v2347_v26  ;;  %v2422_v17 = vld [vmem:[%s3590_s1 + $0x320] ss:$8 sps:$4 sm:$0xff]   ;;  %v2430_v19 = vld [vmem:[%s3590_s1 + $0x334] ss:$8 sps:$4 sm:$0xff]   ;;  %v2425_v20 = vld [vmem:[%s3590_s1 + $0x230] ss:$8 sps:$4 sm:$0xff]  }
  0x1c   :  { %1680 = vmatpush1.bf16.msra.mxu1 %v2348_v27  ;;  %1640 = vmatprep.subr.bf16.mxu0 %v2349_v28  ;;  %v2428_v21 = vld [vmem:[%s3590_s1 + $0x330] ss:$8 sps:$4 sm:$0xff]   ;;  %v2433_v22 = vld [vmem:[%s3590_s1 + $0x244] ss:$8 sps:$4 sm:$0xff]   ;;  %v2431_v24 = vld [vmem:[%s3590_s1 + $0x240] ss:$8 sps:$4 sm:$0xff]  }
  0x1d   :  { %1681 = vmatprep.subr.bf16.mxu1 %v2351_v29  ;;  %v2436_v23 = vld [vmem:[%s3590_s1 + $0x344] ss:$8 sps:$4 sm:$0xff]   ;;  %v2434_v25 = vld [vmem:[%s3590_s1 + $0x340] ss:$8 sps:$4 sm:$0xff]   ;;  %v2439_v26 = vld [vmem:[%s3590_s1 + $0x254] ss:$8 sps:$4 sm:$0xff]  }
  0x1e   :  { %v2442_v27 = vld [vmem:[%s3590_s1 + $0x354] ss:$8 sps:$4 sm:$0xff]   ;;  %v2437_v28 = vld [vmem:[%s3590_s1 + $0x250] ss:$8 sps:$4 sm:$0xff]   ;;  %v2472_v51 = vld [vmem:[%s3590_s1 + $0x3a4] ss:$8 sps:$4 sm:$0xff]  }
  0x1f   :  { %1641 = vmatpush1.bf16.msra.mxu0 %v2353_v30  ;;  %v2440_v29 = vld [vmem:[%s3590_s1 + $0x350] ss:$8 sps:$4 sm:$0xff]   ;;  %v2445_v30 = vld [vmem:[%s3590_s1 + $0x264] ss:$8 sps:$4 sm:$0xff]   ;;  %v2463_v46 = vld [vmem:[%s3590_s1 + $0x294] ss:$8 sps:$4 sm:$0xff]  }
  0x20   :  { %1682 = vmatpush1.bf16.msra.mxu1 %v2354_v31  ;;  %1642 = vmatprep.subr.bf16.mxu0 %v2355_v32  ;;  %v2448_v31 = vld [vmem:[%s3590_s1 + $0x364] ss:$8 sps:$4 sm:$0xff]   ;;  %v3016_v32 = vld [vmem:[%s3591_s0 + $0x10] sm:$0xff] }
  0x21   :  { %1683 = vmatprep.subr.bf16.mxu1 %v2357_v33  ;;  %v3021_v33 = vld [vmem:[%s3591_s0 + $0x18] sm:$0xff] }
  0x22   :  { %v2466_v47 = vld [vmem:[%s3590_s1 + $0x394] ss:$8 sps:$4 sm:$0xff]   ;;  %v2461_v48 = vld [vmem:[%s3590_s1 + $0x290] ss:$8 sps:$4 sm:$0xff]  }
  0x23   :  { %1643 = vmatpush1.bf16.msra.mxu0 %v2359_v34  ;;  %v2443_v34 = vld [vmem:[%s3590_s1 + $0x260] ss:$8 sps:$4 sm:$0xff]  }
  0x24   :  { %1684 = vmatpush1.bf16.msra.mxu1 %v2360_v35  ;;  %1644 = vmatprep.subr.bf16.mxu0 %v2361_v36  ;;  %v2446_v35 = vld [vmem:[%s3590_s1 + $0x360] ss:$8 sps:$4 sm:$0xff]   ;;  %v2040_v36 = vcombine.high %v3016_v32, %v3016_v32 }
  0x25   :  { %1685 = vmatprep.subr.bf16.mxu1 %v2363_v37  ;;  %v2042_v37 = vcombine.high %v3021_v33, %v3021_v33 }
  0x27   :  { %1645 = vmatpush1.bf16.msra.mxu0 %v2365_v38  ;;  %v2451_v38 = vld [vmem:[%s3590_s1 + $0x274] ss:$8 sps:$4 sm:$0xff]  }
  0x28   :  { %1686 = vmatpush1.bf16.msra.mxu1 %v2366_v39  ;;  %1646 = vmatprep.subr.bf16.mxu0 %v2367_v40  ;;  %v2454_v39 = vld [vmem:[%s3590_s1 + $0x374] ss:$8 sps:$4 sm:$0xff]   ;;  %v2449_v40 = vld [vmem:[%s3590_s1 + $0x270] ss:$8 sps:$4 sm:$0xff]  }
  0x29   :  { %1687 = vmatprep.subr.bf16.mxu1 %v2369_v41  ;;  %v2452_v41 = vld [vmem:[%s3590_s1 + $0x370] ss:$8 sps:$4 sm:$0xff]  }
  0x2b   :  { %1647 = vmatpush1.bf16.msra.mxu0 %v2371_v42  ;;  %v2457_v42 = vld [vmem:[%s3590_s1 + $0x284] ss:$8 sps:$4 sm:$0xff]  }
  0x2c   :  { %1688 = vmatpush1.bf16.msra.mxu1 %v2372_v43  ;;  %1648 = vmatprep.subr.bf16.mxu0 %v2373_v44  ;;  %v2460_v43 = vld [vmem:[%s3590_s1 + $0x384] ss:$8 sps:$4 sm:$0xff]   ;;  %v2455_v44 = vld [vmem:[%s3590_s1 + $0x280] ss:$8 sps:$4 sm:$0xff]  }
  0x2d   :  { %1689 = vmatprep.subr.bf16.mxu1 %v2375_v45  ;;  %v2458_v45 = vld [vmem:[%s3590_s1 + $0x380] ss:$8 sps:$4 sm:$0xff]  }
  0x2f   :  { %1649 = vmatpush1.bf16.msra.mxu0 %v2377_v49  ;;  %v2464_v49 = vld [vmem:[%s3590_s1 + $0x390] ss:$8 sps:$4 sm:$0xff]  }
  0x30   :  { %1690 = vmatpush1.bf16.msra.mxu1 %v2378_v50  ;;  %1650 = vmatprep.subr.bf16.mxu0 %v2379_v52  ;;  %v2469_v50 = vld [vmem:[%s3590_s1 + $0x2a4] ss:$8 sps:$4 sm:$0xff]   ;;  %v2467_v52 = vld [vmem:[%s3590_s1 + $0x2a0] ss:$8 sps:$4 sm:$0xff]  }
  0x31   :  { %1691 = vmatprep.subr.bf16.mxu1 %v2381_v53  ;;  %v2470_v53 = vld [vmem:[%s3590_s1 + $0x3a0] ss:$8 sps:$4 sm:$0xff]  }
  0x33   :  { %1651 = vmatpush1.bf16.msra.mxu0 %v2383_v54  ;;  %v2475_v54 = vld [vmem:[%s3590_s1 + $0x2b4] ss:$8 sps:$4 sm:$0xff]  }
  0x34   :  { %1692 = vmatpush1.bf16.msra.mxu1 %v2384_v55  ;;  %1652 = vmatprep.subr.bf16.mxu0 %v2385_v56  ;;  %v2478_v55 = vld [vmem:[%s3590_s1 + $0x3b4] ss:$8 sps:$4 sm:$0xff]   ;;  %v2473_v56 = vld [vmem:[%s3590_s1 + $0x2b0] ss:$8 sps:$4 sm:$0xff]  }
  0x35   :  { %1693 = vmatprep.subr.bf16.mxu1 %v2387_v57  ;;  %v2476_v57 = vld [vmem:[%s3590_s1 + $0x3b0] ss:$8 sps:$4 sm:$0xff]  }
  0x37   :  { %1653 = vmatpush1.bf16.msra.mxu0 %v2389_v58  ;;  %v2481_v58 = vld [vmem:[%s3590_s1 + $0x2c4] ss:$8 sps:$4 sm:$0xff]  }
  0x38   :  { %1694 = vmatpush1.bf16.msra.mxu1 %v2390_v59  ;;  %1654 = vmatprep.subr.bf16.mxu0 %v2391_v60  ;;  %v2484_v59 = vld [vmem:[%s3590_s1 + $0x3c4] ss:$8 sps:$4 sm:$0xff]   ;;  %v2479_v60 = vld [vmem:[%s3590_s1 + $0x2c0] ss:$8 sps:$4 sm:$0xff]  }
  0x39   :  { %1695 = vmatprep.subr.bf16.mxu1 %v2393_v61  ;;  %v2482_v61 = vld [vmem:[%s3590_s1 + $0x3c0] ss:$8 sps:$4 sm:$0xff]  }
  0x3b   :  { %1655 = vmatpush1.bf16.msra.mxu0 %v2395_v62  ;;  %v2487_v62 = vld [vmem:[%s3590_s1 + $0x2d4] ss:$8 sps:$4 sm:$0xff]  }
  0x3c   :  { %1696 = vmatpush1.bf16.msra.mxu1 %v2396_v63  ;;  %1656 = vmatprep.subr.bf16.mxu0 %v2397_v0  ;;  %v2490_v63 = vld [vmem:[%s3590_s1 + $0x3d4] ss:$8 sps:$4 sm:$0xff]   ;;  %v2485_v0 = vld [vmem:[%s3590_s1 + $0x2d0] ss:$8 sps:$4 sm:$0xff]  }
  0x3d   :  { %1697 = vmatprep.subr.bf16.mxu1 %v2399_v1  ;;  %v2488_v1 = vld [vmem:[%s3590_s1 + $0x3d0] ss:$8 sps:$4 sm:$0xff]  }
  0x3f   :  { %1657 = vmatpush1.bf16.msra.mxu0 %v2401_v2  ;;  %v2493_v2 = vld [vmem:[%s3590_s1 + $0x2e4] ss:$8 sps:$4 sm:$0xff]  }
  0x40   :  { %1698 = vmatpush1.bf16.msra.mxu1 %v2402_v3  ;;  %1708 = vmatprep.subr.bf16.mxu0 %v2409_v4  ;;  %v2496_v3 = vld [vmem:[%s3590_s1 + $0x3e4] ss:$8 sps:$4 sm:$0xff]   ;;  %v2491_v4 = vld [vmem:[%s3590_s1 + $0x2e0] ss:$8 sps:$4 sm:$0xff]  }
  0x41   :  { %1749 = vmatprep.subr.bf16.mxu1 %v2412_v5  ;;  %v2494_v5 = vld [vmem:[%s3590_s1 + $0x3e0] ss:$8 sps:$4 sm:$0xff]  }
  0x42   :  { %1659 = vmatmul.mubr.bf16.vlgmr.msra.gmra.mrb[0].mxu0 %v2035_v6  ;;  %v2499_v6 = vld [vmem:[%s3590_s1 + $0x2f4] ss:$8 sps:$4 sm:$0xff]  }
  0x43   :  { %1700 = vmatmul.mubr.bf16.vlgmr.msra.gmra.mrb[0].mxu1 %v2037_v7  ;;  %1709 = vmatpush1.bf16.msra.mxu0 %v2407_v8  ;;  %v2502_v7 = vld [vmem:[%s3590_s1 + $0x3f4] ss:$8 sps:$4 sm:$0xff]   ;;  %v2497_v8 = vld [vmem:[%s3590_s1 + $0x2f0] ss:$8 sps:$4 sm:$0xff]  }
  0x44   :  { %1750 = vmatpush1.bf16.msra.mxu1 %v2410_v9  ;;  %1710 = vmatprep.subr.bf16.mxu0 %v2415_v10  ;;  %v2500_v9 = vld [vmem:[%s3590_s1 + $0x3f0] ss:$8 sps:$4 sm:$0xff]   ;;  %v2509_v10 = vld [vmem:[%s3590_s1 + $0x404] ss:$8 sps:$4 sm:$0xff]  }
  0x45   :  { %1751 = vmatprep.subr.bf16.mxu1 %v2418_v11  ;;  %1740 = vmatprep.mubr.bf16.mxu0 %v2040_v36  ;;  %v2512_v11 = vld [vmem:[%s3590_s1 + $0x504] ss:$8 sps:$4 sm:$0xff]   ;;  %v2539_v36 = vld [vmem:[%s3590_s1 + $0x454] ss:$8 sps:$4 sm:$0xff]  }
  0x46   :  { %1781 = vmatprep.mubr.bf16.mxu1 %v2042_v37  ;;  %v2542_v37 = vld [vmem:[%s3590_s1 + $0x554] ss:$8 sps:$4 sm:$0xff]  }
  0x47   :  { %1711 = vmatpush1.bf16.msra.mxu0 %v2413_v12  ;;  %v2039_v12 = vcombine.low %v3016_v32, %v3016_v32  ;;  %v2533_v32 = vld [vmem:[%s3590_s1 + $0x444] ss:$8 sps:$4 sm:$0xff]  }
  0x48   :  { %1752 = vmatpush1.bf16.msra.mxu1 %v2416_v13  ;;  %1712 = vmatprep.subr.bf16.mxu0 %v2421_v14  ;;  %v2041_v13 = vcombine.low %v3021_v33, %v3021_v33  ;;  %v2507_v14 = vld [vmem:[%s3590_s1 + $0x400] ss:$8 sps:$4 sm:$0xff]   ;;  %v2536_v33 = vld [vmem:[%s3590_s1 + $0x544] ss:$8 sps:$4 sm:$0xff]  }
  0x49   :  { %1753 = vmatprep.subr.bf16.mxu1 %v2424_v15  ;;  %v2510_v15 = vld [vmem:[%s3590_s1 + $0x500] ss:$8 sps:$4 sm:$0xff]  }
  0x4b   :  { %1713 = vmatpush1.bf16.msra.mxu0 %v2419_v16  ;;  %v2515_v16 = vld [vmem:[%s3590_s1 + $0x414] ss:$8 sps:$4 sm:$0xff]  }
  0x4c   :  { %1754 = vmatpush1.bf16.msra.mxu1 %v2422_v17  ;;  %1714 = vmatprep.subr.bf16.mxu0 %v2427_v18  ;;  %v2518_v17 = vld [vmem:[%s3590_s1 + $0x514] ss:$8 sps:$4 sm:$0xff]   ;;  %v3166_v18 = vld [vmem:[%s3591_s0 + $0x20] sm:$0xff] }
  0x4d   :  { %1755 = vmatprep.subr.bf16.mxu1 %v2430_v19  ;;  %v3171_v19 = vld [vmem:[%s3591_s0 + $0x28] sm:$0xff] }
  0x4f   :  { %1715 = vmatpush1.bf16.msra.mxu0 %v2425_v20  ;;  %v2044_v20 = vcombine.high %v3166_v18, %v3166_v18 }
  0x50   :  { %1756 = vmatpush1.bf16.msra.mxu1 %v2428_v21  ;;  %1716 = vmatprep.subr.bf16.mxu0 %v2433_v22  ;;  %v2046_v21 = vcombine.high %v3171_v19, %v3171_v19  ;;  %v2513_v22 = vld [vmem:[%s3590_s1 + $0x410] ss:$8 sps:$4 sm:$0xff]  }
  0x51   :  { %1757 = vmatprep.subr.bf16.mxu1 %v2436_v23  ;;  %v2516_v23 = vld [vmem:[%s3590_s1 + $0x510] ss:$8 sps:$4 sm:$0xff]  }
  0x53   :  { %1717 = vmatpush1.bf16.msra.mxu0 %v2431_v24  ;;  %v2521_v24 = vld [vmem:[%s3590_s1 + $0x424] ss:$8 sps:$4 sm:$0xff]  }
  0x54   :  { %1758 = vmatpush1.bf16.msra.mxu1 %v2434_v25  ;;  %1718 = vmatprep.subr.bf16.mxu0 %v2439_v26  ;;  %v2524_v25 = vld [vmem:[%s3590_s1 + $0x524] ss:$8 sps:$4 sm:$0xff]   ;;  %v2519_v26 = vld [vmem:[%s3590_s1 + $0x420] ss:$8 sps:$4 sm:$0xff]  }
  0x55   :  { %1759 = vmatprep.subr.bf16.mxu1 %v2442_v27  ;;  %v2522_v27 = vld [vmem:[%s3590_s1 + $0x520] ss:$8 sps:$4 sm:$0xff]  }
  0x57   :  { %1719 = vmatpush1.bf16.msra.mxu0 %v2437_v28  ;;  %v2527_v28 = vld [vmem:[%s3590_s1 + $0x434] ss:$8 sps:$4 sm:$0xff]  }
  0x58   :  { %1760 = vmatpush1.bf16.msra.mxu1 %v2440_v29  ;;  %1720 = vmatprep.subr.bf16.mxu0 %v2445_v30  ;;  %v2530_v29 = vld [vmem:[%s3590_s1 + $0x534] ss:$8 sps:$4 sm:$0xff]   ;;  %v2525_v30 = vld [vmem:[%s3590_s1 + $0x430] ss:$8 sps:$4 sm:$0xff]  }
  0x59   :  { %1761 = vmatprep.subr.bf16.mxu1 %v2448_v31  ;;  %v2528_v31 = vld [vmem:[%s3590_s1 + $0x530] ss:$8 sps:$4 sm:$0xff]  }
  0x5b   :  { %1721 = vmatpush1.bf16.msra.mxu0 %v2443_v34  ;;  %v2531_v34 = vld [vmem:[%s3590_s1 + $0x440] ss:$8 sps:$4 sm:$0xff]  }
  0x5c   :  { %1762 = vmatpush1.bf16.msra.mxu1 %v2446_v35  ;;  %1722 = vmatprep.subr.bf16.mxu0 %v2451_v38  ;;  %v2534_v35 = vld [vmem:[%s3590_s1 + $0x540] ss:$8 sps:$4 sm:$0xff]   ;;  %v2537_v38 = vld [vmem:[%s3590_s1 + $0x450] ss:$8 sps:$4 sm:$0xff]  }
  0x5d   :  { %1763 = vmatprep.subr.bf16.mxu1 %v2454_v39  ;;  %v2540_v39 = vld [vmem:[%s3590_s1 + $0x550] ss:$8 sps:$4 sm:$0xff]  }
  0x5f   :  { %1723 = vmatpush1.bf16.msra.mxu0 %v2449_v40  ;;  %v2545_v40 = vld [vmem:[%s3590_s1 + $0x464] ss:$8 sps:$4 sm:$0xff]  }
  0x60   :  { %1764 = vmatpush1.bf16.msra.mxu1 %v2452_v41  ;;  %1724 = vmatprep.subr.bf16.mxu0 %v2457_v42  ;;  %v2548_v41 = vld [vmem:[%s3590_s1 + $0x564] ss:$8 sps:$4 sm:$0xff]   ;;  %v2543_v42 = vld [vmem:[%s3590_s1 + $0x460] ss:$8 sps:$4 sm:$0xff]  }
  0x61   :  { %1765 = vmatprep.subr.bf16.mxu1 %v2460_v43  ;;  %v2546_v43 = vld [vmem:[%s3590_s1 + $0x560] ss:$8 sps:$4 sm:$0xff]  }
  0x63   :  { %1725 = vmatpush1.bf16.msra.mxu0 %v2455_v44  ;;  %v2551_v44 = vld [vmem:[%s3590_s1 + $0x474] ss:$8 sps:$4 sm:$0xff]  }
  0x64   :  { %1766 = vmatpush1.bf16.msra.mxu1 %v2458_v45  ;;  %1726 = vmatprep.subr.bf16.mxu0 %v2463_v46  ;;  %v2554_v45 = vld [vmem:[%s3590_s1 + $0x574] ss:$8 sps:$4 sm:$0xff]   ;;  %v2549_v46 = vld [vmem:[%s3590_s1 + $0x470] ss:$8 sps:$4 sm:$0xff]  }
  0x65   :  { %1767 = vmatprep.subr.bf16.mxu1 %v2466_v47  ;;  %v2552_v47 = vld [vmem:[%s3590_s1 + $0x570] ss:$8 sps:$4 sm:$0xff]  }
  0x67   :  { %1727 = vmatpush1.bf16.msra.mxu0 %v2461_v48  ;;  %v2557_v48 = vld [vmem:[%s3590_s1 + $0x484] ss:$8 sps:$4 sm:$0xff]  }
  0x68   :  { %1768 = vmatpush1.bf16.msra.mxu1 %v2464_v49  ;;  %1728 = vmatprep.subr.bf16.mxu0 %v2469_v50  ;;  %v2560_v49 = vld [vmem:[%s3590_s1 + $0x584] ss:$8 sps:$4 sm:$0xff]   ;;  %v2555_v50 = vld [vmem:[%s3590_s1 + $0x480] ss:$8 sps:$4 sm:$0xff]  }
  0x69   :  { %1769 = vmatprep.subr.bf16.mxu1 %v2472_v51  ;;  %v2558_v51 = vld [vmem:[%s3590_s1 + $0x580] ss:$8 sps:$4 sm:$0xff]  }
  0x6b   :  { %1729 = vmatpush1.bf16.msra.mxu0 %v2467_v52  ;;  %v2563_v52 = vld [vmem:[%s3590_s1 + $0x494] ss:$8 sps:$4 sm:$0xff]  }
  0x6c   :  { %1770 = vmatpush1.bf16.msra.mxu1 %v2470_v53  ;;  %1730 = vmatprep.subr.bf16.mxu0 %v2475_v54  ;;  %v2566_v53 = vld [vmem:[%s3590_s1 + $0x594] ss:$8 sps:$4 sm:$0xff]   ;;  %v2561_v54 = vld [vmem:[%s3590_s1 + $0x490] ss:$8 sps:$4 sm:$0xff]  }
  0x6d   :  { %1771 = vmatprep.subr.bf16.mxu1 %v2478_v55  ;;  %v2564_v55 = vld [vmem:[%s3590_s1 + $0x590] ss:$8 sps:$4 sm:$0xff]  }
  0x6f   :  { %1731 = vmatpush1.bf16.msra.mxu0 %v2473_v56  ;;  %v2569_v56 = vld [vmem:[%s3590_s1 + $0x4a4] ss:$8 sps:$4 sm:$0xff]  }
  0x70   :  { %1772 = vmatpush1.bf16.msra.mxu1 %v2476_v57  ;;  %1732 = vmatprep.subr.bf16.mxu0 %v2481_v58  ;;  %v2572_v57 = vld [vmem:[%s3590_s1 + $0x5a4] ss:$8 sps:$4 sm:$0xff]   ;;  %v2567_v58 = vld [vmem:[%s3590_s1 + $0x4a0] ss:$8 sps:$4 sm:$0xff]  }
  0x71   :  { %1773 = vmatprep.subr.bf16.mxu1 %v2484_v59  ;;  %v2570_v59 = vld [vmem:[%s3590_s1 + $0x5a0] ss:$8 sps:$4 sm:$0xff]  }
  0x73   :  { %1733 = vmatpush1.bf16.msra.mxu0 %v2479_v60  ;;  %v2575_v60 = vld [vmem:[%s3590_s1 + $0x4b4] ss:$8 sps:$4 sm:$0xff]  }
  0x74   :  { %1774 = vmatpush1.bf16.msra.mxu1 %v2482_v61  ;;  %1734 = vmatprep.subr.bf16.mxu0 %v2487_v62  ;;  %v2578_v61 = vld [vmem:[%s3590_s1 + $0x5b4] ss:$8 sps:$4 sm:$0xff]   ;;  %v2573_v62 = vld [vmem:[%s3590_s1 + $0x4b0] ss:$8 sps:$4 sm:$0xff]  }
  0x75   :  { %1775 = vmatprep.subr.bf16.mxu1 %v2490_v63  ;;  %v2576_v63 = vld [vmem:[%s3590_s1 + $0x5b0] ss:$8 sps:$4 sm:$0xff]  }
  0x77   :  { %1735 = vmatpush1.bf16.msra.mxu0 %v2485_v0  ;;  %v2581_v0 = vld [vmem:[%s3590_s1 + $0x4c4] ss:$8 sps:$4 sm:$0xff]  }
  0x78   :  { %1776 = vmatpush1.bf16.msra.mxu1 %v2488_v1  ;;  %1736 = vmatprep.subr.bf16.mxu0 %v2493_v2  ;;  %v2584_v1 = vld [vmem:[%s3590_s1 + $0x5c4] ss:$8 sps:$4 sm:$0xff]   ;;  %v2579_v2 = vld [vmem:[%s3590_s1 + $0x4c0] ss:$8 sps:$4 sm:$0xff]  }
  0x79   :  { %1777 = vmatprep.subr.bf16.mxu1 %v2496_v3  ;;  %v2582_v3 = vld [vmem:[%s3590_s1 + $0x5c0] ss:$8 sps:$4 sm:$0xff]  }
  0x7b   :  { %1737 = vmatpush1.bf16.msra.mxu0 %v2491_v4  ;;  %v2587_v4 = vld [vmem:[%s3590_s1 + $0x4d4] ss:$8 sps:$4 sm:$0xff]  }
  0x7c   :  { %1778 = vmatpush1.bf16.msra.mxu1 %v2494_v5  ;;  %1738 = vmatprep.subr.bf16.mxu0 %v2499_v6  ;;  %v2590_v5 = vld [vmem:[%s3590_s1 + $0x5d4] ss:$8 sps:$4 sm:$0xff]   ;;  %v2585_v6 = vld [vmem:[%s3590_s1 + $0x4d0] ss:$8 sps:$4 sm:$0xff]  }
  0x7d   :  { %1779 = vmatprep.subr.bf16.mxu1 %v2502_v7  ;;  %v2588_v7 = vld [vmem:[%s3590_s1 + $0x5d0] ss:$8 sps:$4 sm:$0xff]  }
  0x7f   :  { %1739 = vmatpush1.bf16.msra.mxu0 %v2497_v8  ;;  %v2593_v8 = vld [vmem:[%s3590_s1 + $0x4e4] ss:$8 sps:$4 sm:$0xff]  }
  0x80   :  { %1780 = vmatpush1.bf16.msra.mxu1 %v2500_v9  ;;  %1790 = vmatprep.subr.bf16.mxu0 %v2509_v10  ;;  %v2596_v9 = vld [vmem:[%s3590_s1 + $0x5e4] ss:$8 sps:$4 sm:$0xff]   ;;  %v2591_v10 = vld [vmem:[%s3590_s1 + $0x4e0] ss:$8 sps:$4 sm:$0xff]  }
  0x81   :  { %1831 = vmatprep.subr.bf16.mxu1 %v2512_v11  ;;  %v2594_v11 = vld [vmem:[%s3590_s1 + $0x5e0] ss:$8 sps:$4 sm:$0xff]  }
  0x82   :  { %1741 = vmatmul.mubr.bf16.vlgmr.msra.gmra.mrb[4].mxu0 %v2039_v12  ;;  %v2599_v12 = vld [vmem:[%s3590_s1 + $0x4f4] ss:$8 sps:$4 sm:$0xff]  }
  0x83   :  { %1782 = vmatmul.mubr.bf16.vlgmr.msra.gmra.mrb[4].mxu1 %v2041_v13  ;;  %1791 = vmatpush1.bf16.msra.mxu0 %v2507_v14  ;;  %v2602_v13 = vld [vmem:[%s3590_s1 + $0x5f4] ss:$8 sps:$4 sm:$0xff]   ;;  %v2597_v14 = vld [vmem:[%s3590_s1 + $0x4f0] ss:$8 sps:$4 sm:$0xff]  }
  0x84   :  { %1832 = vmatpush1.bf16.msra.mxu1 %v2510_v15  ;;  %1792 = vmatprep.subr.bf16.mxu0 %v2515_v16  ;;  %v2600_v15 = vld [vmem:[%s3590_s1 + $0x5f0] ss:$8 sps:$4 sm:$0xff]   ;;  %v2609_v16 = vld [vmem:[%s3590_s1 + $0x604] ss:$8 sps:$4 sm:$0xff]  }
  0x85   :  { %1833 = vmatprep.subr.bf16.mxu1 %v2518_v17  ;;  %1822 = vmatprep.mubr.bf16.mxu0 %v2044_v20  ;;  %v2612_v17 = vld [vmem:[%s3590_s1 + $0x704] ss:$8 sps:$4 sm:$0xff]   ;;  %v2043_v20 = vcombine.low %v3166_v18, %v3166_v18  ;;  %v2610_v18 = vld [vmem:[%s3590_s1 + $0x700] ss:$8 sps:$4 sm:$0xff]  }
  0x86   :  { %1863 = vmatprep.mubr.bf16.mxu1 %v2046_v21  ;;  %v2045_v21 = vcombine.low %v3171_v19, %v3171_v19  ;;  %v2615_v19 = vld [vmem:[%s3590_s1 + $0x614] ss:$8 sps:$4 sm:$0xff]  }
  0x87   :  { %1793 = vmatpush1.bf16.msra.mxu0 %v2513_v22  ;;  %v3364_v22 = vld [vmem:[%s3591_s0 + $0x30] sm:$0xff] }
  0x88   :  { %1834 = vmatpush1.bf16.msra.mxu1 %v2516_v23  ;;  %1794 = vmatprep.subr.bf16.mxu0 %v2521_v24  ;;  %v3369_v23 = vld [vmem:[%s3591_s0 + $0x38] sm:$0xff]  ;;  %v2607_v24 = vld [vmem:[%s3590_s1 + $0x600] ss:$8 sps:$4 sm:$0xff]  }
  0x89   :  { %1835 = vmatprep.subr.bf16.mxu1 %v2524_v25  ;;  %v2618_v25 = vld [vmem:[%s3590_s1 + $0x714] ss:$8 sps:$4 sm:$0xff]  }
  0x8b   :  { %1795 = vmatpush1.bf16.msra.mxu0 %v2519_v26  ;;  %v2048_v26 = vcombine.high %v3364_v22, %v3364_v22 }
  0x8c   :  { %1836 = vmatpush1.bf16.msra.mxu1 %v2522_v27  ;;  %1796 = vmatprep.subr.bf16.mxu0 %v2527_v28  ;;  %v2050_v27 = vcombine.high %v3369_v23, %v3369_v23  ;;  %v2613_v28 = vld [vmem:[%s3590_s1 + $0x610] ss:$8 sps:$4 sm:$0xff]  }
  0x8d   :  { %1837 = vmatprep.subr.bf16.mxu1 %v2530_v29  ;;  %v2616_v29 = vld [vmem:[%s3590_s1 + $0x710] ss:$8 sps:$4 sm:$0xff]  }
  0x8f   :  { %1797 = vmatpush1.bf16.msra.mxu0 %v2525_v30  ;;  %v2621_v30 = vld [vmem:[%s3590_s1 + $0x624] ss:$8 sps:$4 sm:$0xff]  }
  0x90   :  { %1838 = vmatpush1.bf16.msra.mxu1 %v2528_v31  ;;  %1798 = vmatprep.subr.bf16.mxu0 %v2533_v32  ;;  %v2624_v31 = vld [vmem:[%s3590_s1 + $0x724] ss:$8 sps:$4 sm:$0xff]   ;;  %v2619_v32 = vld [vmem:[%s3590_s1 + $0x620] ss:$8 sps:$4 sm:$0xff]  }
  0x91   :  { %1839 = vmatprep.subr.bf16.mxu1 %v2536_v33  ;;  %v2622_v33 = vld [vmem:[%s3590_s1 + $0x720] ss:$8 sps:$4 sm:$0xff]  }
  0x93   :  { %1799 = vmatpush1.bf16.msra.mxu0 %v2531_v34  ;;  %v2627_v34 = vld [vmem:[%s3590_s1 + $0x634] ss:$8 sps:$4 sm:$0xff]  }
  0x94   :  { %1840 = vmatpush1.bf16.msra.mxu1 %v2534_v35  ;;  %1800 = vmatprep.subr.bf16.mxu0 %v2539_v36  ;;  %v2630_v35 = vld [vmem:[%s3590_s1 + $0x734] ss:$8 sps:$4 sm:$0xff]   ;;  %v2625_v36 = vld [vmem:[%s3590_s1 + $0x630] ss:$8 sps:$4 sm:$0xff]  }
  0x95   :  { %1841 = vmatprep.subr.bf16.mxu1 %v2542_v37  ;;  %v2628_v37 = vld [vmem:[%s3590_s1 + $0x730] ss:$8 sps:$4 sm:$0xff]  }
  0x97   :  { %1801 = vmatpush1.bf16.msra.mxu0 %v2537_v38  ;;  %v2633_v38 = vld [vmem:[%s3590_s1 + $0x644] ss:$8 sps:$4 sm:$0xff]  }
  0x98   :  { %1842 = vmatpush1.bf16.msra.mxu1 %v2540_v39  ;;  %1802 = vmatprep.subr.bf16.mxu0 %v2545_v40  ;;  %v2636_v39 = vld [vmem:[%s3590_s1 + $0x744] ss:$8 sps:$4 sm:$0xff]   ;;  %v2631_v40 = vld [vmem:[%s3590_s1 + $0x640] ss:$8 sps:$4 sm:$0xff]  }
  0x99   :  { %1843 = vmatprep.subr.bf16.mxu1 %v2548_v41  ;;  %v2634_v41 = vld [vmem:[%s3590_s1 + $0x740] ss:$8 sps:$4 sm:$0xff]  }
  0x9b   :  { %1803 = vmatpush1.bf16.msra.mxu0 %v2543_v42  ;;  %v2639_v42 = vld [vmem:[%s3590_s1 + $0x654] ss:$8 sps:$4 sm:$0xff]  }
  0x9c   :  { %1844 = vmatpush1.bf16.msra.mxu1 %v2546_v43  ;;  %1804 = vmatprep.subr.bf16.mxu0 %v2551_v44  ;;  %v2642_v43 = vld [vmem:[%s3590_s1 + $0x754] ss:$8 sps:$4 sm:$0xff]   ;;  %v2637_v44 = vld [vmem:[%s3590_s1 + $0x650] ss:$8 sps:$4 sm:$0xff]  }
  0x9d   :  { %1845 = vmatprep.subr.bf16.mxu1 %v2554_v45  ;;  %v2640_v45 = vld [vmem:[%s3590_s1 + $0x750] ss:$8 sps:$4 sm:$0xff]  }
  0x9f   :  { %1805 = vmatpush1.bf16.msra.mxu0 %v2549_v46  ;;  %v2645_v46 = vld [vmem:[%s3590_s1 + $0x664] ss:$8 sps:$4 sm:$0xff]  }
  0xa0   :  { %1846 = vmatpush1.bf16.msra.mxu1 %v2552_v47  ;;  %1806 = vmatprep.subr.bf16.mxu0 %v2557_v48  ;;  %v2648_v47 = vld [vmem:[%s3590_s1 + $0x764] ss:$8 sps:$4 sm:$0xff]   ;;  %v2643_v48 = vld [vmem:[%s3590_s1 + $0x660] ss:$8 sps:$4 sm:$0xff]  }
  0xa1   :  { %1847 = vmatprep.subr.bf16.mxu1 %v2560_v49  ;;  %v2646_v49 = vld [vmem:[%s3590_s1 + $0x760] ss:$8 sps:$4 sm:$0xff]  }
  0xa3   :  { %1807 = vmatpush1.bf16.msra.mxu0 %v2555_v50  ;;  %v2651_v50 = vld [vmem:[%s3590_s1 + $0x674] ss:$8 sps:$4 sm:$0xff]  }
  0xa4   :  { %1848 = vmatpush1.bf16.msra.mxu1 %v2558_v51  ;;  %1808 = vmatprep.subr.bf16.mxu0 %v2563_v52  ;;  %v2654_v51 = vld [vmem:[%s3590_s1 + $0x774] ss:$8 sps:$4 sm:$0xff]   ;;  %v2649_v52 = vld [vmem:[%s3590_s1 + $0x670] ss:$8 sps:$4 sm:$0xff]  }
  0xa5   :  { %1849 = vmatprep.subr.bf16.mxu1 %v2566_v53  ;;  %v2652_v53 = vld [vmem:[%s3590_s1 + $0x770] ss:$8 sps:$4 sm:$0xff]  }
  0xa7   :  { %1809 = vmatpush1.bf16.msra.mxu0 %v2561_v54  ;;  %v2657_v54 = vld [vmem:[%s3590_s1 + $0x684] ss:$8 sps:$4 sm:$0xff]  }
  0xa8   :  { %1850 = vmatpush1.bf16.msra.mxu1 %v2564_v55  ;;  %1810 = vmatprep.subr.bf16.mxu0 %v2569_v56  ;;  %v2660_v55 = vld [vmem:[%s3590_s1 + $0x784] ss:$8 sps:$4 sm:$0xff]   ;;  %v2655_v56 = vld [vmem:[%s3590_s1 + $0x680] ss:$8 sps:$4 sm:$0xff]  }
  0xa9   :  { %1851 = vmatprep.subr.bf16.mxu1 %v2572_v57  ;;  %v2658_v57 = vld [vmem:[%s3590_s1 + $0x780] ss:$8 sps:$4 sm:$0xff]  }
  0xab   :  { %1811 = vmatpush1.bf16.msra.mxu0 %v2567_v58  ;;  %v2663_v58 = vld [vmem:[%s3590_s1 + $0x694] ss:$8 sps:$4 sm:$0xff]  }
  0xac   :  { %1852 = vmatpush1.bf16.msra.mxu1 %v2570_v59  ;;  %1812 = vmatprep.subr.bf16.mxu0 %v2575_v60  ;;  %v2666_v59 = vld [vmem:[%s3590_s1 + $0x794] ss:$8 sps:$4 sm:$0xff]   ;;  %v2661_v60 = vld [vmem:[%s3590_s1 + $0x690] ss:$8 sps:$4 sm:$0xff]  }
  0xad   :  { %1853 = vmatprep.subr.bf16.mxu1 %v2578_v61  ;;  %v2664_v61 = vld [vmem:[%s3590_s1 + $0x790] ss:$8 sps:$4 sm:$0xff]  }
  0xaf   :  { %1813 = vmatpush1.bf16.msra.mxu0 %v2573_v62  ;;  %v2669_v62 = vld [vmem:[%s3590_s1 + $0x6a4] ss:$8 sps:$4 sm:$0xff]  }
  0xb0   :  { %1854 = vmatpush1.bf16.msra.mxu1 %v2576_v63  ;;  %1814 = vmatprep.subr.bf16.mxu0 %v2581_v0  ;;  %v2672_v63 = vld [vmem:[%s3590_s1 + $0x7a4] ss:$8 sps:$4 sm:$0xff]   ;;  %v2667_v0 = vld [vmem:[%s3590_s1 + $0x6a0] ss:$8 sps:$4 sm:$0xff]  }
  0xb1   :  { %1855 = vmatprep.subr.bf16.mxu1 %v2584_v1  ;;  %v2670_v1 = vld [vmem:[%s3590_s1 + $0x7a0] ss:$8 sps:$4 sm:$0xff]  }
  0xb3   :  { %1815 = vmatpush1.bf16.msra.mxu0 %v2579_v2  ;;  %v2675_v2 = vld [vmem:[%s3590_s1 + $0x6b4] ss:$8 sps:$4 sm:$0xff]  }
  0xb4   :  { %1856 = vmatpush1.bf16.msra.mxu1 %v2582_v3  ;;  %1816 = vmatprep.subr.bf16.mxu0 %v2587_v4  ;;  %v2678_v3 = vld [vmem:[%s3590_s1 + $0x7b4] ss:$8 sps:$4 sm:$0xff]   ;;  %v2673_v4 = vld [vmem:[%s3590_s1 + $0x6b0] ss:$8 sps:$4 sm:$0xff]  }
  0xb5   :  { %1857 = vmatprep.subr.bf16.mxu1 %v2590_v5  ;;  %v2676_v5 = vld [vmem:[%s3590_s1 + $0x7b0] ss:$8 sps:$4 sm:$0xff]  }
  0xb7   :  { %1817 = vmatpush1.bf16.msra.mxu0 %v2585_v6  ;;  %v2681_v6 = vld [vmem:[%s3590_s1 + $0x6c4] ss:$8 sps:$4 sm:$0xff]  }
  0xb8   :  { %1858 = vmatpush1.bf16.msra.mxu1 %v2588_v7  ;;  %1818 = vmatprep.subr.bf16.mxu0 %v2593_v8  ;;  %v2684_v7 = vld [vmem:[%s3590_s1 + $0x7c4] ss:$8 sps:$4 sm:$0xff]   ;;  %v2679_v8 = vld [vmem:[%s3590_s1 + $0x6c0] ss:$8 sps:$4 sm:$0xff]  }
  0xb9   :  { %1859 = vmatprep.subr.bf16.mxu1 %v2596_v9  ;;  %v2682_v9 = vld [vmem:[%s3590_s1 + $0x7c0] ss:$8 sps:$4 sm:$0xff]  }
  0xbb   :  { %1819 = vmatpush1.bf16.msra.mxu0 %v2591_v10  ;;  %v2687_v10 = vld [vmem:[%s3590_s1 + $0x6d4] ss:$8 sps:$4 sm:$0xff]  }
  0xbc   :  { %1860 = vmatpush1.bf16.msra.mxu1 %v2594_v11  ;;  %1820 = vmatprep.subr.bf16.mxu0 %v2599_v12  ;;  %v2690_v11 = vld [vmem:[%s3590_s1 + $0x7d4] ss:$8 sps:$4 sm:$0xff]   ;;  %v2685_v12 = vld [vmem:[%s3590_s1 + $0x6d0] ss:$8 sps:$4 sm:$0xff]  }
  0xbd   :  { %1861 = vmatprep.subr.bf16.mxu1 %v2602_v13  ;;  %v2688_v13 = vld [vmem:[%s3590_s1 + $0x7d0] ss:$8 sps:$4 sm:$0xff]  }
  0xbf   :  { %1821 = vmatpush1.bf16.msra.mxu0 %v2597_v14  ;;  %v2693_v14 = vld [vmem:[%s3590_s1 + $0x6e4] ss:$8 sps:$4 sm:$0xff]  }
  0xc0   :  { %1862 = vmatpush1.bf16.msra.mxu1 %v2600_v15  ;;  %1872 = vmatprep.subr.bf16.mxu0 %v2609_v16  ;;  %v2696_v15 = vld [vmem:[%s3590_s1 + $0x7e4] ss:$8 sps:$4 sm:$0xff]   ;;  %v2691_v16 = vld [vmem:[%s3590_s1 + $0x6e0] ss:$8 sps:$4 sm:$0xff]  }
  0xc1   :  { %1913 = vmatprep.subr.bf16.mxu1 %v2612_v17  ;;  %v2694_v17 = vld [vmem:[%s3590_s1 + $0x7e0] ss:$8 sps:$4 sm:$0xff]  }
  0xc2   :  { %1823 = vmatmul.mubr.bf16.vlgmr.msra.gmra.mrb[8].mxu0 %v2043_v20  ;;  %v2699_v20 = vld [vmem:[%s3590_s1 + $0x6f4] ss:$8 sps:$4 sm:$0xff]  }
  0xc3   :  { %1864 = vmatmul.mubr.bf16.vlgmr.msra.gmra.mrb[8].mxu1 %v2045_v21  ;;  %1873 = vmatpush1.bf16.msra.mxu0 %v2607_v24  ;;  %v2702_v21 = vld [vmem:[%s3590_s1 + $0x7f4] ss:$8 sps:$4 sm:$0xff]   ;;  %v2697_v24 = vld [vmem:[%s3590_s1 + $0x6f0] ss:$8 sps:$4 sm:$0xff]  }
  0xc4   :  { %1914 = vmatpush1.bf16.msra.mxu1 %v2610_v18  ;;  %1874 = vmatprep.subr.bf16.mxu0 %v2615_v19  ;;  %v2700_v18 = vld [vmem:[%s3590_s1 + $0x7f0] ss:$8 sps:$4 sm:$0xff]   ;;  %v2047_v19 = vcombine.low %v3364_v22, %v3364_v22 }
  0xc5   :  { %1915 = vmatprep.subr.bf16.mxu1 %v2618_v25  ;;  %1904 = vmatprep.mubr.bf16.mxu0 %v2048_v26  ;;  %v2049_v25 = vcombine.low %v3369_v23, %v3369_v23 }
  0xc6   :  { %1945 = vmatprep.mubr.bf16.mxu1 %v2050_v27 }
  0xc7   :  { %1875 = vmatpush1.bf16.msra.mxu0 %v2613_v28 }
  0xc8   :  { %1916 = vmatpush1.bf16.msra.mxu1 %v2616_v29  ;;  %1876 = vmatprep.subr.bf16.mxu0 %v2621_v30 }
  0xc9   :  { %1917 = vmatprep.subr.bf16.mxu1 %v2624_v31 }
  0xcb   :  { %1877 = vmatpush1.bf16.msra.mxu0 %v2619_v32 }
  0xcc   :  { %1918 = vmatpush1.bf16.msra.mxu1 %v2622_v33  ;;  %1878 = vmatprep.subr.bf16.mxu0 %v2627_v34 }
  0xcd   :  { %1919 = vmatprep.subr.bf16.mxu1 %v2630_v35 }
  0xcf   :  { %1879 = vmatpush1.bf16.msra.mxu0 %v2625_v36 }
  0xd0   :  { %1920 = vmatpush1.bf16.msra.mxu1 %v2628_v37  ;;  %1880 = vmatprep.subr.bf16.mxu0 %v2633_v38 }
  0xd1   :  { %1921 = vmatprep.subr.bf16.mxu1 %v2636_v39 }
  0xd3   :  { %1881 = vmatpush1.bf16.msra.mxu0 %v2631_v40 }
  0xd4   :  { %1922 = vmatpush1.bf16.msra.mxu1 %v2634_v41  ;;  %1882 = vmatprep.subr.bf16.mxu0 %v2639_v42 }
  0xd5   :  { %1923 = vmatprep.subr.bf16.mxu1 %v2642_v43 }
  0xd7   :  { %1883 = vmatpush1.bf16.msra.mxu0 %v2637_v44 }
  0xd8   :  { %1924 = vmatpush1.bf16.msra.mxu1 %v2640_v45  ;;  %1884 = vmatprep.subr.bf16.mxu0 %v2645_v46 }
  0xd9   :  { %1925 = vmatprep.subr.bf16.mxu1 %v2648_v47 }
  0xdb   :  { %1885 = vmatpush1.bf16.msra.mxu0 %v2643_v48 }
  0xdc   :  { %1926 = vmatpush1.bf16.msra.mxu1 %v2646_v49  ;;  %1886 = vmatprep.subr.bf16.mxu0 %v2651_v50 }
  0xdd   :  { %1927 = vmatprep.subr.bf16.mxu1 %v2654_v51 }
  0xdf   :  { %1887 = vmatpush1.bf16.msra.mxu0 %v2649_v52 }
  0xe0   :  { %1928 = vmatpush1.bf16.msra.mxu1 %v2652_v53  ;;  %1888 = vmatprep.subr.bf16.mxu0 %v2657_v54 }
  0xe1   :  { %1929 = vmatprep.subr.bf16.mxu1 %v2660_v55 }
  0xe3   :  { %1889 = vmatpush1.bf16.msra.mxu0 %v2655_v56 }
  0xe4   :  { %1930 = vmatpush1.bf16.msra.mxu1 %v2658_v57  ;;  %1890 = vmatprep.subr.bf16.mxu0 %v2663_v58  ;;  %v1965_v58 = vlaneseq }
  0xe5   :  { %1931 = vmatprep.subr.bf16.mxu1 %v2666_v59 }
  0xe6   :  { %v1966_v59 = vshrl.u32 %v1965_v58, 7 }
  0xe7   :  { %1891 = vmatpush1.bf16.msra.mxu0 %v2661_v60 }
  0xe8   :  { %1932 = vmatpush1.bf16.msra.mxu1 %v2664_v61  ;;  %1892 = vmatprep.subr.bf16.mxu0 %v2669_v62  ;;  %v1967_v60 = vsub.s32 0, %v1966_v59  ;;  %v1963_v61 = vld [vmem:[%s3592_s2] sm:$0x3]  ;;  %v1971_v62 = vsub.s32 1, %v1966_v59  ;;  %vm2014_vm0 = vcmp.eq.s32.totalorder %v1966_v59, 0 }
  0xe9   :  { %1933 = vmatprep.subr.bf16.mxu1 %v2672_v63 }
  0xeb   :  { %1893 = vmatpush1.bf16.msra.mxu0 %v2667_v0 }
  0xec   :  { %1934 = vmatpush1.bf16.msra.mxu1 %v2670_v1  ;;  %1894 = vmatprep.subr.bf16.mxu0 %v2675_v2  ;;  %v1968_v2 = vrot.slane %v1963_v61, %v1967_v60 }
  0xed   :  { %1935 = vmatprep.subr.bf16.mxu1 %v2678_v3 }
  0xef   :  { %1895 = vmatpush1.bf16.msra.mxu0 %v2673_v4 }
  0xf0   :  { %1936 = vmatpush1.bf16.msra.mxu1 %v2676_v5  ;;  %1896 = vmatprep.subr.bf16.mxu0 %v2681_v6  ;;  %v1972_v6 = vrot.slane %v1963_v61, %v1971_v62 }
  0xf1   :  { %1937 = vmatprep.subr.bf16.mxu1 %v2684_v7 }
  0xf3   :  { %1897 = vmatpush1.bf16.msra.mxu0 %v2679_v8 }
  0xf4   :  { %1938 = vmatpush1.bf16.msra.mxu1 %v2682_v9  ;;  %1898 = vmatprep.subr.bf16.mxu0 %v2687_v10 }
  0xf5   :  { %1939 = vmatprep.subr.bf16.mxu1 %v2690_v11 }
  0xf7   :  { %1899 = vmatpush1.bf16.msra.mxu0 %v2685_v12 }
  0xf8   :  { %1940 = vmatpush1.bf16.msra.mxu1 %v2688_v13  ;;  %1900 = vmatprep.subr.bf16.mxu0 %v2693_v14 }
  0xf9   :  { %1941 = vmatprep.subr.bf16.mxu1 %v2696_v15 }
  0xfb   :  { %1901 = vmatpush1.bf16.msra.mxu0 %v2691_v16 }
  0xfc   :  { %1942 = vmatpush1.bf16.msra.mxu1 %v2694_v17  ;;  %1902 = vmatprep.subr.bf16.mxu0 %v2699_v20 }
  0xfd   :  { %1943 = vmatprep.subr.bf16.mxu1 %v2702_v21 }
  0xff   :  { %1903 = vmatpush1.bf16.msra.mxu0 %v2697_v24 }
 0x100   :  { %1944 = vmatpush1.bf16.msra.mxu1 %v2700_v18 }
 0x102   :  { %1905 = vmatmul.mubr.bf16.vlgmr.msra.gmra.mrb[12].mxu0 %v2047_v19 }
 0x103   :  { %1946 = vmatmul.mubr.bf16.vlgmr.msra.gmra.mrb[12].mxu1 %v2049_v25 }
 0x115   :  { %v1660_v26 = vpop.f32.mrb[0].mxu0 }
 0x116   :  { %v1701_v27 = vpop.f32.mrb[0].mxu1  ;;  %v1662_v29 = vpop.f32.mrb[1].mxu0 }
 0x117   :  { %v1702_v28 = vadd.f32 %v1701_v27, %v1660_v26  ;;  %v1703_v30 = vpop.f32.mrb[1].mxu1  ;;  %v1664_v32 = vpop.f32.mrb[2].mxu0 }
 0x118   :  { %v1704_v31 = vadd.f32 %v1703_v30, %v1662_v29  ;;  %v1705_v33 = vpop.f32.mrb[2].mxu1  ;;  %v1665_v34 = vpop.f32.mrb[3].mxu0 }
 0x119   :  { %v1706_v35 = vpop.f32.mrb[3].mxu1 }
 0x155   :  { %v1742_v36 = vpop.f32.mrb[4].mxu0 }
 0x156   :  { %v1783_v37 = vpop.f32.mrb[4].mxu1  ;;  %v1743_v22 = vadd.f32 %v1742_v36, %v1702_v28  ;;  %v1744_v38 = vpop.f32.mrb[5].mxu0 }
 0x157   :  { %v1785_v39 = vpop.f32.mrb[5].mxu1  ;;  %v1745_v23 = vadd.f32 %v1744_v38, %v1704_v31  ;;  %v1746_v40 = vpop.f32.mrb[6].mxu0 }
 0x158   :  { %v1787_v41 = vpop.f32.mrb[6].mxu1  ;;  %v1784_v42 = vadd.f32 %v1783_v37, %v1743_v22  ;;  %v1747_v43 = vpop.f32.mrb[7].mxu0 }
 0x159   :  { %v1788_v44 = vpop.f32.mrb[7].mxu1  ;;  %v1786_v45 = vadd.f32 %v1785_v39, %v1745_v23 }
 0x195   :  { %v1824_v46 = vpop.f32.mrb[8].mxu0 }
 0x196   :  { %v1865_v47 = vpop.f32.mrb[8].mxu1  ;;  %v1825_v48 = vadd.f32 %v1824_v46, %v1784_v42  ;;  %v1826_v49 = vpop.f32.mrb[9].mxu0 }
 0x197   :  { %v1867_v50 = vpop.f32.mrb[9].mxu1  ;;  %v1827_v51 = vadd.f32 %v1826_v49, %v1786_v45  ;;  %v1828_v52 = vpop.f32.mrb[10].mxu0 }
 0x198   :  { %v1869_v53 = vpop.f32.mrb[10].mxu1  ;;  %v1866_v54 = vadd.f32 %v1865_v47, %v1825_v48  ;;  %v1829_v55 = vpop.f32.mrb[11].mxu0 }
 0x199   :  { %v1870_v56 = vpop.f32.mrb[11].mxu1  ;;  %v1868_v57 = vadd.f32 %v1867_v50, %v1827_v51 }
 0x1d5   :  { %v1906_v63 = vpop.f32.mrb[12].mxu0 }
 0x1d6   :  { %v1947_v0 = vpop.f32.mrb[12].mxu1  ;;  %v1907_v1 = vadd.f32 %v1906_v63, %v1866_v54  ;;  %v1908_v3 = vpop.f32.mrb[13].mxu0 }
 0x1d7   :  { %v1949_v4 = vpop.f32.mrb[13].mxu1  ;;  %v1909_v5 = vadd.f32 %v1908_v3, %v1868_v57  ;;  %v1910_v7 = vpop.f32.mrb[14].mxu0 }
 0x1d8   :  { %v1951_v8 = vpop.f32.mrb[14].mxu1  ;;  %v1948_v9 = vadd.f32 %v1947_v0, %v1907_v1  ;;  %v1911_v10 = vpop.f32.mrb[15].mxu0 }
 0x1d9   :  { %v1952_v11 = vpop.f32.mrb[15].mxu1  ;;  %v1950_v12 = vadd.f32 %v1949_v4, %v1909_v5 }
 0x1da   :  { %v1975_v13 = vadd.f32 %v1968_v2, %v1948_v9 }
 0x1db   :  { %v1976_v14 = vadd.f32 %v1972_v6, %v1950_v12 }
 0x1dc   :  { %1977 = vst [vmem:[%s3593_s3] sm:$0xff] %v1975_v13  ;;  %v1988_v15 = vrot.slane %v1975_v13, 4  ;;  %v2000_v16 = vmul.f32 %v1975_v13, %v1975_v13 }
 0x1dd   :  { %1978 = vst [vmem:[%s3593_s3 + $0x8] sm:$0xff] %v1976_v14  ;;  %v1994_v17 = vrot.slane %v1976_v14, 4  ;;  %v2001_v20 = vmul.f32 %v1976_v14, %v1976_v14 }
 0x1de   :  { %v1989_v21 = vadd.f32 %v1988_v15, %v1975_v13  ;;  %v2002_v24 = vrot.slane %v2000_v16, 4 }
 0x1df   :  { %v1995_v18 = vadd.f32 %v1994_v17, %v1976_v14  ;;  %v2008_v19 = vrot.slane %v2001_v20, 4 }
 0x1e0   :  { %v1990_v25 = vrot.slane %v1989_v21, 2  ;;  %v2003_v26 = vadd.f32 %v2002_v24, %v2000_v16 }
 0x1e1   :  { %v1996_v27 = vrot.slane %v1995_v18, 2  ;;  %v2009_v28 = vadd.f32 %v2008_v19, %v2001_v20 }
 0x1e2   :  { %v1991_v29 = vadd.f32 %v1990_v25, %v1989_v21  ;;  %v2004_v30 = vrot.slane %v2003_v26, 2 }
 0x1e3   :  { %v1997_v31 = vadd.f32 %v1996_v27, %v1995_v18  ;;  %v2010_v32 = vrot.slane %v2009_v28, 2 }
 0x1e4   :  { %v1992_v33 = vrot.slane %v1991_v29, 1  ;;  %v2005_v34 = vadd.f32 %v2004_v30, %v2003_v26 }
 0x1e5   :  { %v1998_v35 = vrot.slane %v1997_v31, 1  ;;  %v2011_v36 = vadd.f32 %v2010_v32, %v2009_v28 }
 0x1e6   :  { %v1993_v37 = vadd.f32 %v1992_v33, %v1991_v29  ;;  %v2006_v22 = vrot.slane %v2005_v34, 1 }
 0x1e7   :  { %v1999_v38 = vadd.f32 %v1998_v35, %v1997_v31  ;;  %v2012_v39 = vrot.slane %v2011_v36, 1 }
 0x1e8   :  { %v2007_v23 = vadd.f32 %v2006_v22, %v2005_v34  ;;  %v2015_v40 = vsel %vm2014_vm0, %v1993_v37, 0.0 }
 0x1e9   :  { %2017 = vst [vmem:[%s3594_s4] sm:$0xff] %v2015_v40  ;;  %v2013_v41 = vadd.f32 %v2012_v39, %v2011_v36  ;;  %v2016_v42 = vsel %vm2014_vm0, %v1999_v38, 0.0 }
 0x1ea   :  { %v2019_v43 = vsel %vm2014_vm0, %v2007_v23, 0.0  ;;  %2018 = vst [vmem:[%s3594_s4 + $0x8] sm:$0xff] %v2016_v42 }
 0x1eb   :  { %2021 = vst [vmem:[%s3595_s5] sm:$0xff] %v2019_v43  ;;  %v2020_v44 = vsel %vm2014_vm0, %v2013_v41, 0.0 }
 0x1ec   :  { %2022 = vst [vmem:[%s3595_s5 + $0x8] sm:$0xff] %v2020_v44 }

// kernel: generator_forward.37
= control target key start
LH: loop header
LB: loop body
LE: loop exit
PB: predicated region body
PF: predicated region fallthrough
CT: control target
= control target key end

     0   :  { %s1261_s1 = inlined_call_operand.vmem [shape: bf16[1024,128], index: 1, kind: input, shape index: {}]   ;;  %s1262_s0 = inlined_call_operand.vmem [shape: bf16[8,1024], index: 0, kind: input, shape index: {}]   ;;  %s1263_s2 = inlined_call_operand.vmem [shape: f32[1,128], index: 2, kind: input, shape index: {}]   ;;  %s1264_s3 = inlined_call_operand.vmem [shape: f32[8,128], index: 3, kind: output, shape index: {0}]   ;;  %s1265_s4 = inlined_call_operand.vmem [shape: f32[8,128], index: 4, kind: output, shape index: {1}]   ;;  %s1266_s5 = inlined_call_operand.vmem [shape: f32[8,128], index: 5, kind: output, shape index: {2}]  }
   0x1   :  { %v943_v0 = vld [vmem:[%s1261_s1 + $0x40] sm:$0xff]   ;;  %v947_v4 = vld [vmem:[%s1261_s1 + $0x48] sm:$0xff]   ;;  %v951_v8 = vld [vmem:[%s1261_s1 + $0x50] sm:$0xff]  }
   0x2   :  { %v944_v1 = vld [vmem:[%s1261_s1 + $0xc0] sm:$0xff]   ;;  %855 = vmatprep.subr.bf16.mxu0 %v943_v0  ;;  %v948_v5 = vld [vmem:[%s1261_s1 + $0xc8] sm:$0xff]   ;;  %v952_v9 = vld [vmem:[%s1261_s1 + $0xd0] sm:$0xff]  }
   0x3   :  { %v945_v2 = vld [vmem:[%s1261_s1] sm:$0xff]   ;;  %877 = vmatprep.subr.bf16.mxu1 %v944_v1  ;;  %v949_v6 = vld [vmem:[%s1261_s1 + $0x8] sm:$0xff]   ;;  %v953_v10 = vld [vmem:[%s1261_s1 + $0x10] sm:$0xff]  }
   0x4   :  { %v946_v3 = vld [vmem:[%s1261_s1 + $0x80] sm:$0xff]   ;;  %856 = vmatpush3.bf16.msra.mxu0 %v945_v2  ;;  %v950_v7 = vld [vmem:[%s1261_s1 + $0x88] sm:$0xff]   ;;  %v954_v11 = vld [vmem:[%s1261_s1 + $0x90] sm:$0xff]  }
   0x5   :  { %878 = vmatpush3.bf16.msra.mxu1 %v946_v3  ;;  %857 = vmatprep.subr.bf16.mxu0 %v947_v4  ;;  %v955_v12 = vld [vmem:[%s1261_s1 + $0x58] sm:$0xff]   ;;  %v959_v16 = vld [vmem:[%s1261_s1 + $0x60] sm:$0xff]   ;;  %v963_v20 = vld [vmem:[%s1261_s1 + $0x68] sm:$0xff]  }
   0x6   :  { %879 = vmatprep.subr.bf16.mxu1 %v948_v5  ;;  %v956_v13 = vld [vmem:[%s1261_s1 + $0xd8] sm:$0xff]   ;;  %v960_v17 = vld [vmem:[%s1261_s1 + $0xe0] sm:$0xff]   ;;  %v964_v21 = vld [vmem:[%s1261_s1 + $0xe8] sm:$0xff]  }
   0x7   :  { %v957_v14 = vld [vmem:[%s1261_s1 + $0x18] sm:$0xff]   ;;  %v961_v18 = vld [vmem:[%s1261_s1 + $0x20] sm:$0xff]   ;;  %v965_v22 = vld [vmem:[%s1261_s1 + $0x28] sm:$0xff]  }
   0x8   :  { %858 = vmatpush3.bf16.msra.mxu0 %v949_v6  ;;  %v958_v15 = vld [vmem:[%s1261_s1 + $0x98] sm:$0xff]   ;;  %v962_v19 = vld [vmem:[%s1261_s1 + $0xa0] sm:$0xff]   ;;  %v966_v23 = vld [vmem:[%s1261_s1 + $0xa8] sm:$0xff]  }
   0x9   :  { %880 = vmatpush3.bf16.msra.mxu1 %v950_v7  ;;  %859 = vmatprep.subr.bf16.mxu0 %v951_v8  ;;  %v967_v24 = vld [vmem:[%s1261_s1 + $0x70] sm:$0xff]   ;;  %v971_v28 = vld [vmem:[%s1261_s1 + $0x78] sm:$0xff]   ;;  %v25_v32 = vld [vmem:[%s1262_s0] sm:$0xff] }
   0xa   :  { %881 = vmatprep.subr.bf16.mxu1 %v952_v9  ;;  %v968_v25 = vld [vmem:[%s1261_s1 + $0xf0] sm:$0xff]   ;;  %v972_v29 = vld [vmem:[%s1261_s1 + $0xf8] sm:$0xff]   ;;  %v26_v33 = vld [vmem:[%s1262_s0 + $0x8] sm:$0xff]  ;;  %v782_v34 = vcombine.low %v25_v32, %v25_v32  ;;  %v783_v35 = vcombine.high %v25_v32, %v25_v32 }
   0xb   :  { %v969_v26 = vld [vmem:[%s1261_s1 + $0x30] sm:$0xff]   ;;  %v973_v30 = vld [vmem:[%s1261_s1 + $0x38] sm:$0xff]   ;;  %v784_v36 = vcombine.low %v26_v33, %v26_v33  ;;  %v785_v37 = vcombine.high %v26_v33, %v26_v33  ;;  %v979_v38 = vld [vmem:[%s1261_s1 + $0x140] sm:$0xff]  }
   0xc   :  { %860 = vmatpush3.bf16.msra.mxu0 %v953_v10  ;;  %v970_v27 = vld [vmem:[%s1261_s1 + $0xb0] sm:$0xff]   ;;  %v974_v31 = vld [vmem:[%s1261_s1 + $0xb8] sm:$0xff]   ;;  %v980_v39 = vld [vmem:[%s1261_s1 + $0x1c0] sm:$0xff]   ;;  %601 = vmatprep.mubr.bf16.mxu0 %v783_v35 }
   0xd   :  { %882 = vmatpush3.bf16.msra.mxu1 %v954_v11  ;;  %861 = vmatprep.subr.bf16.mxu0 %v955_v12  ;;  %v981_v40 = vld [vmem:[%s1261_s1 + $0x100] sm:$0xff]   ;;  %v983_v42 = vld [vmem:[%s1261_s1 + $0x148] sm:$0xff]   ;;  %v987_v46 = vld [vmem:[%s1261_s1 + $0x150] sm:$0xff]  }
   0xe   :  { %883 = vmatprep.subr.bf16.mxu1 %v956_v13  ;;  %641 = vmatprep.mubr.bf16.mxu1 %v785_v37  ;;  %v982_v41 = vld [vmem:[%s1261_s1 + $0x180] sm:$0xff]   ;;  %v984_v43 = vld [vmem:[%s1261_s1 + $0x1c8] sm:$0xff]   ;;  %v988_v47 = vld [vmem:[%s1261_s1 + $0x1d0] sm:$0xff]  }
   0xf   :  { %v985_v44 = vld [vmem:[%s1261_s1 + $0x108] sm:$0xff]   ;;  %v989_v48 = vld [vmem:[%s1261_s1 + $0x110] sm:$0xff]   ;;  %v991_v50 = vld [vmem:[%s1261_s1 + $0x158] sm:$0xff]  }
  0x10   :  { %862 = vmatpush3.bf16.msra.mxu0 %v957_v14  ;;  %v986_v45 = vld [vmem:[%s1261_s1 + $0x188] sm:$0xff]   ;;  %v990_v49 = vld [vmem:[%s1261_s1 + $0x190] sm:$0xff]   ;;  %v992_v51 = vld [vmem:[%s1261_s1 + $0x1d8] sm:$0xff]  }
  0x11   :  { %884 = vmatpush3.bf16.msra.mxu1 %v958_v15  ;;  %863 = vmatprep.subr.bf16.mxu0 %v959_v16  ;;  %v993_v52 = vld [vmem:[%s1261_s1 + $0x118] sm:$0xff]   ;;  %v995_v54 = vld [vmem:[%s1261_s1 + $0x160] sm:$0xff]   ;;  %v999_v58 = vld [vmem:[%s1261_s1 + $0x168] sm:$0xff]  }
  0x12   :  { %885 = vmatprep.subr.bf16.mxu1 %v960_v17  ;;  %v994_v53 = vld [vmem:[%s1261_s1 + $0x198] sm:$0xff]   ;;  %v996_v55 = vld [vmem:[%s1261_s1 + $0x1e0] sm:$0xff]   ;;  %v1000_v59 = vld [vmem:[%s1261_s1 + $0x1e8] sm:$0xff]  }
  0x13   :  { %v997_v56 = vld [vmem:[%s1261_s1 + $0x120] sm:$0xff]   ;;  %v1001_v60 = vld [vmem:[%s1261_s1 + $0x128] sm:$0xff]   ;;  %v1003_v62 = vld [vmem:[%s1261_s1 + $0x170] sm:$0xff]  }
  0x14   :  { %864 = vmatpush3.bf16.msra.mxu0 %v961_v18  ;;  %v998_v57 = vld [vmem:[%s1261_s1 + $0x1a0] sm:$0xff]   ;;  %v1002_v61 = vld [vmem:[%s1261_s1 + $0x1a8] sm:$0xff]   ;;  %v1004_v63 = vld [vmem:[%s1261_s1 + $0x1f0] sm:$0xff]  }
  0x15   :  { %886 = vmatpush3.bf16.msra.mxu1 %v962_v19  ;;  %865 = vmatprep.subr.bf16.mxu0 %v963_v20  ;;  %v1005_v0 = vld [vmem:[%s1261_s1 + $0x130] sm:$0xff]   ;;  %v1007_v2 = vld [vmem:[%s1261_s1 + $0x178] sm:$0xff]  }
  0x16   :  { %887 = vmatprep.subr.bf16.mxu1 %v964_v21  ;;  %v1006_v1 = vld [vmem:[%s1261_s1 + $0x1b0] sm:$0xff]   ;;  %v1008_v3 = vld [vmem:[%s1261_s1 + $0x1f8] sm:$0xff]  }
  0x17   :  { %v1009_v4 = vld [vmem:[%s1261_s1 + $0x138] sm:$0xff]   ;;  %v27_v6 = vld [vmem:[%s1262_s0 + $0x10] sm:$0xff] }
  0x18   :  { %866 = vmatpush3.bf16.msra.mxu0 %v965_v22  ;;  %v1010_v5 = vld [vmem:[%s1261_s1 + $0x1b8] sm:$0xff]   ;;  %v786_v7 = vcombine.low %v27_v6, %v27_v6  ;;  %v787_v8 = vcombine.high %v27_v6, %v27_v6 }
  0x19   :  { %888 = vmatpush3.bf16.msra.mxu1 %v966_v23  ;;  %867 = vmatprep.subr.bf16.mxu0 %v967_v24  ;;  %v28_v9 = vld [vmem:[%s1262_s0 + $0x18] sm:$0xff] }
  0x1a   :  { %889 = vmatprep.subr.bf16.mxu1 %v968_v25  ;;  %v788_v10 = vcombine.low %v28_v9, %v28_v9  ;;  %v789_v11 = vcombine.high %v28_v9, %v28_v9 }
  0x1c   :  { %868 = vmatpush3.bf16.msra.mxu0 %v969_v26 }
  0x1d   :  { %890 = vmatpush3.bf16.msra.mxu1 %v970_v27  ;;  %869 = vmatprep.subr.bf16.mxu0 %v971_v28 }
  0x1e   :  { %891 = vmatprep.subr.bf16.mxu1 %v972_v29 }
  0x20   :  { %870 = vmatpush3.bf16.msra.mxu0 %v973_v30 }
  0x21   :  { %892 = vmatpush3.bf16.msra.mxu1 %v974_v31  ;;  %899 = vmatprep.subr.bf16.mxu0 %v979_v38 }
  0x22   :  { %921 = vmatprep.subr.bf16.mxu1 %v980_v39  ;;  %v744_v39 = vlaneseq }
  0x23   :  { %602 = vmatmul.mubr.bf16.vlgmr.msra.gmra.mrb[0].mxu0 %v782_v34  ;;  %v854_v34 = vld [vmem:[%s1263_s2] ss:$0 sm:$0xff] }
  0x24   :  { %642 = vmatmul.mubr.bf16.vlgmr.msra.gmra.mrb[0].mxu1 %v784_v36  ;;  %900 = vmatpush3.bf16.msra.mxu0 %v981_v40 }
  0x25   :  { %922 = vmatpush3.bf16.msra.mxu1 %v982_v41  ;;  %901 = vmatprep.subr.bf16.mxu0 %v983_v42 }
  0x26   :  { %923 = vmatprep.subr.bf16.mxu1 %v984_v43  ;;  %681 = vmatprep.mubr.bf16.mxu0 %v787_v8 }
  0x27   :  { %721 = vmatprep.mubr.bf16.mxu1 %v789_v11 }
  0x28   :  { %902 = vmatpush3.bf16.msra.mxu0 %v985_v44  ;;  %v745_v44 = vshrl.u32 %v744_v39, 7 }
  0x29   :  { %924 = vmatpush3.bf16.msra.mxu1 %v986_v45  ;;  %903 = vmatprep.subr.bf16.mxu0 %v987_v46 }
  0x2a   :  { %925 = vmatprep.subr.bf16.mxu1 %v988_v47  ;;  %vm765_vm0 = vcmp.eq.s32.totalorder %v745_v44, 0 }
  0x2c   :  { %904 = vmatpush3.bf16.msra.mxu0 %v989_v48 }
  0x2d   :  { %926 = vmatpush3.bf16.msra.mxu1 %v990_v49  ;;  %905 = vmatprep.subr.bf16.mxu0 %v991_v50 }
  0x2e   :  { %927 = vmatprep.subr.bf16.mxu1 %v992_v51 }
  0x30   :  { %906 = vmatpush3.bf16.msra.mxu0 %v993_v52 }
  0x31   :  { %928 = vmatpush3.bf16.msra.mxu1 %v994_v53  ;;  %907 = vmatprep.subr.bf16.mxu0 %v995_v54 }
  0x32   :  { %929 = vmatprep.subr.bf16.mxu1 %v996_v55 }
  0x34   :  { %908 = vmatpush3.bf16.msra.mxu0 %v997_v56 }
  0x35   :  { %930 = vmatpush3.bf16.msra.mxu1 %v998_v57  ;;  %909 = vmatprep.subr.bf16.mxu0 %v999_v58 }
  0x36   :  { %931 = vmatprep.subr.bf16.mxu1 %v1000_v59 }
  0x38   :  { %910 = vmatpush3.bf16.msra.mxu0 %v1001_v60 }
  0x39   :  { %932 = vmatpush3.bf16.msra.mxu1 %v1002_v61  ;;  %911 = vmatprep.subr.bf16.mxu0 %v1003_v62 }
  0x3a   :  { %933 = vmatprep.subr.bf16.mxu1 %v1004_v63 }
  0x3c   :  { %912 = vmatpush3.bf16.msra.mxu0 %v1005_v0 }
  0x3d   :  { %934 = vmatpush3.bf16.msra.mxu1 %v1006_v1  ;;  %913 = vmatprep.subr.bf16.mxu0 %v1007_v2 }
  0x3e   :  { %935 = vmatprep.subr.bf16.mxu1 %v1008_v3 }
  0x40   :  { %914 = vmatpush3.bf16.msra.mxu0 %v1009_v4 }
  0x41   :  { %936 = vmatpush3.bf16.msra.mxu1 %v1010_v5 }
  0x43   :  { %682 = vmatmul.mubr.bf16.vlgmr.msra.gmra.mrb[4].mxu0 %v786_v7 }
  0x44   :  { %722 = vmatmul.mubr.bf16.vlgmr.msra.gmra.mrb[4].mxu1 %v788_v10 }
  0xf6   :  { %v871_v12 = vpop.f32.mrb[0].mxu0 }
  0xf7   :  { %v893_v13 = vpop.f32.mrb[0].mxu1  ;;  %v872_v14 = vpop.f32.mrb[1].mxu0 }
  0xf8   :  { %v894_v15 = vpop.f32.mrb[1].mxu1  ;;  %v873_v16 = vadd.f32 %v872_v14, %v871_v12  ;;  %v874_v18 = vpop.f32.mrb[2].mxu0 }
  0xf9   :  { %v895_v17 = vadd.f32 %v894_v15, %v893_v13  ;;  %v896_v19 = vpop.f32.mrb[2].mxu1  ;;  %v875_v20 = vpop.f32.mrb[3].mxu0 }
  0xfa   :  { %v897_v21 = vpop.f32.mrb[3].mxu1 }
  0xfb   :  { %v644_v22 = vadd.f32 %v895_v17, %v873_v16 }
 0x116   :  { %v915_v23 = vpop.f32.mrb[4].mxu0 }
 0x117   :  { %v937_v24 = vpop.f32.mrb[4].mxu1  ;;  %v916_v25 = vpop.f32.mrb[5].mxu0 }
 0x118   :  { %v938_v26 = vpop.f32.mrb[5].mxu1  ;;  %v917_v27 = vadd.f32 %v916_v25, %v915_v23  ;;  %v918_v29 = vpop.f32.mrb[6].mxu0 }
 0x119   :  { %v939_v28 = vadd.f32 %v938_v26, %v937_v24  ;;  %v940_v30 = vpop.f32.mrb[6].mxu1  ;;  %v919_v31 = vpop.f32.mrb[7].mxu0 }
 0x11a   :  { %v941_v32 = vpop.f32.mrb[7].mxu1  ;;  %v684_v33 = vadd.f32 %v917_v27, %v644_v22 }
 0x11c   :  { %v724_v35 = vadd.f32 %v939_v28, %v684_v33 }
 0x11e   :  { %v742_v36 = vadd.f32 %v854_v34, %v724_v35 }
 0x120   :  { %743 = vst [vmem:[%s1264_s3] sm:$0xff] %v742_v36  ;;  %v752_v37 = vrot.slane %v742_v36, 4  ;;  %v758_v38 = vmul.f32 %v742_v36, %v742_v36 }
 0x122   :  { %v753_v40 = vadd.f32 %v752_v37, %v742_v36  ;;  %v759_v41 = vrot.slane %v758_v38, 4 }
 0x124   :  { %v754_v42 = vrot.slane %v753_v40, 2  ;;  %v760_v43 = vadd.f32 %v759_v41, %v758_v38 }
 0x126   :  { %v755_v45 = vadd.f32 %v754_v42, %v753_v40  ;;  %v761_v46 = vrot.slane %v760_v43, 2 }
 0x128   :  { %v756_v47 = vrot.slane %v755_v45, 1  ;;  %v762_v48 = vadd.f32 %v761_v46, %v760_v43 }
 0x12a   :  { %v757_v49 = vadd.f32 %v756_v47, %v755_v45  ;;  %v763_v50 = vrot.slane %v762_v48, 1 }
 0x12c   :  { %v764_v51 = vadd.f32 %v763_v50, %v762_v48  ;;  %v766_v52 = vsel %vm765_vm0, %v757_v49, 0.0 }
 0x12d   :  { %767 = vst [vmem:[%s1265_s4] sm:$0xff] %v766_v52 }
 0x12e   :  { %v768_v53 = vsel %vm765_vm0, %v764_v51, 0.0 }
 0x12f   :  { %769 = vst [vmem:[%s1266_s5] sm:$0xff] %v768_v53 }

// kernel: generator_forward.46
= control target key start
LH: loop header
LB: loop body
LE: loop exit
PB: predicated region body
PF: predicated region fallthrough
CT: control target
= control target key end

     0   :  { %s305_s0 = inlined_call_operand.vmem [shape: f32[128,128], index: 0, kind: input, shape index: {}]   ;;  %s306_s1 = inlined_call_operand.vmem [shape: f32[1,128], index: 1, kind: input, shape index: {}]   ;;  %s307_s2 = inlined_call_operand.vmem [shape: f32[1,128], index: 2, kind: input, shape index: {}]   ;;  %s308_s3 = inlined_call_operand.vmem [shape: f32[128,128], index: 3, kind: output, shape index: {}]  }
   0x1   :  { %v14_v0 = vld [vmem:[%s305_s0] sm:$0xff]  ;;  %v15_v4 = vld [vmem:[%s305_s0 + $0x8] sm:$0xff]  ;;  %v16_v5 = vld [vmem:[%s305_s0 + $0x10] sm:$0xff] }
   0x2   :  { %v172_v1 = vld [vmem:[%s306_s1] ss:$0 sm:$0xff]  ;;  %v17_v6 = vld [vmem:[%s305_s0 + $0x18] sm:$0xff]  ;;  %v19_v11 = vld [vmem:[%s305_s0 + $0x28] sm:$0xff] }
   0x3   :  { %v177_v2 = vld [vmem:[%s307_s2] ss:$0 sm:$0xff]  ;;  %v37_v3 = vmul.f32 %v172_v1, %v14_v0  ;;  %v38_v7 = vmul.f32 %v172_v1, %v15_v4  ;;  %v39_v8 = vmul.f32 %v172_v1, %v16_v5  ;;  %v40_v9 = vmul.f32 %v172_v1, %v17_v6  ;;  %v20_v12 = vld [vmem:[%s305_s0 + $0x30] sm:$0xff]  ;;  %v21_v17 = vld [vmem:[%s305_s0 + $0x38] sm:$0xff] }
   0x4   :  { %v18_v10 = vld [vmem:[%s305_s0 + $0x20] sm:$0xff]  ;;  %v42_v15 = vmul.f32 %v172_v1, %v19_v11  ;;  %v43_v16 = vmul.f32 %v172_v1, %v20_v12  ;;  %v44_v21 = vmul.f32 %v172_v1, %v21_v17  ;;  %v23_v30 = vld [vmem:[%s305_s0 + $0x48] sm:$0xff]  ;;  %v24_v31 = vld [vmem:[%s305_s0 + $0x50] sm:$0xff] }
   0x5   :  { %v60_v13 = vadd.f32 %v177_v2, %v37_v3  ;;  %v41_v14 = vmul.f32 %v172_v1, %v18_v10  ;;  %v61_v18 = vadd.f32 %v177_v2, %v38_v7  ;;  %v62_v19 = vadd.f32 %v177_v2, %v39_v8  ;;  %v22_v25 = vld [vmem:[%s305_s0 + $0x40] sm:$0xff]  ;;  %v25_v43 = vld [vmem:[%s305_s0 + $0x58] sm:$0xff]  ;;  %v27_v45 = vld [vmem:[%s305_s0 + $0x68] sm:$0xff] }
   0x6   :  { %v63_v20 = vadd.f32 %v177_v2, %v40_v9  ;;  %v65_v24 = vadd.f32 %v177_v2, %v42_v15  ;;  %v66_v37 = vadd.f32 %v177_v2, %v43_v16  ;;  %v67_v38 = vadd.f32 %v177_v2, %v44_v21  ;;  %v26_v44 = vld [vmem:[%s305_s0 + $0x60] sm:$0xff]  ;;  %v28_v56 = vld [vmem:[%s305_s0 + $0x70] sm:$0xff]  ;;  %v29_v4 = vld [vmem:[%s305_s0 + $0x78] sm:$0xff] }
   0x7   :  { %vm76_vm0 = vcmp.gt.f32.partialorder %v60_v13, 0.0  ;;  %v92_v22 = vmul.f32 0.2, %v60_v13  ;;  %v64_v23 = vadd.f32 %v177_v2, %v41_v14  ;;  %vm77_vm1 = vcmp.gt.f32.partialorder %v61_v18, 0.0 }
   0x8   :  { %v93_v26 = vmul.f32 0.2, %v61_v18  ;;  %vm78_vm2 = vcmp.gt.f32.partialorder %v62_v19, 0.0  ;;  %v94_v27 = vmul.f32 0.2, %v62_v19  ;;  %vm79_vm3 = vcmp.gt.f32.partialorder %v63_v20, 0.0 }
   0x9   :  { %v108_v28 = vsel %vm76_vm0, %v60_v13, %v92_v22  ;;  %v95_v29 = vmul.f32 0.2, %v63_v20  ;;  %vm80_vm4 = vcmp.gt.f32.partialorder %v64_v23, 0.0  ;;  %v96_v34 = vmul.f32 0.2, %v64_v23 }
   0xa   :  { %124 = vst [vmem:[%s308_s3] sm:$0xff] %v108_v28  ;;  %v109_v32 = vsel %vm77_vm1, %v61_v18, %v93_v26  ;;  %v110_v33 = vsel %vm78_vm2, %v62_v19, %v94_v27  ;;  %vm81_vm5 = vcmp.gt.f32.partialorder %v65_v24, 0.0  ;;  %v97_v36 = vmul.f32 0.2, %v65_v24 }
   0xb   :  { %125 = vst [vmem:[%s308_s3 + $0x8] sm:$0xff] %v109_v32  ;;  %126 = vst [vmem:[%s308_s3 + $0x10] sm:$0xff] %v110_v33  ;;  %v111_v35 = vsel %vm79_vm3, %v63_v20, %v95_v29  ;;  %v112_v39 = vsel %vm80_vm4, %v64_v23, %v96_v34  ;;  %v45_v40 = vmul.f32 %v172_v1, %v22_v25  ;;  %vm82_vm6 = vcmp.gt.f32.partialorder %v66_v37, 0.0 }
   0xc   :  { %127 = vst [vmem:[%s308_s3 + $0x18] sm:$0xff] %v111_v35  ;;  %v46_v41 = vmul.f32 %v172_v1, %v23_v30  ;;  %v47_v42 = vmul.f32 %v172_v1, %v24_v31  ;;  %128 = vst [vmem:[%s308_s3 + $0x20] sm:$0xff] %v112_v39  ;;  %v113_v46 = vsel %vm81_vm5, %v65_v24, %v97_v36  ;;  %v98_v47 = vmul.f32 0.2, %v66_v37 }
   0xd   :  { %vm83_vm7 = vcmp.gt.f32.partialorder %v67_v38, 0.0  ;;  %129 = vst [vmem:[%s308_s3 + $0x28] sm:$0xff] %v113_v46  ;;  %v99_v48 = vmul.f32 0.2, %v67_v38  ;;  %v68_v49 = vadd.f32 %v177_v2, %v45_v40  ;;  %v48_v53 = vmul.f32 %v172_v1, %v25_v43 }
   0xe   :  { %v69_v50 = vadd.f32 %v177_v2, %v46_v41  ;;  %v70_v51 = vadd.f32 %v177_v2, %v47_v42  ;;  %v114_v52 = vsel %vm82_vm6, %v66_v37, %v98_v47  ;;  %v49_v54 = vmul.f32 %v172_v1, %v26_v44 }
   0xf   :  { %v50_v55 = vmul.f32 %v172_v1, %v27_v45  ;;  %130 = vst [vmem:[%s308_s3 + $0x30] sm:$0xff] %v114_v52  ;;  %v115_v57 = vsel %vm83_vm7, %v67_v38, %v99_v48  ;;  %vm84_vm8 = vcmp.gt.f32.partialorder %v68_v49, 0.0  ;;  %v100_v58 = vmul.f32 0.2, %v68_v49 }
  0x10   :  { %vm85_vm9 = vcmp.gt.f32.partialorder %v69_v50, 0.0  ;;  %131 = vst [vmem:[%s308_s3 + $0x38] sm:$0xff] %v115_v57  ;;  %v101_v59 = vmul.f32 0.2, %v69_v50  ;;  %vm86_vm10 = vcmp.gt.f32.partialorder %v70_v51, 0.0  ;;  %v71_v61 = vadd.f32 %v177_v2, %v48_v53 }
  0x11   :  { %v102_v60 = vmul.f32 0.2, %v70_v51  ;;  %v116_v62 = vsel %vm84_vm8, %v68_v49, %v100_v58  ;;  %v72_v63 = vadd.f32 %v177_v2, %v49_v54  ;;  %v73_v0 = vadd.f32 %v177_v2, %v50_v55 }
  0x12   :  { %v51_v3 = vmul.f32 %v172_v1, %v28_v56  ;;  %132 = vst [vmem:[%s308_s3 + $0x40] sm:$0xff] %v116_v62  ;;  %v117_v5 = vsel %vm85_vm9, %v69_v50, %v101_v59  ;;  %vm87_vm11 = vcmp.gt.f32.partialorder %v71_v61, 0.0  ;;  %v103_v7 = vmul.f32 0.2, %v71_v61 }
  0x13   :  { %v118_v6 = vsel %vm86_vm10, %v70_v51, %v102_v60  ;;  %133 = vst [vmem:[%s308_s3 + $0x48] sm:$0xff] %v117_v5  ;;  %vm88_vm12 = vcmp.gt.f32.partialorder %v72_v63, 0.0  ;;  %v104_v8 = vmul.f32 0.2, %v72_v63  ;;  %vm89_vm13 = vcmp.gt.f32.partialorder %v73_v0, 0.0 }
  0x14   :  { %134 = vst [vmem:[%s308_s3 + $0x50] sm:$0xff] %v118_v6  ;;  %v105_v9 = vmul.f32 0.2, %v73_v0  ;;  %v119_v10 = vsel %vm87_vm11, %v71_v61, %v103_v7  ;;  %v74_v11 = vadd.f32 %v177_v2, %v51_v3  ;;  %v52_v12 = vmul.f32 %v172_v1, %v29_v4 }
  0x15   :  { %135 = vst [vmem:[%s308_s3 + $0x58] sm:$0xff] %v119_v10  ;;  %v120_v13 = vsel %vm88_vm12, %v72_v63, %v104_v8 }
  0x16   :  { %v121_v14 = vsel %vm89_vm13, %v73_v0, %v105_v9  ;;  %136 = vst [vmem:[%s308_s3 + $0x60] sm:$0xff] %v120_v13  ;;  %vm90_vm14 = vcmp.gt.f32.partialorder %v74_v11, 0.0  ;;  %v106_v15 = vmul.f32 0.2, %v74_v11  ;;  %v75_v16 = vadd.f32 %v177_v2, %v52_v12 }
  0x17   :  { %137 = vst [vmem:[%s308_s3 + $0x68] sm:$0xff] %v121_v14 }
  0x18   :  { %v122_v17 = vsel %vm90_vm14, %v74_v11, %v106_v15  ;;  %vm91_vm15 = vcmp.gt.f32.partialorder %v75_v16, 0.0  ;;  %v107_v1 = vmul.f32 0.2, %v75_v16 }
  0x19   :  { %138 = vst [vmem:[%s308_s3 + $0x70] sm:$0xff] %v122_v17 }
  0x1a   :  { %v123_v18 = vsel %vm91_vm15, %v75_v16, %v107_v1 }
  0x1b   :  { %139 = vst [vmem:[%s308_s3 + $0x78] sm:$0xff] %v123_v18 }

// kernel: generator_forward.47
= control target key start
LH: loop header
LB: loop body
LE: loop exit
PB: predicated region body
PF: predicated region fallthrough
CT: control target
= control target key end

     0   :  { %s2141_s1 = inlined_call_operand.vmem [shape: bf16[768,128], index: 1, kind: input, shape index: {}]   ;;  %s2142_s0 = inlined_call_operand.vmem [shape: bf16[128,768], index: 0, kind: input, shape index: {}]   ;;  %s2143_s2 = inlined_call_operand.vmem [shape: f32[1,128], index: 2, kind: input, shape index: {}]   ;;  %s2144_s3 = inlined_call_operand.vmem [shape: f32[128,128], index: 3, kind: output, shape index: {0}]   ;;  %s2145_s4 = inlined_call_operand.vmem [shape: f32[8,128], index: 4, kind: output, shape index: {1}]   ;;  %s2146_s5 = inlined_call_operand.vmem [shape: f32[8,128], index: 5, kind: output, shape index: {2}]  }
   0x1   :  { %v1586_v0 = vld [vmem:[%s2141_s1 + $0x40] sm:$0xff]   ;;  %v1588_v2 = vld [vmem:[%s2141_s1 + $0x48] sm:$0xff]   ;;  %v1590_v4 = vld [vmem:[%s2141_s1 + $0x50] sm:$0xff]  }
   0x2   :  { %v1587_v1 = vld [vmem:[%s2141_s1] sm:$0xff]   ;;  %1378 = vmatprep.subr.bf16.mxu0 %v1586_v0  ;;  %1570 = vmatprep.subr.bf16.mxu1 %v1586_v0  ;;  %v1589_v3 = vld [vmem:[%s2141_s1 + $0x8] sm:$0xff]   ;;  %v1591_v5 = vld [vmem:[%s2141_s1 + $0x10] sm:$0xff]  }
   0x3   :  { %1379 = vmatpush3.bf16.msra.mxu0 %v1587_v1  ;;  %1578 = vmatpush3.bf16.msra.mxu1 %v1587_v1  ;;  %v1592_v6 = vld [vmem:[%s2141_s1 + $0x58] sm:$0xff]   ;;  %v1594_v8 = vld [vmem:[%s2141_s1 + $0x60] sm:$0xff]   ;;  %v1596_v10 = vld [vmem:[%s2141_s1 + $0x68] sm:$0xff]  }
   0x4   :  { %1380 = vmatprep.subr.bf16.mxu0 %v1588_v2  ;;  %1571 = vmatprep.subr.bf16.mxu1 %v1588_v2  ;;  %v1593_v7 = vld [vmem:[%s2141_s1 + $0x18] sm:$0xff]   ;;  %v1595_v9 = vld [vmem:[%s2141_s1 + $0x20] sm:$0xff]   ;;  %v1597_v13 = vld [vmem:[%s2141_s1 + $0x28] sm:$0xff]  }
   0x5   :  { %v1604_v11 = vld [vmem:[%s2142_s0 + $0x4] ss:$24 sps:$4 sm:$0xff]   ;;  %v1598_v14 = vld [vmem:[%s2141_s1 + $0x70] sm:$0xff]   ;;  %v1602_v18 = vld [vmem:[%s2142_s0] ss:$24 sps:$4 sm:$0xff]  }
   0x6   :  { %v1607_v12 = vld [vmem:[%s2142_s0 + $0xc4] ss:$24 sps:$4 sm:$0xff]   ;;  %759 = vmatprep.mubr.bf16.mxu0 %v1604_v11  ;;  %v1599_v15 = vld [vmem:[%s2141_s1 + $0x30] sm:$0xff]   ;;  %v1605_v19 = vld [vmem:[%s2142_s0 + $0xc0] ss:$24 sps:$4 sm:$0xff]  }
   0x7   :  { %1381 = vmatpush3.bf16.msra.mxu0 %v1589_v3  ;;  %1579 = vmatpush3.bf16.msra.mxu1 %v1589_v3  ;;  %v1600_v16 = vld [vmem:[%s2141_s1 + $0x78] sm:$0xff]   ;;  %v1608_v20 = vld [vmem:[%s2141_s1 + $0xc0] sm:$0xff]   ;;  %v1612_v24 = vld [vmem:[%s2141_s1 + $0xc8] sm:$0xff]  }
   0x8   :  { %1382 = vmatprep.subr.bf16.mxu0 %v1590_v4  ;;  %1572 = vmatprep.subr.bf16.mxu1 %v1590_v4  ;;  %v1601_v17 = vld [vmem:[%s2141_s1 + $0x38] sm:$0xff]   ;;  %v1609_v21 = vld [vmem:[%s2141_s1 + $0x140] sm:$0xff]   ;;  %v1613_v25 = vld [vmem:[%s2141_s1 + $0x148] sm:$0xff]  }
   0x9   :  { %791 = vmatprep.mubr.bf16.mxu1 %v1607_v12  ;;  %v1610_v22 = vld [vmem:[%s2141_s1 + $0x80] sm:$0xff]   ;;  %v1616_v26 = vld [vmem:[%s2142_s0 + $0x34] ss:$24 sps:$4 sm:$0xff]   ;;  %v1620_v31 = vld [vmem:[%s2142_s0 + $0x30] ss:$24 sps:$4 sm:$0xff]  }
   0xa   :  { %v1611_v23 = vld [vmem:[%s2141_s1 + $0x100] sm:$0xff]   ;;  %v1614_v27 = vld [vmem:[%s2141_s1 + $0x88] sm:$0xff]   ;;  %v1622_v30 = vld [vmem:[%s2141_s1 + $0xd0] sm:$0xff]  }
   0xb   :  { %1383 = vmatpush3.bf16.msra.mxu0 %v1591_v5  ;;  %1580 = vmatpush3.bf16.msra.mxu1 %v1591_v5  ;;  %v1618_v28 = vld [vmem:[%s2142_s0 + $0xf4] ss:$24 sps:$4 sm:$0xff]   ;;  %v1621_v33 = vld [vmem:[%s2142_s0 + $0xf0] ss:$24 sps:$4 sm:$0xff]   ;;  %v1626_v36 = vld [vmem:[%s2141_s1 + $0xd8] sm:$0xff]  }
   0xc   :  { %1384 = vmatprep.subr.bf16.mxu0 %v1592_v6  ;;  %1573 = vmatprep.subr.bf16.mxu1 %v1592_v6  ;;  %v1615_v29 = vld [vmem:[%s2141_s1 + $0x108] sm:$0xff]   ;;  %v1623_v32 = vld [vmem:[%s2141_s1 + $0x150] sm:$0xff]   ;;  %v1627_v37 = vld [vmem:[%s2141_s1 + $0x158] sm:$0xff]  }
   0xd   :  { %v1624_v34 = vld [vmem:[%s2141_s1 + $0x90] sm:$0xff]   ;;  %v1630_v38 = vld [vmem:[%s2142_s0 + $0x64] ss:$24 sps:$4 sm:$0xff]   ;;  %v1634_v43 = vld [vmem:[%s2142_s0 + $0x60] ss:$24 sps:$4 sm:$0xff]  }
   0xe   :  { %v1625_v35 = vld [vmem:[%s2141_s1 + $0x110] sm:$0xff]   ;;  %v1628_v39 = vld [vmem:[%s2141_s1 + $0x98] sm:$0xff]   ;;  %v1636_v42 = vld [vmem:[%s2141_s1 + $0xe0] sm:$0xff]  }
   0xf   :  { %1385 = vmatpush3.bf16.msra.mxu0 %v1593_v7  ;;  %1581 = vmatpush3.bf16.msra.mxu1 %v1593_v7  ;;  %v1632_v40 = vld [vmem:[%s2142_s0 + $0x124] ss:$24 sps:$4 sm:$0xff]   ;;  %v1635_v44 = vld [vmem:[%s2142_s0 + $0x120] ss:$24 sps:$4 sm:$0xff]   ;;  %v1640_v48 = vld [vmem:[%s2141_s1 + $0xe8] sm:$0xff]  }
  0x10   :  { %1386 = vmatprep.subr.bf16.mxu0 %v1594_v8  ;;  %1574 = vmatprep.subr.bf16.mxu1 %v1594_v8  ;;  %v1629_v41 = vld [vmem:[%s2141_s1 + $0x118] sm:$0xff]   ;;  %v1637_v45 = vld [vmem:[%s2141_s1 + $0x160] sm:$0xff]   ;;  %v1641_v49 = vld [vmem:[%s2141_s1 + $0x168] sm:$0xff]  }
  0x11   :  { %v1638_v46 = vld [vmem:[%s2141_s1 + $0xa0] sm:$0xff]   ;;  %v1644_v50 = vld [vmem:[%s2142_s0 + $0x94] ss:$24 sps:$4 sm:$0xff]   ;;  %v1648_v55 = vld [vmem:[%s2142_s0 + $0x90] ss:$24 sps:$4 sm:$0xff]  }
  0x12   :  { %v1639_v47 = vld [vmem:[%s2141_s1 + $0x120] sm:$0xff]   ;;  %v1646_v51 = vld [vmem:[%s2142_s0 + $0x154] ss:$24 sps:$4 sm:$0xff]   ;;  %v1649_v56 = vld [vmem:[%s2142_s0 + $0x150] ss:$24 sps:$4 sm:$0xff]  }
  0x13   :  { %1387 = vmatpush3.bf16.msra.mxu0 %v1595_v9  ;;  %1582 = vmatpush3.bf16.msra.mxu1 %v1595_v9  ;;  %v1642_v52 = vld [vmem:[%s2141_s1 + $0xa8] sm:$0xff]   ;;  %v1650_v54 = vld [vmem:[%s2141_s1 + $0xf0] sm:$0xff]   ;;  %v1654_v60 = vld [vmem:[%s2141_s1 + $0xf8] sm:$0xff]  }
  0x14   :  { %1388 = vmatprep.subr.bf16.mxu0 %v1596_v10  ;;  %1575 = vmatprep.subr.bf16.mxu1 %v1596_v10  ;;  %v1643_v53 = vld [vmem:[%s2141_s1 + $0x128] sm:$0xff]   ;;  %v1651_v57 = vld [vmem:[%s2141_s1 + $0x170] sm:$0xff]   ;;  %v1655_v61 = vld [vmem:[%s2141_s1 + $0x178] sm:$0xff]  }
  0x15   :  { %v1652_v58 = vld [vmem:[%s2141_s1 + $0xb0] sm:$0xff]   ;;  %v1656_v62 = vld [vmem:[%s2141_s1 + $0xb8] sm:$0xff]   ;;  %v1660_v0 = vld [vmem:[%s2142_s0 + $0xc] ss:$24 sps:$4 sm:$0xff]  }
  0x16   :  { %v1653_v59 = vld [vmem:[%s2141_s1 + $0x130] sm:$0xff]   ;;  %v1657_v63 = vld [vmem:[%s2141_s1 + $0x138] sm:$0xff]   ;;  %v1658_v1 = vld [vmem:[%s2142_s0 + $0x8] ss:$24 sps:$4 sm:$0xff]  }
  0x17   :  { %1389 = vmatpush3.bf16.msra.mxu0 %v1597_v13  ;;  %1583 = vmatpush3.bf16.msra.mxu1 %v1597_v13  ;;  %v1663_v2 = vld [vmem:[%s2142_s0 + $0x14] ss:$24 sps:$4 sm:$0xff]   ;;  %v1661_v3 = vld [vmem:[%s2142_s0 + $0x10] ss:$24 sps:$4 sm:$0xff]   ;;  %v1666_v5 = vld [vmem:[%s2142_s0 + $0x44] ss:$24 sps:$4 sm:$0xff]  }
  0x18   :  { %1390 = vmatprep.subr.bf16.mxu0 %v1598_v14  ;;  %1576 = vmatprep.subr.bf16.mxu1 %v1598_v14  ;;  %v1664_v4 = vld [vmem:[%s2142_s0 + $0x3c] ss:$24 sps:$4 sm:$0xff]   ;;  %v1668_v6 = vld [vmem:[%s2142_s0 + $0x38] ss:$24 sps:$4 sm:$0xff]   ;;  %v1670_v8 = vld [vmem:[%s2142_s0 + $0x6c] ss:$24 sps:$4 sm:$0xff]  }
  0x19   :  { %v1669_v7 = vld [vmem:[%s2142_s0 + $0x40] ss:$24 sps:$4 sm:$0xff]   ;;  %v1672_v9 = vld [vmem:[%s2142_s0 + $0x74] ss:$24 sps:$4 sm:$0xff]   ;;  %v1675_v11 = vld [vmem:[%s2142_s0 + $0x70] ss:$24 sps:$4 sm:$0xff]  }
  0x1a   :  { %v1674_v10 = vld [vmem:[%s2142_s0 + $0x68] ss:$24 sps:$4 sm:$0xff]   ;;  %v1676_v12 = vld [vmem:[%s2142_s0 + $0x9c] ss:$24 sps:$4 sm:$0xff]   ;;  %v1680_v14 = vld [vmem:[%s2142_s0 + $0x98] ss:$24 sps:$4 sm:$0xff]  }
  0x1b   :  { %1391 = vmatpush3.bf16.msra.mxu0 %v1599_v15  ;;  %1584 = vmatpush3.bf16.msra.mxu1 %v1599_v15  ;;  %v1678_v13 = vld [vmem:[%s2142_s0 + $0xa4] ss:$24 sps:$4 sm:$0xff]   ;;  %v1681_v15 = vld [vmem:[%s2142_s0 + $0xa0] ss:$24 sps:$4 sm:$0xff]  }
  0x1c   :  { %1392 = vmatprep.subr.bf16.mxu0 %v1600_v16  ;;  %1577 = vmatprep.subr.bf16.mxu1 %v1600_v16  ;;  %v1682_v16 = vld [vmem:[%s2142_s0 + $0xcc] ss:$24 sps:$4 sm:$0xff]  }
  0x1f   :  { %1393 = vmatpush3.bf16.msra.mxu0 %v1601_v17  ;;  %1585 = vmatpush3.bf16.msra.mxu1 %v1601_v17  ;;  %v1684_v17 = vld [vmem:[%s2142_s0 + $0xd4] ss:$24 sps:$4 sm:$0xff]  }
  0x20   :  { %1442 = vmatprep.subr.bf16.mxu1 %v1608_v20  ;;  %1506 = vmatprep.subr.bf16.mxu0 %v1609_v21  ;;  %v1688_v20 = vld [vmem:[%s2142_s0 + $0xfc] ss:$24 sps:$4 sm:$0xff]  }
  0x21   :  { %v1690_v21 = vld [vmem:[%s2142_s0 + $0x104] ss:$24 sps:$4 sm:$0xff]  }
  0x22   :  { %760 = vmatmul.mubr.bf16.vlgmr.msra.gmra.mrb[0].mxu0 %v1602_v18  ;;  %792 = vmatmul.mubr.bf16.vlgmr.msra.gmra.mrb[0].mxu1 %v1605_v19  ;;  %v1686_v18 = vld [vmem:[%s2142_s0 + $0xc8] ss:$24 sps:$4 sm:$0xff]  }
  0x23   :  { %1443 = vmatpush3.bf16.msra.mxu1 %v1610_v22  ;;  %1507 = vmatpush3.bf16.msra.mxu0 %v1611_v23  ;;  %v1687_v19 = vld [vmem:[%s2142_s0 + $0xd0] ss:$24 sps:$4 sm:$0xff]   ;;  %v1693_v23 = vld [vmem:[%s2142_s0 + $0x100] ss:$24 sps:$4 sm:$0xff]  }
  0x24   :  { %1444 = vmatprep.subr.bf16.mxu1 %v1612_v24  ;;  %1508 = vmatprep.subr.bf16.mxu0 %v1613_v25  ;;  %v1692_v22 = vld [vmem:[%s2142_s0 + $0xf8] ss:$24 sps:$4 sm:$0xff]   ;;  %v1694_v24 = vld [vmem:[%s2142_s0 + $0x12c] ss:$24 sps:$4 sm:$0xff]  }
  0x25   :  { %767 = vmatprep.mubr.bf16.mxu0 %v1616_v26  ;;  %799 = vmatprep.mubr.bf16.mxu1 %v1618_v28  ;;  %v1696_v25 = vld [vmem:[%s2142_s0 + $0x134] ss:$24 sps:$4 sm:$0xff]   ;;  %v1698_v26 = vld [vmem:[%s2142_s0 + $0x128] ss:$24 sps:$4 sm:$0xff]  }
  0x26   :  { %v1700_v28 = vld [vmem:[%s2142_s0 + $0x15c] ss:$24 sps:$4 sm:$0xff]  }
  0x27   :  { %1445 = vmatpush3.bf16.msra.mxu1 %v1614_v27  ;;  %1509 = vmatpush3.bf16.msra.mxu0 %v1615_v29  ;;  %v1699_v27 = vld [vmem:[%s2142_s0 + $0x130] ss:$24 sps:$4 sm:$0xff]   ;;  %v1702_v29 = vld [vmem:[%s2142_s0 + $0x164] ss:$24 sps:$4 sm:$0xff]  }
  0x28   :  { %1446 = vmatprep.subr.bf16.mxu1 %v1622_v30  ;;  %1510 = vmatprep.subr.bf16.mxu0 %v1623_v32  ;;  %v1704_v30 = vld [vmem:[%s2142_s0 + $0x158] ss:$24 sps:$4 sm:$0xff]  }
  0x2a   :  { %768 = vmatmul.mubr.bf16.gmra.mrb[4].mxu0 %v1620_v31  ;;  %800 = vmatmul.mubr.bf16.gmra.mrb[4].mxu1 %v1621_v33  ;;  %v1705_v31 = vld [vmem:[%s2142_s0 + $0x160] ss:$24 sps:$4 sm:$0xff]  }
  0x2b   :  { %1447 = vmatpush3.bf16.msra.mxu1 %v1624_v34  ;;  %1511 = vmatpush3.bf16.msra.mxu0 %v1625_v35 }
  0x2c   :  { %1448 = vmatprep.subr.bf16.mxu1 %v1626_v36  ;;  %1512 = vmatprep.subr.bf16.mxu0 %v1627_v37 }
  0x2d   :  { %775 = vmatprep.mubr.bf16.mxu0 %v1630_v38  ;;  %807 = vmatprep.mubr.bf16.mxu1 %v1632_v40 }
  0x2f   :  { %1449 = vmatpush3.bf16.msra.mxu1 %v1628_v39  ;;  %1513 = vmatpush3.bf16.msra.mxu0 %v1629_v41 }
  0x30   :  { %1450 = vmatprep.subr.bf16.mxu1 %v1636_v42  ;;  %1514 = vmatprep.subr.bf16.mxu0 %v1637_v45 }
  0x32   :  { %776 = vmatmul.mubr.bf16.gmra.mrb[8].mxu0 %v1634_v43  ;;  %808 = vmatmul.mubr.bf16.gmra.mrb[8].mxu1 %v1635_v44 }
  0x33   :  { %1451 = vmatpush3.bf16.msra.mxu1 %v1638_v46  ;;  %1515 = vmatpush3.bf16.msra.mxu0 %v1639_v47 }
  0x34   :  { %1452 = vmatprep.subr.bf16.mxu1 %v1640_v48  ;;  %1516 = vmatprep.subr.bf16.mxu0 %v1641_v49 }
  0x35   :  { %783 = vmatprep.mubr.bf16.mxu0 %v1644_v50  ;;  %815 = vmatprep.mubr.bf16.mxu1 %v1646_v51 }
  0x37   :  { %1453 = vmatpush3.bf16.msra.mxu1 %v1642_v52  ;;  %1517 = vmatpush3.bf16.msra.mxu0 %v1643_v53 }
  0x38   :  { %1454 = vmatprep.subr.bf16.mxu1 %v1650_v54  ;;  %1518 = vmatprep.subr.bf16.mxu0 %v1651_v57 }
  0x3a   :  { %784 = vmatmul.mubr.bf16.gmra.mrb[12].mxu0 %v1648_v55  ;;  %816 = vmatmul.mubr.bf16.gmra.mrb[12].mxu1 %v1649_v56 }
  0x3b   :  { %1455 = vmatpush3.bf16.msra.mxu1 %v1652_v58  ;;  %1519 = vmatpush3.bf16.msra.mxu0 %v1653_v59 }
  0x3c   :  { %1456 = vmatprep.subr.bf16.mxu1 %v1654_v60  ;;  %1520 = vmatprep.subr.bf16.mxu0 %v1655_v61 }
  0x3d   :  { %856 = vmatprep.mubr.bf16.mxu1 %v1660_v0  ;;  %953 = vmatprep.mubr.bf16.mxu0 %v1663_v2 }
  0x3f   :  { %1457 = vmatpush3.bf16.msra.mxu1 %v1656_v62  ;;  %1521 = vmatpush3.bf16.msra.mxu0 %v1657_v63 }
  0x42   :  { %857 = vmatmul.mubr.bf16.vlgmr.msra.gmra.mrb[16].mxu1 %v1658_v1  ;;  %954 = vmatmul.mubr.bf16.vlgmr.msra.gmra.mrb[16].mxu0 %v1661_v3 }
  0x43   :  { %864 = vmatprep.mubr.bf16.mxu1 %v1664_v4  ;;  %961 = vmatprep.mubr.bf16.mxu0 %v1666_v5 }
  0x4a   :  { %865 = vmatmul.mubr.bf16.gmra.mrb[20].mxu1 %v1668_v6  ;;  %962 = vmatmul.mubr.bf16.gmra.mrb[20].mxu0 %v1669_v7 }
  0x4b   :  { %872 = vmatprep.mubr.bf16.mxu1 %v1670_v8  ;;  %969 = vmatprep.mubr.bf16.mxu0 %v1672_v9 }
  0x52   :  { %873 = vmatmul.mubr.bf16.gmra.mrb[24].mxu1 %v1674_v10  ;;  %970 = vmatmul.mubr.bf16.gmra.mrb[24].mxu0 %v1675_v11 }
  0x53   :  { %880 = vmatprep.mubr.bf16.mxu1 %v1676_v12  ;;  %977 = vmatprep.mubr.bf16.mxu0 %v1678_v13 }
  0x5a   :  { %881 = vmatmul.mubr.bf16.gmra.mrb[28].mxu1 %v1680_v14  ;;  %978 = vmatmul.mubr.bf16.gmra.mrb[28].mxu0 %v1681_v15 }
  0x5b   :  { %888 = vmatprep.mubr.bf16.mxu1 %v1682_v16  ;;  %985 = vmatprep.mubr.bf16.mxu0 %v1684_v17 }
  0x62   :  { %889 = vmatmul.mubr.bf16.gmra.mrb[32].mxu1 %v1686_v18  ;;  %986 = vmatmul.mubr.bf16.gmra.mrb[32].mxu0 %v1687_v19 }
  0x63   :  { %896 = vmatprep.mubr.bf16.mxu1 %v1688_v20  ;;  %993 = vmatprep.mubr.bf16.mxu0 %v1690_v21 }
  0x6a   :  { %897 = vmatmul.mubr.bf16.gmra.mrb[36].mxu1 %v1692_v22  ;;  %994 = vmatmul.mubr.bf16.gmra.mrb[36].mxu0 %v1693_v23 }
  0x6b   :  { %904 = vmatprep.mubr.bf16.mxu1 %v1694_v24  ;;  %1001 = vmatprep.mubr.bf16.mxu0 %v1696_v25 }
  0x72   :  { %905 = vmatmul.mubr.bf16.gmra.mrb[40].mxu1 %v1698_v26  ;;  %1002 = vmatmul.mubr.bf16.gmra.mrb[40].mxu0 %v1699_v27 }
  0x73   :  { %912 = vmatprep.mubr.bf16.mxu1 %v1700_v28  ;;  %1009 = vmatprep.mubr.bf16.mxu0 %v1702_v29  ;;  %v2055_v29 = vld [vmem:[%s2143_s2] ss:$0 sm:$0xff] }
  0x7a   :  { %913 = vmatmul.mubr.bf16.gmra.mrb[44].mxu1 %v1704_v30  ;;  %1010 = vmatmul.mubr.bf16.gmra.mrb[44].mxu0 %v1705_v31 }
  0xf5   :  { %v1394_v32 = vpop.f32.mrb[0].mxu0  ;;  %v1418_v33 = vpop.f32.mrb[0].mxu1 }
  0xf6   :  { %v1395_v34 = vpop.f32.mrb[1].mxu0  ;;  %v1419_v35 = vpop.f32.mrb[1].mxu1 }
  0xf7   :  { %v1396_v36 = vadd.f32 %v1395_v34, %v1394_v32  ;;  %v2024_v37 = vadd.f32 %v1419_v35, %v1418_v33  ;;  %v1397_v38 = vpop.f32.mrb[2].mxu0  ;;  %v1421_v39 = vpop.f32.mrb[2].mxu1 }
  0xf8   :  { %v1398_v40 = vpop.f32.mrb[3].mxu0  ;;  %v1422_v41 = vpop.f32.mrb[3].mxu1 }
  0xf9   :  { %v1399_v42 = vadd.f32 %v1398_v40, %v1397_v38  ;;  %v2026_v43 = vadd.f32 %v1422_v41, %v1421_v39 }
  0xfd   :  { %v1400_v44 = vpop.f32.mrb[4].mxu0  ;;  %v1424_v45 = vpop.f32.mrb[4].mxu1 }
  0xfe   :  { %v1401_v46 = vpop.f32.mrb[5].mxu0  ;;  %v1425_v47 = vpop.f32.mrb[5].mxu1 }
  0xff   :  { %v2028_v48 = vadd.f32 %v1401_v46, %v1400_v44  ;;  %v2030_v49 = vadd.f32 %v1425_v47, %v1424_v45  ;;  %v1403_v50 = vpop.f32.mrb[6].mxu0  ;;  %v1427_v51 = vpop.f32.mrb[6].mxu1 }
 0x100   :  { %v1404_v52 = vpop.f32.mrb[7].mxu0  ;;  %v1428_v53 = vpop.f32.mrb[7].mxu1 }
 0x101   :  { %v2032_v54 = vadd.f32 %v1404_v52, %v1403_v50  ;;  %v2034_v55 = vadd.f32 %v1428_v53, %v1427_v51 }
 0x105   :  { %v1406_v56 = vpop.f32.mrb[8].mxu0  ;;  %v1430_v57 = vpop.f32.mrb[8].mxu1 }
 0x106   :  { %v1407_v58 = vpop.f32.mrb[9].mxu0  ;;  %v1431_v59 = vpop.f32.mrb[9].mxu1 }
 0x107   :  { %v2036_v60 = vadd.f32 %v1407_v58, %v1406_v56  ;;  %v2038_v61 = vadd.f32 %v1431_v59, %v1430_v57  ;;  %v1409_v62 = vpop.f32.mrb[10].mxu0  ;;  %v1433_v63 = vpop.f32.mrb[10].mxu1 }
 0x108   :  { %v1410_v0 = vpop.f32.mrb[11].mxu0  ;;  %v1434_v1 = vpop.f32.mrb[11].mxu1 }
 0x109   :  { %v2040_v2 = vadd.f32 %v1410_v0, %v1409_v62  ;;  %v2042_v3 = vadd.f32 %v1434_v1, %v1433_v63 }
 0x10d   :  { %v1412_v4 = vpop.f32.mrb[12].mxu0  ;;  %v1436_v5 = vpop.f32.mrb[12].mxu1 }
 0x10e   :  { %v1413_v6 = vpop.f32.mrb[13].mxu0  ;;  %v1437_v7 = vpop.f32.mrb[13].mxu1 }
 0x10f   :  { %v2044_v8 = vadd.f32 %v1413_v6, %v1412_v4  ;;  %v2046_v9 = vadd.f32 %v1437_v7, %v1436_v5  ;;  %v1415_v10 = vpop.f32.mrb[14].mxu0  ;;  %v1439_v11 = vpop.f32.mrb[14].mxu1 }
 0x110   :  { %v1416_v12 = vpop.f32.mrb[15].mxu0  ;;  %v1440_v13 = vpop.f32.mrb[15].mxu1 }
 0x111   :  { %v2048_v14 = vadd.f32 %v1416_v12, %v1415_v10  ;;  %v2050_v15 = vadd.f32 %v1440_v13, %v1439_v11 }
 0x115   :  { %v1458_v16 = vpop.f32.mrb[16].mxu1  ;;  %v1522_v17 = vpop.f32.mrb[16].mxu0 }
 0x116   :  { %v1459_v18 = vpop.f32.mrb[17].mxu1  ;;  %v1523_v19 = vpop.f32.mrb[17].mxu0 }
 0x117   :  { %v1460_v20 = vadd.f32 %v1459_v18, %v1458_v16  ;;  %v1524_v21 = vadd.f32 %v1523_v19, %v1522_v17  ;;  %v1461_v22 = vpop.f32.mrb[18].mxu1  ;;  %v1525_v23 = vpop.f32.mrb[18].mxu0 }
 0x118   :  { %v1462_v24 = vpop.f32.mrb[19].mxu1  ;;  %v1526_v25 = vpop.f32.mrb[19].mxu0 }
 0x119   :  { %v859_v26 = vadd.f32 %v1460_v20, %v1396_v36  ;;  %v1463_v27 = vadd.f32 %v1462_v24, %v1461_v22  ;;  %v1527_v28 = vadd.f32 %v1526_v25, %v1525_v23 }
 0x11b   :  { %v956_v30 = vadd.f32 %v1524_v21, %v859_v26  ;;  %v862_v31 = vadd.f32 %v1463_v27, %v1399_v42 }
 0x11d   :  { %v1076_v32 = vadd.f32 %v2055_v29, %v956_v30  ;;  %v959_v33 = vadd.f32 %v1527_v28, %v862_v31  ;;  %v1464_v34 = vpop.f32.mrb[20].mxu1  ;;  %v1528_v35 = vpop.f32.mrb[20].mxu0 }
 0x11e   :  { %v1465_v38 = vpop.f32.mrb[21].mxu1  ;;  %v1529_v39 = vpop.f32.mrb[21].mxu0 }
 0x11f   :  { %1092 = vst [vmem:[%s2144_s3] sm:$0xff] %v1076_v32  ;;  %v1077_v36 = vadd.f32 %v2055_v29, %v959_v33  ;;  %v1466_v40 = vadd.f32 %v1465_v38, %v1464_v34  ;;  %v1530_v41 = vadd.f32 %v1529_v39, %v1528_v35  ;;  %v1467_v44 = vpop.f32.mrb[22].mxu1  ;;  %v1531_v45 = vpop.f32.mrb[22].mxu0  ;;  %v1227_v46 = vmul.f32 %v1076_v32, %v1076_v32 }
 0x120   :  { %v1468_v47 = vpop.f32.mrb[23].mxu1  ;;  %v1532_v42 = vpop.f32.mrb[23].mxu0 }
 0x121   :  { %1093 = vst [vmem:[%s2144_s3 + $0x8] sm:$0xff] %v1077_v36  ;;  %v1206_v50 = vadd.f32 %v1077_v36, %v1076_v32  ;;  %v1228_v51 = vmul.f32 %v1077_v36, %v1077_v36  ;;  %v867_v52 = vadd.f32 %v1466_v40, %v2028_v48  ;;  %v1469_v53 = vadd.f32 %v1468_v47, %v1467_v44 }
 0x122   :  { %v1533_v56 = vadd.f32 %v1532_v42, %v1531_v45 }
 0x123   :  { %v1243_v57 = vadd.f32 %v1228_v51, %v1227_v46  ;;  %v964_v58 = vadd.f32 %v1530_v41, %v867_v52  ;;  %v870_v59 = vadd.f32 %v1469_v53, %v2032_v54 }
 0x125   :  { %v1078_v62 = vadd.f32 %v2055_v29, %v964_v58  ;;  %v967_v63 = vadd.f32 %v1533_v56, %v870_v59  ;;  %v1470_v0 = vpop.f32.mrb[24].mxu1  ;;  %v1534_v1 = vpop.f32.mrb[24].mxu0 }
 0x126   :  { %v1471_v4 = vpop.f32.mrb[25].mxu1  ;;  %v1535_v5 = vpop.f32.mrb[25].mxu0 }
 0x127   :  { %1094 = vst [vmem:[%s2144_s3 + $0x10] sm:$0xff] %v1078_v62  ;;  %v1207_v6 = vadd.f32 %v1206_v50, %v1078_v62  ;;  %v1229_v7 = vmul.f32 %v1078_v62, %v1078_v62  ;;  %v1079_v48 = vadd.f32 %v2055_v29, %v967_v63  ;;  %v1472_v10 = vadd.f32 %v1471_v4, %v1470_v0  ;;  %v1473_v11 = vpop.f32.mrb[26].mxu1  ;;  %v1537_v12 = vpop.f32.mrb[26].mxu0 }
 0x128   :  { %v1536_v13 = vadd.f32 %v1535_v5, %v1534_v1  ;;  %v1474_v54 = vpop.f32.mrb[27].mxu1  ;;  %v1538_v16 = vpop.f32.mrb[27].mxu0 }
 0x129   :  { %v1244_v17 = vadd.f32 %v1243_v57, %v1229_v7  ;;  %1095 = vst [vmem:[%s2144_s3 + $0x18] sm:$0xff] %v1079_v48  ;;  %v1208_v18 = vadd.f32 %v1207_v6, %v1079_v48  ;;  %v1230_v19 = vmul.f32 %v1079_v48, %v1079_v48  ;;  %v875_v20 = vadd.f32 %v1472_v10, %v2036_v60 }
 0x12a   :  { %v1475_v21 = vadd.f32 %v1474_v54, %v1473_v11  ;;  %v1539_v22 = vadd.f32 %v1538_v16, %v1537_v12 }
 0x12b   :  { %v1245_v23 = vadd.f32 %v1244_v17, %v1230_v19  ;;  %v972_v24 = vadd.f32 %v1536_v13, %v875_v20 }
 0x12c   :  { %v878_v25 = vadd.f32 %v1475_v21, %v2040_v2 }
 0x12d   :  { %v1080_v26 = vadd.f32 %v2055_v29, %v972_v24  ;;  %v1476_v27 = vpop.f32.mrb[28].mxu1  ;;  %v1540_v28 = vpop.f32.mrb[28].mxu0 }
 0x12e   :  { %v975_v30 = vadd.f32 %v1539_v22, %v878_v25  ;;  %v1477_v31 = vpop.f32.mrb[29].mxu1  ;;  %v1541_v32 = vpop.f32.mrb[29].mxu0 }
 0x12f   :  { %1096 = vst [vmem:[%s2144_s3 + $0x20] sm:$0xff] %v1080_v26  ;;  %v1209_v33 = vadd.f32 %v1208_v18, %v1080_v26  ;;  %v1231_v34 = vmul.f32 %v1080_v26, %v1080_v26  ;;  %v1478_v60 = vadd.f32 %v1477_v31, %v1476_v27  ;;  %v1542_v35 = vadd.f32 %v1541_v32, %v1540_v28  ;;  %v1479_v38 = vpop.f32.mrb[30].mxu1  ;;  %v1543_v39 = vpop.f32.mrb[30].mxu0 }
 0x130   :  { %v1081_v36 = vadd.f32 %v2055_v29, %v975_v30  ;;  %v1480_v2 = vpop.f32.mrb[31].mxu1  ;;  %v1544_v40 = vpop.f32.mrb[31].mxu0 }
 0x131   :  { %v1246_v41 = vadd.f32 %v1245_v23, %v1231_v34  ;;  %v883_v44 = vadd.f32 %v1478_v60, %v2044_v8  ;;  %v1481_v45 = vadd.f32 %v1480_v2, %v1479_v38  ;;  %v1545_v46 = vadd.f32 %v1544_v40, %v1543_v39 }
 0x132   :  { %1097 = vst [vmem:[%s2144_s3 + $0x28] sm:$0xff] %v1081_v36  ;;  %v1210_v47 = vadd.f32 %v1209_v33, %v1081_v36  ;;  %v1232_v42 = vmul.f32 %v1081_v36, %v1081_v36 }
 0x133   :  { %v980_v50 = vadd.f32 %v1542_v35, %v883_v44  ;;  %v886_v51 = vadd.f32 %v1481_v45, %v2048_v14 }
 0x134   :  { %v1247_v52 = vadd.f32 %v1246_v41, %v1232_v42 }
 0x135   :  { %v1082_v53 = vadd.f32 %v2055_v29, %v980_v50  ;;  %v983_v56 = vadd.f32 %v1545_v46, %v886_v51  ;;  %v1482_v57 = vpop.f32.mrb[32].mxu1  ;;  %v1546_v58 = vpop.f32.mrb[32].mxu0 }
 0x136   :  { %v1483_v59 = vpop.f32.mrb[33].mxu1  ;;  %v1547_v62 = vpop.f32.mrb[33].mxu0 }
 0x137   :  { %1098 = vst [vmem:[%s2144_s3 + $0x30] sm:$0xff] %v1082_v53  ;;  %v1211_v8 = vadd.f32 %v1210_v47, %v1082_v53  ;;  %v1233_v63 = vmul.f32 %v1082_v53, %v1082_v53  ;;  %v1083_v0 = vadd.f32 %v2055_v29, %v983_v56  ;;  %v1484_v1 = vadd.f32 %v1483_v59, %v1482_v57  ;;  %v1485_v4 = vpop.f32.mrb[34].mxu1  ;;  %v1549_v5 = vpop.f32.mrb[34].mxu0 }
 0x138   :  { %v1548_v14 = vadd.f32 %v1547_v62, %v1546_v58  ;;  %v1486_v6 = vpop.f32.mrb[35].mxu1  ;;  %v1550_v7 = vpop.f32.mrb[35].mxu0 }
 0x139   :  { %v1248_v48 = vadd.f32 %v1247_v52, %v1233_v63  ;;  %1099 = vst [vmem:[%s2144_s3 + $0x38] sm:$0xff] %v1083_v0  ;;  %v1212_v10 = vadd.f32 %v1211_v8, %v1083_v0  ;;  %v1234_v11 = vmul.f32 %v1083_v0, %v1083_v0  ;;  %v891_v12 = vadd.f32 %v1484_v1, %v2024_v37 }
 0x13a   :  { %v1487_v13 = vadd.f32 %v1486_v6, %v1485_v4  ;;  %v1551_v54 = vadd.f32 %v1550_v7, %v1549_v5 }
 0x13b   :  { %v1249_v16 = vadd.f32 %v1248_v48, %v1234_v11  ;;  %v988_v17 = vadd.f32 %v1548_v14, %v891_v12 }
 0x13c   :  { %v894_v18 = vadd.f32 %v1487_v13, %v2026_v43 }
 0x13d   :  { %v1084_v19 = vadd.f32 %v2055_v29, %v988_v17  ;;  %v1488_v20 = vpop.f32.mrb[36].mxu1  ;;  %v1552_v21 = vpop.f32.mrb[36].mxu0 }
 0x13e   :  { %v991_v22 = vadd.f32 %v1551_v54, %v894_v18  ;;  %v1489_v23 = vpop.f32.mrb[37].mxu1  ;;  %v1553_v24 = vpop.f32.mrb[37].mxu0 }
 0x13f   :  { %1100 = vst [vmem:[%s2144_s3 + $0x40] sm:$0xff] %v1084_v19  ;;  %v1213_v25 = vadd.f32 %v1212_v10, %v1084_v19  ;;  %v1235_v26 = vmul.f32 %v1084_v19, %v1084_v19  ;;  %v1490_v37 = vadd.f32 %v1489_v23, %v1488_v20  ;;  %v1554_v27 = vadd.f32 %v1553_v24, %v1552_v21  ;;  %v1491_v28 = vpop.f32.mrb[38].mxu1  ;;  %v1555_v30 = vpop.f32.mrb[38].mxu0 }
 0x140   :  { %v1085_v31 = vadd.f32 %v2055_v29, %v991_v22  ;;  %v1492_v43 = vpop.f32.mrb[39].mxu1  ;;  %v1556_v32 = vpop.f32.mrb[39].mxu0 }
 0x141   :  { %v1250_v33 = vadd.f32 %v1249_v16, %v1235_v26  ;;  %v899_v34 = vadd.f32 %v1490_v37, %v2030_v49  ;;  %v1493_v60 = vadd.f32 %v1492_v43, %v1491_v28  ;;  %v1557_v35 = vadd.f32 %v1556_v32, %v1555_v30 }
 0x142   :  { %1101 = vst [vmem:[%s2144_s3 + $0x48] sm:$0xff] %v1085_v31  ;;  %v1214_v38 = vadd.f32 %v1213_v25, %v1085_v31  ;;  %v1236_v39 = vmul.f32 %v1085_v31, %v1085_v31 }
 0x143   :  { %v996_v36 = vadd.f32 %v1554_v27, %v899_v34  ;;  %v902_v2 = vadd.f32 %v1493_v60, %v2034_v55 }
 0x144   :  { %v1251_v40 = vadd.f32 %v1250_v33, %v1236_v39 }
 0x145   :  { %v1086_v41 = vadd.f32 %v2055_v29, %v996_v36  ;;  %v999_v44 = vadd.f32 %v1557_v35, %v902_v2  ;;  %v1494_v45 = vpop.f32.mrb[40].mxu1  ;;  %v1558_v46 = vpop.f32.mrb[40].mxu0 }
 0x146   :  { %v1495_v47 = vpop.f32.mrb[41].mxu1  ;;  %v1559_v42 = vpop.f32.mrb[41].mxu0 }
 0x147   :  { %1102 = vst [vmem:[%s2144_s3 + $0x50] sm:$0xff] %v1086_v41  ;;  %v1215_v49 = vadd.f32 %v1214_v38, %v1086_v41  ;;  %v1237_v50 = vmul.f32 %v1086_v41, %v1086_v41  ;;  %v1087_v51 = vadd.f32 %v2055_v29, %v999_v44  ;;  %v1496_v52 = vadd.f32 %v1495_v47, %v1494_v45  ;;  %v1497_v53 = vpop.f32.mrb[42].mxu1  ;;  %v1561_v56 = vpop.f32.mrb[42].mxu0 }
 0x148   :  { %v1560_v55 = vadd.f32 %v1559_v42, %v1558_v46  ;;  %v1498_v57 = vpop.f32.mrb[43].mxu1  ;;  %v1562_v58 = vpop.f32.mrb[43].mxu0  ;;  %v1108_v38 = vlaneseq }
 0x149   :  { %v1252_v59 = vadd.f32 %v1251_v40, %v1237_v50  ;;  %1103 = vst [vmem:[%s2144_s3 + $0x58] sm:$0xff] %v1087_v51  ;;  %v1216_v62 = vadd.f32 %v1215_v49, %v1087_v51  ;;  %v1238_v8 = vmul.f32 %v1087_v51, %v1087_v51  ;;  %v907_v63 = vadd.f32 %v1496_v52, %v2038_v61 }
 0x14a   :  { %v1499_v0 = vadd.f32 %v1498_v57, %v1497_v53  ;;  %v1563_v1 = vadd.f32 %v1562_v58, %v1561_v56  ;;  %v1109_v41 = vshrl.u32 %v1108_v38, 7 }
 0x14b   :  { %v1253_v4 = vadd.f32 %v1252_v59, %v1238_v8  ;;  %v1004_v5 = vadd.f32 %v1560_v55, %v907_v63 }
 0x14c   :  { %v910_v14 = vadd.f32 %v1499_v0, %v2042_v3  ;;  %vm1264_vm0 = vcmp.eq.s32.totalorder %v1109_v41, 0 }
 0x14d   :  { %v1088_v6 = vadd.f32 %v2055_v29, %v1004_v5  ;;  %v1500_v7 = vpop.f32.mrb[44].mxu1  ;;  %v1564_v48 = vpop.f32.mrb[44].mxu0 }
 0x14e   :  { %v1007_v10 = vadd.f32 %v1563_v1, %v910_v14  ;;  %v1501_v11 = vpop.f32.mrb[45].mxu1  ;;  %v1565_v12 = vpop.f32.mrb[45].mxu0 }
 0x14f   :  { %1104 = vst [vmem:[%s2144_s3 + $0x60] sm:$0xff] %v1088_v6  ;;  %v1217_v13 = vadd.f32 %v1216_v62, %v1088_v6  ;;  %v1239_v54 = vmul.f32 %v1088_v6, %v1088_v6  ;;  %v1502_v61 = vadd.f32 %v1501_v11, %v1500_v7  ;;  %v1566_v16 = vadd.f32 %v1565_v12, %v1564_v48  ;;  %v1503_v17 = vpop.f32.mrb[46].mxu1  ;;  %v1567_v18 = vpop.f32.mrb[46].mxu0 }
 0x150   :  { %v1089_v19 = vadd.f32 %v2055_v29, %v1007_v10  ;;  %v1504_v3 = vpop.f32.mrb[47].mxu1  ;;  %v1568_v20 = vpop.f32.mrb[47].mxu0 }
 0x151   :  { %v1254_v21 = vadd.f32 %v1253_v4, %v1239_v54  ;;  %v915_v22 = vadd.f32 %v1502_v61, %v2046_v9  ;;  %v1505_v23 = vadd.f32 %v1504_v3, %v1503_v17  ;;  %v1569_v24 = vadd.f32 %v1568_v20, %v1567_v18 }
 0x152   :  { %1105 = vst [vmem:[%s2144_s3 + $0x68] sm:$0xff] %v1089_v19  ;;  %v1218_v25 = vadd.f32 %v1217_v13, %v1089_v19  ;;  %v1240_v26 = vmul.f32 %v1089_v19, %v1089_v19 }
 0x153   :  { %v1012_v37 = vadd.f32 %v1566_v16, %v915_v22  ;;  %v918_v27 = vadd.f32 %v1505_v23, %v2050_v15 }
 0x154   :  { %v1255_v28 = vadd.f32 %v1254_v21, %v1240_v26 }
 0x155   :  { %v1090_v30 = vadd.f32 %v2055_v29, %v1012_v37  ;;  %v1015_v31 = vadd.f32 %v1569_v24, %v918_v27 }
 0x157   :  { %1106 = vst [vmem:[%s2144_s3 + $0x70] sm:$0xff] %v1090_v30  ;;  %v1219_v9 = vadd.f32 %v1218_v25, %v1090_v30  ;;  %v1241_v43 = vmul.f32 %v1090_v30, %v1090_v30  ;;  %v1091_v32 = vadd.f32 %v2055_v29, %v1015_v31 }
 0x159   :  { %v1256_v33 = vadd.f32 %v1255_v28, %v1241_v43  ;;  %1107 = vst [vmem:[%s2144_s3 + $0x78] sm:$0xff] %v1091_v32  ;;  %v1220_v34 = vadd.f32 %v1219_v9, %v1091_v32  ;;  %v1242_v60 = vmul.f32 %v1091_v32, %v1091_v32 }
 0x15b   :  { %v1221_v15 = vrot.slane %v1220_v34, 4  ;;  %v1257_v35 = vadd.f32 %v1256_v33, %v1242_v60 }
 0x15d   :  { %v1222_v39 = vadd.f32 %v1221_v15, %v1220_v34  ;;  %v1258_v36 = vrot.slane %v1257_v35, 4 }
 0x15f   :  { %v1223_v2 = vrot.slane %v1222_v39, 2  ;;  %v1259_v40 = vadd.f32 %v1258_v36, %v1257_v35 }
 0x161   :  { %v1224_v44 = vadd.f32 %v1223_v2, %v1222_v39  ;;  %v1260_v45 = vrot.slane %v1259_v40, 2 }
 0x163   :  { %v1225_v46 = vrot.slane %v1224_v44, 1  ;;  %v1261_v47 = vadd.f32 %v1260_v45, %v1259_v40 }
 0x165   :  { %v1226_v29 = vadd.f32 %v1225_v46, %v1224_v44  ;;  %v1262_v42 = vrot.slane %v1261_v47, 1 }
 0x167   :  { %v1263_v49 = vadd.f32 %v1262_v42, %v1261_v47  ;;  %v1265_v50 = vsel %vm1264_vm0, %v1226_v29, 0.0 }
 0x168   :  { %1266 = vst [vmem:[%s2145_s4] sm:$0xff] %v1265_v50 }
 0x169   :  { %v1267_v51 = vsel %vm1264_vm0, %v1263_v49, 0.0 }
 0x16a   :  { %1268 = vst [vmem:[%s2146_s5] sm:$0xff] %v1267_v51 }

// kernel: generator_forward.51
= control target key start
LH: loop header
LB: loop body
LE: loop exit
PB: predicated region body
PF: predicated region fallthrough
CT: control target
= control target key end

     0   :  { %s546_s0 = inlined_call_operand.vmem [shape: f32[256,128], index: 0, kind: input, shape index: {}]   ;;  %s547_s1 = inlined_call_operand.vmem [shape: f32[1,128], index: 1, kind: input, shape index: {}]   ;;  %s548_s2 = inlined_call_operand.vmem [shape: f32[1,128], index: 2, kind: input, shape index: {}]   ;;  %s549_s3 = inlined_call_operand.vmem [shape: f32[256,128], index: 3, kind: output, shape index: {}]  }
   0x1   :  { %v14_v0 = vld [vmem:[%s546_s0] sm:$0xff]  ;;  %v15_v4 = vld [vmem:[%s546_s0 + $0x8] sm:$0xff]  ;;  %v16_v5 = vld [vmem:[%s546_s0 + $0x10] sm:$0xff] }
   0x2   :  { %v284_v1 = vld [vmem:[%s547_s1] ss:$0 sm:$0xff]  ;;  %v17_v6 = vld [vmem:[%s546_s0 + $0x18] sm:$0xff]  ;;  %v19_v11 = vld [vmem:[%s546_s0 + $0x28] sm:$0xff] }
   0x3   :  { %v289_v2 = vld [vmem:[%s548_s2] ss:$0 sm:$0xff]  ;;  %v53_v3 = vmul.f32 %v284_v1, %v14_v0  ;;  %v54_v7 = vmul.f32 %v284_v1, %v15_v4  ;;  %v55_v8 = vmul.f32 %v284_v1, %v16_v5  ;;  %v56_v9 = vmul.f32 %v284_v1, %v17_v6  ;;  %v20_v12 = vld [vmem:[%s546_s0 + $0x30] sm:$0xff]  ;;  %v21_v17 = vld [vmem:[%s546_s0 + $0x38] sm:$0xff] }
   0x4   :  { %v18_v10 = vld [vmem:[%s546_s0 + $0x20] sm:$0xff]  ;;  %v58_v15 = vmul.f32 %v284_v1, %v19_v11  ;;  %v59_v16 = vmul.f32 %v284_v1, %v20_v12  ;;  %v60_v21 = vmul.f32 %v284_v1, %v21_v17  ;;  %v23_v30 = vld [vmem:[%s546_s0 + $0x48] sm:$0xff]  ;;  %v24_v31 = vld [vmem:[%s546_s0 + $0x50] sm:$0xff] }
   0x5   :  { %v92_v13 = vadd.f32 %v289_v2, %v53_v3  ;;  %v57_v14 = vmul.f32 %v284_v1, %v18_v10  ;;  %v93_v18 = vadd.f32 %v289_v2, %v54_v7  ;;  %v94_v19 = vadd.f32 %v289_v2, %v55_v8  ;;  %v22_v25 = vld [vmem:[%s546_s0 + $0x40] sm:$0xff]  ;;  %v25_v43 = vld [vmem:[%s546_s0 + $0x58] sm:$0xff]  ;;  %v27_v45 = vld [vmem:[%s546_s0 + $0x68] sm:$0xff] }
   0x6   :  { %v95_v20 = vadd.f32 %v289_v2, %v56_v9  ;;  %v97_v24 = vadd.f32 %v289_v2, %v58_v15  ;;  %v98_v37 = vadd.f32 %v289_v2, %v59_v16  ;;  %v99_v38 = vadd.f32 %v289_v2, %v60_v21  ;;  %v26_v44 = vld [vmem:[%s546_s0 + $0x60] sm:$0xff]  ;;  %v28_v56 = vld [vmem:[%s546_s0 + $0x70] sm:$0xff]  ;;  %v29_v4 = vld [vmem:[%s546_s0 + $0x78] sm:$0xff] }
   0x7   :  { %vm124_vm0 = vcmp.gt.f32.partialorder %v92_v13, 0.0  ;;  %v156_v22 = vmul.f32 0.2, %v92_v13  ;;  %v96_v23 = vadd.f32 %v289_v2, %v57_v14  ;;  %vm125_vm1 = vcmp.gt.f32.partialorder %v93_v18, 0.0  ;;  %v30_v5 = vld [vmem:[%s546_s0 + $0x80] sm:$0xff]  ;;  %v31_v9 = vld [vmem:[%s546_s0 + $0x88] sm:$0xff] }
   0x8   :  { %v157_v26 = vmul.f32 0.2, %v93_v18  ;;  %vm126_vm2 = vcmp.gt.f32.partialorder %v94_v19, 0.0  ;;  %v158_v27 = vmul.f32 0.2, %v94_v19  ;;  %vm127_vm3 = vcmp.gt.f32.partialorder %v95_v20, 0.0 }
   0x9   :  { %v188_v28 = vsel %vm124_vm0, %v92_v13, %v156_v22  ;;  %v159_v29 = vmul.f32 0.2, %v95_v20  ;;  %vm128_vm4 = vcmp.gt.f32.partialorder %v96_v23, 0.0  ;;  %v160_v34 = vmul.f32 0.2, %v96_v23  ;;  %v32_v10 = vld [vmem:[%s546_s0 + $0x90] sm:$0xff] }
   0xa   :  { %220 = vst [vmem:[%s549_s3] sm:$0xff] %v188_v28  ;;  %v189_v32 = vsel %vm125_vm1, %v93_v18, %v157_v26  ;;  %v190_v33 = vsel %vm126_vm2, %v94_v19, %v158_v27  ;;  %vm129_vm5 = vcmp.gt.f32.partialorder %v97_v24, 0.0  ;;  %v161_v36 = vmul.f32 0.2, %v97_v24  ;;  %v33_v17 = vld [vmem:[%s546_s0 + $0x98] sm:$0xff]  ;;  %v34_v18 = vld [vmem:[%s546_s0 + $0xa0] sm:$0xff] }
   0xb   :  { %221 = vst [vmem:[%s549_s3 + $0x8] sm:$0xff] %v189_v32  ;;  %222 = vst [vmem:[%s549_s3 + $0x10] sm:$0xff] %v190_v33  ;;  %v191_v35 = vsel %vm127_vm3, %v95_v20, %v159_v29  ;;  %v192_v39 = vsel %vm128_vm4, %v96_v23, %v160_v34  ;;  %v61_v40 = vmul.f32 %v284_v1, %v22_v25  ;;  %vm130_vm6 = vcmp.gt.f32.partialorder %v98_v37, 0.0  ;;  %v35_v32 = vld [vmem:[%s546_s0 + $0xa8] sm:$0xff]  ;;  %v36_v33 = vld [vmem:[%s546_s0 + $0xb0] sm:$0xff] }
   0xc   :  { %223 = vst [vmem:[%s549_s3 + $0x18] sm:$0xff] %v191_v35  ;;  %v62_v41 = vmul.f32 %v284_v1, %v23_v30  ;;  %v63_v42 = vmul.f32 %v284_v1, %v24_v31  ;;  %224 = vst [vmem:[%s549_s3 + $0x20] sm:$0xff] %v192_v39  ;;  %v193_v46 = vsel %vm129_vm5, %v97_v24, %v161_v36  ;;  %v162_v47 = vmul.f32 0.2, %v98_v37 }
   0xd   :  { %vm131_vm7 = vcmp.gt.f32.partialorder %v99_v38, 0.0  ;;  %225 = vst [vmem:[%s549_s3 + $0x28] sm:$0xff] %v193_v46  ;;  %v163_v48 = vmul.f32 0.2, %v99_v38  ;;  %v100_v49 = vadd.f32 %v289_v2, %v61_v40  ;;  %v64_v53 = vmul.f32 %v284_v1, %v25_v43  ;;  %v37_v40 = vld [vmem:[%s546_s0 + $0xb8] sm:$0xff]  ;;  %v39_v46 = vld [vmem:[%s546_s0 + $0xc8] sm:$0xff] }
   0xe   :  { %v101_v50 = vadd.f32 %v289_v2, %v62_v41  ;;  %v102_v51 = vadd.f32 %v289_v2, %v63_v42  ;;  %v194_v52 = vsel %vm130_vm6, %v98_v37, %v162_v47  ;;  %v65_v54 = vmul.f32 %v284_v1, %v26_v44  ;;  %v40_v47 = vld [vmem:[%s546_s0 + $0xd0] sm:$0xff] }
   0xf   :  { %v66_v55 = vmul.f32 %v284_v1, %v27_v45  ;;  %226 = vst [vmem:[%s549_s3 + $0x30] sm:$0xff] %v194_v52  ;;  %v195_v57 = vsel %vm131_vm7, %v99_v38, %v163_v48  ;;  %vm132_vm8 = vcmp.gt.f32.partialorder %v100_v49, 0.0  ;;  %v164_v58 = vmul.f32 0.2, %v100_v49  ;;  %v38_v45 = vld [vmem:[%s546_s0 + $0xc0] sm:$0xff] }
  0x10   :  { %vm133_vm9 = vcmp.gt.f32.partialorder %v101_v50, 0.0  ;;  %227 = vst [vmem:[%s549_s3 + $0x38] sm:$0xff] %v195_v57  ;;  %v165_v59 = vmul.f32 0.2, %v101_v50  ;;  %vm134_vm10 = vcmp.gt.f32.partialorder %v102_v51, 0.0  ;;  %v103_v61 = vadd.f32 %v289_v2, %v64_v53 }
  0x11   :  { %v166_v60 = vmul.f32 0.2, %v102_v51  ;;  %v196_v62 = vsel %vm132_vm8, %v100_v49, %v164_v58  ;;  %v104_v63 = vadd.f32 %v289_v2, %v65_v54  ;;  %v105_v0 = vadd.f32 %v289_v2, %v66_v55  ;;  %v41_v58 = vld [vmem:[%s546_s0 + $0xd8] sm:$0xff] }
  0x12   :  { %v67_v3 = vmul.f32 %v284_v1, %v28_v56  ;;  %228 = vst [vmem:[%s549_s3 + $0x40] sm:$0xff] %v196_v62  ;;  %v197_v6 = vsel %vm133_vm9, %v101_v50, %v165_v59  ;;  %vm135_vm11 = vcmp.gt.f32.partialorder %v103_v61, 0.0  ;;  %v167_v8 = vmul.f32 0.2, %v103_v61  ;;  %v42_v59 = vld [vmem:[%s546_s0 + $0xe0] sm:$0xff] }
  0x13   :  { %v198_v7 = vsel %vm134_vm10, %v102_v51, %v166_v60  ;;  %229 = vst [vmem:[%s549_s3 + $0x48] sm:$0xff] %v197_v6  ;;  %vm136_vm12 = vcmp.gt.f32.partialorder %v104_v63, 0.0  ;;  %v168_v11 = vmul.f32 0.2, %v104_v63  ;;  %vm137_vm13 = vcmp.gt.f32.partialorder %v105_v0, 0.0 }
  0x14   :  { %230 = vst [vmem:[%s549_s3 + $0x50] sm:$0xff] %v198_v7  ;;  %v169_v12 = vmul.f32 0.2, %v105_v0  ;;  %v199_v13 = vsel %vm135_vm11, %v103_v61, %v167_v8  ;;  %v106_v14 = vadd.f32 %v289_v2, %v67_v3  ;;  %v68_v15 = vmul.f32 %v284_v1, %v29_v4 }
  0x15   :  { %v69_v16 = vmul.f32 %v284_v1, %v30_v5  ;;  %231 = vst [vmem:[%s549_s3 + $0x58] sm:$0xff] %v199_v13  ;;  %v200_v19 = vsel %vm136_vm12, %v104_v63, %v168_v11  ;;  %v70_v21 = vmul.f32 %v284_v1, %v31_v9  ;;  %v71_v22 = vmul.f32 %v284_v1, %v32_v10  ;;  %v43_v10 = vld [vmem:[%s546_s0 + $0xe8] sm:$0xff]  ;;  %v44_v11 = vld [vmem:[%s546_s0 + $0xf0] sm:$0xff] }
  0x16   :  { %v201_v20 = vsel %vm137_vm13, %v105_v0, %v169_v12  ;;  %232 = vst [vmem:[%s549_s3 + $0x60] sm:$0xff] %v200_v19  ;;  %vm138_vm14 = vcmp.gt.f32.partialorder %v106_v14, 0.0  ;;  %v170_v23 = vmul.f32 0.2, %v106_v14  ;;  %v107_v24 = vadd.f32 %v289_v2, %v68_v15 }
  0x17   :  { %233 = vst [vmem:[%s549_s3 + $0x68] sm:$0xff] %v201_v20  ;;  %v108_v25 = vadd.f32 %v289_v2, %v69_v16  ;;  %v109_v26 = vadd.f32 %v289_v2, %v70_v21  ;;  %v110_v27 = vadd.f32 %v289_v2, %v71_v22  ;;  %v72_v28 = vmul.f32 %v284_v1, %v33_v17 }
  0x18   :  { %v73_v29 = vmul.f32 %v284_v1, %v34_v18  ;;  %v202_v30 = vsel %vm138_vm14, %v106_v14, %v170_v23  ;;  %vm139_vm15 = vcmp.gt.f32.partialorder %v107_v24, 0.0  ;;  %v171_v31 = vmul.f32 0.2, %v107_v24  ;;  %v45_v18 = vld [vmem:[%s546_s0 + $0xf8] sm:$0xff] }
  0x19   :  { %vm140_vm0 = vcmp.gt.f32.partialorder %v108_v25, 0.0  ;;  %234 = vst [vmem:[%s549_s3 + $0x70] sm:$0xff] %v202_v30  ;;  %v172_v34 = vmul.f32 0.2, %v108_v25  ;;  %vm141_vm1 = vcmp.gt.f32.partialorder %v109_v26, 0.0  ;;  %vm142_vm2 = vcmp.gt.f32.partialorder %v110_v27, 0.0 }
  0x1a   :  { %v173_v35 = vmul.f32 0.2, %v109_v26  ;;  %v203_v36 = vsel %vm139_vm15, %v107_v24, %v171_v31  ;;  %v174_v37 = vmul.f32 0.2, %v110_v27  ;;  %v111_v38 = vadd.f32 %v289_v2, %v72_v28 }
  0x1b   :  { %v112_v39 = vadd.f32 %v289_v2, %v73_v29  ;;  %235 = vst [vmem:[%s549_s3 + $0x78] sm:$0xff] %v203_v36  ;;  %v204_v41 = vsel %vm140_vm0, %v108_v25, %v172_v34  ;;  %v74_v43 = vmul.f32 %v284_v1, %v35_v32  ;;  %v75_v44 = vmul.f32 %v284_v1, %v36_v33 }
  0x1c   :  { %v205_v42 = vsel %vm141_vm1, %v109_v26, %v173_v35  ;;  %236 = vst [vmem:[%s549_s3 + $0x80] sm:$0xff] %v204_v41  ;;  %v206_v48 = vsel %vm142_vm2, %v110_v27, %v174_v37  ;;  %vm143_vm3 = vcmp.gt.f32.partialorder %v111_v38, 0.0  ;;  %v175_v49 = vmul.f32 0.2, %v111_v38 }
  0x1d   :  { %237 = vst [vmem:[%s549_s3 + $0x88] sm:$0xff] %v205_v42  ;;  %vm144_vm4 = vcmp.gt.f32.partialorder %v112_v39, 0.0  ;;  %238 = vst [vmem:[%s549_s3 + $0x90] sm:$0xff] %v206_v48  ;;  %v176_v50 = vmul.f32 0.2, %v112_v39  ;;  %v113_v51 = vadd.f32 %v289_v2, %v74_v43  ;;  %v114_v52 = vadd.f32 %v289_v2, %v75_v44 }
  0x1e   :  { %v76_v53 = vmul.f32 %v284_v1, %v37_v40  ;;  %v207_v54 = vsel %vm143_vm3, %v111_v38, %v175_v49  ;;  %v77_v55 = vmul.f32 %v284_v1, %v38_v45  ;;  %v78_v56 = vmul.f32 %v284_v1, %v39_v46 }
  0x1f   :  { %v79_v57 = vmul.f32 %v284_v1, %v40_v47  ;;  %239 = vst [vmem:[%s549_s3 + $0x98] sm:$0xff] %v207_v54  ;;  %v208_v60 = vsel %vm144_vm4, %v112_v39, %v176_v50  ;;  %vm145_vm5 = vcmp.gt.f32.partialorder %v113_v51, 0.0  ;;  %v177_v61 = vmul.f32 0.2, %v113_v51 }
  0x20   :  { %vm146_vm6 = vcmp.gt.f32.partialorder %v114_v52, 0.0  ;;  %240 = vst [vmem:[%s549_s3 + $0xa0] sm:$0xff] %v208_v60  ;;  %v178_v62 = vmul.f32 0.2, %v114_v52  ;;  %v115_v63 = vadd.f32 %v289_v2, %v76_v53  ;;  %v116_v0 = vadd.f32 %v289_v2, %v77_v55 }
  0x21   :  { %v117_v3 = vadd.f32 %v289_v2, %v78_v56  ;;  %v209_v4 = vsel %vm145_vm5, %v113_v51, %v177_v61  ;;  %v118_v5 = vadd.f32 %v289_v2, %v79_v57  ;;  %v80_v6 = vmul.f32 %v284_v1, %v41_v58 }
  0x22   :  { %v81_v7 = vmul.f32 %v284_v1, %v42_v59  ;;  %241 = vst [vmem:[%s549_s3 + $0xa8] sm:$0xff] %v209_v4  ;;  %v210_v8 = vsel %vm146_vm6, %v114_v52, %v178_v62  ;;  %vm147_vm7 = vcmp.gt.f32.partialorder %v115_v63, 0.0  ;;  %v179_v9 = vmul.f32 0.2, %v115_v63 }
  0x23   :  { %vm148_vm8 = vcmp.gt.f32.partialorder %v116_v0, 0.0  ;;  %242 = vst [vmem:[%s549_s3 + $0xb0] sm:$0xff] %v210_v8  ;;  %v180_v12 = vmul.f32 0.2, %v116_v0  ;;  %vm149_vm9 = vcmp.gt.f32.partialorder %v117_v3, 0.0  ;;  %vm150_vm10 = vcmp.gt.f32.partialorder %v118_v5, 0.0 }
  0x24   :  { %v181_v13 = vmul.f32 0.2, %v117_v3  ;;  %v211_v14 = vsel %vm147_vm7, %v115_v63, %v179_v9  ;;  %v182_v15 = vmul.f32 0.2, %v118_v5  ;;  %v119_v16 = vadd.f32 %v289_v2, %v80_v6 }
  0x25   :  { %v120_v17 = vadd.f32 %v289_v2, %v81_v7  ;;  %243 = vst [vmem:[%s549_s3 + $0xb8] sm:$0xff] %v211_v14  ;;  %v212_v19 = vsel %vm148_vm8, %v116_v0, %v180_v12  ;;  %v82_v21 = vmul.f32 %v284_v1, %v43_v10  ;;  %v83_v22 = vmul.f32 %v284_v1, %v44_v11 }
  0x26   :  { %v213_v20 = vsel %vm149_vm9, %v117_v3, %v181_v13  ;;  %244 = vst [vmem:[%s549_s3 + $0xc0] sm:$0xff] %v212_v19  ;;  %v214_v23 = vsel %vm150_vm10, %v118_v5, %v182_v15  ;;  %vm151_vm11 = vcmp.gt.f32.partialorder %v119_v16, 0.0  ;;  %v183_v24 = vmul.f32 0.2, %v119_v16 }
  0x27   :  { %245 = vst [vmem:[%s549_s3 + $0xc8] sm:$0xff] %v213_v20  ;;  %vm152_vm12 = vcmp.gt.f32.partialorder %v120_v17, 0.0  ;;  %246 = vst [vmem:[%s549_s3 + $0xd0] sm:$0xff] %v214_v23  ;;  %v184_v25 = vmul.f32 0.2, %v120_v17  ;;  %v121_v26 = vadd.f32 %v289_v2, %v82_v21  ;;  %v122_v27 = vadd.f32 %v289_v2, %v83_v22 }
  0x28   :  { %v84_v28 = vmul.f32 %v284_v1, %v45_v18  ;;  %v215_v29 = vsel %vm151_vm11, %v119_v16, %v183_v24 }
  0x29   :  { %247 = vst [vmem:[%s549_s3 + $0xd8] sm:$0xff] %v215_v29  ;;  %v216_v30 = vsel %vm152_vm12, %v120_v17, %v184_v25  ;;  %vm153_vm13 = vcmp.gt.f32.partialorder %v121_v26, 0.0  ;;  %v185_v31 = vmul.f32 0.2, %v121_v26  ;;  %vm154_vm14 = vcmp.gt.f32.partialorder %v122_v27, 0.0 }
  0x2a   :  { %248 = vst [vmem:[%s549_s3 + $0xe0] sm:$0xff] %v216_v30  ;;  %v186_v32 = vmul.f32 0.2, %v122_v27  ;;  %v123_v33 = vadd.f32 %v289_v2, %v84_v28 }
  0x2b   :  { %v217_v34 = vsel %vm153_vm13, %v121_v26, %v185_v31 }
  0x2c   :  { %249 = vst [vmem:[%s549_s3 + $0xe8] sm:$0xff] %v217_v34  ;;  %v218_v1 = vsel %vm154_vm14, %v122_v27, %v186_v32  ;;  %vm155_vm15 = vcmp.gt.f32.partialorder %v123_v33, 0.0  ;;  %v187_v35 = vmul.f32 0.2, %v123_v33 }
  0x2d   :  { %250 = vst [vmem:[%s549_s3 + $0xf0] sm:$0xff] %v218_v1 }
  0x2e   :  { %v219_v36 = vsel %vm155_vm15, %v123_v33, %v187_v35 }
  0x2f   :  { %251 = vst [vmem:[%s549_s3 + $0xf8] sm:$0xff] %v219_v36 }

// kernel: generator_forward.52
= control target key start
LH: loop header
LB: loop body
LE: loop exit
PB: predicated region body
PF: predicated region fallthrough
CT: control target
= control target key end

     0   :  { %v2929_v0 = vmov 0   ;;  %vm988_vm0 = vcmask 1043456   ;;  %vm891_vm1 = vcmask 64512   ;;  %s3849_s1 = inlined_call_operand.vmem [shape: bf16[264,128], index: 1, kind: input, shape index: {}]   ;;  %s3850_s0 = inlined_call_operand.vmem [shape: bf16[512,264], index: 0, kind: input, shape index: {}]   ;;  %s3851_s2 = inlined_call_operand.vmem [shape: f32[1,128], index: 2, kind: input, shape index: {}]   ;;  %s3852_s3 = inlined_call_operand.vmem [shape: f32[512,128], index: 3, kind: output, shape index: {0}]   ;;  %s3853_s4 = inlined_call_operand.vmem [shape: f32[8,128], index: 4, kind: output, shape index: {1}]   ;;  %s3854_s5 = inlined_call_operand.vmem [shape: f32[8,128], index: 5, kind: output, shape index: {2}]  }
   0x1   :  { %992 = vmatprep.subr.bf16.mxu0 %v2929_v0  ;;  %2750 = vmatprep.subr.bf16.mxu1 %v2929_v0  ;;  %v2784_v1 = vld [vmem:[%s3849_s1] sm:$0xff]   ;;  %v2785_v2 = vld [vmem:[%s3849_s1 + $0x8] sm:$0xff]   ;;  %v2786_v3 = vld [vmem:[%s3849_s1 + $0x10] sm:$0xff]  }
   0x2   :  { %993 = vmatpush1.bf16.msra.mxu0 %v2784_v1  ;;  %2766 = vmatpush1.bf16.msra.mxu1 %v2784_v1  ;;  %v2787_v4 = vld [vmem:[%s3849_s1 + $0x18] sm:$0xff]   ;;  %v2788_v5 = vld [vmem:[%s3849_s1 + $0x20] sm:$0xff]   ;;  %v2789_v7 = vld [vmem:[%s3849_s1 + $0x28] sm:$0xff]  }
   0x3   :  { %994 = vmatprep.subr.bf16.mxu0 %v2929_v0  ;;  %2751 = vmatprep.subr.bf16.mxu1 %v2929_v0  ;;  %v2802_v6 = vld [vmem:[%s3850_s0 + $0x4] ss:$12 sps:$4 sm:$0xff]   ;;  %v2791_v10 = vld [vmem:[%s3849_s1 + $0x38] sm:$0xff]   ;;  %v2793_v12 = vld [vmem:[%s3849_s1 + $0x48] sm:$0xff]  }
   0x4   :  { %v2805_v8 = vld [vmem:[%s3850_s0 + $0x244] ss:$12 sps:$4 sm:$0xff]   ;;  %1024 = vmatprep.mubr.bf16.mxu0 %v2802_v6  ;;  %v2795_v14 = vld [vmem:[%s3849_s1 + $0x58] sm:$0xff]   ;;  %v2797_v16 = vld [vmem:[%s3849_s1 + $0x68] sm:$0xff]  }
   0x5   :  { %1216 = vmatprep.mubr.bf16.mxu1 %v2805_v8  ;;  %v2790_v9 = vld [vmem:[%s3849_s1 + $0x30] sm:$0xff]   ;;  %v2792_v11 = vld [vmem:[%s3849_s1 + $0x40] sm:$0xff]   ;;  %v2799_v18 = vld [vmem:[%s3849_s1 + $0x78] sm:$0xff]  }
   0x6   :  { %995 = vmatpush1.bf16.msra.mxu0 %v2785_v2  ;;  %2767 = vmatpush1.bf16.msra.mxu1 %v2785_v2  ;;  %v2794_v13 = vld [vmem:[%s3849_s1 + $0x50] sm:$0xff]   ;;  %v2796_v15 = vld [vmem:[%s3849_s1 + $0x60] sm:$0xff]   ;;  %v2806_v22 = vld [vmem:[%s3850_s0 + $0x1c] ss:$12 sps:$4 sm:$0xff]  }
   0x7   :  { %996 = vmatprep.subr.bf16.mxu0 %v2929_v0  ;;  %2752 = vmatprep.subr.bf16.mxu1 %v2929_v0  ;;  %v2798_v17 = vld [vmem:[%s3849_s1 + $0x70] sm:$0xff]   ;;  %v2800_v19 = vld [vmem:[%s3850_s0] ss:$12 sps:$4 sm:$0xff]   ;;  %v2808_v23 = vld [vmem:[%s3850_s0 + $0x25c] ss:$12 sps:$4 sm:$0xff]  }
   0x8   :  { %v2824_v20 = vld [vmem:[%s3849_s1 + $0x80] ss:$0 sps:$4 sm:$0xff]   ;;  %v2810_v25 = vld [vmem:[%s3850_s0 + $0x18] ss:$12 sps:$4 sm:$0xff]   ;;  %v2816_v29 = vld [vmem:[%s3850_s0 + $0x30] ss:$12 sps:$4 sm:$0xff]  }
   0x9   :  { %v2803_v21 = vld [vmem:[%s3850_s0 + $0x240] ss:$12 sps:$4 sm:$0xff]   ;;  %v990_v24 = vsel %vm988_vm0, %v2824_v20, 0  ;;  %v2811_v26 = vld [vmem:[%s3850_s0 + $0x258] ss:$12 sps:$4 sm:$0xff]  }
   0xa   :  { %997 = vmatpush1.bf16.msra.mxu0 %v2786_v3  ;;  %2768 = vmatpush1.bf16.msra.mxu1 %v2786_v3  ;;  %v2812_v27 = vld [vmem:[%s3850_s0 + $0x34] ss:$12 sps:$4 sm:$0xff]   ;;  %v2817_v30 = vld [vmem:[%s3850_s0 + $0x270] ss:$12 sps:$4 sm:$0xff]   ;;  %v2818_v31 = vld [vmem:[%s3850_s0 + $0x4c] ss:$12 sps:$4 sm:$0xff]  }
   0xb   :  { %998 = vmatprep.subr.bf16.mxu0 %v2929_v0  ;;  %2753 = vmatprep.subr.bf16.mxu1 %v2929_v0  ;;  %v2814_v28 = vld [vmem:[%s3850_s0 + $0x274] ss:$12 sps:$4 sm:$0xff]   ;;  %v2820_v32 = vld [vmem:[%s3850_s0 + $0x28c] ss:$12 sps:$4 sm:$0xff]   ;;  %v2825_v35 = vld [vmem:[%s3850_s0 + $0x64] ss:$12 sps:$4 sm:$0xff]  }
   0xc   :  { %v2822_v33 = vld [vmem:[%s3850_s0 + $0x48] ss:$12 sps:$4 sm:$0xff]   ;;  %v2827_v36 = vld [vmem:[%s3850_s0 + $0x2a4] ss:$12 sps:$4 sm:$0xff]   ;;  %v2829_v37 = vld [vmem:[%s3850_s0 + $0x60] ss:$12 sps:$4 sm:$0xff]  }
   0xd   :  { %v2823_v34 = vld [vmem:[%s3850_s0 + $0x288] ss:$12 sps:$4 sm:$0xff]   ;;  %v2830_v38 = vld [vmem:[%s3850_s0 + $0x2a0] ss:$12 sps:$4 sm:$0xff]   ;;  %v2835_v41 = vld [vmem:[%s3850_s0 + $0x78] ss:$12 sps:$4 sm:$0xff]  }
   0xe   :  { %999 = vmatpush1.bf16.msra.mxu0 %v2787_v4  ;;  %2769 = vmatpush1.bf16.msra.mxu1 %v2787_v4  ;;  %v2831_v39 = vld [vmem:[%s3850_s0 + $0x7c] ss:$12 sps:$4 sm:$0xff]   ;;  %v2836_v42 = vld [vmem:[%s3850_s0 + $0x2b8] ss:$12 sps:$4 sm:$0xff]   ;;  %v2837_v43 = vld [vmem:[%s3850_s0 + $0x94] ss:$12 sps:$4 sm:$0xff]  }
   0xf   :  { %1000 = vmatprep.subr.bf16.mxu0 %v2929_v0  ;;  %2754 = vmatprep.subr.bf16.mxu1 %v2929_v0  ;;  %v2833_v40 = vld [vmem:[%s3850_s0 + $0x2bc] ss:$12 sps:$4 sm:$0xff]   ;;  %v2839_v44 = vld [vmem:[%s3850_s0 + $0x2d4] ss:$12 sps:$4 sm:$0xff]   ;;  %v2843_v47 = vld [vmem:[%s3850_s0 + $0xac] ss:$12 sps:$4 sm:$0xff]  }
  0x10   :  { %v2841_v45 = vld [vmem:[%s3850_s0 + $0x90] ss:$12 sps:$4 sm:$0xff]   ;;  %v2845_v48 = vld [vmem:[%s3850_s0 + $0x2ec] ss:$12 sps:$4 sm:$0xff]   ;;  %v2847_v49 = vld [vmem:[%s3850_s0 + $0xa8] ss:$12 sps:$4 sm:$0xff]  }
  0x11   :  { %v2842_v46 = vld [vmem:[%s3850_s0 + $0x2d0] ss:$12 sps:$4 sm:$0xff]   ;;  %v2848_v50 = vld [vmem:[%s3850_s0 + $0x2e8] ss:$12 sps:$4 sm:$0xff]   ;;  %v2852_v53 = vld [vmem:[%s3850_s0 + $0xc0] ss:$12 sps:$4 sm:$0xff]  }
  0x12   :  { %1001 = vmatpush1.bf16.msra.mxu0 %v2788_v5  ;;  %2770 = vmatpush1.bf16.msra.mxu1 %v2788_v5  ;;  %v2849_v51 = vld [vmem:[%s3850_s0 + $0xc4] ss:$12 sps:$4 sm:$0xff]   ;;  %v2851_v52 = vld [vmem:[%s3850_s0 + $0x8] ss:$12 sps:$4 sm:$0xff]   ;;  %v2853_v54 = vld [vmem:[%s3850_s0 + $0x20] ss:$12 sps:$4 sm:$0xff]  }
  0x13   :  { %1002 = vmatprep.subr.bf16.mxu0 %v2929_v0  ;;  %2755 = vmatprep.subr.bf16.mxu1 %v2929_v0  ;;  %v2854_v55 = vld [vmem:[%s3850_s0 + $0xdc] ss:$12 sps:$4 sm:$0xff]   ;;  %v2856_v56 = vld [vmem:[%s3850_s0 + $0x38] ss:$12 sps:$4 sm:$0xff]   ;;  %v2859_v59 = vld [vmem:[%s3850_s0 + $0xf4] ss:$12 sps:$4 sm:$0xff]  }
  0x14   :  { %v2857_v57 = vld [vmem:[%s3850_s0 + $0xd8] ss:$12 sps:$4 sm:$0xff]   ;;  %v2858_v58 = vld [vmem:[%s3850_s0 + $0x50] ss:$12 sps:$4 sm:$0xff]   ;;  %v2861_v60 = vld [vmem:[%s3850_s0 + $0x68] ss:$12 sps:$4 sm:$0xff]  }
  0x15   :  { %v2862_v61 = vld [vmem:[%s3850_s0 + $0xf0] ss:$12 sps:$4 sm:$0xff]   ;;  %v2863_v62 = vld [vmem:[%s3850_s0 + $0x80] ss:$12 sps:$4 sm:$0xff]   ;;  %v2867_v1 = vld [vmem:[%s3850_s0 + $0x108] ss:$12 sps:$4 sm:$0xff]  }
  0x16   :  { %1003 = vmatpush1.bf16.msra.mxu0 %v2789_v7  ;;  %2771 = vmatpush1.bf16.msra.mxu1 %v2789_v7  ;;  %v2864_v63 = vld [vmem:[%s3850_s0 + $0x10c] ss:$12 sps:$4 sm:$0xff]   ;;  %v2868_v2 = vld [vmem:[%s3850_s0 + $0xb0] ss:$12 sps:$4 sm:$0xff]   ;;  %v2871_v4 = vld [vmem:[%s3850_s0 + $0xc8] ss:$12 sps:$4 sm:$0xff]  }
  0x17   :  { %1004 = vmatprep.subr.bf16.mxu0 %v2929_v0  ;;  %2756 = vmatprep.subr.bf16.mxu1 %v2929_v0  ;;  %v2869_v3 = vld [vmem:[%s3850_s0 + $0x124] ss:$12 sps:$4 sm:$0xff]   ;;  %v2872_v5 = vld [vmem:[%s3850_s0 + $0x120] ss:$12 sps:$4 sm:$0xff]   ;;  %v2874_v7 = vld [vmem:[%s3850_s0 + $0x13c] ss:$12 sps:$4 sm:$0xff]  }
  0x18   :  { %v2873_v6 = vld [vmem:[%s3850_s0 + $0xe0] ss:$12 sps:$4 sm:$0xff]   ;;  %v2876_v8 = vld [vmem:[%s3850_s0 + $0xf8] ss:$12 sps:$4 sm:$0xff]  }
  0x1a   :  { %1005 = vmatpush1.bf16.msra.mxu0 %v2790_v9  ;;  %2772 = vmatpush1.bf16.msra.mxu1 %v2790_v9  ;;  %v2877_v9 = vld [vmem:[%s3850_s0 + $0x138] ss:$12 sps:$4 sm:$0xff]  }
  0x1b   :  { %1006 = vmatprep.subr.bf16.mxu0 %v2929_v0  ;;  %2757 = vmatprep.subr.bf16.mxu1 %v2929_v0 }
  0x1e   :  { %1007 = vmatpush1.bf16.msra.mxu0 %v2791_v10  ;;  %2773 = vmatpush1.bf16.msra.mxu1 %v2791_v10  ;;  %v2878_v10 = vld [vmem:[%s3850_s0 + $0x110] ss:$12 sps:$4 sm:$0xff]  }
  0x1f   :  { %1008 = vmatprep.subr.bf16.mxu0 %v2929_v0  ;;  %2758 = vmatprep.subr.bf16.mxu1 %v2929_v0 }
  0x22   :  { %1009 = vmatpush1.bf16.msra.mxu0 %v2792_v11  ;;  %2774 = vmatpush1.bf16.msra.mxu1 %v2792_v11  ;;  %v2879_v11 = vld [vmem:[%s3850_s0 + $0x154] ss:$12 sps:$4 sm:$0xff]  }
  0x23   :  { %1010 = vmatprep.subr.bf16.mxu0 %v2929_v0  ;;  %2759 = vmatprep.subr.bf16.mxu1 %v2929_v0 }
  0x26   :  { %1011 = vmatpush1.bf16.msra.mxu0 %v2793_v12  ;;  %2775 = vmatpush1.bf16.msra.mxu1 %v2793_v12  ;;  %v2881_v12 = vld [vmem:[%s3850_s0 + $0x128] ss:$12 sps:$4 sm:$0xff]  }
  0x27   :  { %1012 = vmatprep.subr.bf16.mxu0 %v2929_v0  ;;  %2760 = vmatprep.subr.bf16.mxu1 %v2929_v0 }
  0x2a   :  { %1013 = vmatpush1.bf16.msra.mxu0 %v2794_v13  ;;  %2776 = vmatpush1.bf16.msra.mxu1 %v2794_v13  ;;  %v2882_v13 = vld [vmem:[%s3850_s0 + $0x150] ss:$12 sps:$4 sm:$0xff]  }
  0x2b   :  { %1014 = vmatprep.subr.bf16.mxu0 %v2929_v0  ;;  %2761 = vmatprep.subr.bf16.mxu1 %v2929_v0 }
  0x2e   :  { %1015 = vmatpush1.bf16.msra.mxu0 %v2795_v14  ;;  %2777 = vmatpush1.bf16.msra.mxu1 %v2795_v14  ;;  %v2883_v14 = vld [vmem:[%s3850_s0 + $0x140] ss:$12 sps:$4 sm:$0xff]  }
  0x2f   :  { %1016 = vmatprep.subr.bf16.mxu0 %v2929_v0  ;;  %2762 = vmatprep.subr.bf16.mxu1 %v2929_v0 }
  0x32   :  { %1017 = vmatpush1.bf16.msra.mxu0 %v2796_v15  ;;  %2778 = vmatpush1.bf16.msra.mxu1 %v2796_v15  ;;  %v2884_v15 = vld [vmem:[%s3850_s0 + $0x16c] ss:$12 sps:$4 sm:$0xff]  }
  0x33   :  { %1018 = vmatprep.subr.bf16.mxu0 %v2929_v0  ;;  %2763 = vmatprep.subr.bf16.mxu1 %v2929_v0 }
  0x36   :  { %1019 = vmatpush1.bf16.msra.mxu0 %v2797_v16  ;;  %2779 = vmatpush1.bf16.msra.mxu1 %v2797_v16  ;;  %v2886_v16 = vld [vmem:[%s3850_s0 + $0x158] ss:$12 sps:$4 sm:$0xff]  }
  0x37   :  { %1020 = vmatprep.subr.bf16.mxu0 %v2929_v0  ;;  %2764 = vmatprep.subr.bf16.mxu1 %v2929_v0 }
  0x3a   :  { %1021 = vmatpush1.bf16.msra.mxu0 %v2798_v17  ;;  %2780 = vmatpush1.bf16.msra.mxu1 %v2798_v17  ;;  %v2887_v17 = vld [vmem:[%s3850_s0 + $0x168] ss:$12 sps:$4 sm:$0xff]  }
  0x3b   :  { %1022 = vmatprep.subr.bf16.mxu0 %v2929_v0  ;;  %2765 = vmatprep.subr.bf16.mxu1 %v2929_v0  ;;  %v2866_v0 = vld [vmem:[%s3850_s0 + $0x98] ss:$12 sps:$4 sm:$0xff]  }
  0x3e   :  { %1023 = vmatpush1.bf16.msra.mxu0 %v2799_v18  ;;  %2781 = vmatpush1.bf16.msra.mxu1 %v2799_v18  ;;  %v2888_v18 = vld [vmem:[%s3850_s0 + $0x170] ss:$12 sps:$4 sm:$0xff]  }
  0x3f   :  { %2782 = vmatprep.subr.msk.bf16.mxu1 %vm988_vm0, %v2824_v20  ;;  %v2891_v20 = vld [vmem:[%s3850_s0 + $0x188] ss:$12 sps:$4 sm:$0xff]  }
  0x41   :  { %1025 = vmatmul.mubr.bf16.vlgmr.msra.gmra.mrb[0].mxu0 %v2800_v19  ;;  %1217 = vmatmul.mubr.bf16.vlgmr.msra.gmra.mrb[0].mxu1 %v2803_v21  ;;  %v2889_v19 = vld [vmem:[%s3850_s0 + $0x184] ss:$12 sps:$4 sm:$0xff]   ;;  %v2892_v21 = vld [vmem:[%s3850_s0 + $0x180] ss:$12 sps:$4 sm:$0xff]  }
  0x42   :  { %1032 = vmatprep.mubr.bf16.mxu0 %v2806_v22  ;;  %1224 = vmatprep.mubr.bf16.mxu1 %v2808_v23  ;;  %v2893_v22 = vld [vmem:[%s3850_s0 + $0x1a0] ss:$12 sps:$4 sm:$0xff]   ;;  %v2894_v23 = vld [vmem:[%s3850_s0 + $0x19c] ss:$12 sps:$4 sm:$0xff]  }
  0x43   :  { %2685 = vmatpush3.bf16.msra.mxu1 %v990_v24  ;;  %v2896_v24 = vld [vmem:[%s3850_s0 + $0x1b8] ss:$12 sps:$4 sm:$0xff]  }
  0x49   :  { %1033 = vmatmul.mubr.bf16.gmra.mrb[4].mxu0 %v2810_v25  ;;  %1225 = vmatmul.mubr.bf16.gmra.mrb[4].mxu1 %v2811_v26  ;;  %v2897_v25 = vld [vmem:[%s3850_s0 + $0x198] ss:$12 sps:$4 sm:$0xff]   ;;  %v2898_v26 = vld [vmem:[%s3850_s0 + $0x1d0] ss:$12 sps:$4 sm:$0xff]  }
  0x4a   :  { %1040 = vmatprep.mubr.bf16.mxu0 %v2812_v27  ;;  %1232 = vmatprep.mubr.bf16.mxu1 %v2814_v28  ;;  %v2899_v27 = vld [vmem:[%s3850_s0 + $0x1b4] ss:$12 sps:$4 sm:$0xff]  }
  0x4b   :  { %v2901_v28 = vld [vmem:[%s3850_s0 + $0x1e8] ss:$12 sps:$4 sm:$0xff]  }
  0x51   :  { %1041 = vmatmul.mubr.bf16.gmra.mrb[8].mxu0 %v2816_v29  ;;  %1233 = vmatmul.mubr.bf16.gmra.mrb[8].mxu1 %v2817_v30  ;;  %v2902_v29 = vld [vmem:[%s3850_s0 + $0x1b0] ss:$12 sps:$4 sm:$0xff]   ;;  %v2903_v30 = vld [vmem:[%s3850_s0 + $0x200] ss:$12 sps:$4 sm:$0xff]  }
  0x52   :  { %1048 = vmatprep.mubr.bf16.mxu0 %v2818_v31  ;;  %1240 = vmatprep.mubr.bf16.mxu1 %v2820_v32  ;;  %v2904_v31 = vld [vmem:[%s3850_s0 + $0x1cc] ss:$12 sps:$4 sm:$0xff]  }
  0x53   :  { %v2906_v32 = vld [vmem:[%s3850_s0 + $0x218] ss:$12 sps:$4 sm:$0xff]  }
  0x59   :  { %1049 = vmatmul.mubr.bf16.gmra.mrb[12].mxu0 %v2822_v33  ;;  %1241 = vmatmul.mubr.bf16.gmra.mrb[12].mxu1 %v2823_v34  ;;  %v2907_v33 = vld [vmem:[%s3850_s0 + $0x1c8] ss:$12 sps:$4 sm:$0xff]   ;;  %v2908_v34 = vld [vmem:[%s3850_s0 + $0x230] ss:$12 sps:$4 sm:$0xff]  }
  0x5a   :  { %1056 = vmatprep.mubr.bf16.mxu0 %v2825_v35  ;;  %1248 = vmatprep.mubr.bf16.mxu1 %v2827_v36  ;;  %v2909_v35 = vld [vmem:[%s3850_s0 + $0x1e4] ss:$12 sps:$4 sm:$0xff]   ;;  %v2911_v36 = vld [vmem:[%s3850_s0 + $0x248] ss:$12 sps:$4 sm:$0xff]  }
  0x61   :  { %1057 = vmatmul.mubr.bf16.gmra.mrb[16].mxu0 %v2829_v37  ;;  %1249 = vmatmul.mubr.bf16.gmra.mrb[16].mxu1 %v2830_v38  ;;  %v2912_v37 = vld [vmem:[%s3850_s0 + $0x1e0] ss:$12 sps:$4 sm:$0xff]  }
  0x62   :  { %1064 = vmatprep.mubr.bf16.mxu0 %v2831_v39  ;;  %1256 = vmatprep.mubr.bf16.mxu1 %v2833_v40  ;;  %v2913_v38 = vld [vmem:[%s3850_s0 + $0x260] ss:$12 sps:$4 sm:$0xff]   ;;  %v2914_v39 = vld [vmem:[%s3850_s0 + $0x1fc] ss:$12 sps:$4 sm:$0xff]   ;;  %v2916_v40 = vld [vmem:[%s3850_s0 + $0x278] ss:$12 sps:$4 sm:$0xff]  }
  0x69   :  { %1065 = vmatmul.mubr.bf16.gmra.mrb[20].mxu0 %v2835_v41  ;;  %1257 = vmatmul.mubr.bf16.gmra.mrb[20].mxu1 %v2836_v42  ;;  %v2917_v41 = vld [vmem:[%s3850_s0 + $0x1f8] ss:$12 sps:$4 sm:$0xff]   ;;  %v2918_v42 = vld [vmem:[%s3850_s0 + $0x290] ss:$12 sps:$4 sm:$0xff]  }
  0x6a   :  { %1072 = vmatprep.mubr.bf16.mxu0 %v2837_v43  ;;  %1264 = vmatprep.mubr.bf16.mxu1 %v2839_v44  ;;  %v2919_v43 = vld [vmem:[%s3850_s0 + $0x214] ss:$12 sps:$4 sm:$0xff]  }
  0x6b   :  { %v2921_v44 = vld [vmem:[%s3850_s0 + $0x2a8] ss:$12 sps:$4 sm:$0xff]  }
  0x71   :  { %1073 = vmatmul.mubr.bf16.gmra.mrb[24].mxu0 %v2841_v45  ;;  %1265 = vmatmul.mubr.bf16.gmra.mrb[24].mxu1 %v2842_v46  ;;  %v2922_v45 = vld [vmem:[%s3850_s0 + $0x210] ss:$12 sps:$4 sm:$0xff]   ;;  %v2923_v46 = vld [vmem:[%s3850_s0 + $0x2c0] ss:$12 sps:$4 sm:$0xff]  }
  0x72   :  { %1080 = vmatprep.mubr.bf16.mxu0 %v2843_v47  ;;  %1272 = vmatprep.mubr.bf16.mxu1 %v2845_v48  ;;  %v2924_v47 = vld [vmem:[%s3850_s0 + $0x22c] ss:$12 sps:$4 sm:$0xff]  }
  0x73   :  { %v2926_v48 = vld [vmem:[%s3850_s0 + $0x2d8] ss:$12 sps:$4 sm:$0xff]  }
  0x79   :  { %1081 = vmatmul.mubr.bf16.gmra.mrb[28].mxu0 %v2847_v49  ;;  %1273 = vmatmul.mubr.bf16.gmra.mrb[28].mxu1 %v2848_v50  ;;  %v2927_v49 = vld [vmem:[%s3850_s0 + $0x228] ss:$12 sps:$4 sm:$0xff]   ;;  %v2928_v50 = vld [vmem:[%s3850_s0 + $0x2f0] ss:$12 sps:$4 sm:$0xff]  }
  0x7a   :  { %1088 = vmatprep.mubr.bf16.mxu0 %v2849_v51  ;;  %2686 = vmatprep.mubr.msk.bf16.mxu1 %vm891_vm1, %v2851_v52 }
  0x81   :  { %1089 = vmatmul.mubr.bf16.gmra.mrb[32].mxu0 %v2852_v53  ;;  %2687 = vmatmul.mubr.msk.bf16.vlgmr.msra.gmra.mrb[32].mxu1 %vm891_vm1, %v2853_v54 }
  0x82   :  { %1096 = vmatprep.mubr.bf16.mxu0 %v2854_v55  ;;  %2690 = vmatprep.mubr.msk.bf16.mxu1 %vm891_vm1, %v2856_v56 }
  0x89   :  { %1097 = vmatmul.mubr.bf16.gmra.mrb[36].mxu0 %v2857_v57  ;;  %2691 = vmatmul.mubr.msk.bf16.gmra.mrb[36].mxu1 %vm891_vm1, %v2858_v58 }
  0x8a   :  { %1104 = vmatprep.mubr.bf16.mxu0 %v2859_v59  ;;  %2694 = vmatprep.mubr.msk.bf16.mxu1 %vm891_vm1, %v2861_v60 }
  0x91   :  { %1105 = vmatmul.mubr.bf16.gmra.mrb[40].mxu0 %v2862_v61  ;;  %2695 = vmatmul.mubr.msk.bf16.gmra.mrb[40].mxu1 %vm891_vm1, %v2863_v62 }
  0x92   :  { %1112 = vmatprep.mubr.bf16.mxu0 %v2864_v63  ;;  %2698 = vmatprep.mubr.msk.bf16.mxu1 %vm891_vm1, %v2866_v0 }
  0x99   :  { %1113 = vmatmul.mubr.bf16.gmra.mrb[44].mxu0 %v2867_v1  ;;  %2699 = vmatmul.mubr.msk.bf16.gmra.mrb[44].mxu1 %vm891_vm1, %v2868_v2 }
  0x9a   :  { %1120 = vmatprep.mubr.bf16.mxu0 %v2869_v3  ;;  %2702 = vmatprep.mubr.msk.bf16.mxu1 %vm891_vm1, %v2871_v4 }
  0xa1   :  { %1121 = vmatmul.mubr.bf16.gmra.mrb[48].mxu0 %v2872_v5  ;;  %2703 = vmatmul.mubr.msk.bf16.gmra.mrb[48].mxu1 %vm891_vm1, %v2873_v6 }
  0xa2   :  { %1128 = vmatprep.mubr.bf16.mxu0 %v2874_v7  ;;  %2706 = vmatprep.mubr.msk.bf16.mxu1 %vm891_vm1, %v2876_v8 }
  0xa9   :  { %1129 = vmatmul.mubr.bf16.gmra.mrb[52].mxu0 %v2877_v9  ;;  %2707 = vmatmul.mubr.msk.bf16.gmra.mrb[52].mxu1 %vm891_vm1, %v2878_v10 }
  0xaa   :  { %1136 = vmatprep.mubr.bf16.mxu0 %v2879_v11  ;;  %2710 = vmatprep.mubr.msk.bf16.mxu1 %vm891_vm1, %v2881_v12 }
  0xb1   :  { %1137 = vmatmul.mubr.bf16.gmra.mrb[56].mxu0 %v2882_v13  ;;  %2711 = vmatmul.mubr.msk.bf16.gmra.mrb[56].mxu1 %vm891_vm1, %v2883_v14 }
  0xb2   :  { %1144 = vmatprep.mubr.bf16.mxu0 %v2884_v15  ;;  %2714 = vmatprep.mubr.msk.bf16.mxu1 %vm891_vm1, %v2886_v16 }
  0xb9   :  { %1145 = vmatmul.mubr.bf16.gmra.mrb[60].mxu0 %v2887_v17  ;;  %2715 = vmatmul.mubr.msk.bf16.gmra.mrb[60].mxu1 %vm891_vm1, %v2888_v18 }
  0xba   :  { %1152 = vmatprep.mubr.bf16.mxu0 %v2889_v19  ;;  %2718 = vmatprep.mubr.msk.bf16.mxu1 %vm891_vm1, %v2891_v20 }
  0xc1   :  { %1153 = vmatmul.mubr.bf16.gmra.mrb[64].mxu0 %v2892_v21  ;;  %2719 = vmatmul.mubr.msk.bf16.gmra.mrb[64].mxu1 %vm891_vm1, %v2893_v22 }
  0xc2   :  { %1160 = vmatprep.mubr.bf16.mxu0 %v2894_v23  ;;  %2722 = vmatprep.mubr.msk.bf16.mxu1 %vm891_vm1, %v2896_v24 }
  0xc9   :  { %1161 = vmatmul.mubr.bf16.gmra.mrb[68].mxu0 %v2897_v25  ;;  %2723 = vmatmul.mubr.msk.bf16.gmra.mrb[68].mxu1 %vm891_vm1, %v2898_v26 }
  0xca   :  { %1168 = vmatprep.mubr.bf16.mxu0 %v2899_v27  ;;  %2726 = vmatprep.mubr.msk.bf16.mxu1 %vm891_vm1, %v2901_v28 }
  0xd1   :  { %1169 = vmatmul.mubr.bf16.gmra.mrb[72].mxu0 %v2902_v29  ;;  %2727 = vmatmul.mubr.msk.bf16.gmra.mrb[72].mxu1 %vm891_vm1, %v2903_v30 }
  0xd2   :  { %1176 = vmatprep.mubr.bf16.mxu0 %v2904_v31  ;;  %2730 = vmatprep.mubr.msk.bf16.mxu1 %vm891_vm1, %v2906_v32 }
  0xd9   :  { %1177 = vmatmul.mubr.bf16.gmra.mrb[76].mxu0 %v2907_v33  ;;  %2731 = vmatmul.mubr.msk.bf16.gmra.mrb[76].mxu1 %vm891_vm1, %v2908_v34 }
  0xda   :  { %1184 = vmatprep.mubr.bf16.mxu0 %v2909_v35  ;;  %2734 = vmatprep.mubr.msk.bf16.mxu1 %vm891_vm1, %v2911_v36 }
  0xe1   :  { %1185 = vmatmul.mubr.bf16.gmra.mrb[80].mxu0 %v2912_v37  ;;  %2735 = vmatmul.mubr.msk.bf16.gmra.mrb[80].mxu1 %vm891_vm1, %v2913_v38 }
  0xe2   :  { %1192 = vmatprep.mubr.bf16.mxu0 %v2914_v39  ;;  %2738 = vmatprep.mubr.msk.bf16.mxu1 %vm891_vm1, %v2916_v40 }
  0xe9   :  { %1193 = vmatmul.mubr.bf16.gmra.mrb[84].mxu0 %v2917_v41  ;;  %2739 = vmatmul.mubr.msk.bf16.gmra.mrb[84].mxu1 %vm891_vm1, %v2918_v42 }
  0xea   :  { %1200 = vmatprep.mubr.bf16.mxu0 %v2919_v43  ;;  %2742 = vmatprep.mubr.msk.bf16.mxu1 %vm891_vm1, %v2921_v44 }
  0xf1   :  { %1201 = vmatmul.mubr.bf16.gmra.mrb[88].mxu0 %v2922_v45  ;;  %2743 = vmatmul.mubr.msk.bf16.gmra.mrb[88].mxu1 %vm891_vm1, %v2923_v46 }
  0xf2   :  { %1208 = vmatprep.mubr.bf16.mxu0 %v2924_v47  ;;  %2746 = vmatprep.mubr.msk.bf16.mxu1 %vm891_vm1, %v2926_v48 }
  0xf9   :  { %1209 = vmatmul.mubr.bf16.gmra.mrb[92].mxu0 %v2927_v49  ;;  %2747 = vmatmul.mubr.msk.bf16.gmra.mrb[92].mxu1 %vm891_vm1, %v2928_v50 }
 0x114   :  { %v3363_v51 = vpop.f32.mrb[0].mxu0  ;;  %v3365_v52 = vpop.f32.mrb[0].mxu1 }
 0x115   :  { %v1028_v53 = vpop.f32.mrb[1].mxu0  ;;  %v1220_v54 = vpop.f32.mrb[1].mxu1 }
 0x116   :  { %v3367_v55 = vpop.f32.mrb[2].mxu0  ;;  %v3369_v56 = vpop.f32.mrb[2].mxu1 }
 0x117   :  { %v1031_v57 = vpop.f32.mrb[3].mxu0  ;;  %v1223_v58 = vpop.f32.mrb[3].mxu1 }
 0x118   :  { %v3430_v57 = vld [vmem:[%s3851_s2] ss:$0 sm:$0xff] }
 0x11c   :  { %v1034_v59 = vpop.f32.mrb[4].mxu0  ;;  %v3371_v60 = vpop.f32.mrb[4].mxu1 }
 0x11d   :  { %v1036_v61 = vpop.f32.mrb[5].mxu0  ;;  %v1228_v62 = vpop.f32.mrb[5].mxu1 }
 0x11e   :  { %v3373_v63 = vpop.f32.mrb[6].mxu0  ;;  %v3375_v0 = vpop.f32.mrb[6].mxu1 }
 0x11f   :  { %v1039_v1 = vpop.f32.mrb[7].mxu0  ;;  %v1231_v2 = vpop.f32.mrb[7].mxu1 }
 0x124   :  { %v3377_v3 = vpop.f32.mrb[8].mxu0  ;;  %v3379_v4 = vpop.f32.mrb[8].mxu1 }
 0x125   :  { %v1044_v5 = vpop.f32.mrb[9].mxu0  ;;  %v1236_v6 = vpop.f32.mrb[9].mxu1 }
 0x126   :  { %v3381_v7 = vpop.f32.mrb[10].mxu0  ;;  %v3383_v8 = vpop.f32.mrb[10].mxu1 }
 0x127   :  { %v1047_v9 = vpop.f32.mrb[11].mxu0  ;;  %v1239_v10 = vpop.f32.mrb[11].mxu1 }
 0x12c   :  { %v3385_v11 = vpop.f32.mrb[12].mxu0  ;;  %v3387_v12 = vpop.f32.mrb[12].mxu1 }
 0x12d   :  { %v1052_v13 = vpop.f32.mrb[13].mxu0  ;;  %v1244_v14 = vpop.f32.mrb[13].mxu1 }
 0x12e   :  { %v3389_v15 = vpop.f32.mrb[14].mxu0  ;;  %v3391_v16 = vpop.f32.mrb[14].mxu1 }
 0x12f   :  { %v1055_v17 = vpop.f32.mrb[15].mxu0  ;;  %v1247_v18 = vpop.f32.mrb[15].mxu1 }
 0x134   :  { %v3393_v19 = vpop.f32.mrb[16].mxu0  ;;  %v3395_v20 = vpop.f32.mrb[16].mxu1 }
 0x135   :  { %v1060_v21 = vpop.f32.mrb[17].mxu0  ;;  %v1252_v22 = vpop.f32.mrb[17].mxu1 }
 0x136   :  { %v3397_v23 = vpop.f32.mrb[18].mxu0  ;;  %v3399_v24 = vpop.f32.mrb[18].mxu1 }
 0x137   :  { %v1063_v25 = vpop.f32.mrb[19].mxu0  ;;  %v1255_v26 = vpop.f32.mrb[19].mxu1 }
 0x13c   :  { %v3401_v27 = vpop.f32.mrb[20].mxu0  ;;  %v3403_v28 = vpop.f32.mrb[20].mxu1 }
 0x13d   :  { %v1068_v29 = vpop.f32.mrb[21].mxu0  ;;  %v1260_v30 = vpop.f32.mrb[21].mxu1 }
 0x13e   :  { %v3405_v31 = vpop.f32.mrb[22].mxu0  ;;  %v3407_v32 = vpop.f32.mrb[22].mxu1 }
 0x13f   :  { %v1071_v33 = vpop.f32.mrb[23].mxu0  ;;  %v1263_v34 = vpop.f32.mrb[23].mxu1 }
 0x144   :  { %v3409_v35 = vpop.f32.mrb[24].mxu0  ;;  %v3411_v36 = vpop.f32.mrb[24].mxu1 }
 0x145   :  { %v1076_v37 = vpop.f32.mrb[25].mxu0  ;;  %v1268_v38 = vpop.f32.mrb[25].mxu1 }
 0x146   :  { %v3413_v39 = vpop.f32.mrb[26].mxu0  ;;  %v3415_v40 = vpop.f32.mrb[26].mxu1 }
 0x147   :  { %v1079_v41 = vpop.f32.mrb[27].mxu0  ;;  %v1271_v42 = vpop.f32.mrb[27].mxu1 }
 0x14c   :  { %v3417_v43 = vpop.f32.mrb[28].mxu0  ;;  %v3419_v44 = vpop.f32.mrb[28].mxu1 }
 0x14d   :  { %v1084_v45 = vpop.f32.mrb[29].mxu0  ;;  %v1276_v46 = vpop.f32.mrb[29].mxu1 }
 0x14e   :  { %v3421_v47 = vpop.f32.mrb[30].mxu0  ;;  %v3423_v48 = vpop.f32.mrb[30].mxu1 }
 0x14f   :  { %v1087_v49 = vpop.f32.mrb[31].mxu0  ;;  %v1279_v50 = vpop.f32.mrb[31].mxu1 }
 0x154   :  { %v3425_v53 = vpop.f32.mrb[32].mxu0  ;;  %v2688_v54 = vpop.f32.mrb[32].mxu1 }
 0x155   :  { %v1324_v58 = vadd.f32 %v2688_v54, %v1034_v59  ;;  %v1092_v61 = vpop.f32.mrb[33].mxu0  ;;  %v1315_v62 = vpop.f32.mrb[33].mxu1 }
 0x156   :  { %v1316_v1 = vadd.f32 %v1315_v62, %v3363_v51  ;;  %v3433_v2 = vpop.f32.mrb[34].mxu0  ;;  %v2689_v5 = vpop.f32.mrb[34].mxu1 }
 0x157   :  { %v1774_v6 = vadd.f32 %v3430_v57, %v1324_v58  ;;  %v1327_v9 = vadd.f32 %v2689_v5, %v3373_v63  ;;  %v1095_v10 = vpop.f32.mrb[35].mxu0  ;;  %v1318_v13 = vpop.f32.mrb[35].mxu1 }
 0x158   :  { %v1772_v14 = vadd.f32 %v3430_v57, %v1316_v1  ;;  %v1319_v17 = vadd.f32 %v1318_v13, %v3367_v55 }
 0x159   :  { %1838 = vst [vmem:[%s3852_s3 + $0x10] sm:$0xff] %v1774_v6  ;;  %v1775_v59 = vadd.f32 %v3430_v57, %v1327_v9  ;;  %v2357_v30 = vmul.f32 %v1774_v6, %v1774_v6 }
 0x15a   :  { %1836 = vst [vmem:[%s3852_s3] sm:$0xff] %v1772_v14  ;;  %v1773_v51 = vadd.f32 %v3430_v57, %v1319_v17  ;;  %v2355_v63 = vmul.f32 %v1772_v14, %v1772_v14 }
 0x15b   :  { %1839 = vst [vmem:[%s3852_s3 + $0x18] sm:$0xff] %v1775_v59  ;;  %v2358_v42 = vmul.f32 %v1775_v59, %v1775_v59 }
 0x15c   :  { %1837 = vst [vmem:[%s3852_s3 + $0x8] sm:$0xff] %v1773_v51  ;;  %v2286_v55 = vadd.f32 %v1773_v51, %v1772_v14  ;;  %v2356_v18 = vmul.f32 %v1773_v51, %v1773_v51  ;;  %v3453_v21 = vpop.f32.mrb[36].mxu0  ;;  %v2692_v22 = vpop.f32.mrb[36].mxu1 }
 0x15d   :  { %v1340_v25 = vadd.f32 %v2692_v22, %v3385_v11  ;;  %v1100_v26 = vpop.f32.mrb[37].mxu0  ;;  %v1331_v29 = vpop.f32.mrb[37].mxu1 }
 0x15e   :  { %v2287_v33 = vadd.f32 %v2286_v55, %v1774_v6  ;;  %v2419_v34 = vadd.f32 %v2356_v18, %v2355_v63  ;;  %v1332_v37 = vadd.f32 %v1331_v29, %v3377_v3  ;;  %v3457_v38 = vpop.f32.mrb[38].mxu0  ;;  %v2693_v41 = vpop.f32.mrb[38].mxu1 }
 0x15f   :  { %v1778_v45 = vadd.f32 %v3430_v57, %v1340_v25  ;;  %v1343_v46 = vadd.f32 %v2693_v41, %v3389_v15  ;;  %v1103_v49 = vpop.f32.mrb[39].mxu0  ;;  %v1334_v50 = vpop.f32.mrb[39].mxu1 }
 0x160   :  { %v2420_v54 = vadd.f32 %v2419_v34, %v2357_v30  ;;  %v1776_v11 = vadd.f32 %v3430_v57, %v1332_v37  ;;  %v2288_v58 = vadd.f32 %v2287_v33, %v1775_v59  ;;  %v1335_v61 = vadd.f32 %v1334_v50, %v3381_v7 }
 0x161   :  { %1842 = vst [vmem:[%s3852_s3 + $0x30] sm:$0xff] %v1778_v45  ;;  %v1779_v3 = vadd.f32 %v3430_v57, %v1343_v46  ;;  %v2361_v51 = vmul.f32 %v1778_v45, %v1778_v45 }
 0x162   :  { %1840 = vst [vmem:[%s3852_s3 + $0x20] sm:$0xff] %v1776_v11  ;;  %v2289_v62 = vadd.f32 %v2288_v58, %v1776_v11  ;;  %v2359_v15 = vmul.f32 %v1776_v11, %v1776_v11  ;;  %v2421_v1 = vadd.f32 %v2420_v54, %v2358_v42  ;;  %v1777_v5 = vadd.f32 %v3430_v57, %v1335_v61 }
 0x163   :  { %1843 = vst [vmem:[%s3852_s3 + $0x38] sm:$0xff] %v1779_v3  ;;  %v2362_v26 = vmul.f32 %v1779_v3, %v1779_v3 }
 0x164   :  { %v2422_v7 = vadd.f32 %v2421_v1, %v2359_v15  ;;  %1841 = vst [vmem:[%s3852_s3 + $0x28] sm:$0xff] %v1777_v5  ;;  %v2290_v6 = vadd.f32 %v2289_v62, %v1777_v5  ;;  %v2360_v9 = vmul.f32 %v1777_v5, %v1777_v5  ;;  %v3477_v10 = vpop.f32.mrb[40].mxu0  ;;  %v2696_v13 = vpop.f32.mrb[40].mxu1 }
 0x165   :  { %v1356_v14 = vadd.f32 %v2696_v13, %v3401_v27  ;;  %v1108_v17 = vpop.f32.mrb[41].mxu0  ;;  %v1347_v59 = vpop.f32.mrb[41].mxu1 }
 0x166   :  { %v2291_v63 = vadd.f32 %v2290_v6, %v1778_v45  ;;  %v2423_v55 = vadd.f32 %v2422_v7, %v2360_v9  ;;  %v1348_v18 = vadd.f32 %v1347_v59, %v3393_v19  ;;  %v3481_v22 = vpop.f32.mrb[42].mxu0  ;;  %v2697_v25 = vpop.f32.mrb[42].mxu1 }
 0x167   :  { %v1782_v29 = vadd.f32 %v3430_v57, %v1356_v14  ;;  %v1359_v30 = vadd.f32 %v2697_v25, %v3405_v31  ;;  %v1111_v33 = vpop.f32.mrb[43].mxu0  ;;  %v1350_v34 = vpop.f32.mrb[43].mxu1 }
 0x168   :  { %v2424_v37 = vadd.f32 %v2423_v55, %v2361_v51  ;;  %v1780_v27 = vadd.f32 %v3430_v57, %v1348_v18  ;;  %v2292_v41 = vadd.f32 %v2291_v63, %v1779_v3  ;;  %v1351_v42 = vadd.f32 %v1350_v34, %v3397_v23 }
 0x169   :  { %1846 = vst [vmem:[%s3852_s3 + $0x50] sm:$0xff] %v1782_v29  ;;  %v1783_v19 = vadd.f32 %v3430_v57, %v1359_v30  ;;  %v2365_v15 = vmul.f32 %v1782_v29, %v1782_v29 }
 0x16a   :  { %1844 = vst [vmem:[%s3852_s3 + $0x40] sm:$0xff] %v1780_v27  ;;  %v2293_v45 = vadd.f32 %v2292_v41, %v1780_v27  ;;  %v2363_v31 = vmul.f32 %v1780_v27, %v1780_v27  ;;  %v2425_v46 = vadd.f32 %v2424_v37, %v2362_v26  ;;  %v1781_v49 = vadd.f32 %v3430_v57, %v1351_v42 }
 0x16b   :  { %1847 = vst [vmem:[%s3852_s3 + $0x58] sm:$0xff] %v1783_v19  ;;  %v2366_v13 = vmul.f32 %v1783_v19, %v1783_v19 }
 0x16c   :  { %v2426_v23 = vadd.f32 %v2425_v46, %v2363_v31  ;;  %1845 = vst [vmem:[%s3852_s3 + $0x48] sm:$0xff] %v1781_v49  ;;  %v2294_v50 = vadd.f32 %v2293_v45, %v1781_v49  ;;  %v2364_v54 = vmul.f32 %v1781_v49, %v1781_v49  ;;  %v3501_v11 = vpop.f32.mrb[44].mxu0  ;;  %v2700_v58 = vpop.f32.mrb[44].mxu1 }
 0x16d   :  { %v1372_v61 = vadd.f32 %v2700_v58, %v3417_v43  ;;  %v1116_v3 = vpop.f32.mrb[45].mxu0  ;;  %v1363_v62 = vpop.f32.mrb[45].mxu1 }
 0x16e   :  { %v2295_v1 = vadd.f32 %v2294_v50, %v1782_v29  ;;  %v2427_v5 = vadd.f32 %v2426_v23, %v2364_v54  ;;  %v1364_v7 = vadd.f32 %v1363_v62, %v3409_v35  ;;  %v3505_v6 = vpop.f32.mrb[46].mxu0  ;;  %v2701_v9 = vpop.f32.mrb[46].mxu1 }
 0x16f   :  { %v1786_v14 = vadd.f32 %v3430_v57, %v1372_v61  ;;  %v1375_v17 = vadd.f32 %v2701_v9, %v3421_v47  ;;  %v1119_v59 = vpop.f32.mrb[47].mxu0  ;;  %v1366_v51 = vpop.f32.mrb[47].mxu1 }
 0x170   :  { %v2428_v63 = vadd.f32 %v2427_v5, %v2365_v15  ;;  %v1784_v43 = vadd.f32 %v3430_v57, %v1364_v7  ;;  %v2296_v55 = vadd.f32 %v2295_v1, %v1783_v19  ;;  %v1367_v18 = vadd.f32 %v1366_v51, %v3413_v39 }
 0x171   :  { %1850 = vst [vmem:[%s3852_s3 + $0x70] sm:$0xff] %v1786_v14  ;;  %v1787_v35 = vadd.f32 %v3430_v57, %v1375_v17  ;;  %v2369_v19 = vmul.f32 %v1786_v14, %v1786_v14 }
 0x172   :  { %1848 = vst [vmem:[%s3852_s3 + $0x60] sm:$0xff] %v1784_v43  ;;  %v2297_v25 = vadd.f32 %v2296_v55, %v1784_v43  ;;  %v2367_v47 = vmul.f32 %v1784_v43, %v1784_v43  ;;  %v2429_v26 = vadd.f32 %v2428_v63, %v2366_v13  ;;  %v1785_v29 = vadd.f32 %v3430_v57, %v1367_v18 }
 0x173   :  { %1851 = vst [vmem:[%s3852_s3 + $0x78] sm:$0xff] %v1787_v35  ;;  %v2370_v50 = vmul.f32 %v1787_v35, %v1787_v35 }
 0x174   :  { %v2430_v39 = vadd.f32 %v2429_v26, %v2367_v47  ;;  %1849 = vst [vmem:[%s3852_s3 + $0x68] sm:$0xff] %v1785_v29  ;;  %v2298_v30 = vadd.f32 %v2297_v25, %v1785_v29  ;;  %v2368_v33 = vmul.f32 %v1785_v29, %v1785_v29  ;;  %v3525_v34 = vpop.f32.mrb[48].mxu0  ;;  %v2704_v37 = vpop.f32.mrb[48].mxu1 }
 0x175   :  { %v1388_v27 = vadd.f32 %v2704_v37, %v3453_v21  ;;  %v1124_v41 = vpop.f32.mrb[49].mxu0  ;;  %v1379_v42 = vpop.f32.mrb[49].mxu1 }
 0x176   :  { %v2299_v45 = vadd.f32 %v2298_v30, %v1786_v14  ;;  %v2431_v31 = vadd.f32 %v2430_v39, %v2368_v33  ;;  %v1380_v46 = vadd.f32 %v1379_v42, %v3425_v53  ;;  %v3529_v49 = vpop.f32.mrb[50].mxu0  ;;  %v2705_v23 = vpop.f32.mrb[50].mxu1 }
 0x177   :  { %v1790_v54 = vadd.f32 %v3430_v57, %v1388_v27  ;;  %v1391_v58 = vadd.f32 %v2705_v23, %v3457_v38  ;;  %v1127_v61 = vpop.f32.mrb[51].mxu0  ;;  %v1382_v3 = vpop.f32.mrb[51].mxu1 }
 0x178   :  { %v2432_v62 = vadd.f32 %v2431_v31, %v2369_v19  ;;  %v1788_v21 = vadd.f32 %v3430_v57, %v1380_v46  ;;  %v2300_v15 = vadd.f32 %v2299_v45, %v1787_v35  ;;  %v1383_v1 = vadd.f32 %v1382_v3, %v3433_v2 }
 0x179   :  { %1854 = vst [vmem:[%s3852_s3 + $0x90] sm:$0xff] %v1790_v54  ;;  %v1791_v53 = vadd.f32 %v3430_v57, %v1391_v58  ;;  %v2373_v55 = vmul.f32 %v1790_v54, %v1790_v54 }
 0x17a   :  { %1852 = vst [vmem:[%s3852_s3 + $0x80] sm:$0xff] %v1788_v21  ;;  %v2301_v5 = vadd.f32 %v2300_v15, %v1788_v21  ;;  %v2371_v38 = vmul.f32 %v1788_v21, %v1788_v21  ;;  %v2433_v7 = vadd.f32 %v2432_v62, %v2370_v50  ;;  %v1789_v9 = vadd.f32 %v3430_v57, %v1383_v1 }
 0x17b   :  { %1855 = vst [vmem:[%s3852_s3 + $0x98] sm:$0xff] %v1791_v53  ;;  %v2374_v29 = vmul.f32 %v1791_v53, %v1791_v53 }
 0x17c   :  { %v2434_v2 = vadd.f32 %v2433_v7, %v2371_v38  ;;  %1853 = vst [vmem:[%s3852_s3 + $0x88] sm:$0xff] %v1789_v9  ;;  %v2302_v13 = vadd.f32 %v2301_v5, %v1789_v9  ;;  %v2372_v14 = vmul.f32 %v1789_v9, %v1789_v9  ;;  %v1130_v17 = vpop.f32.mrb[52].mxu0  ;;  %v2708_v59 = vpop.f32.mrb[52].mxu1 }
 0x17d   :  { %v1404_v51 = vadd.f32 %v2708_v59, %v3501_v11  ;;  %v1132_v63 = vpop.f32.mrb[53].mxu0  ;;  %v1395_v43 = vpop.f32.mrb[53].mxu1 }
 0x17e   :  { %v2303_v18 = vadd.f32 %v2302_v13, %v1790_v54  ;;  %v2435_v35 = vadd.f32 %v2434_v2, %v2372_v14  ;;  %v1396_v25 = vadd.f32 %v1395_v43, %v3477_v10  ;;  %v1133_v47 = vpop.f32.mrb[54].mxu0  ;;  %v2709_v26 = vpop.f32.mrb[54].mxu1 }
 0x17f   :  { %v1794_v39 = vadd.f32 %v3430_v57, %v1404_v51  ;;  %v1407_v30 = vadd.f32 %v2709_v26, %v3505_v6  ;;  %v1135_v33 = vpop.f32.mrb[55].mxu0  ;;  %v1398_v37 = vpop.f32.mrb[55].mxu1 }
 0x180   :  { %v2436_v27 = vadd.f32 %v2435_v35, %v2373_v55  ;;  %v1792_v41 = vadd.f32 %v3430_v57, %v1396_v25  ;;  %v2304_v11 = vadd.f32 %v2303_v18, %v1791_v53  ;;  %v1399_v42 = vadd.f32 %v1398_v37, %v3481_v22 }
 0x181   :  { %1858 = vst [vmem:[%s3852_s3 + $0xb0] sm:$0xff] %v1794_v39  ;;  %v1795_v10 = vadd.f32 %v3430_v57, %v1407_v30  ;;  %v2377_v62 = vmul.f32 %v1794_v39, %v1794_v39 }
 0x182   :  { %1856 = vst [vmem:[%s3852_s3 + $0xa0] sm:$0xff] %v1792_v41  ;;  %v2305_v19 = vadd.f32 %v2304_v11, %v1792_v41  ;;  %v2375_v6 = vmul.f32 %v1792_v41, %v1792_v41  ;;  %v2437_v45 = vadd.f32 %v2436_v27, %v2374_v29  ;;  %v1793_v31 = vadd.f32 %v3430_v57, %v1399_v42 }
 0x183   :  { %1859 = vst [vmem:[%s3852_s3 + $0xb8] sm:$0xff] %v1795_v10  ;;  %v2378_v38 = vmul.f32 %v1795_v10, %v1795_v10 }
 0x184   :  { %v2438_v22 = vadd.f32 %v2437_v45, %v2375_v6  ;;  %1857 = vst [vmem:[%s3852_s3 + $0xa8] sm:$0xff] %v1793_v31  ;;  %v2306_v46 = vadd.f32 %v2305_v19, %v1793_v31  ;;  %v2376_v23 = vmul.f32 %v1793_v31, %v1793_v31  ;;  %v1138_v50 = vpop.f32.mrb[56].mxu0  ;;  %v2712_v54 = vpop.f32.mrb[56].mxu1 }
 0x185   :  { %v1420_v58 = vadd.f32 %v2712_v54, %v1130_v17  ;;  %v1140_v61 = vpop.f32.mrb[57].mxu0  ;;  %v1411_v3 = vpop.f32.mrb[57].mxu1 }
 0x186   :  { %v2307_v21 = vadd.f32 %v2306_v46, %v1794_v39  ;;  %v2439_v15 = vadd.f32 %v2438_v22, %v2376_v23  ;;  %v1412_v1 = vadd.f32 %v1411_v3, %v3525_v34  ;;  %v1141_v53 = vpop.f32.mrb[58].mxu0  ;;  %v2713_v5 = vpop.f32.mrb[58].mxu1 }
 0x187   :  { %v1798_v7 = vadd.f32 %v3430_v57, %v1420_v58  ;;  %v1423_v9 = vadd.f32 %v2713_v5, %v1133_v47  ;;  %v1143_v2 = vpop.f32.mrb[59].mxu0  ;;  %v1414_v13 = vpop.f32.mrb[59].mxu1 }
 0x188   :  { %v2440_v14 = vadd.f32 %v2439_v15, %v2377_v62  ;;  %v1796_v59 = vadd.f32 %v3430_v57, %v1412_v1  ;;  %v2308_v51 = vadd.f32 %v2307_v21, %v1795_v10  ;;  %v1415_v17 = vadd.f32 %v1414_v13, %v3529_v49 }
 0x189   :  { %1862 = vst [vmem:[%s3852_s3 + $0xd0] sm:$0xff] %v1798_v7  ;;  %v1799_v34 = vadd.f32 %v3430_v57, %v1423_v9  ;;  %v2381_v33 = vmul.f32 %v1798_v7, %v1798_v7 }
 0x18a   :  { %1860 = vst [vmem:[%s3852_s3 + $0xc0] sm:$0xff] %v1796_v59  ;;  %v2309_v63 = vadd.f32 %v2308_v51, %v1796_v59  ;;  %v2379_v43 = vmul.f32 %v1796_v59, %v1796_v59  ;;  %v2441_v55 = vadd.f32 %v2440_v14, %v2378_v38  ;;  %v1797_v18 = vadd.f32 %v3430_v57, %v1415_v17 }
 0x18b   :  { %1863 = vst [vmem:[%s3852_s3 + $0xd8] sm:$0xff] %v1799_v34  ;;  %v2382_v10 = vmul.f32 %v1799_v34, %v1799_v34 }
 0x18c   :  { %v2442_v49 = vadd.f32 %v2441_v55, %v2379_v43  ;;  %1861 = vst [vmem:[%s3852_s3 + $0xc8] sm:$0xff] %v1797_v18  ;;  %v2310_v35 = vadd.f32 %v2309_v63, %v1797_v18  ;;  %v2380_v25 = vmul.f32 %v1797_v18, %v1797_v18  ;;  %v1146_v47 = vpop.f32.mrb[60].mxu0  ;;  %v2716_v26 = vpop.f32.mrb[60].mxu1 }
 0x18d   :  { %v1436_v29 = vadd.f32 %v2716_v26, %v1146_v47  ;;  %v1148_v39 = vpop.f32.mrb[61].mxu0  ;;  %v1427_v30 = vpop.f32.mrb[61].mxu1 }
 0x18e   :  { %v2311_v37 = vadd.f32 %v2310_v35, %v1798_v7  ;;  %v2443_v27 = vadd.f32 %v2442_v49, %v2380_v25  ;;  %v1428_v41 = vadd.f32 %v1427_v30, %v1138_v50  ;;  %v1149_v11 = vpop.f32.mrb[62].mxu0  ;;  %v2717_v42 = vpop.f32.mrb[62].mxu1 }
 0x18f   :  { %v1802_v19 = vadd.f32 %v3430_v57, %v1436_v29  ;;  %v1439_v6 = vadd.f32 %v2717_v42, %v1149_v11  ;;  %v1151_v45 = vpop.f32.mrb[63].mxu0  ;;  %v1430_v31 = vpop.f32.mrb[63].mxu1 }
 0x190   :  { %v2444_v22 = vadd.f32 %v2443_v27, %v2381_v33  ;;  %v1800_v46 = vadd.f32 %v3430_v57, %v1428_v41  ;;  %v2312_v23 = vadd.f32 %v2311_v37, %v1799_v34  ;;  %v1431_v54 = vadd.f32 %v1430_v31, %v1141_v53 }
 0x191   :  { %1866 = vst [vmem:[%s3852_s3 + $0xf0] sm:$0xff] %v1802_v19  ;;  %v1803_v58 = vadd.f32 %v3430_v57, %v1439_v6  ;;  %v2385_v9 = vmul.f32 %v1802_v19, %v1802_v19 }
 0x192   :  { %1864 = vst [vmem:[%s3852_s3 + $0xe0] sm:$0xff] %v1800_v46  ;;  %v2313_v50 = vadd.f32 %v2312_v23, %v1800_v46  ;;  %v2383_v61 = vmul.f32 %v1800_v46, %v1800_v46  ;;  %v2445_v3 = vadd.f32 %v2444_v22, %v2382_v10  ;;  %v1801_v62 = vadd.f32 %v3430_v57, %v1431_v54 }
 0x193   :  { %1867 = vst [vmem:[%s3852_s3 + $0xf8] sm:$0xff] %v1803_v58  ;;  %v2386_v17 = vmul.f32 %v1803_v58, %v1803_v58 }
 0x194   :  { %v2446_v21 = vadd.f32 %v2445_v3, %v2383_v61  ;;  %1865 = vst [vmem:[%s3852_s3 + $0xe8] sm:$0xff] %v1801_v62  ;;  %v2314_v15 = vadd.f32 %v2313_v50, %v1801_v62  ;;  %v2384_v1 = vmul.f32 %v1801_v62, %v1801_v62  ;;  %v1154_v53 = vpop.f32.mrb[64].mxu0  ;;  %v2720_v5 = vpop.f32.mrb[64].mxu1 }
 0x195   :  { %v1156_v38 = vpop.f32.mrb[65].mxu0  ;;  %v1443_v7 = vpop.f32.mrb[65].mxu1 }
 0x196   :  { %v2315_v2 = vadd.f32 %v2314_v15, %v1802_v19  ;;  %v2447_v13 = vadd.f32 %v2446_v21, %v2384_v1  ;;  %v1444_v14 = vadd.f32 %v1443_v7, %v1154_v53  ;;  %v1157_v59 = vpop.f32.mrb[66].mxu0  ;;  %v2721_v51 = vpop.f32.mrb[66].mxu1 }
 0x197   :  { %v1159_v34 = vpop.f32.mrb[67].mxu0  ;;  %v1446_v63 = vpop.f32.mrb[67].mxu1 }
 0x198   :  { %v2448_v43 = vadd.f32 %v2447_v13, %v2385_v9  ;;  %v1804_v55 = vadd.f32 %v3430_v57, %v1444_v14  ;;  %v2316_v18 = vadd.f32 %v2315_v2, %v1803_v58  ;;  %v1447_v49 = vadd.f32 %v1446_v63, %v1157_v59 }
 0x19a   :  { %1868 = vst [vmem:[%s3852_s3 + $0x100] sm:$0xff] %v1804_v55  ;;  %v2317_v35 = vadd.f32 %v2316_v18, %v1804_v55  ;;  %v2387_v25 = vmul.f32 %v1804_v55, %v1804_v55  ;;  %v2449_v47 = vadd.f32 %v2448_v43, %v2386_v17  ;;  %v1805_v26 = vadd.f32 %v3430_v57, %v1447_v49 }
 0x19c   :  { %v2450_v29 = vadd.f32 %v2449_v47, %v2387_v25  ;;  %1869 = vst [vmem:[%s3852_s3 + $0x108] sm:$0xff] %v1805_v26  ;;  %v2318_v39 = vadd.f32 %v2317_v35, %v1805_v26  ;;  %v2388_v30 = vmul.f32 %v1805_v26, %v1805_v26  ;;  %v1162_v33 = vpop.f32.mrb[68].mxu0  ;;  %v2724_v37 = vpop.f32.mrb[68].mxu1 }
 0x19d   :  { %v1452_v27 = vadd.f32 %v2720_v5, %v1162_v33  ;;  %v1164_v41 = vpop.f32.mrb[69].mxu0  ;;  %v1459_v11 = vpop.f32.mrb[69].mxu1 }
 0x19e   :  { %v2451_v42 = vadd.f32 %v2450_v29, %v2388_v30  ;;  %v1165_v10 = vpop.f32.mrb[70].mxu0  ;;  %v2725_v19 = vpop.f32.mrb[70].mxu1 }
 0x19f   :  { %v1806_v6 = vadd.f32 %v3430_v57, %v1452_v27  ;;  %v1455_v45 = vadd.f32 %v2721_v51, %v1165_v10  ;;  %v1167_v31 = vpop.f32.mrb[71].mxu0  ;;  %v1462_v22 = vpop.f32.mrb[71].mxu1 }
 0x1a1   :  { %1870 = vst [vmem:[%s3852_s3 + $0x110] sm:$0xff] %v1806_v6  ;;  %v2319_v46 = vadd.f32 %v2318_v39, %v1806_v6  ;;  %v2389_v23 = vmul.f32 %v1806_v6, %v1806_v6  ;;  %v1807_v54 = vadd.f32 %v3430_v57, %v1455_v45 }
 0x1a3   :  { %v2452_v58 = vadd.f32 %v2451_v42, %v2389_v23  ;;  %1871 = vst [vmem:[%s3852_s3 + $0x118] sm:$0xff] %v1807_v54  ;;  %v2320_v50 = vadd.f32 %v2319_v46, %v1807_v54  ;;  %v2390_v61 = vmul.f32 %v1807_v54, %v1807_v54 }
 0x1a4   :  { %v1170_v3 = vpop.f32.mrb[72].mxu0  ;;  %v3619_v62 = vpop.f32.mrb[72].mxu1 }
 0x1a5   :  { %v2453_v21 = vadd.f32 %v2452_v58, %v2390_v61  ;;  %v1460_v15 = vadd.f32 %v1459_v11, %v1170_v3  ;;  %v1172_v1 = vpop.f32.mrb[73].mxu0  ;;  %v1475_v53 = vpop.f32.mrb[73].mxu1 }
 0x1a6   :  { %v1173_v5 = vpop.f32.mrb[74].mxu0  ;;  %v3621_v38 = vpop.f32.mrb[74].mxu1 }
 0x1a7   :  { %v1808_v7 = vadd.f32 %v3430_v57, %v1460_v15  ;;  %v1463_v9 = vadd.f32 %v1462_v22, %v1173_v5  ;;  %v1175_v2 = vpop.f32.mrb[75].mxu0  ;;  %v1478_v13 = vpop.f32.mrb[75].mxu1 }
 0x1a9   :  { %1872 = vst [vmem:[%s3852_s3 + $0x120] sm:$0xff] %v1808_v7  ;;  %v2321_v14 = vadd.f32 %v2320_v50, %v1808_v7  ;;  %v2391_v59 = vmul.f32 %v1808_v7, %v1808_v7  ;;  %v1809_v51 = vadd.f32 %v3430_v57, %v1463_v9 }
 0x1ab   :  { %v2454_v17 = vadd.f32 %v2453_v21, %v2391_v59  ;;  %1873 = vst [vmem:[%s3852_s3 + $0x128] sm:$0xff] %v1809_v51  ;;  %v2322_v34 = vadd.f32 %v2321_v14, %v1809_v51  ;;  %v2392_v63 = vmul.f32 %v1809_v51, %v1809_v51 }
 0x1ac   :  { %v1178_v43 = vpop.f32.mrb[76].mxu0  ;;  %v3631_v55 = vpop.f32.mrb[76].mxu1 }
 0x1ad   :  { %v2455_v18 = vadd.f32 %v2454_v17, %v2392_v63  ;;  %v1468_v49 = vadd.f32 %v2724_v37, %v1178_v43  ;;  %v1180_v35 = vpop.f32.mrb[77].mxu0  ;;  %v3633_v25 = vpop.f32.mrb[77].mxu1 }
 0x1ae   :  { %v1181_v47 = vpop.f32.mrb[78].mxu0  ;;  %v3635_v26 = vpop.f32.mrb[78].mxu1 }
 0x1af   :  { %v1810_v29 = vadd.f32 %v3430_v57, %v1468_v49  ;;  %v1471_v39 = vadd.f32 %v2725_v19, %v1181_v47  ;;  %v1183_v30 = vpop.f32.mrb[79].mxu0  ;;  %v3638_v33 = vpop.f32.mrb[79].mxu1 }
 0x1b1   :  { %1874 = vst [vmem:[%s3852_s3 + $0x130] sm:$0xff] %v1810_v29  ;;  %v2323_v27 = vadd.f32 %v2322_v34, %v1810_v29  ;;  %v2393_v41 = vmul.f32 %v1810_v29, %v1810_v29  ;;  %v1811_v37 = vadd.f32 %v3430_v57, %v1471_v39 }
 0x1b3   :  { %v2456_v11 = vadd.f32 %v2455_v18, %v2393_v41  ;;  %1875 = vst [vmem:[%s3852_s3 + $0x138] sm:$0xff] %v1811_v37  ;;  %v2324_v42 = vadd.f32 %v2323_v27, %v1811_v37  ;;  %v2394_v10 = vmul.f32 %v1811_v37, %v1811_v37 }
 0x1b4   :  { %v1186_v6 = vpop.f32.mrb[80].mxu0  ;;  %v2736_v19 = vpop.f32.mrb[80].mxu1 }
 0x1b5   :  { %v2457_v45 = vadd.f32 %v2456_v11, %v2394_v10  ;;  %v1476_v31 = vadd.f32 %v1475_v53, %v1186_v6  ;;  %v1516_v22 = vadd.f32 %v2736_v19, %v3371_v60  ;;  %v1188_v46 = vpop.f32.mrb[81].mxu0  ;;  %v1507_v23 = vpop.f32.mrb[81].mxu1 }
 0x1b6   :  { %v1508_v54 = vadd.f32 %v1507_v23, %v3365_v52  ;;  %v1189_v58 = vpop.f32.mrb[82].mxu0  ;;  %v2737_v50 = vpop.f32.mrb[82].mxu1 }
 0x1b7   :  { %v1812_v61 = vadd.f32 %v3430_v57, %v1476_v31  ;;  %v3651_v3 = vadd.f32 %v3430_v57, %v1516_v22  ;;  %v1479_v21 = vadd.f32 %v1478_v13, %v1189_v58  ;;  %v1519_v15 = vadd.f32 %v2737_v50, %v3375_v0  ;;  %v1191_v1 = vpop.f32.mrb[83].mxu0  ;;  %v1510_v5 = vpop.f32.mrb[83].mxu1 }
 0x1b8   :  { %v3655_v53 = vadd.f32 %v3430_v57, %v1508_v54  ;;  %v1511_v60 = vadd.f32 %v1510_v5, %v3369_v56 }
 0x1b9   :  { %1876 = vst [vmem:[%s3852_s3 + $0x140] sm:$0xff] %v1812_v61  ;;  %v2325_v52 = vadd.f32 %v2324_v42, %v1812_v61  ;;  %v2395_v7 = vmul.f32 %v1812_v61, %v1812_v61  ;;  %1886 = vst [vmem:[%s3852_s3 + $0x190] sm:$0xff] %v3651_v3  ;;  %v1813_v0 = vadd.f32 %v3430_v57, %v1479_v21 }
 0x1ba   :  { %1884 = vst [vmem:[%s3852_s3 + $0x180] sm:$0xff] %v3655_v53  ;;  %v3671_v56 = vadd.f32 %v3430_v57, %v1519_v15  ;;  %v3674_v9 = vadd.f32 %v3430_v57, %v1511_v60 }
 0x1bb   :  { %v2458_v2 = vadd.f32 %v2457_v45, %v2395_v7  ;;  %1877 = vst [vmem:[%s3852_s3 + $0x148] sm:$0xff] %v1813_v0  ;;  %v2326_v13 = vadd.f32 %v2325_v52, %v1813_v0  ;;  %v2396_v14 = vmul.f32 %v1813_v0, %v1813_v0 }
 0x1bc   :  { %1887 = vst [vmem:[%s3852_s3 + $0x198] sm:$0xff] %v3671_v56  ;;  %1885 = vst [vmem:[%s3852_s3 + $0x188] sm:$0xff] %v3674_v9  ;;  %v1194_v59 = vpop.f32.mrb[84].mxu0  ;;  %v2740_v51 = vpop.f32.mrb[84].mxu1 }
 0x1bd   :  { %v2459_v17 = vadd.f32 %v2458_v2, %v2396_v14  ;;  %v1484_v34 = vadd.f32 %v3619_v62, %v1194_v59  ;;  %v1532_v63 = vadd.f32 %v2740_v51, %v3387_v12  ;;  %v1196_v43 = vpop.f32.mrb[85].mxu0  ;;  %v1523_v18 = vpop.f32.mrb[85].mxu1 }
 0x1be   :  { %v1524_v49 = vadd.f32 %v1523_v18, %v3379_v4  ;;  %v1197_v35 = vpop.f32.mrb[86].mxu0  ;;  %v2741_v47 = vpop.f32.mrb[86].mxu1 }
 0x1bf   :  { %v1814_v29 = vadd.f32 %v3430_v57, %v1484_v34  ;;  %v3692_v39 = vadd.f32 %v3430_v57, %v1532_v63  ;;  %v1487_v30 = vadd.f32 %v3621_v38, %v1197_v35  ;;  %v1535_v27 = vadd.f32 %v2741_v47, %v3391_v16  ;;  %v1199_v41 = vpop.f32.mrb[87].mxu0  ;;  %v1526_v37 = vpop.f32.mrb[87].mxu1 }
 0x1c0   :  { %v3697_v62 = vadd.f32 %v3430_v57, %v1524_v49  ;;  %v1527_v12 = vadd.f32 %v1526_v37, %v3383_v8 }
 0x1c1   :  { %1878 = vst [vmem:[%s3852_s3 + $0x150] sm:$0xff] %v1814_v29  ;;  %v2327_v4 = vadd.f32 %v2326_v13, %v1814_v29  ;;  %v2397_v11 = vmul.f32 %v1814_v29, %v1814_v29  ;;  %1890 = vst [vmem:[%s3852_s3 + $0x1b0] sm:$0xff] %v3692_v39  ;;  %v1815_v16 = vadd.f32 %v3430_v57, %v1487_v30 }
 0x1c2   :  { %1888 = vst [vmem:[%s3852_s3 + $0x1a0] sm:$0xff] %v3697_v62  ;;  %v3713_v8 = vadd.f32 %v3430_v57, %v1535_v27  ;;  %v3716_v38 = vadd.f32 %v3430_v57, %v1527_v12 }
 0x1c3   :  { %v2460_v42 = vadd.f32 %v2459_v17, %v2397_v11  ;;  %1879 = vst [vmem:[%s3852_s3 + $0x158] sm:$0xff] %v1815_v16  ;;  %v2328_v10 = vadd.f32 %v2327_v4, %v1815_v16  ;;  %v2398_v6 = vmul.f32 %v1815_v16, %v1815_v16 }
 0x1c4   :  { %1891 = vst [vmem:[%s3852_s3 + $0x1b8] sm:$0xff] %v3713_v8  ;;  %1889 = vst [vmem:[%s3852_s3 + $0x1a8] sm:$0xff] %v3716_v38  ;;  %v1202_v19 = vpop.f32.mrb[88].mxu0  ;;  %v2744_v45 = vpop.f32.mrb[88].mxu1 }
 0x1c5   :  { %v2461_v31 = vadd.f32 %v2460_v42, %v2398_v6  ;;  %v1492_v22 = vadd.f32 %v3633_v25, %v1202_v19  ;;  %v1548_v46 = vadd.f32 %v2744_v45, %v3403_v28  ;;  %v1204_v23 = vpop.f32.mrb[89].mxu0  ;;  %v1539_v54 = vpop.f32.mrb[89].mxu1  ;;  %v2403_v42 = vmul.f32 %v3655_v53, %v3655_v53 }
 0x1c6   :  { %v1540_v58 = vadd.f32 %v1539_v54, %v3395_v20  ;;  %v1205_v50 = vpop.f32.mrb[90].mxu0  ;;  %v2745_v61 = vpop.f32.mrb[90].mxu1  ;;  %v2404_v6 = vmul.f32 %v3674_v9, %v3674_v9  ;;  %v2406_v23 = vmul.f32 %v3671_v56, %v3671_v56 }
 0x1c7   :  { %v1816_v21 = vadd.f32 %v3430_v57, %v1492_v22  ;;  %v3734_v15 = vadd.f32 %v3430_v57, %v1548_v46  ;;  %v1495_v1 = vadd.f32 %v3638_v33, %v1205_v50  ;;  %v1551_v5 = vadd.f32 %v2745_v61, %v3407_v32  ;;  %v1207_v60 = vpop.f32.mrb[91].mxu0  ;;  %v1542_v52 = vpop.f32.mrb[91].mxu1 }
 0x1c8   :  { %v3739_v25 = vadd.f32 %v3430_v57, %v1540_v58  ;;  %v1543_v28 = vadd.f32 %v1542_v52, %v3399_v24 }
 0x1c9   :  { %1880 = vst [vmem:[%s3852_s3 + $0x160] sm:$0xff] %v1816_v21  ;;  %v2329_v20 = vadd.f32 %v2328_v10, %v1816_v21  ;;  %v2399_v7 = vmul.f32 %v1816_v21, %v1816_v21  ;;  %1894 = vst [vmem:[%s3852_s3 + $0x1d0] sm:$0xff] %v3734_v15  ;;  %v1817_v32 = vadd.f32 %v3430_v57, %v1495_v1 }
 0x1ca   :  { %1892 = vst [vmem:[%s3852_s3 + $0x1c0] sm:$0xff] %v3739_v25  ;;  %v3755_v24 = vadd.f32 %v3430_v57, %v1551_v5  ;;  %v3758_v33 = vadd.f32 %v3430_v57, %v1543_v28 }
 0x1cb   :  { %v2462_v0 = vadd.f32 %v2461_v31, %v2399_v7  ;;  %1881 = vst [vmem:[%s3852_s3 + $0x168] sm:$0xff] %v1817_v32  ;;  %v2330_v2 = vadd.f32 %v2329_v20, %v1817_v32  ;;  %v2400_v13 = vmul.f32 %v1817_v32, %v1817_v32  ;;  %v2405_v31 = vmul.f32 %v3651_v3, %v3651_v3 }
 0x1cc   :  { %1895 = vst [vmem:[%s3852_s3 + $0x1d8] sm:$0xff] %v3755_v24  ;;  %1893 = vst [vmem:[%s3852_s3 + $0x1c8] sm:$0xff] %v3758_v33  ;;  %v1210_v14 = vpop.f32.mrb[92].mxu0  ;;  %v2748_v59 = vpop.f32.mrb[92].mxu1 }
 0x1cd   :  { %v2463_v51 = vadd.f32 %v2462_v0, %v2400_v13  ;;  %v1500_v17 = vadd.f32 %v3631_v55, %v1210_v14  ;;  %v1564_v34 = vadd.f32 %v2748_v59, %v3419_v44  ;;  %v1212_v63 = vpop.f32.mrb[93].mxu0  ;;  %v1555_v43 = vpop.f32.mrb[93].mxu1 }
 0x1ce   :  { %v1556_v18 = vadd.f32 %v1555_v43, %v3411_v36  ;;  %v1213_v49 = vpop.f32.mrb[94].mxu0  ;;  %v2749_v35 = vpop.f32.mrb[94].mxu1 }
 0x1cf   :  { %v1818_v47 = vadd.f32 %v3430_v57, %v1500_v17  ;;  %v3776_v29 = vadd.f32 %v3430_v57, %v1564_v34  ;;  %v1503_v30 = vadd.f32 %v3635_v26, %v1213_v49  ;;  %v1567_v27 = vadd.f32 %v2749_v35, %v3423_v48  ;;  %v1215_v41 = vpop.f32.mrb[95].mxu0  ;;  %v1558_v37 = vpop.f32.mrb[95].mxu1 }
 0x1d0   :  { %v1832_v55 = vadd.f32 %v3430_v57, %v1556_v18  ;;  %v1559_v44 = vadd.f32 %v1558_v37, %v3415_v40  ;;  %v1900_v41 = vlaneseq }
 0x1d1   :  { %1882 = vst [vmem:[%s3852_s3 + $0x170] sm:$0xff] %v1818_v47  ;;  %v2331_v36 = vadd.f32 %v2330_v2, %v1818_v47  ;;  %v2401_v12 = vmul.f32 %v1818_v47, %v1818_v47  ;;  %1898 = vst [vmem:[%s3852_s3 + $0x1f0] sm:$0xff] %v3776_v29  ;;  %v1819_v26 = vadd.f32 %v3430_v57, %v1503_v30 }
 0x1d2   :  { %1896 = vst [vmem:[%s3852_s3 + $0x1e0] sm:$0xff] %v1832_v55  ;;  %v1835_v48 = vadd.f32 %v3430_v57, %v1567_v27  ;;  %v1833_v40 = vadd.f32 %v3430_v57, %v1559_v44 }
 0x1d3   :  { %v2464_v4 = vadd.f32 %v2463_v51, %v2401_v12  ;;  %1883 = vst [vmem:[%s3852_s3 + $0x178] sm:$0xff] %v1819_v26  ;;  %v2332_v11 = vadd.f32 %v2331_v36, %v1819_v26  ;;  %v2402_v16 = vmul.f32 %v1819_v26, %v1819_v26  ;;  %v1901_v36 = vshrl.u32 %v1900_v41, 7 }
 0x1d4   :  { %1899 = vst [vmem:[%s3852_s3 + $0x1f8] sm:$0xff] %v1835_v48  ;;  %1897 = vst [vmem:[%s3852_s3 + $0x1e8] sm:$0xff] %v1833_v40  ;;  %v2416_v63 = vmul.f32 %v1833_v40, %v1833_v40 }
 0x1d5   :  { %v2333_v57 = vadd.f32 %v2332_v11, %v3655_v53  ;;  %v2465_v10 = vadd.f32 %v2464_v4, %v2402_v16  ;;  %v2407_v53 = vmul.f32 %v3697_v62, %v3697_v62  ;;  %vm2488_vm2 = vcmp.eq.s32.totalorder %v1901_v36, 0 }
 0x1d7   :  { %v2334_v19 = vadd.f32 %v2333_v57, %v3674_v9  ;;  %v2466_v45 = vadd.f32 %v2465_v10, %v2403_v42  ;;  %v2408_v9 = vmul.f32 %v3716_v38, %v3716_v38 }
 0x1d9   :  { %v2335_v22 = vadd.f32 %v2334_v19, %v3651_v3  ;;  %v2467_v46 = vadd.f32 %v2466_v45, %v2404_v6  ;;  %v2409_v3 = vmul.f32 %v3692_v39, %v3692_v39 }
 0x1db   :  { %v2336_v54 = vadd.f32 %v2335_v22, %v3671_v56  ;;  %v2468_v58 = vadd.f32 %v2467_v46, %v2405_v31  ;;  %v2410_v56 = vmul.f32 %v3713_v8, %v3713_v8 }
 0x1dd   :  { %v2337_v50 = vadd.f32 %v2336_v54, %v3697_v62  ;;  %v2469_v61 = vadd.f32 %v2468_v58, %v2406_v23  ;;  %v2411_v62 = vmul.f32 %v3739_v25, %v3739_v25 }
 0x1df   :  { %v2338_v21 = vadd.f32 %v2337_v50, %v3716_v38  ;;  %v2470_v1 = vadd.f32 %v2469_v61, %v2407_v53  ;;  %v2412_v38 = vmul.f32 %v3758_v33, %v3758_v33 }
 0x1e1   :  { %v2471_v5 = vadd.f32 %v2470_v1, %v2408_v9  ;;  %v2339_v60 = vadd.f32 %v2338_v21, %v3692_v39  ;;  %v2413_v39 = vmul.f32 %v3734_v15, %v3734_v15 }
 0x1e3   :  { %v2340_v52 = vadd.f32 %v2339_v60, %v3713_v8  ;;  %v2472_v28 = vadd.f32 %v2471_v5, %v2409_v3  ;;  %v2414_v8 = vmul.f32 %v3755_v24, %v3755_v24 }
 0x1e5   :  { %v2341_v20 = vadd.f32 %v2340_v52, %v3739_v25  ;;  %v2473_v7 = vadd.f32 %v2472_v28, %v2410_v56  ;;  %v2415_v25 = vmul.f32 %v1832_v55, %v1832_v55 }
 0x1e7   :  { %v2342_v32 = vadd.f32 %v2341_v20, %v3758_v33  ;;  %v2474_v0 = vadd.f32 %v2473_v7, %v2411_v62  ;;  %v2417_v33 = vmul.f32 %v3776_v29, %v3776_v29 }
 0x1e9   :  { %v2343_v2 = vadd.f32 %v2342_v32, %v3734_v15  ;;  %v2475_v13 = vadd.f32 %v2474_v0, %v2412_v38  ;;  %v2418_v15 = vmul.f32 %v1835_v48, %v1835_v48 }
 0x1eb   :  { %v2344_v14 = vadd.f32 %v2343_v2, %v3755_v24  ;;  %v2476_v59 = vadd.f32 %v2475_v13, %v2413_v39 }
 0x1ed   :  { %v2345_v51 = vadd.f32 %v2344_v14, %v1832_v55  ;;  %v2477_v17 = vadd.f32 %v2476_v59, %v2414_v8 }
 0x1ef   :  { %v2346_v34 = vadd.f32 %v2345_v51, %v1833_v40  ;;  %v2478_v43 = vadd.f32 %v2477_v17, %v2415_v25 }
 0x1f1   :  { %v2347_v18 = vadd.f32 %v2346_v34, %v3776_v29  ;;  %v2479_v49 = vadd.f32 %v2478_v43, %v2416_v63 }
 0x1f3   :  { %v2348_v35 = vadd.f32 %v2347_v18, %v1835_v48  ;;  %v2480_v47 = vadd.f32 %v2479_v49, %v2417_v33 }
 0x1f5   :  { %v2349_v30 = vrot.slane %v2348_v35, 4  ;;  %v2481_v27 = vadd.f32 %v2480_v47, %v2418_v15 }
 0x1f7   :  { %v2350_v24 = vadd.f32 %v2349_v30, %v2348_v35  ;;  %v2482_v37 = vrot.slane %v2481_v27, 4 }
 0x1f9   :  { %v2351_v44 = vrot.slane %v2350_v24, 2  ;;  %v2483_v55 = vadd.f32 %v2482_v37, %v2481_v27 }
 0x1fb   :  { %v2352_v12 = vadd.f32 %v2351_v44, %v2350_v24  ;;  %v2484_v26 = vrot.slane %v2483_v55, 2 }
 0x1fd   :  { %v2353_v40 = vrot.slane %v2352_v12, 1  ;;  %v2485_v4 = vadd.f32 %v2484_v26, %v2483_v55 }
 0x1ff   :  { %v2354_v11 = vadd.f32 %v2353_v40, %v2352_v12  ;;  %v2486_v16 = vrot.slane %v2485_v4, 1 }
 0x201   :  { %v2487_v29 = vadd.f32 %v2486_v16, %v2485_v4  ;;  %v2489_v42 = vsel %vm2488_vm2, %v2354_v11, 0.0 }
 0x202   :  { %2490 = vst [vmem:[%s3853_s4] sm:$0xff] %v2489_v42 }
 0x203   :  { %v2491_v48 = vsel %vm2488_vm2, %v2487_v29, 0.0 }
 0x204   :  { %2492 = vst [vmem:[%s3854_s5] sm:$0xff] %v2491_v48 }

// kernel: tile.79
= control target key start
LH: loop header
LB: loop body
LE: loop exit
PB: predicated region body
PF: predicated region fallthrough
CT: control target
= control target key end

     0   :  { %s64_s0 = inlined_call_operand.vmem [shape: f32[2], index: 0, kind: input, shape index: {}]   ;;  %s65_s1 = inlined_call_operand.vmem [shape: f32[64,2], index: 1, kind: output, shape index: {}]  }
   0x1   :  { %v4_v0 = vld [vmem:[%s64_s0] ss:$0 sm:$0xff] }
   0x2   :  { %5 = vst [vmem:[%s65_s1] sm:$0xff] %v4_v0  ;;  %20 = vst [vmem:[%s65_s1 + $0x8] sm:$0xff] %v4_v0 }
   0x3   :  { %21 = vst [vmem:[%s65_s1 + $0x10] sm:$0xff] %v4_v0  ;;  %22 = vst [vmem:[%s65_s1 + $0x18] sm:$0xff] %v4_v0 }
   0x4   :  { %23 = vst [vmem:[%s65_s1 + $0x20] sm:$0xff] %v4_v0  ;;  %24 = vst [vmem:[%s65_s1 + $0x28] sm:$0xff] %v4_v0 }
   0x5   :  { %25 = vst [vmem:[%s65_s1 + $0x30] sm:$0xff] %v4_v0  ;;  %26 = vst [vmem:[%s65_s1 + $0x38] sm:$0xff] %v4_v0 }

// kernel: tile.80
= control target key start
LH: loop header
LB: loop body
LE: loop exit
PB: predicated region body
PF: predicated region fallthrough
CT: control target
= control target key end

     0   :  { %s515_s10 = smov 126   ;;  %s516_s11 = smov 122   ;;  %vm3_vm0 = vcmask 15360   ;;  %vm9_vm1 = vcmask 1048560   ;;  %vm21_vm2 = vcmask 1015760   ;;  %vm15_vm3 = vcmask 1032160   ;;  %s783_s0 = inlined_call_operand.vmem [shape: f32[64,2], index: 0, kind: input, shape index: {}]   ;;  %s784_s1 = inlined_call_operand.vmem [shape: f32[1,128], index: 1, kind: output, shape index: {}]  }
   0x1   :  { %v389_v0 = vld [vmem:[%s783_s0 + $0x3f] sm:$0x1]   ;;  %v391_v1 = vld [vmem:[%s783_s0 + $0x3d] sm:$0x1]   ;;  %v390_v2 = vld [vmem:[%s783_s0 + $0x3e] sm:$0x1]  }
   0x2   :  { %7 = vrot.lane.b32.xlu0 %v389_v0, %s515_s10  ;;  %19 = vrot.lane.b32.xlu1 %v391_v1, %s516_s11  ;;  %v392_v3 = vld [vmem:[%s783_s0 + $0x3c] sm:$0x1]   ;;  %s517_s16 = smov 124   ;;  %s518_s17 = smov 120   ;;  %v393_v4 = vld [vmem:[%s783_s0 + $0x3b] sm:$0x1]  }
   0x3   :  { %v394_v5 = vld [vmem:[%s783_s0 + $0x3a] sm:$0x1]   ;;  %s519_s22 = smov 118   ;;  %s520_s23 = smov 116   ;;  %v395_v6 = vld [vmem:[%s783_s0 + $0x39] sm:$0x1]  }
   0x4   :  { %v396_v7 = vld [vmem:[%s783_s0 + $0x38] sm:$0x1]   ;;  %s521_s28 = smov 114   ;;  %s522_s29 = smov 112   ;;  %v397_v8 = vld [vmem:[%s783_s0 + $0x37] sm:$0x1]  }
   0x5   :  { %v398_v9 = vld [vmem:[%s783_s0 + $0x36] sm:$0x1]   ;;  %s523_s5 = smov 110   ;;  %s524_s6 = smov 108   ;;  %v399_v10 = vld [vmem:[%s783_s0 + $0x35] sm:$0x1]  }
   0x6   :  { %13 = vrot.lane.b32.xlu0 %v390_v2, %s517_s16  ;;  %25 = vrot.lane.b32.xlu1 %v392_v3, %s518_s17  ;;  %v400_v11 = vld [vmem:[%s783_s0 + $0x34] sm:$0x1]   ;;  %s525_s11 = smov 106   ;;  %s526_s12 = smov 104   ;;  %v401_v12 = vld [vmem:[%s783_s0 + $0x33] sm:$0x1]  }
   0x7   :  { %v402_v13 = vld [vmem:[%s783_s0 + $0x32] sm:$0x1]   ;;  %s527_s17 = smov 102   ;;  %s528_s18 = smov 100   ;;  %v403_v14 = vld [vmem:[%s783_s0 + $0x31] sm:$0x1]  }
   0x8   :  { %v404_v15 = vld [vmem:[%s783_s0 + $0x30] sm:$0x1]   ;;  %v2_v16 = vld [vmem:[%s783_s0] sm:$0x1]   ;;  %s529_s25 = smov 98   ;;  %s530_s26 = smov 96  }
   0x9   :  { %v405_v17 = vld [vmem:[%s783_s0 + $0x2f] sm:$0x1]   ;;  %v406_v18 = vld [vmem:[%s783_s0 + $0x2e] sm:$0x1]   ;;  %4 = vst.msk [vmem:[#allocation0] sm:$0x1] %vm3_vm0, %v2_v16  }
   0xa   :  { %31 = vrot.lane.b32.xlu0 %v393_v4, %s519_s22  ;;  %37 = vrot.lane.b32.xlu1 %v394_v5, %s520_s23  ;;  %s531_s2 = smov 94   ;;  %s532_s3 = smov 92   ;;  %v407_v19 = vld [vmem:[%s783_s0 + $0x2d] sm:$0x1]   ;;  %v408_v20 = vld [vmem:[%s783_s0 + $0x2c] sm:$0x1]  }
   0xb   :  { %s533_s8 = smov 90   ;;  %s534_s9 = smov 88   ;;  %v409_v21 = vld [vmem:[%s783_s0 + $0x2b] sm:$0x1]   ;;  %v410_v22 = vld [vmem:[%s783_s0 + $0x2a] sm:$0x1]  }
   0xc   :  { %s535_s14 = smov 86   ;;  %s536_s15 = smov 84   ;;  %v411_v23 = vld [vmem:[%s783_s0 + $0x29] sm:$0x1]   ;;  %v412_v24 = vld [vmem:[%s783_s0 + $0x28] sm:$0x1]  }
   0xd   :  { %s537_s20 = smov 82   ;;  %s538_s21 = smov 80   ;;  %v413_v25 = vld [vmem:[%s783_s0 + $0x27] sm:$0x1]   ;;  %v414_v26 = vld [vmem:[%s783_s0 + $0x26] sm:$0x1]  }
   0xe   :  { %43 = vrot.lane.b32.xlu0 %v395_v6, %s521_s28  ;;  %49 = vrot.lane.b32.xlu1 %v396_v7, %s522_s29  ;;  %s540_s27 = smov 76   ;;  %v415_v27 = vld [vmem:[%s783_s0 + $0x25] sm:$0x1]   ;;  %v416_v28 = vld [vmem:[%s783_s0 + $0x24] sm:$0x1]   ;;  %s542_s4 = smov 72  }
   0xf   :  { %v417_v29 = vld [vmem:[%s783_s0 + $0x23] sm:$0x1]   ;;  %v418_v30 = vld [vmem:[%s783_s0 + $0x22] sm:$0x1]   ;;  %s544_s10 = smov 68   ;;  %s546_s16 = smov 64  }
  0x10   :  { %v419_v31 = vld [vmem:[%s783_s0 + $0x21] sm:$0x1]   ;;  %v420_v32 = vld [vmem:[%s783_s0 + $0x20] sm:$0x1]   ;;  %v421_v33 = vld [vmem:[%s783_s0 + $0x1f] sm:$0x1]  }
  0x11   :  { %v422_v34 = vld [vmem:[%s783_s0 + $0x1e] sm:$0x1]   ;;  %s548_s22 = smov 60   ;;  %v423_v35 = vld [vmem:[%s783_s0 + $0x1d] sm:$0x1]   ;;  %s550_s28 = smov 56  }
  0x12   :  { %55 = vrot.lane.b32.xlu0 %v397_v8, %s523_s5  ;;  %61 = vrot.lane.b32.xlu1 %v398_v9, %s524_s6  ;;  %v424_v36 = vld [vmem:[%s783_s0 + $0x1c] sm:$0x1]   ;;  %v425_v37 = vld [vmem:[%s783_s0 + $0x1b] sm:$0x1]   ;;  %s552_s5 = smov 52   ;;  %s558_s23 = smov 40  }
  0x13   :  { %v426_v38 = vld [vmem:[%s783_s0 + $0x1a] sm:$0x1]   ;;  %v427_v39 = vld [vmem:[%s783_s0 + $0x19] sm:$0x1]   ;;  %v428_v40 = vld [vmem:[%s783_s0 + $0x18] sm:$0x1]  }
  0x14   :  { %v429_v41 = vld [vmem:[%s783_s0 + $0x17] sm:$0x1]   ;;  %v430_v42 = vld [vmem:[%s783_s0 + $0x16] sm:$0x1]   ;;  %v431_v43 = vld [vmem:[%s783_s0 + $0x15] sm:$0x1]  }
  0x15   :  { %v432_v44 = vld [vmem:[%s783_s0 + $0x14] sm:$0x1]   ;;  %v433_v45 = vld [vmem:[%s783_s0 + $0x13] sm:$0x1]   ;;  %v434_v46 = vld [vmem:[%s783_s0 + $0x12] sm:$0x1]  }
  0x16   :  { %67 = vrot.lane.b32.xlu0 %v399_v10, %s525_s11  ;;  %73 = vrot.lane.b32.xlu1 %v400_v11, %s526_s12  ;;  %s554_s11 = smov 48   ;;  %s560_s29 = smov 36   ;;  %v435_v47 = vld [vmem:[%s783_s0 + $0x11] sm:$0x1]   ;;  %v436_v48 = vld [vmem:[%s783_s0 + $0x10] sm:$0x1]  }
  0x17   :  { %s562_s6 = smov 32   ;;  %v437_v49 = vld [vmem:[%s783_s0 + $0xf] sm:$0x1]   ;;  %v438_v50 = vld [vmem:[%s783_s0 + $0xe] sm:$0x1]   ;;  %s564_s12 = smov 28  }
  0x18   :  { %v439_v51 = vld [vmem:[%s783_s0 + $0xd] sm:$0x1]   ;;  %v440_v52 = vld [vmem:[%s783_s0 + $0xc] sm:$0x1]   ;;  %v441_v53 = vld [vmem:[%s783_s0 + $0xb] sm:$0x1]  }
  0x19   :  { %v442_v54 = vld [vmem:[%s783_s0 + $0xa] sm:$0x1]   ;;  %s568_s24 = smov 20   ;;  %v443_v55 = vld [vmem:[%s783_s0 + $0x9] sm:$0x1]   ;;  %s570_s30 = smov 16  }
  0x1a   :  { %79 = vrot.lane.b32.xlu0 %v401_v12, %s527_s17  ;;  %85 = vrot.lane.b32.xlu1 %v402_v13, %s528_s18  ;;  %s556_s17 = smov 44   ;;  %s566_s18 = smov 24   ;;  %v444_v56 = vld [vmem:[%s783_s0 + $0x8] sm:$0x1]   ;;  %v445_v57 = vld [vmem:[%s783_s0 + $0x7] sm:$0x1]  }
  0x1b   :  { %v446_v58 = vld [vmem:[%s783_s0 + $0x6] sm:$0x1]   ;;  %s572_s7 = smov 12   ;;  %v447_v59 = vld [vmem:[%s783_s0 + $0x5] sm:$0x1]   ;;  %s574_s13 = smov 8  }
  0x1c   :  { %v448_v60 = vld [vmem:[%s783_s0 + $0x4] sm:$0x1]   ;;  %v449_v63 = vld [vmem:[%s783_s0 + $0x3] sm:$0x1]   ;;  %v450_v0 = vld [vmem:[%s783_s0 + $0x2] sm:$0x1]  }
  0x1d   :  { %vm27_vm4 = vcmask 999360   ;;  %vm33_vm5 = vcmask 982960   ;;  %s576_s19 = smov 4   ;;  %v451_v3 = vld [vmem:[%s783_s0 + $0x1] sm:$0x1]   ;;  %vm39_vm6 = vcmask 966560  }
  0x1e   :  { %91 = vrot.lane.b32.xlu0 %v403_v14, %s529_s25  ;;  %97 = vrot.lane.b32.xlu1 %v404_v15, %s530_s26  ;;  %s539_s26 = smov 78   ;;  %s577_s0 = smov 2   ;;  %vm45_vm7 = vcmask 950160   ;;  %vm51_vm8 = vcmask 933760   ;;  %vm57_vm9 = vcmask 917360   ;;  %vm63_vm10 = vcmask 900960  }
  0x1f   :  { %vm69_vm11 = vcmask 884560   ;;  %vm75_vm12 = vcmask 868160   ;;  %vm81_vm13 = vcmask 851760   ;;  %vm87_vm14 = vcmask 835360  }
  0x20   :  { %vm93_vm15 = vcmask 818960   ;;  %vm99_vm0 = vcmask 802560  }
  0x22   :  { %103 = vrot.lane.b32.xlu0 %v405_v17, %s531_s2  ;;  %109 = vrot.lane.b32.xlu1 %v406_v18, %s532_s3  ;;  %s541_s3 = smov 74  }
  0x26   :  { %115 = vrot.lane.b32.xlu0 %v407_v19, %s533_s8  ;;  %121 = vrot.lane.b32.xlu1 %v408_v20, %s534_s9  ;;  %s543_s9 = smov 70  }
  0x2a   :  { %127 = vrot.lane.b32.xlu0 %v409_v21, %s535_s14  ;;  %133 = vrot.lane.b32.xlu1 %v410_v22, %s536_s15  ;;  %s545_s15 = smov 66  }
  0x2e   :  { %139 = vrot.lane.b32.xlu0 %v411_v23, %s537_s20  ;;  %145 = vrot.lane.b32.xlu1 %v412_v24, %s538_s21  ;;  %s547_s21 = smov 62  }
  0x32   :  { %151 = vrot.lane.b32.xlu0 %v413_v25, %s539_s26  ;;  %157 = vrot.lane.b32.xlu1 %v414_v26, %s540_s27  ;;  %s549_s27 = smov 58  }
  0x36   :  { %163 = vrot.lane.b32.xlu0 %v415_v27, %s541_s3  ;;  %169 = vrot.lane.b32.xlu1 %v416_v28, %s542_s4  ;;  %s551_s4 = smov 54  }
  0x3a   :  { %175 = vrot.lane.b32.xlu0 %v417_v29, %s543_s9  ;;  %181 = vrot.lane.b32.xlu1 %v418_v30, %s544_s10  ;;  %s553_s10 = smov 50  }
  0x3e   :  { %187 = vrot.lane.b32.xlu0 %v419_v31, %s545_s15  ;;  %193 = vrot.lane.b32.xlu1 %v420_v32, %s546_s16  ;;  %s555_s16 = smov 46  }
  0x42   :  { %199 = vrot.lane.b32.xlu0 %v421_v33, %s547_s21  ;;  %205 = vrot.lane.b32.xlu1 %v422_v34, %s548_s22  ;;  %s557_s22 = smov 42  }
  0x46   :  { %211 = vrot.lane.b32.xlu0 %v423_v35, %s549_s27  ;;  %217 = vrot.lane.b32.xlu1 %v424_v36, %s550_s28  ;;  %s559_s28 = smov 38  }
  0x4a   :  { %223 = vrot.lane.b32.xlu0 %v425_v37, %s551_s4  ;;  %229 = vrot.lane.b32.xlu1 %v426_v38, %s552_s5  ;;  %s561_s5 = smov 34  }
  0x4e   :  { %235 = vrot.lane.b32.xlu0 %v427_v39, %s553_s10  ;;  %241 = vrot.lane.b32.xlu1 %v428_v40, %s554_s11  ;;  %s563_s11 = smov 30  }
  0x52   :  { %247 = vrot.lane.b32.xlu0 %v429_v41, %s555_s16  ;;  %253 = vrot.lane.b32.xlu1 %v430_v42, %s556_s17  ;;  %s565_s17 = smov 26  }
  0x56   :  { %259 = vrot.lane.b32.xlu0 %v431_v43, %s557_s22  ;;  %265 = vrot.lane.b32.xlu1 %v432_v44, %s558_s23  ;;  %s567_s23 = smov 22  }
  0x5a   :  { %271 = vrot.lane.b32.xlu0 %v433_v45, %s559_s28  ;;  %277 = vrot.lane.b32.xlu1 %v434_v46, %s560_s29  ;;  %s569_s29 = smov 18  }
  0x5e   :  { %283 = vrot.lane.b32.xlu0 %v435_v47, %s561_s5  ;;  %289 = vrot.lane.b32.xlu1 %v436_v48, %s562_s6  ;;  %s571_s6 = smov 14  }
  0x62   :  { %295 = vrot.lane.b32.xlu0 %v437_v49, %s563_s11  ;;  %301 = vrot.lane.b32.xlu1 %v438_v50, %s564_s12  ;;  %s573_s12 = smov 10  }
  0x66   :  { %307 = vrot.lane.b32.xlu0 %v439_v51, %s565_s17  ;;  %313 = vrot.lane.b32.xlu1 %v440_v52, %s566_s18  ;;  %s575_s18 = smov 6  }
  0x6a   :  { %319 = vrot.lane.b32.xlu0 %v441_v53, %s567_s23  ;;  %325 = vrot.lane.b32.xlu1 %v442_v54, %s568_s24 }
  0x6e   :  { %331 = vrot.lane.b32.xlu0 %v443_v55, %s569_s29  ;;  %337 = vrot.lane.b32.xlu1 %v444_v56, %s570_s30 }
  0x72   :  { %343 = vrot.lane.b32.xlu0 %v445_v57, %s571_s6  ;;  %349 = vrot.lane.b32.xlu1 %v446_v58, %s572_s7 }
  0x74   :  { %v8_v61 = vpop.permute.xlu0 %7   ;;  %v20_v62 = vpop.permute.xlu1 %19  }
  0x75   :  { %10 = vst.msk [vmem:[#allocation0] sm:$0x1] %vm9_vm1, %v8_v61   ;;  %vm105_vm1 = vcmask 786160  }
  0x76   :  { %355 = vrot.lane.b32.xlu0 %v447_v59, %s573_s12  ;;  %361 = vrot.lane.b32.xlu1 %v448_v60, %s574_s13 }
  0x78   :  { %v14_v1 = vpop.permute.xlu0 %13   ;;  %v26_v2 = vpop.permute.xlu1 %25  }
  0x79   :  { %16 = vst.msk [vmem:[#allocation0] sm:$0x1] %vm15_vm3, %v14_v1   ;;  %vm117_vm3 = vcmask 753360  }
  0x7a   :  { %22 = vst.msk [vmem:[#allocation0] sm:$0x1] %vm21_vm2, %v20_v62   ;;  %367 = vrot.lane.b32.xlu0 %v449_v63, %s575_s18  ;;  %373 = vrot.lane.b32.xlu1 %v450_v0, %s576_s19  ;;  %vm111_vm2 = vcmask 769760  }
  0x7b   :  { %28 = vst.msk [vmem:[#allocation0] sm:$0x1] %vm27_vm4, %v26_v2   ;;  %vm123_vm4 = vcmask 736960  }
  0x7c   :  { %v32_v4 = vpop.permute.xlu0 %31   ;;  %v38_v5 = vpop.permute.xlu1 %37  }
  0x7d   :  { %34 = vst.msk [vmem:[#allocation0] sm:$0x1] %vm33_vm5, %v32_v4   ;;  %vm129_vm5 = vcmask 720560  }
  0x7e   :  { %379 = vrot.lane.b32.xlu0 %v451_v3, %s577_s0  ;;  %40 = vst.msk [vmem:[#allocation0] sm:$0x1] %vm39_vm6, %v38_v5   ;;  %vm135_vm6 = vcmask 704160  }
  0x80   :  { %v44_v6 = vpop.permute.xlu0 %43   ;;  %v50_v7 = vpop.permute.xlu1 %49  }
  0x81   :  { %46 = vst.msk [vmem:[#allocation0] sm:$0x1] %vm45_vm7, %v44_v6   ;;  %vm141_vm7 = vcmask 687760  }
  0x82   :  { %52 = vst.msk [vmem:[#allocation0] sm:$0x1] %vm51_vm8, %v50_v7   ;;  %vm147_vm8 = vcmask 671360  }
  0x84   :  { %v56_v8 = vpop.permute.xlu0 %55   ;;  %v62_v9 = vpop.permute.xlu1 %61  }
  0x85   :  { %58 = vst.msk [vmem:[#allocation0] sm:$0x1] %vm57_vm9, %v56_v8   ;;  %vm153_vm9 = vcmask 654960  }
  0x86   :  { %64 = vst.msk [vmem:[#allocation0] sm:$0x1] %vm63_vm10, %v62_v9   ;;  %vm159_vm10 = vcmask 638560  }
  0x88   :  { %v68_v10 = vpop.permute.xlu0 %67   ;;  %v74_v11 = vpop.permute.xlu1 %73  }
  0x89   :  { %70 = vst.msk [vmem:[#allocation0] sm:$0x1] %vm69_vm11, %v68_v10   ;;  %vm165_vm11 = vcmask 622160  }
  0x8a   :  { %76 = vst.msk [vmem:[#allocation0] sm:$0x1] %vm75_vm12, %v74_v11   ;;  %vm171_vm12 = vcmask 605760  }
  0x8c   :  { %v80_v12 = vpop.permute.xlu0 %79   ;;  %v86_v13 = vpop.permute.xlu1 %85  }
  0x8d   :  { %82 = vst.msk [vmem:[#allocation0] sm:$0x1] %vm81_vm13, %v80_v12   ;;  %vm177_vm13 = vcmask 589360  }
  0x8e   :  { %88 = vst.msk [vmem:[#allocation0] sm:$0x1] %vm87_vm14, %v86_v13   ;;  %vm183_vm14 = vcmask 572960  }
  0x90   :  { %v92_v14 = vpop.permute.xlu0 %91   ;;  %v98_v15 = vpop.permute.xlu1 %97  }
  0x91   :  { %94 = vst.msk [vmem:[#allocation0] sm:$0x1] %vm93_vm15, %v92_v14   ;;  %vm189_vm15 = vcmask 556560  }
  0x92   :  { %100 = vst.msk [vmem:[#allocation0] sm:$0x1] %vm99_vm0, %v98_v15   ;;  %vm195_vm0 = vcmask 540160  }
  0x94   :  { %v104_v16 = vpop.permute.xlu0 %103   ;;  %v110_v17 = vpop.permute.xlu1 %109  }
  0x95   :  { %106 = vst.msk [vmem:[#allocation0] sm:$0x1] %vm105_vm1, %v104_v16   ;;  %vm201_vm1 = vcmask 523760  }
  0x96   :  { %112 = vst.msk [vmem:[#allocation0] sm:$0x1] %vm111_vm2, %v110_v17   ;;  %vm207_vm2 = vcmask 507360  }
  0x98   :  { %v116_v18 = vpop.permute.xlu0 %115   ;;  %v122_v19 = vpop.permute.xlu1 %121  }
  0x99   :  { %118 = vst.msk [vmem:[#allocation0] sm:$0x1] %vm117_vm3, %v116_v18   ;;  %vm213_vm3 = vcmask 490960  }
  0x9a   :  { %124 = vst.msk [vmem:[#allocation0] sm:$0x1] %vm123_vm4, %v122_v19   ;;  %vm219_vm4 = vcmask 474560  }
  0x9c   :  { %v128_v20 = vpop.permute.xlu0 %127   ;;  %v134_v21 = vpop.permute.xlu1 %133  }
  0x9d   :  { %130 = vst.msk [vmem:[#allocation0] sm:$0x1] %vm129_vm5, %v128_v20   ;;  %vm225_vm5 = vcmask 458160  }
  0x9e   :  { %136 = vst.msk [vmem:[#allocation0] sm:$0x1] %vm135_vm6, %v134_v21   ;;  %vm231_vm6 = vcmask 441760  }
  0xa0   :  { %v140_v22 = vpop.permute.xlu0 %139   ;;  %v146_v23 = vpop.permute.xlu1 %145  }
  0xa1   :  { %142 = vst.msk [vmem:[#allocation0] sm:$0x1] %vm141_vm7, %v140_v22   ;;  %vm237_vm7 = vcmask 425360  }
  0xa2   :  { %148 = vst.msk [vmem:[#allocation0] sm:$0x1] %vm147_vm8, %v146_v23   ;;  %vm243_vm8 = vcmask 408960  }
  0xa4   :  { %v152_v24 = vpop.permute.xlu0 %151   ;;  %v158_v25 = vpop.permute.xlu1 %157  }
  0xa5   :  { %154 = vst.msk [vmem:[#allocation0] sm:$0x1] %vm153_vm9, %v152_v24   ;;  %vm249_vm9 = vcmask 392560  }
  0xa6   :  { %160 = vst.msk [vmem:[#allocation0] sm:$0x1] %vm159_vm10, %v158_v25   ;;  %vm255_vm10 = vcmask 376160  }
  0xa8   :  { %v164_v26 = vpop.permute.xlu0 %163   ;;  %v170_v27 = vpop.permute.xlu1 %169  }
  0xa9   :  { %166 = vst.msk [vmem:[#allocation0] sm:$0x1] %vm165_vm11, %v164_v26   ;;  %vm261_vm11 = vcmask 359760  }
  0xaa   :  { %172 = vst.msk [vmem:[#allocation0] sm:$0x1] %vm171_vm12, %v170_v27   ;;  %vm267_vm12 = vcmask 343360  }
  0xac   :  { %v176_v28 = vpop.permute.xlu0 %175   ;;  %v182_v29 = vpop.permute.xlu1 %181  }
  0xad   :  { %178 = vst.msk [vmem:[#allocation0] sm:$0x1] %vm177_vm13, %v176_v28   ;;  %vm273_vm13 = vcmask 326960  }
  0xae   :  { %184 = vst.msk [vmem:[#allocation0] sm:$0x1] %vm183_vm14, %v182_v29   ;;  %vm279_vm14 = vcmask 310560  }
  0xb0   :  { %v188_v30 = vpop.permute.xlu0 %187   ;;  %v194_v31 = vpop.permute.xlu1 %193  }
  0xb1   :  { %190 = vst.msk [vmem:[#allocation0] sm:$0x1] %vm189_vm15, %v188_v30   ;;  %vm285_vm15 = vcmask 294160  }
  0xb2   :  { %196 = vst.msk [vmem:[#allocation0] sm:$0x1] %vm195_vm0, %v194_v31   ;;  %vm291_vm0 = vcmask 277760  }
  0xb4   :  { %v200_v32 = vpop.permute.xlu0 %199   ;;  %v206_v33 = vpop.permute.xlu1 %205  }
  0xb5   :  { %202 = vst.msk [vmem:[#allocation0] sm:$0x1] %vm201_vm1, %v200_v32   ;;  %vm297_vm1 = vcmask 261360  }
  0xb6   :  { %208 = vst.msk [vmem:[#allocation0] sm:$0x1] %vm207_vm2, %v206_v33   ;;  %vm303_vm2 = vcmask 244960  }
  0xb8   :  { %v212_v34 = vpop.permute.xlu0 %211   ;;  %v218_v35 = vpop.permute.xlu1 %217  }
  0xb9   :  { %214 = vst.msk [vmem:[#allocation0] sm:$0x1] %vm213_vm3, %v212_v34   ;;  %vm309_vm3 = vcmask 228560  }
  0xba   :  { %220 = vst.msk [vmem:[#allocation0] sm:$0x1] %vm219_vm4, %v218_v35   ;;  %vm315_vm4 = vcmask 212160  }
  0xbc   :  { %v224_v36 = vpop.permute.xlu0 %223   ;;  %v230_v37 = vpop.permute.xlu1 %229  }
  0xbd   :  { %226 = vst.msk [vmem:[#allocation0] sm:$0x1] %vm225_vm5, %v224_v36   ;;  %vm321_vm5 = vcmask 195760  }
  0xbe   :  { %232 = vst.msk [vmem:[#allocation0] sm:$0x1] %vm231_vm6, %v230_v37   ;;  %vm327_vm6 = vcmask 179360  }
  0xc0   :  { %v236_v38 = vpop.permute.xlu0 %235   ;;  %v242_v39 = vpop.permute.xlu1 %241  }
  0xc1   :  { %238 = vst.msk [vmem:[#allocation0] sm:$0x1] %vm237_vm7, %v236_v38   ;;  %vm333_vm7 = vcmask 162960  }
  0xc2   :  { %244 = vst.msk [vmem:[#allocation0] sm:$0x1] %vm243_vm8, %v242_v39   ;;  %vm339_vm8 = vcmask 146560  }
  0xc4   :  { %v248_v40 = vpop.permute.xlu0 %247   ;;  %v254_v41 = vpop.permute.xlu1 %253  }
  0xc5   :  { %250 = vst.msk [vmem:[#allocation0] sm:$0x1] %vm249_vm9, %v248_v40   ;;  %vm345_vm9 = vcmask 130160  }
  0xc6   :  { %256 = vst.msk [vmem:[#allocation0] sm:$0x1] %vm255_vm10, %v254_v41   ;;  %vm351_vm10 = vcmask 113760  }
  0xc8   :  { %v260_v42 = vpop.permute.xlu0 %259   ;;  %v266_v43 = vpop.permute.xlu1 %265  }
  0xc9   :  { %262 = vst.msk [vmem:[#allocation0] sm:$0x1] %vm261_vm11, %v260_v42   ;;  %vm357_vm11 = vcmask 97360  }
  0xca   :  { %268 = vst.msk [vmem:[#allocation0] sm:$0x1] %vm267_vm12, %v266_v43   ;;  %vm363_vm12 = vcmask 80960  }
  0xcc   :  { %v272_v44 = vpop.permute.xlu0 %271   ;;  %v278_v45 = vpop.permute.xlu1 %277  }
  0xcd   :  { %274 = vst.msk [vmem:[#allocation0] sm:$0x1] %vm273_vm13, %v272_v44   ;;  %vm369_vm13 = vcmask 64560  }
  0xce   :  { %280 = vst.msk [vmem:[#allocation0] sm:$0x1] %vm279_vm14, %v278_v45   ;;  %vm375_vm14 = vcmask 48160  }
  0xd0   :  { %v284_v46 = vpop.permute.xlu0 %283   ;;  %v290_v47 = vpop.permute.xlu1 %289  }
  0xd1   :  { %286 = vst.msk [vmem:[#allocation0] sm:$0x1] %vm285_vm15, %v284_v46   ;;  %vm381_vm15 = vcmask 31760  }
  0xd2   :  { %292 = vst.msk [vmem:[#allocation0] sm:$0x1] %vm291_vm0, %v290_v47  }
  0xd4   :  { %v296_v48 = vpop.permute.xlu0 %295   ;;  %v302_v49 = vpop.permute.xlu1 %301  }
  0xd5   :  { %298 = vst.msk [vmem:[#allocation0] sm:$0x1] %vm297_vm1, %v296_v48  }
  0xd6   :  { %304 = vst.msk [vmem:[#allocation0] sm:$0x1] %vm303_vm2, %v302_v49  }
  0xd8   :  { %v308_v50 = vpop.permute.xlu0 %307   ;;  %v314_v51 = vpop.permute.xlu1 %313  }
  0xd9   :  { %310 = vst.msk [vmem:[#allocation0] sm:$0x1] %vm309_vm3, %v308_v50  }
  0xda   :  { %316 = vst.msk [vmem:[#allocation0] sm:$0x1] %vm315_vm4, %v314_v51  }
  0xdc   :  { %v320_v52 = vpop.permute.xlu0 %319   ;;  %v326_v53 = vpop.permute.xlu1 %325  }
  0xdd   :  { %322 = vst.msk [vmem:[#allocation0] sm:$0x1] %vm321_vm5, %v320_v52  }
  0xde   :  { %328 = vst.msk [vmem:[#allocation0] sm:$0x1] %vm327_vm6, %v326_v53  }
  0xe0   :  { %v332_v54 = vpop.permute.xlu0 %331   ;;  %v338_v55 = vpop.permute.xlu1 %337  }
  0xe1   :  { %334 = vst.msk [vmem:[#allocation0] sm:$0x1] %vm333_vm7, %v332_v54  }
  0xe2   :  { %340 = vst.msk [vmem:[#allocation0] sm:$0x1] %vm339_vm8, %v338_v55  }
  0xe4   :  { %v344_v56 = vpop.permute.xlu0 %343   ;;  %v350_v57 = vpop.permute.xlu1 %349  }
  0xe5   :  { %346 = vst.msk [vmem:[#allocation0] sm:$0x1] %vm345_vm9, %v344_v56  }
  0xe6   :  { %352 = vst.msk [vmem:[#allocation0] sm:$0x1] %vm351_vm10, %v350_v57  }
  0xe8   :  { %v356_v58 = vpop.permute.xlu0 %355   ;;  %v362_v59 = vpop.permute.xlu1 %361  }
  0xe9   :  { %358 = vst.msk [vmem:[#allocation0] sm:$0x1] %vm357_vm11, %v356_v58  }
  0xea   :  { %364 = vst.msk [vmem:[#allocation0] sm:$0x1] %vm363_vm12, %v362_v59  }
  0xec   :  { %v368_v60 = vpop.permute.xlu0 %367   ;;  %v374_v61 = vpop.permute.xlu1 %373  }
  0xed   :  { %370 = vst.msk [vmem:[#allocation0] sm:$0x1] %vm369_vm13, %v368_v60  }
  0xee   :  { %376 = vst.msk [vmem:[#allocation0] sm:$0x1] %vm375_vm14, %v374_v61  }
  0xf0   :  { %v380_v62 = vpop.permute.xlu0 %379  }
  0xf1   :  { %382 = vst.msk [vmem:[#allocation0] sm:$0x1] %vm381_vm15, %v380_v62  }
  0xf8   :  { %v386_v63 = vld [vmem:[#allocation0] sm:$0x1] }
  0xf9   :  { %388 = vst [vmem:[%s784_s1] sm:$0x1] %v386_v63 }

// kernel: generator_forward.57
= control target key start
LH: loop header
LB: loop body
LE: loop exit
PB: predicated region body
PF: predicated region fallthrough
CT: control target
= control target key end

     0   :  { %11 = vsyncpa [#allocation4], 0  ;;  %vm393_vm0 = vcmask 261120   ;;  %s2636_s0 = inlined_call_operand.vmem [shape: bf16[512,32], index: 0, kind: input, shape index: {}]   ;;  %s2637_s1 = inlined_call_operand.vmem [shape: bf16[32,128], index: 1, kind: input, shape index: {}]   ;;  %s2638_s2 = inlined_call_operand.vmem [shape: f32[1,128], index: 2, kind: input, shape index: {}]   ;;  %s2639_s3 = inlined_call_operand.vmem [shape: f32[512,128], index: 3, kind: output, shape index: {0}]   ;;  %s2640_s4 = inlined_call_operand.hbm [shape: f32[8,128], index: 4, kind: output, shape index: {1}]   ;;  %s2641_s5 = inlined_call_operand.hbm [shape: f32[8,128], index: 5, kind: output, shape index: {2}]  }
   0x1   :  { %v1909_v0 = vld [vmem:[%s2637_s1] sm:$0xff]   ;;  %v1910_v1 = vld [vmem:[%s2637_s1 + $0x8] sm:$0xff]   ;;  %v1913_v4 = vld [vmem:[%s2636_s0 + $0x10] sm:$0xff]  }
   0x2   :  { %1835 = vmatprep.subr.bf16.mxu0 %v1909_v0  ;;  %v1911_v2 = vld [vmem:[%s2636_s0] sm:$0xff]   ;;  %1903 = vmatprep.subr.bf16.mxu1 %v1909_v0  ;;  %v1912_v3 = vld [vmem:[%s2636_s0 + $0x8] sm:$0xff]   ;;  %v1914_v5 = vld [vmem:[%s2636_s0 + $0x18] sm:$0xff]  }
   0x3   :  { %1836 = vmatpush3.bf16.msra.mxu0 %v1909_v0  ;;  %1905 = vmatpush3.bf16.msra.mxu1 %v1909_v0  ;;  %v1915_v6 = vld [vmem:[%s2636_s0 + $0x20] sm:$0xff]   ;;  %v1928_v8 = vld [vmem:[%s2636_s0 + $0x88] sm:$0xff]   ;;  %v1929_v9 = vld [vmem:[%s2636_s0 + $0x90] sm:$0xff]  }
   0x4   :  { %1837 = vmatprep.subr.bf16.mxu0 %v1910_v1  ;;  %1839 = vmatprep.mubr.msk.bf16.mxu0 %vm393_vm0, %v1911_v2  ;;  %v1927_v7 = vld [vmem:[%s2636_s0 + $0x80] sm:$0xff]   ;;  %v1916_v10 = vld [vmem:[%s2636_s0 + $0x28] sm:$0xff]   ;;  %v1917_v11 = vld [vmem:[%s2636_s0 + $0x30] sm:$0xff]  }
   0x5   :  { %1904 = vmatprep.subr.bf16.mxu1 %v1910_v1  ;;  %1871 = vmatprep.mubr.msk.bf16.mxu1 %vm393_vm0, %v1927_v7  ;;  %v1930_v12 = vld [vmem:[%s2636_s0 + $0x98] sm:$0xff]   ;;  %v1931_v13 = vld [vmem:[%s2636_s0 + $0xa0] sm:$0xff]   ;;  %v1932_v16 = vld [vmem:[%s2636_s0 + $0xa8] sm:$0xff]  }
   0x6   :  { %v1918_v14 = vld [vmem:[%s2636_s0 + $0x38] sm:$0xff]   ;;  %v1919_v15 = vld [vmem:[%s2636_s0 + $0x40] sm:$0xff]   ;;  %v1933_v17 = vld [vmem:[%s2636_s0 + $0xb0] sm:$0xff]  }
   0x7   :  { %1838 = vmatpush3.bf16.msra.mxu0 %v1910_v1  ;;  %1906 = vmatpush3.bf16.msra.mxu1 %v1910_v1 }
   0xa   :  { %1840 = vmatmul.mubr.msk.bf16.vlgmr.msra.gmra.mrb[0].mxu0 %vm393_vm0, %v1912_v3  ;;  %1872 = vmatmul.mubr.msk.bf16.vlgmr.msra.gmra.mrb[0].mxu1 %vm393_vm0, %v1928_v8 }
   0xb   :  { %1843 = vmatprep.mubr.msk.bf16.mxu0 %vm393_vm0, %v1913_v4  ;;  %1875 = vmatprep.mubr.msk.bf16.mxu1 %vm393_vm0, %v1929_v9 }
  0x12   :  { %1844 = vmatmul.mubr.msk.bf16.gmra.mrb[4].mxu0 %vm393_vm0, %v1914_v5  ;;  %1876 = vmatmul.mubr.msk.bf16.gmra.mrb[4].mxu1 %vm393_vm0, %v1930_v12 }
  0x13   :  { %1847 = vmatprep.mubr.msk.bf16.mxu0 %vm393_vm0, %v1915_v6  ;;  %1879 = vmatprep.mubr.msk.bf16.mxu1 %vm393_vm0, %v1931_v13 }
  0x1a   :  { %1848 = vmatmul.mubr.msk.bf16.gmra.mrb[8].mxu0 %vm393_vm0, %v1916_v10 }
  0x1b   :  { %1851 = vmatprep.mubr.msk.bf16.mxu0 %vm393_vm0, %v1917_v11 }
  0x22   :  { %1852 = vmatmul.mubr.msk.bf16.gmra.mrb[12].mxu0 %vm393_vm0, %v1918_v14 }
  0x23   :  { %12 = vsyncpa [#allocation6], 0  ;;  %1855 = vmatprep.mubr.msk.bf16.mxu0 %vm393_vm0, %v1919_v15  ;;  %1880 = vmatmul.mubr.msk.bf16.gmra.mrb[8].mxu1 %vm393_vm0, %v1932_v16  ;;  %v1920_v18 = vld [vmem:[%s2636_s0 + $0x48] sm:$0xff]   ;;  %v1921_v19 = vld [vmem:[%s2636_s0 + $0x50] sm:$0xff]   ;;  %s1992_s25 = smov [#allocation5]  }
  0x24   :  { %1883 = vmatprep.mubr.msk.bf16.mxu1 %vm393_vm0, %v1933_v17  ;;  %v1934_v20 = vld [vmem:[%s2636_s0 + $0xb8] sm:$0xff]   ;;  %v1935_v21 = vld [vmem:[%s2636_s0 + $0xc0] sm:$0xff]   ;;  %v1936_v24 = vld [vmem:[%s2636_s0 + $0xc8] sm:$0xff]   ;;  %s1720_s26 = sshll.u32 %s1992_s25, 4  ;;  %s1721_s26 = int_to_ptr.vmem [resolvable:$true] %s1720_s26 }
  0x25   :  { %v1922_v22 = vld [vmem:[%s2636_s0 + $0x58] sm:$0xff]   ;;  %v1923_v23 = vld [vmem:[%s2636_s0 + $0x60] sm:$0xff]   ;;  %v1937_v25 = vld [vmem:[%s2636_s0 + $0xd0] sm:$0xff]  }
  0x26   :  { %v1924_v26 = vld [vmem:[%s2636_s0 + $0x68] sm:$0xff]   ;;  %v1925_v27 = vld [vmem:[%s2636_s0 + $0x70] sm:$0xff]   ;;  %v1938_v28 = vld [vmem:[%s2636_s0 + $0xd8] sm:$0xff]  }
  0x27   :  { %v1939_v29 = vld [vmem:[%s2636_s0 + $0xe0] sm:$0xff]   ;;  %v1926_v30 = vld [vmem:[%s2636_s0 + $0x78] sm:$0xff]   ;;  %v1940_v31 = vld [vmem:[%s2636_s0 + $0xe8] sm:$0xff]  }
  0x28   :  { %v1941_v32 = vld [vmem:[%s2636_s0 + $0xf0] sm:$0xff]   ;;  %v1942_v33 = vld [vmem:[%s2636_s0 + $0xf8] sm:$0xff]   ;;  %v2160_v34 = vld [vmem:[%s2638_s2] ss:$0 sm:$0xff] }
  0x2a   :  { %1856 = vmatmul.mubr.msk.bf16.gmra.mrb[16].mxu0 %vm393_vm0, %v1920_v18 }
  0x2b   :  { %1859 = vmatprep.mubr.msk.bf16.mxu0 %vm393_vm0, %v1921_v19  ;;  %1884 = vmatmul.mubr.msk.bf16.gmra.mrb[12].mxu1 %vm393_vm0, %v1934_v20 }
  0x2c   :  { %1887 = vmatprep.mubr.msk.bf16.mxu1 %vm393_vm0, %v1935_v21 }
  0x32   :  { %1860 = vmatmul.mubr.msk.bf16.gmra.mrb[20].mxu0 %vm393_vm0, %v1922_v22 }
  0x33   :  { %1863 = vmatprep.mubr.msk.bf16.mxu0 %vm393_vm0, %v1923_v23  ;;  %1888 = vmatmul.mubr.msk.bf16.gmra.mrb[16].mxu1 %vm393_vm0, %v1936_v24 }
  0x34   :  { %1891 = vmatprep.mubr.msk.bf16.mxu1 %vm393_vm0, %v1937_v25 }
  0x3a   :  { %1864 = vmatmul.mubr.msk.bf16.gmra.mrb[24].mxu0 %vm393_vm0, %v1924_v26 }
  0x3b   :  { %1867 = vmatprep.mubr.msk.bf16.mxu0 %vm393_vm0, %v1925_v27  ;;  %1892 = vmatmul.mubr.msk.bf16.gmra.mrb[20].mxu1 %vm393_vm0, %v1938_v28 }
  0x3c   :  { %1895 = vmatprep.mubr.msk.bf16.mxu1 %vm393_vm0, %v1939_v29 }
  0x42   :  { %1868 = vmatmul.mubr.msk.bf16.gmra.mrb[28].mxu0 %vm393_vm0, %v1926_v30 }
  0x43   :  { %1896 = vmatmul.mubr.msk.bf16.gmra.mrb[24].mxu1 %vm393_vm0, %v1940_v31 }
  0x44   :  { %1899 = vmatprep.mubr.msk.bf16.mxu1 %vm393_vm0, %v1941_v32 }
  0x4b   :  { %1900 = vmatmul.mubr.msk.bf16.gmra.mrb[28].mxu1 %vm393_vm0, %v1942_v33 }
  0xdd   :  { %v1841_v35 = vpop.f32.mrb[0].mxu0  ;;  %v1873_v59 = vpop.f32.mrb[0].mxu1 }
  0xde   :  { %v983_v36 = vadd.f32 %v1841_v35, %v2160_v34  ;;  %v524_v37 = vpop.f32.mrb[1].mxu0  ;;  %v652_v0 = vpop.f32.mrb[1].mxu1  ;;  %v2192_v1 = vadd.f32 %v1873_v59, %v2160_v34 }
  0xdf   :  { %v981_v38 = vadd.f32 %v2160_v34, %v524_v37  ;;  %v1842_v39 = vpop.f32.mrb[2].mxu0  ;;  %v2195_v2 = vadd.f32 %v2160_v34, %v652_v0  ;;  %v1874_v3 = vpop.f32.mrb[2].mxu1 }
  0xe0   :  { %1047 = vst [vmem:[%s2639_s3 + $0x10] sm:$0xff] %v983_v36  ;;  %v984_v40 = vadd.f32 %v1842_v39, %v2160_v34  ;;  %v527_v41 = vpop.f32.mrb[3].mxu0  ;;  %v1566_v46 = vmul.f32 %v983_v36, %v983_v36  ;;  %v2201_v7 = vadd.f32 %v1874_v3, %v2160_v34  ;;  %v655_v8 = vpop.f32.mrb[3].mxu1  ;;  %1079 = vst [vmem:[%s2639_s3 + $0x110] sm:$0xff] %v2192_v1 }
  0xe1   :  { %1045 = vst [vmem:[%s2639_s3] sm:$0xff] %v981_v38  ;;  %v982_v42 = vadd.f32 %v2160_v34, %v527_v41  ;;  %v1564_v43 = vmul.f32 %v981_v38, %v981_v38  ;;  %1077 = vst [vmem:[%s2639_s3 + $0x100] sm:$0xff] %v2195_v2  ;;  %v2212_v9 = vadd.f32 %v2160_v34, %v655_v8 }
  0xe2   :  { %1048 = vst [vmem:[%s2639_s3 + $0x18] sm:$0xff] %v984_v40  ;;  %v1567_v52 = vmul.f32 %v984_v40, %v984_v40  ;;  %1080 = vst [vmem:[%s2639_s3 + $0x118] sm:$0xff] %v2201_v7 }
  0xe3   :  { %1046 = vst [vmem:[%s2639_s3 + $0x8] sm:$0xff] %v982_v42  ;;  %v1495_v44 = vadd.f32 %v982_v42, %v981_v38  ;;  %v1565_v45 = vmul.f32 %v982_v42, %v982_v42  ;;  %1078 = vst [vmem:[%s2639_s3 + $0x108] sm:$0xff] %v2212_v9 }
  0xe5   :  { %v1496_v47 = vadd.f32 %v1495_v44, %v983_v36  ;;  %v1628_v48 = vadd.f32 %v1565_v45, %v1564_v43  ;;  %v1845_v49 = vpop.f32.mrb[4].mxu0  ;;  %v1877_v23 = vpop.f32.mrb[4].mxu1 }
  0xe6   :  { %v987_v50 = vadd.f32 %v1845_v49, %v2160_v34  ;;  %v540_v51 = vpop.f32.mrb[5].mxu0  ;;  %v668_v28 = vpop.f32.mrb[5].mxu1  ;;  %v2236_v29 = vadd.f32 %v1877_v23, %v2160_v34 }
  0xe7   :  { %v1629_v53 = vadd.f32 %v1628_v48, %v1566_v46  ;;  %v985_v54 = vadd.f32 %v2160_v34, %v540_v51  ;;  %v1497_v55 = vadd.f32 %v1496_v47, %v984_v40  ;;  %v1846_v56 = vpop.f32.mrb[6].mxu0  ;;  %v2239_v30 = vadd.f32 %v2160_v34, %v668_v28  ;;  %v1878_v31 = vpop.f32.mrb[6].mxu1 }
  0xe8   :  { %1051 = vst [vmem:[%s2639_s3 + $0x30] sm:$0xff] %v987_v50  ;;  %v988_v57 = vadd.f32 %v1846_v56, %v2160_v34  ;;  %v543_v58 = vpop.f32.mrb[7].mxu0  ;;  %v1570_v10 = vmul.f32 %v987_v50, %v987_v50  ;;  %v2245_v36 = vadd.f32 %v1878_v31, %v2160_v34  ;;  %v671_v37 = vpop.f32.mrb[7].mxu1  ;;  %1083 = vst [vmem:[%s2639_s3 + $0x130] sm:$0xff] %v2236_v29 }
  0xe9   :  { %1049 = vst [vmem:[%s2639_s3 + $0x20] sm:$0xff] %v985_v54  ;;  %v1498_v60 = vadd.f32 %v1497_v55, %v985_v54  ;;  %v1568_v61 = vmul.f32 %v985_v54, %v985_v54  ;;  %v1630_v62 = vadd.f32 %v1629_v53, %v1567_v52  ;;  %v986_v63 = vadd.f32 %v2160_v34, %v543_v58 }
  0xea   :  { %1052 = vst [vmem:[%s2639_s3 + $0x38] sm:$0xff] %v988_v57  ;;  %v1571_v16 = vmul.f32 %v988_v57, %v988_v57  ;;  %1081 = vst [vmem:[%s2639_s3 + $0x120] sm:$0xff] %v2239_v30  ;;  %v2256_v38 = vadd.f32 %v2160_v34, %v671_v37 }
  0xeb   :  { %v1631_v4 = vadd.f32 %v1630_v62, %v1568_v61  ;;  %1050 = vst [vmem:[%s2639_s3 + $0x28] sm:$0xff] %v986_v63  ;;  %v1499_v5 = vadd.f32 %v1498_v60, %v986_v63  ;;  %v1569_v6 = vmul.f32 %v986_v63, %v986_v63  ;;  %1084 = vst [vmem:[%s2639_s3 + $0x138] sm:$0xff] %v2245_v36 }
  0xec   :  { %1082 = vst [vmem:[%s2639_s3 + $0x128] sm:$0xff] %v2256_v38 }
  0xed   :  { %v1500_v11 = vadd.f32 %v1499_v5, %v987_v50  ;;  %v1632_v12 = vadd.f32 %v1631_v4, %v1569_v6  ;;  %v1849_v13 = vpop.f32.mrb[8].mxu0 }
  0xee   :  { %v991_v14 = vadd.f32 %v1849_v13, %v2160_v34  ;;  %v556_v15 = vpop.f32.mrb[9].mxu0 }
  0xef   :  { %v1633_v17 = vadd.f32 %v1632_v12, %v1570_v10  ;;  %v989_v18 = vadd.f32 %v2160_v34, %v556_v15  ;;  %v1501_v19 = vadd.f32 %v1500_v11, %v988_v57  ;;  %v1850_v20 = vpop.f32.mrb[10].mxu0 }
  0xf0   :  { %1055 = vst [vmem:[%s2639_s3 + $0x50] sm:$0xff] %v991_v14  ;;  %v992_v21 = vadd.f32 %v1850_v20, %v2160_v34  ;;  %v559_v22 = vpop.f32.mrb[11].mxu0  ;;  %v1574_v39 = vmul.f32 %v991_v14, %v991_v14 }
  0xf1   :  { %1053 = vst [vmem:[%s2639_s3 + $0x40] sm:$0xff] %v989_v18  ;;  %v1502_v24 = vadd.f32 %v1501_v19, %v989_v18  ;;  %v1572_v25 = vmul.f32 %v989_v18, %v989_v18  ;;  %v1634_v26 = vadd.f32 %v1633_v17, %v1571_v16  ;;  %v990_v27 = vadd.f32 %v2160_v34, %v559_v22 }
  0xf2   :  { %1056 = vst [vmem:[%s2639_s3 + $0x58] sm:$0xff] %v992_v21  ;;  %v1575_v45 = vmul.f32 %v992_v21, %v992_v21 }
  0xf3   :  { %v1635_v32 = vadd.f32 %v1634_v26, %v1572_v25  ;;  %1054 = vst [vmem:[%s2639_s3 + $0x48] sm:$0xff] %v990_v27  ;;  %v1503_v33 = vadd.f32 %v1502_v24, %v990_v27  ;;  %v1573_v35 = vmul.f32 %v990_v27, %v990_v27 }
  0xf5   :  { %v1504_v40 = vadd.f32 %v1503_v33, %v991_v14  ;;  %v1636_v41 = vadd.f32 %v1635_v32, %v1573_v35  ;;  %v1853_v42 = vpop.f32.mrb[12].mxu0 }
  0xf6   :  { %v995_v43 = vadd.f32 %v1853_v42, %v2160_v34  ;;  %v572_v44 = vpop.f32.mrb[13].mxu0  ;;  %v1881_v52 = vpop.f32.mrb[8].mxu1 }
  0xf7   :  { %v1637_v46 = vadd.f32 %v1636_v41, %v1574_v39  ;;  %v993_v47 = vadd.f32 %v2160_v34, %v572_v44  ;;  %v1505_v48 = vadd.f32 %v1504_v40, %v992_v21  ;;  %v1854_v49 = vpop.f32.mrb[14].mxu0  ;;  %v684_v57 = vpop.f32.mrb[9].mxu1  ;;  %v2280_v58 = vadd.f32 %v1881_v52, %v2160_v34 }
  0xf8   :  { %1059 = vst [vmem:[%s2639_s3 + $0x70] sm:$0xff] %v995_v43  ;;  %v996_v50 = vadd.f32 %v1854_v49, %v2160_v34  ;;  %v575_v51 = vpop.f32.mrb[15].mxu0  ;;  %v2283_v59 = vadd.f32 %v2160_v34, %v684_v57  ;;  %v1882_v60 = vpop.f32.mrb[10].mxu1  ;;  %v1578_v5 = vmul.f32 %v995_v43, %v995_v43 }
  0xf9   :  { %1057 = vst [vmem:[%s2639_s3 + $0x60] sm:$0xff] %v993_v47  ;;  %v1506_v53 = vadd.f32 %v1505_v48, %v993_v47  ;;  %v1576_v54 = vmul.f32 %v993_v47, %v993_v47  ;;  %v1638_v55 = vadd.f32 %v1637_v46, %v1575_v45  ;;  %v994_v56 = vadd.f32 %v2160_v34, %v575_v51  ;;  %v687_v3 = vpop.f32.mrb[11].mxu1 }
  0xfa   :  { %1060 = vst [vmem:[%s2639_s3 + $0x78] sm:$0xff] %v996_v50  ;;  %v2289_v0 = vadd.f32 %v1882_v60, %v2160_v34  ;;  %1087 = vst [vmem:[%s2639_s3 + $0x150] sm:$0xff] %v2280_v58  ;;  %v2300_v4 = vadd.f32 %v2160_v34, %v687_v3  ;;  %v1579_v13 = vmul.f32 %v996_v50, %v996_v50 }
  0xfb   :  { %v1639_v61 = vadd.f32 %v1638_v55, %v1576_v54  ;;  %1058 = vst [vmem:[%s2639_s3 + $0x68] sm:$0xff] %v994_v56  ;;  %v1507_v62 = vadd.f32 %v1506_v53, %v994_v56  ;;  %v1577_v63 = vmul.f32 %v994_v56, %v994_v56  ;;  %1085 = vst [vmem:[%s2639_s3 + $0x140] sm:$0xff] %v2283_v59 }
  0xfc   :  { %1088 = vst [vmem:[%s2639_s3 + $0x158] sm:$0xff] %v2289_v0  ;;  %1086 = vst [vmem:[%s2639_s3 + $0x148] sm:$0xff] %v2300_v4 }
  0xfd   :  { %v1508_v6 = vadd.f32 %v1507_v62, %v995_v43  ;;  %v1640_v8 = vadd.f32 %v1639_v61, %v1577_v63  ;;  %v1857_v10 = vpop.f32.mrb[16].mxu0 }
  0xfe   :  { %v999_v11 = vadd.f32 %v1857_v10, %v2160_v34  ;;  %v588_v12 = vpop.f32.mrb[17].mxu0  ;;  %v1885_v20 = vpop.f32.mrb[12].mxu1 }
  0xff   :  { %v1641_v14 = vadd.f32 %v1640_v8, %v1578_v5  ;;  %v997_v15 = vadd.f32 %v2160_v34, %v588_v12  ;;  %v1509_v16 = vadd.f32 %v1508_v6, %v996_v50  ;;  %v1858_v17 = vpop.f32.mrb[18].mxu0  ;;  %v700_v25 = vpop.f32.mrb[13].mxu1  ;;  %v2324_v26 = vadd.f32 %v1885_v20, %v2160_v34 }
 0x100   :  { %1063 = vst [vmem:[%s2639_s3 + $0x90] sm:$0xff] %v999_v11  ;;  %v1000_v18 = vadd.f32 %v1858_v17, %v2160_v34  ;;  %v591_v19 = vpop.f32.mrb[19].mxu0  ;;  %v2327_v27 = vadd.f32 %v2160_v34, %v700_v25  ;;  %v1886_v28 = vpop.f32.mrb[14].mxu1  ;;  %v1582_v40 = vmul.f32 %v999_v11, %v999_v11 }
 0x101   :  { %1061 = vst [vmem:[%s2639_s3 + $0x80] sm:$0xff] %v997_v15  ;;  %v1510_v21 = vadd.f32 %v1509_v16, %v997_v15  ;;  %v1580_v22 = vmul.f32 %v997_v15, %v997_v15  ;;  %v1642_v23 = vadd.f32 %v1641_v14, %v1579_v13  ;;  %v998_v24 = vadd.f32 %v2160_v34, %v591_v19  ;;  %v703_v37 = vpop.f32.mrb[15].mxu1 }
 0x102   :  { %1064 = vst [vmem:[%s2639_s3 + $0x98] sm:$0xff] %v1000_v18  ;;  %v2333_v35 = vadd.f32 %v1886_v28, %v2160_v34  ;;  %1091 = vst [vmem:[%s2639_s3 + $0x170] sm:$0xff] %v2324_v26  ;;  %v2344_v39 = vadd.f32 %v2160_v34, %v703_v37  ;;  %v1583_v46 = vmul.f32 %v1000_v18, %v1000_v18 }
 0x103   :  { %v1643_v31 = vadd.f32 %v1642_v23, %v1580_v22  ;;  %1062 = vst [vmem:[%s2639_s3 + $0x88] sm:$0xff] %v998_v24  ;;  %v1511_v32 = vadd.f32 %v1510_v21, %v998_v24  ;;  %v1581_v33 = vmul.f32 %v998_v24, %v998_v24  ;;  %1089 = vst [vmem:[%s2639_s3 + $0x160] sm:$0xff] %v2327_v27 }
 0x104   :  { %1092 = vst [vmem:[%s2639_s3 + $0x178] sm:$0xff] %v2333_v35  ;;  %1090 = vst [vmem:[%s2639_s3 + $0x168] sm:$0xff] %v2344_v39 }
 0x105   :  { %v1512_v41 = vadd.f32 %v1511_v32, %v999_v11  ;;  %v1644_v42 = vadd.f32 %v1643_v31, %v1581_v33  ;;  %v1861_v43 = vpop.f32.mrb[20].mxu0 }
 0x106   :  { %v1003_v44 = vadd.f32 %v1861_v43, %v2160_v34  ;;  %v604_v45 = vpop.f32.mrb[21].mxu0  ;;  %v1889_v53 = vpop.f32.mrb[16].mxu1 }
 0x107   :  { %v1645_v47 = vadd.f32 %v1644_v42, %v1582_v40  ;;  %v1001_v48 = vadd.f32 %v2160_v34, %v604_v45  ;;  %v1513_v49 = vadd.f32 %v1512_v41, %v1000_v18  ;;  %v1862_v50 = vpop.f32.mrb[22].mxu0  ;;  %v716_v60 = vpop.f32.mrb[17].mxu1  ;;  %v2368_v61 = vadd.f32 %v1889_v53, %v2160_v34 }
 0x108   :  { %1067 = vst [vmem:[%s2639_s3 + $0xb0] sm:$0xff] %v1003_v44  ;;  %v1004_v51 = vadd.f32 %v1862_v50, %v2160_v34  ;;  %v607_v52 = vpop.f32.mrb[23].mxu0  ;;  %v2371_v62 = vadd.f32 %v2160_v34, %v716_v60  ;;  %v1890_v63 = vpop.f32.mrb[18].mxu1  ;;  %v1586_v12 = vmul.f32 %v1003_v44, %v1003_v44 }
 0x109   :  { %1065 = vst [vmem:[%s2639_s3 + $0xa0] sm:$0xff] %v1001_v48  ;;  %v1514_v54 = vadd.f32 %v1513_v49, %v1001_v48  ;;  %v1584_v55 = vmul.f32 %v1001_v48, %v1001_v48  ;;  %v1646_v56 = vadd.f32 %v1645_v47, %v1583_v46  ;;  %v1002_v57 = vadd.f32 %v2160_v34, %v607_v52  ;;  %v719_v10 = vpop.f32.mrb[19].mxu1 }
 0x10a   :  { %1068 = vst [vmem:[%s2639_s3 + $0xb8] sm:$0xff] %v1004_v51  ;;  %v2377_v8 = vadd.f32 %v1890_v63, %v2160_v34  ;;  %1095 = vst [vmem:[%s2639_s3 + $0x190] sm:$0xff] %v2368_v61  ;;  %v2388_v11 = vadd.f32 %v2160_v34, %v719_v10  ;;  %v1587_v18 = vmul.f32 %v1004_v51, %v1004_v51 }
 0x10b   :  { %v1647_v3 = vadd.f32 %v1646_v56, %v1584_v55  ;;  %1066 = vst [vmem:[%s2639_s3 + $0xa8] sm:$0xff] %v1002_v57  ;;  %v1515_v5 = vadd.f32 %v1514_v54, %v1002_v57  ;;  %v1585_v6 = vmul.f32 %v1002_v57, %v1002_v57  ;;  %1093 = vst [vmem:[%s2639_s3 + $0x180] sm:$0xff] %v2371_v62 }
 0x10c   :  { %1096 = vst [vmem:[%s2639_s3 + $0x198] sm:$0xff] %v2377_v8  ;;  %1094 = vst [vmem:[%s2639_s3 + $0x188] sm:$0xff] %v2388_v11 }
 0x10d   :  { %v1516_v13 = vadd.f32 %v1515_v5, %v1003_v44  ;;  %v1648_v14 = vadd.f32 %v1647_v3, %v1585_v6  ;;  %v1865_v15 = vpop.f32.mrb[24].mxu0 }
 0x10e   :  { %v1007_v16 = vadd.f32 %v1865_v15, %v2160_v34  ;;  %v620_v17 = vpop.f32.mrb[25].mxu0  ;;  %v1893_v25 = vpop.f32.mrb[20].mxu1 }
 0x10f   :  { %v1649_v19 = vadd.f32 %v1648_v14, %v1586_v12  ;;  %v1005_v20 = vadd.f32 %v2160_v34, %v620_v17  ;;  %v1517_v21 = vadd.f32 %v1516_v13, %v1004_v51  ;;  %v1866_v22 = vpop.f32.mrb[26].mxu0  ;;  %v732_v37 = vpop.f32.mrb[21].mxu1  ;;  %v2412_v40 = vadd.f32 %v1893_v25, %v2160_v34 }
 0x110   :  { %1071 = vst [vmem:[%s2639_s3 + $0xd0] sm:$0xff] %v1007_v16  ;;  %v1008_v23 = vadd.f32 %v1866_v22, %v2160_v34  ;;  %v623_v24 = vpop.f32.mrb[27].mxu0  ;;  %v2415_v41 = vadd.f32 %v2160_v34, %v732_v37  ;;  %v1894_v42 = vpop.f32.mrb[22].mxu1  ;;  %v1590_v49 = vmul.f32 %v1007_v16, %v1007_v16 }
 0x111   :  { %1069 = vst [vmem:[%s2639_s3 + $0xc0] sm:$0xff] %v1005_v20  ;;  %v1518_v28 = vadd.f32 %v1517_v21, %v1005_v20  ;;  %v1588_v31 = vmul.f32 %v1005_v20, %v1005_v20  ;;  %v1650_v32 = vadd.f32 %v1649_v19, %v1587_v18  ;;  %v1006_v33 = vadd.f32 %v2160_v34, %v623_v24  ;;  %v735_v47 = vpop.f32.mrb[23].mxu1 }
 0x112   :  { %1072 = vst [vmem:[%s2639_s3 + $0xd8] sm:$0xff] %v1008_v23  ;;  %v2421_v46 = vadd.f32 %v1894_v42, %v2160_v34  ;;  %1099 = vst [vmem:[%s2639_s3 + $0x1b0] sm:$0xff] %v2412_v40  ;;  %v2432_v48 = vadd.f32 %v2160_v34, %v735_v47  ;;  %v1591_v55 = vmul.f32 %v1008_v23, %v1008_v23 }
 0x113   :  { %v1651_v43 = vadd.f32 %v1650_v32, %v1588_v31  ;;  %1070 = vst [vmem:[%s2639_s3 + $0xc8] sm:$0xff] %v1006_v33  ;;  %v1519_v44 = vadd.f32 %v1518_v28, %v1006_v33  ;;  %v1589_v45 = vmul.f32 %v1006_v33, %v1006_v33  ;;  %1097 = vst [vmem:[%s2639_s3 + $0x1a0] sm:$0xff] %v2415_v41 }
 0x114   :  { %1100 = vst [vmem:[%s2639_s3 + $0x1b8] sm:$0xff] %v2421_v46  ;;  %1098 = vst [vmem:[%s2639_s3 + $0x1a8] sm:$0xff] %v2432_v48  ;;  %v1596_v42 = vmul.f32 %v2195_v2, %v2195_v2 }
 0x115   :  { %v1520_v50 = vadd.f32 %v1519_v44, %v1007_v16  ;;  %v1652_v51 = vadd.f32 %v1651_v43, %v1589_v45  ;;  %v1869_v52 = vpop.f32.mrb[28].mxu0 }
 0x116   :  { %v1011_v53 = vadd.f32 %v1869_v52, %v2160_v34  ;;  %v636_v54 = vpop.f32.mrb[29].mxu0  ;;  %v1897_v6 = vpop.f32.mrb[24].mxu1 }
 0x117   :  { %v1653_v56 = vadd.f32 %v1652_v51, %v1590_v49  ;;  %v1009_v57 = vadd.f32 %v2160_v34, %v636_v54  ;;  %v1521_v60 = vadd.f32 %v1520_v50, %v1008_v23  ;;  %v1870_v63 = vpop.f32.mrb[30].mxu0  ;;  %v748_v15 = vpop.f32.mrb[25].mxu1  ;;  %v2456_v16 = vadd.f32 %v1897_v6, %v2160_v34 }
 0x118   :  { %1075 = vst [vmem:[%s2639_s3 + $0xf0] sm:$0xff] %v1011_v53  ;;  %v1012_v3 = vadd.f32 %v1870_v63, %v2160_v34  ;;  %v639_v5 = vpop.f32.mrb[31].mxu0  ;;  %v2459_v17 = vadd.f32 %v2160_v34, %v748_v15  ;;  %v1898_v18 = vpop.f32.mrb[26].mxu1  ;;  %v1594_v25 = vmul.f32 %v1011_v53, %v1011_v53  ;;  %v1597_v54 = vmul.f32 %v2212_v9, %v2212_v9 }
 0x119   :  { %1073 = vst [vmem:[%s2639_s3 + $0xe0] sm:$0xff] %v1009_v57  ;;  %v1522_v10 = vadd.f32 %v1521_v60, %v1009_v57  ;;  %v1592_v12 = vmul.f32 %v1009_v57, %v1009_v57  ;;  %v1654_v13 = vadd.f32 %v1653_v56, %v1591_v55  ;;  %v1010_v14 = vadd.f32 %v2160_v34, %v639_v5  ;;  %v751_v23 = vpop.f32.mrb[27].mxu1 }
 0x11a   :  { %1076 = vst [vmem:[%s2639_s3 + $0xf8] sm:$0xff] %v1012_v3  ;;  %v2465_v22 = vadd.f32 %v1898_v18, %v2160_v34  ;;  %1103 = vst [vmem:[%s2639_s3 + $0x1d0] sm:$0xff] %v2456_v16  ;;  %v2476_v24 = vadd.f32 %v2160_v34, %v751_v23  ;;  %v1595_v32 = vmul.f32 %v1012_v3, %v1012_v3 }
 0x11b   :  { %v1655_v19 = vadd.f32 %v1654_v13, %v1592_v12  ;;  %1074 = vst [vmem:[%s2639_s3 + $0xe8] sm:$0xff] %v1010_v14  ;;  %v1523_v20 = vadd.f32 %v1522_v10, %v1010_v14  ;;  %v1593_v21 = vmul.f32 %v1010_v14, %v1010_v14  ;;  %1101 = vst [vmem:[%s2639_s3 + $0x1c0] sm:$0xff] %v2459_v17 }
 0x11c   :  { %1104 = vst [vmem:[%s2639_s3 + $0x1d8] sm:$0xff] %v2465_v22  ;;  %1102 = vst [vmem:[%s2639_s3 + $0x1c8] sm:$0xff] %v2476_v24  ;;  %v1601_v13 = vmul.f32 %v2256_v38, %v2256_v38  ;;  %v1602_v14 = vmul.f32 %v2236_v29, %v2236_v29 }
 0x11d   :  { %v1524_v28 = vadd.f32 %v1523_v20, %v1011_v53  ;;  %v1656_v31 = vadd.f32 %v1655_v19, %v1593_v21 }
 0x11e   :  { %v1901_v43 = vpop.f32.mrb[28].mxu1 }
 0x11f   :  { %v1657_v33 = vadd.f32 %v1656_v31, %v1594_v25  ;;  %v1525_v37 = vadd.f32 %v1524_v28, %v1012_v3  ;;  %v2490_v47 = vadd.f32 %v1901_v43, %v2160_v34  ;;  %v764_v49 = vpop.f32.mrb[29].mxu1  ;;  %v1605_v28 = vmul.f32 %v2300_v4, %v2300_v4 }
 0x120   :  { %v2493_v50 = vadd.f32 %v2160_v34, %v764_v49  ;;  %v1902_v51 = vpop.f32.mrb[30].mxu1 }
 0x121   :  { %v1526_v44 = vadd.f32 %v1525_v37, %v2195_v2  ;;  %v1658_v45 = vadd.f32 %v1657_v33, %v1595_v32  ;;  %1107 = vst [vmem:[%s2639_s3 + $0x1f0] sm:$0xff] %v2490_v47  ;;  %v2503_v2 = vadd.f32 %v1902_v51, %v2160_v34  ;;  %v767_v55 = vpop.f32.mrb[31].mxu1 }
 0x122   :  { %1105 = vst [vmem:[%s2639_s3 + $0x1e0] sm:$0xff] %v2493_v50  ;;  %v2510_v56 = vadd.f32 %v2160_v34, %v767_v55  ;;  %v1599_v34 = vmul.f32 %v2201_v7, %v2201_v7 }
 0x123   :  { %v1659_v52 = vadd.f32 %v1658_v45, %v1596_v42  ;;  %v1527_v53 = vadd.f32 %v1526_v44, %v2212_v9  ;;  %v1598_v9 = vmul.f32 %v2192_v1, %v2192_v1  ;;  %1108 = vst [vmem:[%s2639_s3 + $0x1f8] sm:$0xff] %v2503_v2  ;;  %v1609_v45 = vmul.f32 %v2344_v39, %v2344_v39 }
 0x124   :  { %1106 = vst [vmem:[%s2639_s3 + $0x1e8] sm:$0xff] %v2510_v56  ;;  %s1991_s3 = smov [#allocation3]  }
 0x125   :  { %v1528_v57 = vadd.f32 %v1527_v53, %v2192_v1  ;;  %v1660_v60 = vadd.f32 %v1659_v52, %v1597_v54  ;;  %v1600_v1 = vmul.f32 %v2239_v30, %v2239_v30  ;;  %s1710_s24 = sshll.u32 %s1991_s3, 4  ;;  %s1711_s24 = int_to_ptr.vmem [resolvable:$true] %s1710_s24 }
 0x126   :  { %s1943_s1 = scalar_lea.vmem %s1711_s24, 128  ;;  %p1948_p1 = scmp.lt.s32.totalorder %s1711_s24, %s1711_s24 }
 0x127   :  { %v1661_v63 = vadd.f32 %v1660_v60, %v1598_v9  ;;  %v1529_v3 = vadd.f32 %v1528_v57, %v2201_v7  ;;  %v1603_v7 = vmul.f32 %v2245_v36, %v2245_v36  ;;  %v1613_v57 = vmul.f32 %v2388_v11, %v2388_v11  ;;  %p1944_p0 = scmp.ne.s32.totalorder %s1711_s24, %s1943_s1  ;;  %p1949_p2 = scmp.lt.s32.totalorder %s1943_s1, %s1943_s1 }
 0x129   :  { %v1530_v5 = vadd.f32 %v1529_v3, %v2239_v30  ;;  %v1662_v6 = vadd.f32 %v1661_v63, %v1599_v34  ;;  %v1604_v30 = vmul.f32 %v2283_v59, %v2283_v59  ;;  %p1950_p3 = por %p1949_p2, %p1948_p1 }
 0x12b   :  { %v1663_v10 = vadd.f32 %v1662_v6, %v1600_v1  ;;  %v1531_v12 = vadd.f32 %v1530_v5, %v2256_v38  ;;  %p1951_p4 = pnand %p1950_p3, %p1944_p0 }
 0x12d   :  { %v1532_v15 = vadd.f32 %v1531_v12, %v2236_v29  ;;  %v1664_v18 = vadd.f32 %v1663_v10, %v1601_v13  ;;  %v1606_v29 = vmul.f32 %v2280_v58, %v2280_v58  ;;  %v1617_v10 = vmul.f32 %v2432_v48, %v2432_v48 }
 0x12f   :  { %v1665_v19 = vadd.f32 %v1664_v18, %v1602_v14  ;;  %v1533_v20 = vadd.f32 %v1532_v15, %v2245_v36  ;;  %v1607_v36 = vmul.f32 %v2289_v0, %v2289_v0 }
 0x131   :  { %v1534_v21 = vadd.f32 %v1533_v20, %v2283_v59  ;;  %v1666_v23 = vadd.f32 %v1665_v19, %v1603_v7  ;;  %v1608_v59 = vmul.f32 %v2327_v27, %v2327_v27  ;;  %v1621_v20 = vmul.f32 %v2476_v24, %v2476_v24 }
 0x133   :  { %v1667_v25 = vadd.f32 %v1666_v23, %v1604_v30  ;;  %v1535_v38 = vadd.f32 %v1534_v21, %v2300_v4 }
 0x135   :  { %v1536_v31 = vadd.f32 %v1535_v38, %v2280_v58  ;;  %v1668_v32 = vadd.f32 %v1667_v25, %v1605_v28  ;;  %v1610_v58 = vmul.f32 %v2324_v26, %v2324_v26 }
 0x137   :  { %v1669_v33 = vadd.f32 %v1668_v32, %v1606_v29  ;;  %v1537_v37 = vadd.f32 %v1536_v31, %v2289_v0  ;;  %v1611_v0 = vmul.f32 %v2333_v35, %v2333_v35  ;;  %v1625_v31 = vmul.f32 %v2510_v56, %v2510_v56 }
 0x139   :  { %v1538_v42 = vadd.f32 %v1537_v37, %v2327_v27  ;;  %v1670_v43 = vadd.f32 %v1669_v33, %v1607_v36  ;;  %v1612_v27 = vmul.f32 %v2371_v62, %v2371_v62 }
 0x13b   :  { %v1671_v44 = vadd.f32 %v1670_v43, %v1608_v59  ;;  %v1539_v4 = vadd.f32 %v1538_v42, %v2344_v39  ;;  %v1109_v42 = vlaneseq }
 0x13d   :  { %v1540_v49 = vadd.f32 %v1539_v4, %v2324_v26  ;;  %v1672_v51 = vadd.f32 %v1671_v44, %v1609_v45  ;;  %v1614_v26 = vmul.f32 %v2368_v61, %v2368_v61 }
 0x13f   :  { %v1673_v52 = vadd.f32 %v1672_v51, %v1610_v58  ;;  %v1541_v53 = vadd.f32 %v1540_v49, %v2333_v35  ;;  %v1615_v35 = vmul.f32 %v2377_v8, %v2377_v8 }
 0x141   :  { %v1542_v54 = vadd.f32 %v1541_v53, %v2371_v62  ;;  %v1674_v55 = vadd.f32 %v1673_v52, %v1611_v0  ;;  %v1616_v62 = vmul.f32 %v2415_v41, %v2415_v41 }
 0x143   :  { %v1675_v9 = vadd.f32 %v1674_v55, %v1612_v27  ;;  %v1543_v39 = vadd.f32 %v1542_v54, %v2388_v11 }
 0x145   :  { %v1544_v60 = vadd.f32 %v1543_v39, %v2368_v61  ;;  %v1676_v34 = vadd.f32 %v1675_v9, %v1613_v57  ;;  %v1618_v61 = vmul.f32 %v2412_v40, %v2412_v40 }
 0x147   :  { %v1677_v63 = vadd.f32 %v1676_v34, %v1614_v26  ;;  %v1545_v3 = vadd.f32 %v1544_v60, %v2377_v8  ;;  %v1619_v8 = vmul.f32 %v2421_v46, %v2421_v46 }
 0x149   :  { %v1546_v1 = vadd.f32 %v1545_v3, %v2415_v41  ;;  %v1678_v5 = vadd.f32 %v1677_v63, %v1615_v35  ;;  %v1620_v41 = vmul.f32 %v2459_v17, %v2459_v17 }
 0x14b   :  { %v1679_v6 = vadd.f32 %v1678_v5, %v1616_v62  ;;  %v1547_v11 = vadd.f32 %v1546_v1, %v2432_v48 }
 0x14d   :  { %v1548_v12 = vadd.f32 %v1547_v11, %v2412_v40  ;;  %v1680_v13 = vadd.f32 %v1679_v6, %v1617_v10  ;;  %v1622_v40 = vmul.f32 %v2456_v16, %v2456_v16 }
 0x14f   :  { %v1681_v14 = vadd.f32 %v1680_v13, %v1618_v61  ;;  %v1549_v15 = vadd.f32 %v1548_v12, %v2421_v46  ;;  %v1623_v46 = vmul.f32 %v2465_v22, %v2465_v22 }
 0x151   :  { %v1550_v18 = vadd.f32 %v1549_v15, %v2459_v17  ;;  %v1682_v7 = vadd.f32 %v1681_v14, %v1619_v8  ;;  %v1624_v17 = vmul.f32 %v2493_v50, %v2493_v50 }
 0x153   :  { %v1683_v19 = vadd.f32 %v1682_v7, %v1620_v41  ;;  %v1551_v48 = vadd.f32 %v1550_v18, %v2476_v24 }
 0x155   :  { %v1552_v30 = vadd.f32 %v1551_v48, %v2456_v16  ;;  %v1684_v21 = vadd.f32 %v1683_v19, %v1621_v20  ;;  %v1626_v16 = vmul.f32 %v2490_v47, %v2490_v47 }
 0x157   :  { %v1685_v23 = vadd.f32 %v1684_v21, %v1622_v40  ;;  %v1553_v25 = vadd.f32 %v1552_v30, %v2465_v22  ;;  %v1627_v22 = vmul.f32 %v2503_v2, %v2503_v2 }
 0x159   :  { %v1554_v38 = vadd.f32 %v1553_v25, %v2493_v50  ;;  %v1686_v28 = vadd.f32 %v1685_v23, %v1623_v46 }
 0x15b   :  { %v1687_v29 = vadd.f32 %v1686_v28, %v1624_v17  ;;  %v1555_v24 = vadd.f32 %v1554_v38, %v2510_v56  ;;  %v1110_v56 = vshrl.u32 %v1109_v42, 7 }
 0x15d   :  { %v1556_v32 = vadd.f32 %v1555_v24, %v2490_v47  ;;  %v1688_v36 = vadd.f32 %v1687_v29, %v1625_v31  ;;  %vm1697_vm1 = vcmp.eq.s32.totalorder %v1110_v56, 0 }
 0x15f   :  { %v1689_v33 = vadd.f32 %v1688_v36, %v1626_v16  ;;  %v1557_v37 = vadd.f32 %v1556_v32, %v2503_v2 }
 0x161   :  { %v1558_v50 = vrot.slane %v1557_v37, 4  ;;  %v1690_v59 = vadd.f32 %v1689_v33, %v1627_v22 }
 0x163   :  { %v1559_v43 = vadd.f32 %v1558_v50, %v1557_v37  ;;  %v1691_v44 = vrot.slane %v1690_v59, 4 }
 0x165   :  { %v1560_v4 = vrot.slane %v1559_v43, 2  ;;  %v1692_v45 = vadd.f32 %v1691_v44, %v1690_v59 }
 0x167   :  { %v1561_v58 = vadd.f32 %v1560_v4, %v1559_v43  ;;  %v1693_v49 = vrot.slane %v1692_v45, 2 }
 0x169   :  { %v1562_v51 = vrot.slane %v1561_v58, 1  ;;  %v1694_v47 = vadd.f32 %v1693_v49, %v1692_v45 }
 0x16b   :  { %v1563_v0 = vadd.f32 %v1562_v51, %v1561_v58  ;;  %v1695_v52 = vrot.slane %v1694_v47, 1 }
 0x16d   :  { %v1698_v2 = vsel %vm1697_vm1, %v1563_v0, 0.0  ;;  %v1696_v53 = vadd.f32 %v1695_v52, %v1694_v47 }
 0x16e   :  { %1699 = vst [vmem:[#allocation3] sm:$0xff] %v1698_v2 }
 0x16f   :  { %1954 = shalt.err (!%p1951_p4)
}
 0x170   :  { %s1955_s29 = scalar_lea.hbm %s2640_s4, 128 }
 0x171   :  { %p1956_p5 = scmp.ne.s32.totalorder %s2640_s4, %s1955_s29  ;;  %p1959_p6 = scmp.lt.u32.totalorder %s1955_s29, %s2640_s4 }
 0x173   :  { %p1961_p7 = pnand %p1959_p6, %p1956_p5 }
 0x175   :  { %1964 = shalt.err (!%p1961_p7)
}
 0x176   :  { %1713 = dma.vmem_to_hbm [thread:$0]  %s1711_s24, 128, %s2640_s4, [#allocation4]   ;;  %v1700_v27 = vsel %vm1697_vm1, %v1696_v53, 0.0 }
 0x177   :  { %1701 = vst [vmem:[#allocation5] sm:$0xff] %v1700_v27  ;;  %s1965_s11 = scalar_lea.vmem %s1721_s26, 128  ;;  %p1970_p9 = scmp.lt.s32.totalorder %s1721_s26, %s1721_s26 }
 0x178   :  { %p1966_p8 = scmp.ne.s32.totalorder %s1721_s26, %s1965_s11  ;;  %p1971_p10 = scmp.lt.s32.totalorder %s1965_s11, %s1965_s11 }
 0x17a   :  { %p1972_p11 = por %p1971_p10, %p1970_p9 }
 0x17c   :  { %p1973_p12 = pnand %p1972_p11, %p1966_p8 }
 0x17e   :  { %1976 = shalt.err (!%p1973_p12)
}
 0x17f   :  { %s1977_s2 = scalar_lea.hbm %s2641_s5, 128 }
 0x180   :  { %p1978_p13 = scmp.ne.s32.totalorder %s2641_s5, %s1977_s2  ;;  %p1981_p0 = scmp.lt.u32.totalorder %s1977_s2, %s2641_s5 }
 0x182   :  { %p1983_p1 = pnand %p1981_p0, %p1978_p13 }
 0x184   :  { %1986 = shalt.err (!%p1983_p1)
}
 0x185   :  { %1723 = dma.vmem_to_hbm [thread:$0]  %s1721_s26, 128, %s2641_s5, [#allocation6]  }
 0x186   :  { %1987 = dma.done.wait [#allocation4], 128  }
 0x187   :  { %1988 = vsyncadd [#allocation4], 4294967168 }
 0x188   :  { %1989 = dma.done.wait [#allocation6], 128  }
 0x189   :  { %1990 = vsyncadd [#allocation6], 4294967168 }
 0x18a   :  { %1732 = vsyncpa [#allocation4], 1 }
 0x18b   :  { %1733 = vsyncpa [#allocation6], 1 }

</bundles_post_ra>
